<compile_context>
chip_gen: v7x
topology: tpu7x:2x2x1
jax: 0.10.0
libtpu: 0.0.40
codegen_flags: <defaults>
</compile_context>

<pallas_src>
import numpy as np
import jax
import jax.numpy as jnp
from jax.experimental import pallas as pl
from jax.experimental.pallas import tpu as pltpu

IMAGES_PER_STEP = 8  # must stay a multiple of 8 (sublane rule on the output block)


# ----------------------------- fused Pallas kernel -----------------------------

def _fused_kernel(x_ref, w1_ref, b1_ref, w2_ref, b2_ref, sel_ref,
                  wf1_ref, bf1_ref, wf2_ref, bf2_ref, o_ref):
    f32 = jnp.float32
    bi = x_ref.shape[0]                              # images per grid step

    y2_rows = []
    for b in range(bi):
        # ---- conv1 (k=7, s=3) as 4 shifted MXU matmuls, channels on sublanes.
        # x_ref[b]: [128, 288] bf16, sublanes = per-cell features (hr, wr, c),
        # lanes = coarse grid 16*Hq + Wq (phase-6 decomposition, zero-padded).
        acc = None
        for g, s0 in enumerate((0, 1, 16, 17)):      # shift 16*a + b
            xs = x_ref[b, :, s0:s0 + 256]            # [128, 256] bf16
            t = jnp.dot(w1_ref[g], xs, preferred_element_type=f32)   # [32, 256]
            acc = t if acc is None else acc + t
        # relu + maxpool1 (2x2): max over the 4 pool-parity groups (8 rows each),
        # bias added after the max (constant within a window), relu after.
        p1 = jnp.maximum(jnp.maximum(acc[0:8], acc[8:16]),
                         jnp.maximum(acc[16:24], acc[24:32]))
        p1 = jnp.maximum(p1 + b1_ref[...], 0.0)      # [8, 256]  (rows 6,7 are 0)

        # ---- conv2 (k=4, s=1): K-packed im2col (16 taps x 8 chan = 128 rows)
        # built from 16 lane-shifted views of pool1, then ONE MXU matmul.
        pieces = []
        for di in range(4):
            for dj in range(4):
                sh = 16 * di + dj
                pieces.append(p1[:, sh:sh + 192])    # [8, 192]
        im2col = jnp.concatenate(pieces, axis=0)     # [128, 192]
        y2 = jnp.dot(w2_ref[...], im2col, preferred_element_type=f32)
        y2_rows.append(y2 + b2_ref[...])             # [16, 192]

    y2_all = jnp.concatenate(y2_rows, axis=0)        # [bi*16, 192]

    # ---- relu + maxpool2 (2x2) via 4 lane-shifted maxes (VPU/XLU, not MXU).
    # Valid pooled values live at lanes 32*p + 2*q (p, q in [0,6)); garbage
    # lanes stay finite and are zeroed out by the gather matrix below.
    m = jnp.maximum(jnp.maximum(y2_all[:, 0:171], y2_all[:, 1:172]),
                    jnp.maximum(y2_all[:, 16:187], y2_all[:, 17:188]))
    m = jnp.maximum(m, 0.0)                          # [bi*16, 171]
    g_all = jnp.dot(m, sel_ref[...], preferred_element_type=f32)   # [bi*16, 36]

    # ---- flatten in torch order (36*c + 6*p + q): lane-concat 12 channel rows.
    rows = []
    for b in range(bi):
        gb = g_all[16 * b:16 * b + 16, :]
        rows.append(jnp.concatenate([gb[c:c + 1, :] for c in range(12)],
                                    axis=1))         # [1, 432]
    x_fc = jnp.concatenate(rows, axis=0)             # [bi, 432]

    # ---- fc1 + relu, fc2: dense MXU matmuls over the whole image block.
    h = jnp.maximum(jnp.dot(x_fc, wf1_ref[...], preferred_element_type=f32)
                    + bf1_ref[...], 0.0)             # [bi, 216]
    o_ref[...] = (jnp.dot(h, wf2_ref[...], preferred_element_type=f32)
                  + bf2_ref[...])                    # [bi, 12]


# ------------------------ wrapper: layout plumbing only ------------------------

def _prep_input(x, block):
    """[B,3,96,96] NCHW -> [Bp, 128, 288] bf16 slab (features on sublanes).

    sublanes = 18*hr + 3*wr + c (zero-padded 108 -> 128)
    lanes    = 16*Hq + Wq       (zero-padded 256 -> 288)
    where h = 6*Hq + hr, w = 6*Wq + wr.
    """
    B = x.shape[0]
    Bp = ((B + block - 1) // block) * block
    xb = x.astype(jnp.bfloat16)
    if Bp != B:
        xb = jnp.pad(xb, ((0, Bp - B), (0, 0), (0, 0), (0, 0)))
    xh = xb.reshape(Bp, 3, 16, 6, 16, 6)             # [b, c, Hq, hr, Wq, wr]
    xh = jnp.transpose(xh, (0, 3, 5, 1, 2, 4))       # [b, hr, wr, c, Hq, Wq]
    xh = xh.reshape(Bp, 108, 256)
    xh = jnp.pad(xh, ((0, 0), (0, 20), (0, 32)))     # [Bp, 128, 288]
    return xh, Bp


def forward(x, kp, block=IMAGES_PER_STEP):
    B = x.shape[0]
    xin, Bp = _prep_input(x, block)
    out = pl.pallas_call(
        _fused_kernel,
        out_shape=jax.ShapeDtypeStruct((Bp, 12), jnp.float32),
        grid=(Bp // block,),
        in_specs=[
            pl.BlockSpec((block, 128, 288), lambda i: (i, 0, 0)),  # input slab
            pl.BlockSpec((4, 32, 128), lambda i: (0, 0, 0)),       # conv1 grouped
            pl.BlockSpec((8, 1), lambda i: (0, 0)),                # conv1 bias
            pl.BlockSpec((16, 128), lambda i: (0, 0)),             # conv2 K-packed
            pl.BlockSpec((16, 1), lambda i: (0, 0)),               # conv2 bias
            pl.BlockSpec((171, 36), lambda i: (0, 0)),             # pool2 gather
            pl.BlockSpec((432, 216), lambda i: (0, 0)),            # fc1 weight
            pl.BlockSpec((1, 216), lambda i: (0, 0)),              # fc1 bias
            pl.BlockSpec((216, 12), lambda i: (0, 0)),             # fc2 weight
            pl.BlockSpec((1, 12), lambda i: (0, 0)),               # fc2 bias
        ],
        out_specs=pl.BlockSpec((block, 12), lambda i: (i, 0)),
        compiler_params=pltpu.CompilerParams(
            dimension_semantics=("parallel",)),
    )(xin, kp["w1"], kp["b1"], kp["w2"], kp["b2"], kp["sel"],
      kp["wf1"], kp["bf1"], kp["wf2"], kp["bf2"])
    return out[:B]


# -------------------- one-time weight repacking (outside jit) ------------------

def prepare_params(p):
    """Repack PyTorch-layout weights into the kernel's fused/padded layouts."""
    W1 = np.asarray(p["conv1_w"], np.float32)   # [6, 3, 7, 7]
    b1 = np.asarray(p["conv1_b"], np.float32)   # [6]
    W2 = np.asarray(p["conv2_w"], np.float32)   # [12, 6, 4, 4]
    b2 = np.asarray(p["conv2_b"], np.float32)   # [12]
    Wf1 = np.asarray(p["fc1_w"], np.float32)    # [216, 432]
    bf1 = np.asarray(p["fc1_b"], np.float32)    # [216]
    Wf2 = np.asarray(p["fc2_w"], np.float32)    # [12, 216]
    bf2 = np.asarray(p["fc2_b"], np.float32)    # [12]

    # conv1 grouped weight (channels on output sublanes).
    # For coarse shift (a, b), pool parity (ph, pw), kernel tap (di, dj):
    #   di = 6a + hr - 3ph,  dj = 6b + wr - 3pw
    # w1gT[g=2a+b, 8*(2ph+pw)+o, 18hr+3wr+c] = W1[o, c, di, dj]
    w1gT = np.zeros((4, 32, 128), np.float32)
    for a in range(2):
        for bb in range(2):
            g = 2 * a + bb
            for ph in range(2):
                for pw in range(2):
                    n0 = 8 * (2 * ph + pw)
                    for hr in range(6):
                        di = 6 * a + hr - 3 * ph
                        if di < 0 or di > 6:
                            continue
                        for wr in range(6):
                            dj = 6 * bb + wr - 3 * pw
                            if dj < 0 or dj > 6:
                                continue
                            k0 = 18 * hr + 3 * wr
                            w1gT[g, n0:n0 + 6, k0:k0 + 3] = W1[:, :, di, dj]
    b1c = np.zeros((8, 1), np.float32)
    b1c[:6, 0] = b1

    # conv2 K-packed weight: w2tT[o2 (pad 16), 8*(4di+dj) + o1 (pad 8)]
    w2tT = np.zeros((16, 128), np.float32)
    for di in range(4):
        for dj in range(4):
            t = 4 * di + dj
            w2tT[:12, 8 * t:8 * t + 6] = W2[:, :, di, dj]
    b2c = np.zeros((16, 1), np.float32)
    b2c[:12, 0] = b2

    # pool2 gather: pooled value for (p, q) sits at conv2 lane 32p + 2q.
    S = np.zeros((171, 36), np.float32)
    for pp in range(6):
        for q in range(6):
            S[32 * pp + 2 * q, 6 * pp + q] = 1.0

    packed = dict(
        w1=jnp.asarray(w1gT, jnp.bfloat16),
        b1=jnp.asarray(b1c),
        w2=jnp.asarray(w2tT),
        b2=jnp.asarray(b2c),
        sel=jnp.asarray(S),
        wf1=jnp.asarray(Wf1.T.copy()),               # [432, 216]
        bf1=jnp.asarray(bf1.reshape(1, 216)),
        wf2=jnp.asarray(Wf2.T.copy()),               # [216, 12]
        bf2=jnp.asarray(bf2.reshape(1, 12)),
    )
    return packed


# ------------------------------ reference & setup ------------------------------

def reference(x, p):
    """Pure-JAX reference mirroring the PyTorch forward (for validation)."""
    dn = ("NCHW", "OIHW", "NCHW")
    y = jax.lax.conv_general_dilated(x, p["conv1_w"], (3, 3), "VALID",
                                     dimension_numbers=dn)
    y = jnp.maximum(y + p["conv1_b"][None, :, None, None], 0.0)
    y = jax.lax.reduce_window(y, -jnp.inf, jax.lax.max,
                              (1, 1, 2, 2), (1, 1, 2, 2), "VALID")
    y = jax.lax.conv_general_dilated(y, p["conv2_w"], (1, 1), "VALID",
                                     dimension_numbers=dn)
    y = jnp.maximum(y + p["conv2_b"][None, :, None, None], 0.0)
    y = jax.lax.reduce_window(y, -jnp.inf, jax.lax.max,
                              (1, 1, 2, 2), (1, 1, 2, 2), "VALID")
    y = y.reshape(-1, 12 * 6 * 6)
    y = jnp.maximum(y @ p["fc1_w"].T + p["fc1_b"], 0.0)
    return y @ p["fc2_w"].T + p["fc2_b"]


def init_params(key):
    ks = jax.random.split(key, 8)
    s = 0.05
    return {
        "conv1_w": jax.random.normal(ks[0], (6, 3, 7, 7), jnp.float32) * s,
        "conv1_b": jax.random.normal(ks[1], (6,), jnp.float32) * s,
        "conv2_w": jax.random.normal(ks[2], (12, 6, 4, 4), jnp.float32) * s,
        "conv2_b": jax.random.normal(ks[3], (12,), jnp.float32) * s,
        "fc1_w":   jax.random.normal(ks[4], (216, 432), jnp.float32) * s,
        "fc1_b":   jax.random.normal(ks[5], (216,), jnp.float32) * s,
        "fc2_w":   jax.random.normal(ks[6], (12, 216), jnp.float32) * s,
        "fc2_b":   jax.random.normal(ks[7], (12,), jnp.float32) * s,
    }


if __name__ == "__main__":
    key = jax.random.PRNGKey(0)
    kx, kparam = jax.random.split(key)
    # Input spatial size must be 96 so the flatten matches fc1's 12*6*6 = 432.
    # B=16 with 8 images/grid-step -> grid length 2 (keeps both v7x TCs busy).
    x = jax.random.normal(kx, (16, 3, 96, 96), jnp.float32)
    params = init_params(kparam)
    kernel_params = prepare_params(params)        # one-time repack, outside jit

    out = jax.block_until_ready(jax.jit(forward)(x, kernel_params))
    assert out.shape == (16, 12), out.shape

    ref = jax.block_until_ready(jax.jit(reference)(x, params))
    max_err = float(jnp.max(jnp.abs(out - ref)))
    assert jnp.allclose(out, ref, rtol=2e-2, atol=2e-2), max_err

    print("KERNEL_OK")
</pallas_src>

<mosaic_0001>
module attributes {stable_mosaic.version = 11 : i64} {
  func.func @_fused_kernel(%arg0: i32, %arg1: memref<8x128x288xbf16, #tpu.memory_space<vmem>>, %arg2: memref<4x32x128xbf16, #tpu.memory_space<vmem>>, %arg3: memref<8x1xf32, #tpu.memory_space<vmem>>, %arg4: memref<16x128xf32, #tpu.memory_space<vmem>>, %arg5: memref<16x1xf32, #tpu.memory_space<vmem>>, %arg6: memref<171x36xf32, #tpu.memory_space<vmem>>, %arg7: memref<432x216xf32, #tpu.memory_space<vmem>>, %arg8: memref<1x216xf32, #tpu.memory_space<vmem>>, %arg9: memref<216x12xf32, #tpu.memory_space<vmem>>, %arg10: memref<1x12xf32, #tpu.memory_space<vmem>>, %arg11: memref<8x12xf32, #tpu.memory_space<vmem>>) attributes {dimension_semantics = [#tpu.dimension_semantics<parallel>], iteration_bounds = array<i64: 2>, scalar_prefetch = 0 : i64, scratch_operands = 0 : i64, tpu.core_type = #tpu.core_type<tc>, window_params = [{transform_indices = @transform_0, window_bounds = array<i64: 8, 128, 288>}, {pipeline_mode = #tpu.pipeline_mode<synchronous>, transform_indices = @transform_1, window_bounds = array<i64: 4, 32, 128>}, {pipeline_mode = #tpu.pipeline_mode<synchronous>, transform_indices = @transform_2, window_bounds = array<i64: 8, 1>}, {pipeline_mode = #tpu.pipeline_mode<synchronous>, transform_indices = @transform_3, window_bounds = array<i64: 16, 128>}, {pipeline_mode = #tpu.pipeline_mode<synchronous>, transform_indices = @transform_4, window_bounds = array<i64: 16, 1>}, {pipeline_mode = #tpu.pipeline_mode<synchronous>, transform_indices = @transform_5, window_bounds = array<i64: 171, 36>}, {pipeline_mode = #tpu.pipeline_mode<synchronous>, transform_indices = @transform_6, window_bounds = array<i64: 432, 216>}, {pipeline_mode = #tpu.pipeline_mode<synchronous>, transform_indices = @transform_7, window_bounds = array<i64: 1, 216>}, {pipeline_mode = #tpu.pipeline_mode<synchronous>, transform_indices = @transform_8, window_bounds = array<i64: 216, 12>}, {pipeline_mode = #tpu.pipeline_mode<synchronous>, transform_indices = @transform_9, window_bounds = array<i64: 1, 12>}, {transform_indices = @transform_10, window_bounds = array<i64: 8, 12>}]} {
    %c0 = arith.constant 0 : index
    %c0_0 = arith.constant 0 : index
    %c0_1 = arith.constant 0 : index
    %0 = vector.load %arg1[%c0, %c0_0, %c0_1] : memref<8x128x288xbf16, #tpu.memory_space<vmem>>, vector<1x128x256xbf16>
    %1 = vector.shape_cast %0 : vector<1x128x256xbf16> to vector<128x256xbf16>
    %c0_2 = arith.constant 0 : index
    %c0_3 = arith.constant 0 : index
    %c0_4 = arith.constant 0 : index
    %2 = vector.load %arg2[%c0_2, %c0_3, %c0_4] : memref<4x32x128xbf16, #tpu.memory_space<vmem>>, vector<1x32x128xbf16>
    %3 = vector.shape_cast %2 : vector<1x32x128xbf16> to vector<32x128xbf16>
    %cst = arith.constant dense<0.000000e+00> : vector<32x256xf32>
    %4 = tpu.matmul %3, %1, %cst {dimension_numbers = #tpu.dot_dimension_numbers<[1], [0], [0], [1], [0, 0, 1, 1], [], []>} : vector<32x128xbf16>, vector<128x256xbf16>, vector<32x256xf32> -> vector<32x256xf32>
    %c0_5 = arith.constant 0 : index
    %c0_6 = arith.constant 0 : index
    %c1 = arith.constant 1 : index
    %5 = vector.load %arg1[%c0_5, %c0_6, %c1] : memref<8x128x288xbf16, #tpu.memory_space<vmem>>, vector<1x128x256xbf16>
    %6 = vector.shape_cast %5 : vector<1x128x256xbf16> to vector<128x256xbf16>
    %c1_7 = arith.constant 1 : index
    %c0_8 = arith.constant 0 : index
    %c0_9 = arith.constant 0 : index
    %7 = vector.load %arg2[%c1_7, %c0_8, %c0_9] : memref<4x32x128xbf16, #tpu.memory_space<vmem>>, vector<1x32x128xbf16>
    %8 = vector.shape_cast %7 : vector<1x32x128xbf16> to vector<32x128xbf16>
    %cst_10 = arith.constant dense<0.000000e+00> : vector<32x256xf32>
    %9 = tpu.matmul %8, %6, %cst_10 {dimension_numbers = #tpu.dot_dimension_numbers<[1], [0], [0], [1], [0, 0, 1, 1], [], []>} : vector<32x128xbf16>, vector<128x256xbf16>, vector<32x256xf32> -> vector<32x256xf32>
    %10 = arith.addf %4, %9 : vector<32x256xf32>
    %c0_11 = arith.constant 0 : index
    %c0_12 = arith.constant 0 : index
    %c16 = arith.constant 16 : index
    %11 = vector.load %arg1[%c0_11, %c0_12, %c16] : memref<8x128x288xbf16, #tpu.memory_space<vmem>>, vector<1x128x256xbf16>
    %12 = vector.shape_cast %11 : vector<1x128x256xbf16> to vector<128x256xbf16>
    %c2 = arith.constant 2 : index
    %c0_13 = arith.constant 0 : index
    %c0_14 = arith.constant 0 : index
    %13 = vector.load %arg2[%c2, %c0_13, %c0_14] : memref<4x32x128xbf16, #tpu.memory_space<vmem>>, vector<1x32x128xbf16>
    %14 = vector.shape_cast %13 : vector<1x32x128xbf16> to vector<32x128xbf16>
    %cst_15 = arith.constant dense<0.000000e+00> : vector<32x256xf32>
    %15 = tpu.matmul %14, %12, %cst_15 {dimension_numbers = #tpu.dot_dimension_numbers<[1], [0], [0], [1], [0, 0, 1, 1], [], []>} : vector<32x128xbf16>, vector<128x256xbf16>, vector<32x256xf32> -> vector<32x256xf32>
    %16 = arith.addf %10, %15 : vector<32x256xf32>
    %c0_16 = arith.constant 0 : index
    %c0_17 = arith.constant 0 : index
    %c17 = arith.constant 17 : index
    %17 = vector.load %arg1[%c0_16, %c0_17, %c17] : memref<8x128x288xbf16, #tpu.memory_space<vmem>>, vector<1x128x256xbf16>
    %18 = vector.shape_cast %17 : vector<1x128x256xbf16> to vector<128x256xbf16>
    %c3 = arith.constant 3 : index
    %c0_18 = arith.constant 0 : index
    %c0_19 = arith.constant 0 : index
    %19 = vector.load %arg2[%c3, %c0_18, %c0_19] : memref<4x32x128xbf16, #tpu.memory_space<vmem>>, vector<1x32x128xbf16>
    %20 = vector.shape_cast %19 : vector<1x32x128xbf16> to vector<32x128xbf16>
    %cst_20 = arith.constant dense<0.000000e+00> : vector<32x256xf32>
    %21 = tpu.matmul %20, %18, %cst_20 {dimension_numbers = #tpu.dot_dimension_numbers<[1], [0], [0], [1], [0, 0, 1, 1], [], []>} : vector<32x128xbf16>, vector<128x256xbf16>, vector<32x256xf32> -> vector<32x256xf32>
    %22 = arith.addf %16, %21 : vector<32x256xf32>
    %23 = vector.extract_strided_slice %22 {offsets = [0, 0], sizes = [8, 256], strides = [1, 1]} : vector<32x256xf32> to vector<8x256xf32>
    %24 = vector.extract_strided_slice %22 {offsets = [8, 0], sizes = [8, 256], strides = [1, 1]} : vector<32x256xf32> to vector<8x256xf32>
    %25 = arith.maximumf %23, %24 : vector<8x256xf32>
    %26 = vector.extract_strided_slice %22 {offsets = [16, 0], sizes = [8, 256], strides = [1, 1]} : vector<32x256xf32> to vector<8x256xf32>
    %27 = vector.extract_strided_slice %22 {offsets = [24, 0], sizes = [8, 256], strides = [1, 1]} : vector<32x256xf32> to vector<8x256xf32>
    %28 = arith.maximumf %26, %27 : vector<8x256xf32>
    %29 = arith.maximumf %25, %28 : vector<8x256xf32>
    %c0_21 = arith.constant 0 : index
    %c0_22 = arith.constant 0 : index
    %30 = vector.load %arg3[%c0_21, %c0_22] : memref<8x1xf32, #tpu.memory_space<vmem>>, vector<8x1xf32>
    %31 = vector.broadcast %30 : vector<8x1xf32> to vector<8x256xf32>
    %32 = arith.addf %29, %31 : vector<8x256xf32>
    %cst_23 = arith.constant 0.000000e+00 : f32
    %33 = vector.broadcast %cst_23 : f32 to vector<8x256xf32>
    %34 = arith.maximumf %32, %33 : vector<8x256xf32>
    %35 = vector.extract_strided_slice %34 {offsets = [0, 0], sizes = [8, 192], strides = [1, 1]} : vector<8x256xf32> to vector<8x192xf32>
    %36 = vector.extract_strided_slice %34 {offsets = [0, 1], sizes = [8, 192], strides = [1, 1]} : vector<8x256xf32> to vector<8x192xf32>
    %37 = vector.extract_strided_slice %34 {offsets = [0, 2], sizes = [8, 192], strides = [1, 1]} : vector<8x256xf32> to vector<8x192xf32>
    %38 = vector.extract_strided_slice %34 {offsets = [0, 3], sizes = [8, 192], strides = [1, 1]} : vector<8x256xf32> to vector<8x192xf32>
    %39 = vector.extract_strided_slice %34 {offsets = [0, 16], sizes = [8, 192], strides = [1, 1]} : vector<8x256xf32> to vector<8x192xf32>
    %40 = vector.extract_strided_slice %34 {offsets = [0, 17], sizes = [8, 192], strides = [1, 1]} : vector<8x256xf32> to vector<8x192xf32>
    %41 = vector.extract_strided_slice %34 {offsets = [0, 18], sizes = [8, 192], strides = [1, 1]} : vector<8x256xf32> to vector<8x192xf32>
    %42 = vector.extract_strided_slice %34 {offsets = [0, 19], sizes = [8, 192], strides = [1, 1]} : vector<8x256xf32> to vector<8x192xf32>
    %43 = vector.extract_strided_slice %34 {offsets = [0, 32], sizes = [8, 192], strides = [1, 1]} : vector<8x256xf32> to vector<8x192xf32>
    %44 = vector.extract_strided_slice %34 {offsets = [0, 33], sizes = [8, 192], strides = [1, 1]} : vector<8x256xf32> to vector<8x192xf32>
    %45 = vector.extract_strided_slice %34 {offsets = [0, 34], sizes = [8, 192], strides = [1, 1]} : vector<8x256xf32> to vector<8x192xf32>
    %46 = vector.extract_strided_slice %34 {offsets = [0, 35], sizes = [8, 192], strides = [1, 1]} : vector<8x256xf32> to vector<8x192xf32>
    %47 = vector.extract_strided_slice %34 {offsets = [0, 48], sizes = [8, 192], strides = [1, 1]} : vector<8x256xf32> to vector<8x192xf32>
    %48 = vector.extract_strided_slice %34 {offsets = [0, 49], sizes = [8, 192], strides = [1, 1]} : vector<8x256xf32> to vector<8x192xf32>
    %49 = vector.extract_strided_slice %34 {offsets = [0, 50], sizes = [8, 192], strides = [1, 1]} : vector<8x256xf32> to vector<8x192xf32>
    %50 = vector.extract_strided_slice %34 {offsets = [0, 51], sizes = [8, 192], strides = [1, 1]} : vector<8x256xf32> to vector<8x192xf32>
    %51 = tpu.concatenate %35, %36, %37, %38, %39, %40, %41, %42, %43, %44, %45, %46, %47, %48, %49, %50 in 0 : vector<8x192xf32>, vector<8x192xf32>, vector<8x192xf32>, vector<8x192xf32>, vector<8x192xf32>, vector<8x192xf32>, vector<8x192xf32>, vector<8x192xf32>, vector<8x192xf32>, vector<8x192xf32>, vector<8x192xf32>, vector<8x192xf32>, vector<8x192xf32>, vector<8x192xf32>, vector<8x192xf32>, vector<8x192xf32> -> vector<128x192xf32>
    %c0_24 = arith.constant 0 : index
    %c0_25 = arith.constant 0 : index
    %52 = vector.load %arg4[%c0_24, %c0_25] : memref<16x128xf32, #tpu.memory_space<vmem>>, vector<16x128xf32>
    %cst_26 = arith.constant dense<0.000000e+00> : vector<16x192xf32>
    %53 = tpu.matmul %52, %51, %cst_26 {dimension_numbers = #tpu.dot_dimension_numbers<[1], [0], [0], [1], [0, 0, 1, 1], [], []>} : vector<16x128xf32>, vector<128x192xf32>, vector<16x192xf32> -> vector<16x192xf32>
    %c0_27 = arith.constant 0 : index
    %c0_28 = arith.constant 0 : index
    %54 = vector.load %arg5[%c0_27, %c0_28] : memref<16x1xf32, #tpu.memory_space<vmem>>, vector<16x1xf32>
    %55 = vector.broadcast %54 : vector<16x1xf32> to vector<16x192xf32>
    %56 = arith.addf %53, %55 : vector<16x192xf32>
    %c1_29 = arith.constant 1 : index
    %c0_30 = arith.constant 0 : index
    %c0_31 = arith.constant 0 : index
    %57 = vector.load %arg1[%c1_29, %c0_30, %c0_31] : memref<8x128x288xbf16, #tpu.memory_space<vmem>>, vector<1x128x256xbf16>
    %58 = vector.shape_cast %57 : vector<1x128x256xbf16> to vector<128x256xbf16>
    %c0_32 = arith.constant 0 : index
    %c0_33 = arith.constant 0 : index
    %c0_34 = arith.constant 0 : index
    %59 = vector.load %arg2[%c0_32, %c0_33, %c0_34] : memref<4x32x128xbf16, #tpu.memory_space<vmem>>, vector<1x32x128xbf16>
    %60 = vector.shape_cast %59 : vector<1x32x128xbf16> to vector<32x128xbf16>
    %cst_35 = arith.constant dense<0.000000e+00> : vector<32x256xf32>
    %61 = tpu.matmul %60, %58, %cst_35 {dimension_numbers = #tpu.dot_dimension_numbers<[1], [0], [0], [1], [0, 0, 1, 1], [], []>} : vector<32x128xbf16>, vector<128x256xbf16>, vector<32x256xf32> -> vector<32x256xf32>
    %c1_36 = arith.constant 1 : index
    %c0_37 = arith.constant 0 : index
    %c1_38 = arith.constant 1 : index
    %62 = vector.load %arg1[%c1_36, %c0_37, %c1_38] : memref<8x128x288xbf16, #tpu.memory_space<vmem>>, vector<1x128x256xbf16>
    %63 = vector.shape_cast %62 : vector<1x128x256xbf16> to vector<128x256xbf16>
    %c1_39 = arith.constant 1 : index
    %c0_40 = arith.constant 0 : index
    %c0_41 = arith.constant 0 : index
    %64 = vector.load %arg2[%c1_39, %c0_40, %c0_41] : memref<4x32x128xbf16, #tpu.memory_space<vmem>>, vector<1x32x128xbf16>
    %65 = vector.shape_cast %64 : vector<1x32x128xbf16> to vector<32x128xbf16>
    %cst_42 = arith.constant dense<0.000000e+00> : vector<32x256xf32>
    %66 = tpu.matmul %65, %63, %cst_42 {dimension_numbers = #tpu.dot_dimension_numbers<[1], [0], [0], [1], [0, 0, 1, 1], [], []>} : vector<32x128xbf16>, vector<128x256xbf16>, vector<32x256xf32> -> vector<32x256xf32>
    %67 = arith.addf %61, %66 : vector<32x256xf32>
    %c1_43 = arith.constant 1 : index
    %c0_44 = arith.constant 0 : index
    %c16_45 = arith.constant 16 : index
    %68 = vector.load %arg1[%c1_43, %c0_44, %c16_45] : memref<8x128x288xbf16, #tpu.memory_space<vmem>>, vector<1x128x256xbf16>
    %69 = vector.shape_cast %68 : vector<1x128x256xbf16> to vector<128x256xbf16>
    %c2_46 = arith.constant 2 : index
    %c0_47 = arith.constant 0 : index
    %c0_48 = arith.constant 0 : index
    %70 = vector.load %arg2[%c2_46, %c0_47, %c0_48] : memref<4x32x128xbf16, #tpu.memory_space<vmem>>, vector<1x32x128xbf16>
    %71 = vector.shape_cast %70 : vector<1x32x128xbf16> to vector<32x128xbf16>
    %cst_49 = arith.constant dense<0.000000e+00> : vector<32x256xf32>
    %72 = tpu.matmul %71, %69, %cst_49 {dimension_numbers = #tpu.dot_dimension_numbers<[1], [0], [0], [1], [0, 0, 1, 1], [], []>} : vector<32x128xbf16>, vector<128x256xbf16>, vector<32x256xf32> -> vector<32x256xf32>
    %73 = arith.addf %67, %72 : vector<32x256xf32>
    %c1_50 = arith.constant 1 : index
    %c0_51 = arith.constant 0 : index
    %c17_52 = arith.constant 17 : index
    %74 = vector.load %arg1[%c1_50, %c0_51, %c17_52] : memref<8x128x288xbf16, #tpu.memory_space<vmem>>, vector<1x128x256xbf16>
    %75 = vector.shape_cast %74 : vector<1x128x256xbf16> to vector<128x256xbf16>
    %c3_53 = arith.constant 3 : index
    %c0_54 = arith.constant 0 : index
    %c0_55 = arith.constant 0 : index
    %76 = vector.load %arg2[%c3_53, %c0_54, %c0_55] : memref<4x32x128xbf16, #tpu.memory_space<vmem>>, vector<1x32x128xbf16>
    %77 = vector.shape_cast %76 : vector<1x32x128xbf16> to vector<32x128xbf16>
    %cst_56 = arith.constant dense<0.000000e+00> : vector<32x256xf32>
    %78 = tpu.matmul %77, %75, %cst_56 {dimension_numbers = #tpu.dot_dimension_numbers<[1], [0], [0], [1], [0, 0, 1, 1], [], []>} : vector<32x128xbf16>, vector<128x256xbf16>, vector<32x256xf32> -> vector<32x256xf32>
    %79 = arith.addf %73, %78 : vector<32x256xf32>
    %80 = vector.extract_strided_slice %79 {offsets = [0, 0], sizes = [8, 256], strides = [1, 1]} : vector<32x256xf32> to vector<8x256xf32>
    %81 = vector.extract_strided_slice %79 {offsets = [8, 0], sizes = [8, 256], strides = [1, 1]} : vector<32x256xf32> to vector<8x256xf32>
    %82 = arith.maximumf %80, %81 : vector<8x256xf32>
    %83 = vector.extract_strided_slice %79 {offsets = [16, 0], sizes = [8, 256], strides = [1, 1]} : vector<32x256xf32> to vector<8x256xf32>
    %84 = vector.extract_strided_slice %79 {offsets = [24, 0], sizes = [8, 256], strides = [1, 1]} : vector<32x256xf32> to vector<8x256xf32>
    %85 = arith.maximumf %83, %84 : vector<8x256xf32>
    %86 = arith.maximumf %82, %85 : vector<8x256xf32>
    %c0_57 = arith.constant 0 : index
    %c0_58 = arith.constant 0 : index
    %87 = vector.load %arg3[%c0_57, %c0_58] : memref<8x1xf32, #tpu.memory_space<vmem>>, vector<8x1xf32>
    %88 = vector.broadcast %87 : vector<8x1xf32> to vector<8x256xf32>
    %89 = arith.addf %86, %88 : vector<8x256xf32>
    %cst_59 = arith.constant 0.000000e+00 : f32
    %90 = vector.broadcast %cst_59 : f32 to vector<8x256xf32>
    %91 = arith.maximumf %89, %90 : vector<8x256xf32>
    %92 = vector.extract_strided_slice %91 {offsets = [0, 0], sizes = [8, 192], strides = [1, 1]} : vector<8x256xf32> to vector<8x192xf32>
    %93 = vector.extract_strided_slice %91 {offsets = [0, 1], sizes = [8, 192], strides = [1, 1]} : vector<8x256xf32> to vector<8x192xf32>
    %94 = vector.extract_strided_slice %91 {offsets = [0, 2], sizes = [8, 192], strides = [1, 1]} : vector<8x256xf32> to vector<8x192xf32>
    %95 = vector.extract_strided_slice %91 {offsets = [0, 3], sizes = [8, 192], strides = [1, 1]} : vector<8x256xf32> to vector<8x192xf32>
    %96 = vector.extract_strided_slice %91 {offsets = [0, 16], sizes = [8, 192], strides = [1, 1]} : vector<8x256xf32> to vector<8x192xf32>
    %97 = vector.extract_strided_slice %91 {offsets = [0, 17], sizes = [8, 192], strides = [1, 1]} : vector<8x256xf32> to vector<8x192xf32>
    %98 = vector.extract_strided_slice %91 {offsets = [0, 18], sizes = [8, 192], strides = [1, 1]} : vector<8x256xf32> to vector<8x192xf32>
    %99 = vector.extract_strided_slice %91 {offsets = [0, 19], sizes = [8, 192], strides = [1, 1]} : vector<8x256xf32> to vector<8x192xf32>
    %100 = vector.extract_strided_slice %91 {offsets = [0, 32], sizes = [8, 192], strides = [1, 1]} : vector<8x256xf32> to vector<8x192xf32>
    %101 = vector.extract_strided_slice %91 {offsets = [0, 33], sizes = [8, 192], strides = [1, 1]} : vector<8x256xf32> to vector<8x192xf32>
    %102 = vector.extract_strided_slice %91 {offsets = [0, 34], sizes = [8, 192], strides = [1, 1]} : vector<8x256xf32> to vector<8x192xf32>
    %103 = vector.extract_strided_slice %91 {offsets = [0, 35], sizes = [8, 192], strides = [1, 1]} : vector<8x256xf32> to vector<8x192xf32>
    %104 = vector.extract_strided_slice %91 {offsets = [0, 48], sizes = [8, 192], strides = [1, 1]} : vector<8x256xf32> to vector<8x192xf32>
    %105 = vector.extract_strided_slice %91 {offsets = [0, 49], sizes = [8, 192], strides = [1, 1]} : vector<8x256xf32> to vector<8x192xf32>
    %106 = vector.extract_strided_slice %91 {offsets = [0, 50], sizes = [8, 192], strides = [1, 1]} : vector<8x256xf32> to vector<8x192xf32>
    %107 = vector.extract_strided_slice %91 {offsets = [0, 51], sizes = [8, 192], strides = [1, 1]} : vector<8x256xf32> to vector<8x192xf32>
    %108 = tpu.concatenate %92, %93, %94, %95, %96, %97, %98, %99, %100, %101, %102, %103, %104, %105, %106, %107 in 0 : vector<8x192xf32>, vector<8x192xf32>, vector<8x192xf32>, vector<8x192xf32>, vector<8x192xf32>, vector<8x192xf32>, vector<8x192xf32>, vector<8x192xf32>, vector<8x192xf32>, vector<8x192xf32>, vector<8x192xf32>, vector<8x192xf32>, vector<8x192xf32>, vector<8x192xf32>, vector<8x192xf32>, vector<8x192xf32> -> vector<128x192xf32>
    %c0_60 = arith.constant 0 : index
    %c0_61 = arith.constant 0 : index
    %109 = vector.load %arg4[%c0_60, %c0_61] : memref<16x128xf32, #tpu.memory_space<vmem>>, vector<16x128xf32>
    %cst_62 = arith.constant dense<0.000000e+00> : vector<16x192xf32>
    %110 = tpu.matmul %109, %108, %cst_62 {dimension_numbers = #tpu.dot_dimension_numbers<[1], [0], [0], [1], [0, 0, 1, 1], [], []>} : vector<16x128xf32>, vector<128x192xf32>, vector<16x192xf32> -> vector<16x192xf32>
    %c0_63 = arith.constant 0 : index
    %c0_64 = arith.constant 0 : index
    %111 = vector.load %arg5[%c0_63, %c0_64] : memref<16x1xf32, #tpu.memory_space<vmem>>, vector<16x1xf32>
    %112 = vector.broadcast %111 : vector<16x1xf32> to vector<16x192xf32>
    %113 = arith.addf %110, %112 : vector<16x192xf32>
    %c2_65 = arith.constant 2 : index
    %c0_66 = arith.constant 0 : index
    %c0_67 = arith.constant 0 : index
    %114 = vector.load %arg1[%c2_65, %c0_66, %c0_67] : memref<8x128x288xbf16, #tpu.memory_space<vmem>>, vector<1x128x256xbf16>
    %115 = vector.shape_cast %114 : vector<1x128x256xbf16> to vector<128x256xbf16>
    %c0_68 = arith.constant 0 : index
    %c0_69 = arith.constant 0 : index
    %c0_70 = arith.constant 0 : index
    %116 = vector.load %arg2[%c0_68, %c0_69, %c0_70] : memref<4x32x128xbf16, #tpu.memory_space<vmem>>, vector<1x32x128xbf16>
    %117 = vector.shape_cast %116 : vector<1x32x128xbf16> to vector<32x128xbf16>
    %cst_71 = arith.constant dense<0.000000e+00> : vector<32x256xf32>
    %118 = tpu.matmul %117, %115, %cst_71 {dimension_numbers = #tpu.dot_dimension_numbers<[1], [0], [0], [1], [0, 0, 1, 1], [], []>} : vector<32x128xbf16>, vector<128x256xbf16>, vector<32x256xf32> -> vector<32x256xf32>
    %c2_72 = arith.constant 2 : index
    %c0_73 = arith.constant 0 : index
    %c1_74 = arith.constant 1 : index
    %119 = vector.load %arg1[%c2_72, %c0_73, %c1_74] : memref<8x128x288xbf16, #tpu.memory_space<vmem>>, vector<1x128x256xbf16>
    %120 = vector.shape_cast %119 : vector<1x128x256xbf16> to vector<128x256xbf16>
    %c1_75 = arith.constant 1 : index
    %c0_76 = arith.constant 0 : index
    %c0_77 = arith.constant 0 : index
    %121 = vector.load %arg2[%c1_75, %c0_76, %c0_77] : memref<4x32x128xbf16, #tpu.memory_space<vmem>>, vector<1x32x128xbf16>
    %122 = vector.shape_cast %121 : vector<1x32x128xbf16> to vector<32x128xbf16>
    %cst_78 = arith.constant dense<0.000000e+00> : vector<32x256xf32>
    %123 = tpu.matmul %122, %120, %cst_78 {dimension_numbers = #tpu.dot_dimension_numbers<[1], [0], [0], [1], [0, 0, 1, 1], [], []>} : vector<32x128xbf16>, vector<128x256xbf16>, vector<32x256xf32> -> vector<32x256xf32>
    %124 = arith.addf %118, %123 : vector<32x256xf32>
    %c2_79 = arith.constant 2 : index
    %c0_80 = arith.constant 0 : index
    %c16_81 = arith.constant 16 : index
    %125 = vector.load %arg1[%c2_79, %c0_80, %c16_81] : memref<8x128x288xbf16, #tpu.memory_space<vmem>>, vector<1x128x256xbf16>
    %126 = vector.shape_cast %125 : vector<1x128x256xbf16> to vector<128x256xbf16>
    %c2_82 = arith.constant 2 : index
    %c0_83 = arith.constant 0 : index
    %c0_84 = arith.constant 0 : index
    %127 = vector.load %arg2[%c2_82, %c0_83, %c0_84] : memref<4x32x128xbf16, #tpu.memory_space<vmem>>, vector<1x32x128xbf16>
    %128 = vector.shape_cast %127 : vector<1x32x128xbf16> to vector<32x128xbf16>
    %cst_85 = arith.constant dense<0.000000e+00> : vector<32x256xf32>
    %129 = tpu.matmul %128, %126, %cst_85 {dimension_numbers = #tpu.dot_dimension_numbers<[1], [0], [0], [1], [0, 0, 1, 1], [], []>} : vector<32x128xbf16>, vector<128x256xbf16>, vector<32x256xf32> -> vector<32x256xf32>
    %130 = arith.addf %124, %129 : vector<32x256xf32>
    %c2_86 = arith.constant 2 : index
    %c0_87 = arith.constant 0 : index
    %c17_88 = arith.constant 17 : index
    %131 = vector.load %arg1[%c2_86, %c0_87, %c17_88] : memref<8x128x288xbf16, #tpu.memory_space<vmem>>, vector<1x128x256xbf16>
    %132 = vector.shape_cast %131 : vector<1x128x256xbf16> to vector<128x256xbf16>
    %c3_89 = arith.constant 3 : index
    %c0_90 = arith.constant 0 : index
    %c0_91 = arith.constant 0 : index
    %133 = vector.load %arg2[%c3_89, %c0_90, %c0_91] : memref<4x32x128xbf16, #tpu.memory_space<vmem>>, vector<1x32x128xbf16>
    %134 = vector.shape_cast %133 : vector<1x32x128xbf16> to vector<32x128xbf16>
    %cst_92 = arith.constant dense<0.000000e+00> : vector<32x256xf32>
    %135 = tpu.matmul %134, %132, %cst_92 {dimension_numbers = #tpu.dot_dimension_numbers<[1], [0], [0], [1], [0, 0, 1, 1], [], []>} : vector<32x128xbf16>, vector<128x256xbf16>, vector<32x256xf32> -> vector<32x256xf32>
    %136 = arith.addf %130, %135 : vector<32x256xf32>
    %137 = vector.extract_strided_slice %136 {offsets = [0, 0], sizes = [8, 256], strides = [1, 1]} : vector<32x256xf32> to vector<8x256xf32>
    %138 = vector.extract_strided_slice %136 {offsets = [8, 0], sizes = [8, 256], strides = [1, 1]} : vector<32x256xf32> to vector<8x256xf32>
    %139 = arith.maximumf %137, %138 : vector<8x256xf32>
    %140 = vector.extract_strided_slice %136 {offsets = [16, 0], sizes = [8, 256], strides = [1, 1]} : vector<32x256xf32> to vector<8x256xf32>
    %141 = vector.extract_strided_slice %136 {offsets = [24, 0], sizes = [8, 256], strides = [1, 1]} : vector<32x256xf32> to vector<8x256xf32>
    %142 = arith.maximumf %140, %141 : vector<8x256xf32>
    %143 = arith.maximumf %139, %142 : vector<8x256xf32>
    %c0_93 = arith.constant 0 : index
    %c0_94 = arith.constant 0 : index
    %144 = vector.load %arg3[%c0_93, %c0_94] : memref<8x1xf32, #tpu.memory_space<vmem>>, vector<8x1xf32>
    %145 = vector.broadcast %144 : vector<8x1xf32> to vector<8x256xf32>
    %146 = arith.addf %143, %145 : vector<8x256xf32>
    %cst_95 = arith.constant 0.000000e+00 : f32
    %147 = vector.broadcast %cst_95 : f32 to vector<8x256xf32>
    %148 = arith.maximumf %146, %147 : vector<8x256xf32>
    %149 = vector.extract_strided_slice %148 {offsets = [0, 0], sizes = [8, 192], strides = [1, 1]} : vector<8x256xf32> to vector<8x192xf32>
    %150 = vector.extract_strided_slice %148 {offsets = [0, 1], sizes = [8, 192], strides = [1, 1]} : vector<8x256xf32> to vector<8x192xf32>
    %151 = vector.extract_strided_slice %148 {offsets = [0, 2], sizes = [8, 192], strides = [1, 1]} : vector<8x256xf32> to vector<8x192xf32>
    %152 = vector.extract_strided_slice %148 {offsets = [0, 3], sizes = [8, 192], strides = [1, 1]} : vector<8x256xf32> to vector<8x192xf32>
    %153 = vector.extract_strided_slice %148 {offsets = [0, 16], sizes = [8, 192], strides = [1, 1]} : vector<8x256xf32> to vector<8x192xf32>
    %154 = vector.extract_strided_slice %148 {offsets = [0, 17], sizes = [8, 192], strides = [1, 1]} : vector<8x256xf32> to vector<8x192xf32>
    %155 = vector.extract_strided_slice %148 {offsets = [0, 18], sizes = [8, 192], strides = [1, 1]} : vector<8x256xf32> to vector<8x192xf32>
    %156 = vector.extract_strided_slice %148 {offsets = [0, 19], sizes = [8, 192], strides = [1, 1]} : vector<8x256xf32> to vector<8x192xf32>
    %157 = vector.extract_strided_slice %148 {offsets = [0, 32], sizes = [8, 192], strides = [1, 1]} : vector<8x256xf32> to vector<8x192xf32>
    %158 = vector.extract_strided_slice %148 {offsets = [0, 33], sizes = [8, 192], strides = [1, 1]} : vector<8x256xf32> to vector<8x192xf32>
    %159 = vector.extract_strided_slice %148 {offsets = [0, 34], sizes = [8, 192], strides = [1, 1]} : vector<8x256xf32> to vector<8x192xf32>
    %160 = vector.extract_strided_slice %148 {offsets = [0, 35], sizes = [8, 192], strides = [1, 1]} : vector<8x256xf32> to vector<8x192xf32>
    %161 = vector.extract_strided_slice %148 {offsets = [0, 48], sizes = [8, 192], strides = [1, 1]} : vector<8x256xf32> to vector<8x192xf32>
    %162 = vector.extract_strided_slice %148 {offsets = [0, 49], sizes = [8, 192], strides = [1, 1]} : vector<8x256xf32> to vector<8x192xf32>
    %163 = vector.extract_strided_slice %148 {offsets = [0, 50], sizes = [8, 192], strides = [1, 1]} : vector<8x256xf32> to vector<8x192xf32>
    %164 = vector.extract_strided_slice %148 {offsets = [0, 51], sizes = [8, 192], strides = [1, 1]} : vector<8x256xf32> to vector<8x192xf32>
    %165 = tpu.concatenate %149, %150, %151, %152, %153, %154, %155, %156, %157, %158, %159, %160, %161, %162, %163, %164 in 0 : vector<8x192xf32>, vector<8x192xf32>, vector<8x192xf32>, vector<8x192xf32>, vector<8x192xf32>, vector<8x192xf32>, vector<8x192xf32>, vector<8x192xf32>, vector<8x192xf32>, vector<8x192xf32>, vector<8x192xf32>, vector<8x192xf32>, vector<8x192xf32>, vector<8x192xf32>, vector<8x192xf32>, vector<8x192xf32> -> vector<128x192xf32>
    %c0_96 = arith.constant 0 : index
    %c0_97 = arith.constant 0 : index
    %166 = vector.load %arg4[%c0_96, %c0_97] : memref<16x128xf32, #tpu.memory_space<vmem>>, vector<16x128xf32>
    %cst_98 = arith.constant dense<0.000000e+00> : vector<16x192xf32>
    %167 = tpu.matmul %166, %165, %cst_98 {dimension_numbers = #tpu.dot_dimension_numbers<[1], [0], [0], [1], [0, 0, 1, 1], [], []>} : vector<16x128xf32>, vector<128x192xf32>, vector<16x192xf32> -> vector<16x192xf32>
    %c0_99 = arith.constant 0 : index
    %c0_100 = arith.constant 0 : index
    %168 = vector.load %arg5[%c0_99, %c0_100] : memref<16x1xf32, #tpu.memory_space<vmem>>, vector<16x1xf32>
    %169 = vector.broadcast %168 : vector<16x1xf32> to vector<16x192xf32>
    %170 = arith.addf %167, %169 : vector<16x192xf32>
    %c3_101 = arith.constant 3 : index
    %c0_102 = arith.constant 0 : index
    %c0_103 = arith.constant 0 : index
    %171 = vector.load %arg1[%c3_101, %c0_102, %c0_103] : memref<8x128x288xbf16, #tpu.memory_space<vmem>>, vector<1x128x256xbf16>
    %172 = vector.shape_cast %171 : vector<1x128x256xbf16> to vector<128x256xbf16>
    %c0_104 = arith.constant 0 : index
    %c0_105 = arith.constant 0 : index
    %c0_106 = arith.constant 0 : index
    %173 = vector.load %arg2[%c0_104, %c0_105, %c0_106] : memref<4x32x128xbf16, #tpu.memory_space<vmem>>, vector<1x32x128xbf16>
    %174 = vector.shape_cast %173 : vector<1x32x128xbf16> to vector<32x128xbf16>
    %cst_107 = arith.constant dense<0.000000e+00> : vector<32x256xf32>
    %175 = tpu.matmul %174, %172, %cst_107 {dimension_numbers = #tpu.dot_dimension_numbers<[1], [0], [0], [1], [0, 0, 1, 1], [], []>} : vector<32x128xbf16>, vector<128x256xbf16>, vector<32x256xf32> -> vector<32x256xf32>
    %c3_108 = arith.constant 3 : index
    %c0_109 = arith.constant 0 : index
    %c1_110 = arith.constant 1 : index
    %176 = vector.load %arg1[%c3_108, %c0_109, %c1_110] : memref<8x128x288xbf16, #tpu.memory_space<vmem>>, vector<1x128x256xbf16>
    %177 = vector.shape_cast %176 : vector<1x128x256xbf16> to vector<128x256xbf16>
    %c1_111 = arith.constant 1 : index
    %c0_112 = arith.constant 0 : index
    %c0_113 = arith.constant 0 : index
    %178 = vector.load %arg2[%c1_111, %c0_112, %c0_113] : memref<4x32x128xbf16, #tpu.memory_space<vmem>>, vector<1x32x128xbf16>
    %179 = vector.shape_cast %178 : vector<1x32x128xbf16> to vector<32x128xbf16>
    %cst_114 = arith.constant dense<0.000000e+00> : vector<32x256xf32>
    %180 = tpu.matmul %179, %177, %cst_114 {dimension_numbers = #tpu.dot_dimension_numbers<[1], [0], [0], [1], [0, 0, 1, 1], [], []>} : vector<32x128xbf16>, vector<128x256xbf16>, vector<32x256xf32> -> vector<32x256xf32>
    %181 = arith.addf %175, %180 : vector<32x256xf32>
    %c3_115 = arith.constant 3 : index
    %c0_116 = arith.constant 0 : index
    %c16_117 = arith.constant 16 : index
    %182 = vector.load %arg1[%c3_115, %c0_116, %c16_117] : memref<8x128x288xbf16, #tpu.memory_space<vmem>>, vector<1x128x256xbf16>
    %183 = vector.shape_cast %182 : vector<1x128x256xbf16> to vector<128x256xbf16>
    %c2_118 = arith.constant 2 : index
    %c0_119 = arith.constant 0 : index
    %c0_120 = arith.constant 0 : index
    %184 = vector.load %arg2[%c2_118, %c0_119, %c0_120] : memref<4x32x128xbf16, #tpu.memory_space<vmem>>, vector<1x32x128xbf16>
    %185 = vector.shape_cast %184 : vector<1x32x128xbf16> to vector<32x128xbf16>
    %cst_121 = arith.constant dense<0.000000e+00> : vector<32x256xf32>
    %186 = tpu.matmul %185, %183, %cst_121 {dimension_numbers = #tpu.dot_dimension_numbers<[1], [0], [0], [1], [0, 0, 1, 1], [], []>} : vector<32x128xbf16>, vector<128x256xbf16>, vector<32x256xf32> -> vector<32x256xf32>
    %187 = arith.addf %181, %186 : vector<32x256xf32>
    %c3_122 = arith.constant 3 : index
    %c0_123 = arith.constant 0 : index
    %c17_124 = arith.constant 17 : index
    %188 = vector.load %arg1[%c3_122, %c0_123, %c17_124] : memref<8x128x288xbf16, #tpu.memory_space<vmem>>, vector<1x128x256xbf16>
    %189 = vector.shape_cast %188 : vector<1x128x256xbf16> to vector<128x256xbf16>
    %c3_125 = arith.constant 3 : index
    %c0_126 = arith.constant 0 : index
    %c0_127 = arith.constant 0 : index
    %190 = vector.load %arg2[%c3_125, %c0_126, %c0_127] : memref<4x32x128xbf16, #tpu.memory_space<vmem>>, vector<1x32x128xbf16>
    %191 = vector.shape_cast %190 : vector<1x32x128xbf16> to vector<32x128xbf16>
    %cst_128 = arith.constant dense<0.000000e+00> : vector<32x256xf32>
    %192 = tpu.matmul %191, %189, %cst_128 {dimension_numbers = #tpu.dot_dimension_numbers<[1], [0], [0], [1], [0, 0, 1, 1], [], []>} : vector<32x128xbf16>, vector<128x256xbf16>, vector<32x256xf32> -> vector<32x256xf32>
    %193 = arith.addf %187, %192 : vector<32x256xf32>
    %194 = vector.extract_strided_slice %193 {offsets = [0, 0], sizes = [8, 256], strides = [1, 1]} : vector<32x256xf32> to vector<8x256xf32>
    %195 = vector.extract_strided_slice %193 {offsets = [8, 0], sizes = [8, 256], strides = [1, 1]} : vector<32x256xf32> to vector<8x256xf32>
    %196 = arith.maximumf %194, %195 : vector<8x256xf32>
    %197 = vector.extract_strided_slice %193 {offsets = [16, 0], sizes = [8, 256], strides = [1, 1]} : vector<32x256xf32> to vector<8x256xf32>
    %198 = vector.extract_strided_slice %193 {offsets = [24, 0], sizes = [8, 256], strides = [1, 1]} : vector<32x256xf32> to vector<8x256xf32>
    %199 = arith.maximumf %197, %198 : vector<8x256xf32>
    %200 = arith.maximumf %196, %199 : vector<8x256xf32>
    %c0_129 = arith.constant 0 : index
    %c0_130 = arith.constant 0 : index
    %201 = vector.load %arg3[%c0_129, %c0_130] : memref<8x1xf32, #tpu.memory_space<vmem>>, vector<8x1xf32>
    %202 = vector.broadcast %201 : vector<8x1xf32> to vector<8x256xf32>
    %203 = arith.addf %200, %202 : vector<8x256xf32>
    %cst_131 = arith.constant 0.000000e+00 : f32
    %204 = vector.broadcast %cst_131 : f32 to vector<8x256xf32>
    %205 = arith.maximumf %203, %204 : vector<8x256xf32>
    %206 = vector.extract_strided_slice %205 {offsets = [0, 0], sizes = [8, 192], strides = [1, 1]} : vector<8x256xf32> to vector<8x192xf32>
    %207 = vector.extract_strided_slice %205 {offsets = [0, 1], sizes = [8, 192], strides = [1, 1]} : vector<8x256xf32> to vector<8x192xf32>
    %208 = vector.extract_strided_slice %205 {offsets = [0, 2], sizes = [8, 192], strides = [1, 1]} : vector<8x256xf32> to vector<8x192xf32>
    %209 = vector.extract_strided_slice %205 {offsets = [0, 3], sizes = [8, 192], strides = [1, 1]} : vector<8x256xf32> to vector<8x192xf32>
    %210 = vector.extract_strided_slice %205 {offsets = [0, 16], sizes = [8, 192], strides = [1, 1]} : vector<8x256xf32> to vector<8x192xf32>
    %211 = vector.extract_strided_slice %205 {offsets = [0, 17], sizes = [8, 192], strides = [1, 1]} : vector<8x256xf32> to vector<8x192xf32>
    %212 = vector.extract_strided_slice %205 {offsets = [0, 18], sizes = [8, 192], strides = [1, 1]} : vector<8x256xf32> to vector<8x192xf32>
    %213 = vector.extract_strided_slice %205 {offsets = [0, 19], sizes = [8, 192], strides = [1, 1]} : vector<8x256xf32> to vector<8x192xf32>
    %214 = vector.extract_strided_slice %205 {offsets = [0, 32], sizes = [8, 192], strides = [1, 1]} : vector<8x256xf32> to vector<8x192xf32>
    %215 = vector.extract_strided_slice %205 {offsets = [0, 33], sizes = [8, 192], strides = [1, 1]} : vector<8x256xf32> to vector<8x192xf32>
    %216 = vector.extract_strided_slice %205 {offsets = [0, 34], sizes = [8, 192], strides = [1, 1]} : vector<8x256xf32> to vector<8x192xf32>
    %217 = vector.extract_strided_slice %205 {offsets = [0, 35], sizes = [8, 192], strides = [1, 1]} : vector<8x256xf32> to vector<8x192xf32>
    %218 = vector.extract_strided_slice %205 {offsets = [0, 48], sizes = [8, 192], strides = [1, 1]} : vector<8x256xf32> to vector<8x192xf32>
    %219 = vector.extract_strided_slice %205 {offsets = [0, 49], sizes = [8, 192], strides = [1, 1]} : vector<8x256xf32> to vector<8x192xf32>
    %220 = vector.extract_strided_slice %205 {offsets = [0, 50], sizes = [8, 192], strides = [1, 1]} : vector<8x256xf32> to vector<8x192xf32>
    %221 = vector.extract_strided_slice %205 {offsets = [0, 51], sizes = [8, 192], strides = [1, 1]} : vector<8x256xf32> to vector<8x192xf32>
    %222 = tpu.concatenate %206, %207, %208, %209, %210, %211, %212, %213, %214, %215, %216, %217, %218, %219, %220, %221 in 0 : vector<8x192xf32>, vector<8x192xf32>, vector<8x192xf32>, vector<8x192xf32>, vector<8x192xf32>, vector<8x192xf32>, vector<8x192xf32>, vector<8x192xf32>, vector<8x192xf32>, vector<8x192xf32>, vector<8x192xf32>, vector<8x192xf32>, vector<8x192xf32>, vector<8x192xf32>, vector<8x192xf32>, vector<8x192xf32> -> vector<128x192xf32>
    %c0_132 = arith.constant 0 : index
    %c0_133 = arith.constant 0 : index
    %223 = vector.load %arg4[%c0_132, %c0_133] : memref<16x128xf32, #tpu.memory_space<vmem>>, vector<16x128xf32>
    %cst_134 = arith.constant dense<0.000000e+00> : vector<16x192xf32>
    %224 = tpu.matmul %223, %222, %cst_134 {dimension_numbers = #tpu.dot_dimension_numbers<[1], [0], [0], [1], [0, 0, 1, 1], [], []>} : vector<16x128xf32>, vector<128x192xf32>, vector<16x192xf32> -> vector<16x192xf32>
    %c0_135 = arith.constant 0 : index
    %c0_136 = arith.constant 0 : index
    %225 = vector.load %arg5[%c0_135, %c0_136] : memref<16x1xf32, #tpu.memory_space<vmem>>, vector<16x1xf32>
    %226 = vector.broadcast %225 : vector<16x1xf32> to vector<16x192xf32>
    %227 = arith.addf %224, %226 : vector<16x192xf32>
    %c4 = arith.constant 4 : index
    %c0_137 = arith.constant 0 : index
    %c0_138 = arith.constant 0 : index
    %228 = vector.load %arg1[%c4, %c0_137, %c0_138] : memref<8x128x288xbf16, #tpu.memory_space<vmem>>, vector<1x128x256xbf16>
    %229 = vector.shape_cast %228 : vector<1x128x256xbf16> to vector<128x256xbf16>
    %c0_139 = arith.constant 0 : index
    %c0_140 = arith.constant 0 : index
    %c0_141 = arith.constant 0 : index
    %230 = vector.load %arg2[%c0_139, %c0_140, %c0_141] : memref<4x32x128xbf16, #tpu.memory_space<vmem>>, vector<1x32x128xbf16>
    %231 = vector.shape_cast %230 : vector<1x32x128xbf16> to vector<32x128xbf16>
    %cst_142 = arith.constant dense<0.000000e+00> : vector<32x256xf32>
    %232 = tpu.matmul %231, %229, %cst_142 {dimension_numbers = #tpu.dot_dimension_numbers<[1], [0], [0], [1], [0, 0, 1, 1], [], []>} : vector<32x128xbf16>, vector<128x256xbf16>, vector<32x256xf32> -> vector<32x256xf32>
    %c4_143 = arith.constant 4 : index
    %c0_144 = arith.constant 0 : index
    %c1_145 = arith.constant 1 : index
    %233 = vector.load %arg1[%c4_143, %c0_144, %c1_145] : memref<8x128x288xbf16, #tpu.memory_space<vmem>>, vector<1x128x256xbf16>
    %234 = vector.shape_cast %233 : vector<1x128x256xbf16> to vector<128x256xbf16>
    %c1_146 = arith.constant 1 : index
    %c0_147 = arith.constant 0 : index
    %c0_148 = arith.constant 0 : index
    %235 = vector.load %arg2[%c1_146, %c0_147, %c0_148] : memref<4x32x128xbf16, #tpu.memory_space<vmem>>, vector<1x32x128xbf16>
    %236 = vector.shape_cast %235 : vector<1x32x128xbf16> to vector<32x128xbf16>
    %cst_149 = arith.constant dense<0.000000e+00> : vector<32x256xf32>
    %237 = tpu.matmul %236, %234, %cst_149 {dimension_numbers = #tpu.dot_dimension_numbers<[1], [0], [0], [1], [0, 0, 1, 1], [], []>} : vector<32x128xbf16>, vector<128x256xbf16>, vector<32x256xf32> -> vector<32x256xf32>
    %238 = arith.addf %232, %237 : vector<32x256xf32>
    %c4_150 = arith.constant 4 : index
    %c0_151 = arith.constant 0 : index
    %c16_152 = arith.constant 16 : index
    %239 = vector.load %arg1[%c4_150, %c0_151, %c16_152] : memref<8x128x288xbf16, #tpu.memory_space<vmem>>, vector<1x128x256xbf16>
    %240 = vector.shape_cast %239 : vector<1x128x256xbf16> to vector<128x256xbf16>
    %c2_153 = arith.constant 2 : index
    %c0_154 = arith.constant 0 : index
    %c0_155 = arith.constant 0 : index
    %241 = vector.load %arg2[%c2_153, %c0_154, %c0_155] : memref<4x32x128xbf16, #tpu.memory_space<vmem>>, vector<1x32x128xbf16>
    %242 = vector.shape_cast %241 : vector<1x32x128xbf16> to vector<32x128xbf16>
    %cst_156 = arith.constant dense<0.000000e+00> : vector<32x256xf32>
    %243 = tpu.matmul %242, %240, %cst_156 {dimension_numbers = #tpu.dot_dimension_numbers<[1], [0], [0], [1], [0, 0, 1, 1], [], []>} : vector<32x128xbf16>, vector<128x256xbf16>, vector<32x256xf32> -> vector<32x256xf32>
    %244 = arith.addf %238, %243 : vector<32x256xf32>
    %c4_157 = arith.constant 4 : index
    %c0_158 = arith.constant 0 : index
    %c17_159 = arith.constant 17 : index
    %245 = vector.load %arg1[%c4_157, %c0_158, %c17_159] : memref<8x128x288xbf16, #tpu.memory_space<vmem>>, vector<1x128x256xbf16>
    %246 = vector.shape_cast %245 : vector<1x128x256xbf16> to vector<128x256xbf16>
    %c3_160 = arith.constant 3 : index
    %c0_161 = arith.constant 0 : index
    %c0_162 = arith.constant 0 : index
    %247 = vector.load %arg2[%c3_160, %c0_161, %c0_162] : memref<4x32x128xbf16, #tpu.memory_space<vmem>>, vector<1x32x128xbf16>
    %248 = vector.shape_cast %247 : vector<1x32x128xbf16> to vector<32x128xbf16>
    %cst_163 = arith.constant dense<0.000000e+00> : vector<32x256xf32>
    %249 = tpu.matmul %248, %246, %cst_163 {dimension_numbers = #tpu.dot_dimension_numbers<[1], [0], [0], [1], [0, 0, 1, 1], [], []>} : vector<32x128xbf16>, vector<128x256xbf16>, vector<32x256xf32> -> vector<32x256xf32>
    %250 = arith.addf %244, %249 : vector<32x256xf32>
    %251 = vector.extract_strided_slice %250 {offsets = [0, 0], sizes = [8, 256], strides = [1, 1]} : vector<32x256xf32> to vector<8x256xf32>
    %252 = vector.extract_strided_slice %250 {offsets = [8, 0], sizes = [8, 256], strides = [1, 1]} : vector<32x256xf32> to vector<8x256xf32>
    %253 = arith.maximumf %251, %252 : vector<8x256xf32>
    %254 = vector.extract_strided_slice %250 {offsets = [16, 0], sizes = [8, 256], strides = [1, 1]} : vector<32x256xf32> to vector<8x256xf32>
    %255 = vector.extract_strided_slice %250 {offsets = [24, 0], sizes = [8, 256], strides = [1, 1]} : vector<32x256xf32> to vector<8x256xf32>
    %256 = arith.maximumf %254, %255 : vector<8x256xf32>
    %257 = arith.maximumf %253, %256 : vector<8x256xf32>
    %c0_164 = arith.constant 0 : index
    %c0_165 = arith.constant 0 : index
    %258 = vector.load %arg3[%c0_164, %c0_165] : memref<8x1xf32, #tpu.memory_space<vmem>>, vector<8x1xf32>
    %259 = vector.broadcast %258 : vector<8x1xf32> to vector<8x256xf32>
    %260 = arith.addf %257, %259 : vector<8x256xf32>
    %cst_166 = arith.constant 0.000000e+00 : f32
    %261 = vector.broadcast %cst_166 : f32 to vector<8x256xf32>
    %262 = arith.maximumf %260, %261 : vector<8x256xf32>
    %263 = vector.extract_strided_slice %262 {offsets = [0, 0], sizes = [8, 192], strides = [1, 1]} : vector<8x256xf32> to vector<8x192xf32>
    %264 = vector.extract_strided_slice %262 {offsets = [0, 1], sizes = [8, 192], strides = [1, 1]} : vector<8x256xf32> to vector<8x192xf32>
    %265 = vector.extract_strided_slice %262 {offsets = [0, 2], sizes = [8, 192], strides = [1, 1]} : vector<8x256xf32> to vector<8x192xf32>
    %266 = vector.extract_strided_slice %262 {offsets = [0, 3], sizes = [8, 192], strides = [1, 1]} : vector<8x256xf32> to vector<8x192xf32>
    %267 = vector.extract_strided_slice %262 {offsets = [0, 16], sizes = [8, 192], strides = [1, 1]} : vector<8x256xf32> to vector<8x192xf32>
    %268 = vector.extract_strided_slice %262 {offsets = [0, 17], sizes = [8, 192], strides = [1, 1]} : vector<8x256xf32> to vector<8x192xf32>
    %269 = vector.extract_strided_slice %262 {offsets = [0, 18], sizes = [8, 192], strides = [1, 1]} : vector<8x256xf32> to vector<8x192xf32>
    %270 = vector.extract_strided_slice %262 {offsets = [0, 19], sizes = [8, 192], strides = [1, 1]} : vector<8x256xf32> to vector<8x192xf32>
    %271 = vector.extract_strided_slice %262 {offsets = [0, 32], sizes = [8, 192], strides = [1, 1]} : vector<8x256xf32> to vector<8x192xf32>
    %272 = vector.extract_strided_slice %262 {offsets = [0, 33], sizes = [8, 192], strides = [1, 1]} : vector<8x256xf32> to vector<8x192xf32>
    %273 = vector.extract_strided_slice %262 {offsets = [0, 34], sizes = [8, 192], strides = [1, 1]} : vector<8x256xf32> to vector<8x192xf32>
    %274 = vector.extract_strided_slice %262 {offsets = [0, 35], sizes = [8, 192], strides = [1, 1]} : vector<8x256xf32> to vector<8x192xf32>
    %275 = vector.extract_strided_slice %262 {offsets = [0, 48], sizes = [8, 192], strides = [1, 1]} : vector<8x256xf32> to vector<8x192xf32>
    %276 = vector.extract_strided_slice %262 {offsets = [0, 49], sizes = [8, 192], strides = [1, 1]} : vector<8x256xf32> to vector<8x192xf32>
    %277 = vector.extract_strided_slice %262 {offsets = [0, 50], sizes = [8, 192], strides = [1, 1]} : vector<8x256xf32> to vector<8x192xf32>
    %278 = vector.extract_strided_slice %262 {offsets = [0, 51], sizes = [8, 192], strides = [1, 1]} : vector<8x256xf32> to vector<8x192xf32>
    %279 = tpu.concatenate %263, %264, %265, %266, %267, %268, %269, %270, %271, %272, %273, %274, %275, %276, %277, %278 in 0 : vector<8x192xf32>, vector<8x192xf32>, vector<8x192xf32>, vector<8x192xf32>, vector<8x192xf32>, vector<8x192xf32>, vector<8x192xf32>, vector<8x192xf32>, vector<8x192xf32>, vector<8x192xf32>, vector<8x192xf32>, vector<8x192xf32>, vector<8x192xf32>, vector<8x192xf32>, vector<8x192xf32>, vector<8x192xf32> -> vector<128x192xf32>
    %c0_167 = arith.constant 0 : index
    %c0_168 = arith.constant 0 : index
    %280 = vector.load %arg4[%c0_167, %c0_168] : memref<16x128xf32, #tpu.memory_space<vmem>>, vector<16x128xf32>
    %cst_169 = arith.constant dense<0.000000e+00> : vector<16x192xf32>
    %281 = tpu.matmul %280, %279, %cst_169 {dimension_numbers = #tpu.dot_dimension_numbers<[1], [0], [0], [1], [0, 0, 1, 1], [], []>} : vector<16x128xf32>, vector<128x192xf32>, vector<16x192xf32> -> vector<16x192xf32>
    %c0_170 = arith.constant 0 : index
    %c0_171 = arith.constant 0 : index
    %282 = vector.load %arg5[%c0_170, %c0_171] : memref<16x1xf32, #tpu.memory_space<vmem>>, vector<16x1xf32>
    %283 = vector.broadcast %282 : vector<16x1xf32> to vector<16x192xf32>
    %284 = arith.addf %281, %283 : vector<16x192xf32>
    %c5 = arith.constant 5 : index
    %c0_172 = arith.constant 0 : index
    %c0_173 = arith.constant 0 : index
    %285 = vector.load %arg1[%c5, %c0_172, %c0_173] : memref<8x128x288xbf16, #tpu.memory_space<vmem>>, vector<1x128x256xbf16>
    %286 = vector.shape_cast %285 : vector<1x128x256xbf16> to vector<128x256xbf16>
    %c0_174 = arith.constant 0 : index
    %c0_175 = arith.constant 0 : index
    %c0_176 = arith.constant 0 : index
    %287 = vector.load %arg2[%c0_174, %c0_175, %c0_176] : memref<4x32x128xbf16, #tpu.memory_space<vmem>>, vector<1x32x128xbf16>
    %288 = vector.shape_cast %287 : vector<1x32x128xbf16> to vector<32x128xbf16>
    %cst_177 = arith.constant dense<0.000000e+00> : vector<32x256xf32>
    %289 = tpu.matmul %288, %286, %cst_177 {dimension_numbers = #tpu.dot_dimension_numbers<[1], [0], [0], [1], [0, 0, 1, 1], [], []>} : vector<32x128xbf16>, vector<128x256xbf16>, vector<32x256xf32> -> vector<32x256xf32>
    %c5_178 = arith.constant 5 : index
    %c0_179 = arith.constant 0 : index
    %c1_180 = arith.constant 1 : index
    %290 = vector.load %arg1[%c5_178, %c0_179, %c1_180] : memref<8x128x288xbf16, #tpu.memory_space<vmem>>, vector<1x128x256xbf16>
    %291 = vector.shape_cast %290 : vector<1x128x256xbf16> to vector<128x256xbf16>
    %c1_181 = arith.constant 1 : index
    %c0_182 = arith.constant 0 : index
    %c0_183 = arith.constant 0 : index
    %292 = vector.load %arg2[%c1_181, %c0_182, %c0_183] : memref<4x32x128xbf16, #tpu.memory_space<vmem>>, vector<1x32x128xbf16>
    %293 = vector.shape_cast %292 : vector<1x32x128xbf16> to vector<32x128xbf16>
    %cst_184 = arith.constant dense<0.000000e+00> : vector<32x256xf32>
    %294 = tpu.matmul %293, %291, %cst_184 {dimension_numbers = #tpu.dot_dimension_numbers<[1], [0], [0], [1], [0, 0, 1, 1], [], []>} : vector<32x128xbf16>, vector<128x256xbf16>, vector<32x256xf32> -> vector<32x256xf32>
    %295 = arith.addf %289, %294 : vector<32x256xf32>
    %c5_185 = arith.constant 5 : index
    %c0_186 = arith.constant 0 : index
    %c16_187 = arith.constant 16 : index
    %296 = vector.load %arg1[%c5_185, %c0_186, %c16_187] : memref<8x128x288xbf16, #tpu.memory_space<vmem>>, vector<1x128x256xbf16>
    %297 = vector.shape_cast %296 : vector<1x128x256xbf16> to vector<128x256xbf16>
    %c2_188 = arith.constant 2 : index
    %c0_189 = arith.constant 0 : index
    %c0_190 = arith.constant 0 : index
    %298 = vector.load %arg2[%c2_188, %c0_189, %c0_190] : memref<4x32x128xbf16, #tpu.memory_space<vmem>>, vector<1x32x128xbf16>
    %299 = vector.shape_cast %298 : vector<1x32x128xbf16> to vector<32x128xbf16>
    %cst_191 = arith.constant dense<0.000000e+00> : vector<32x256xf32>
    %300 = tpu.matmul %299, %297, %cst_191 {dimension_numbers = #tpu.dot_dimension_numbers<[1], [0], [0], [1], [0, 0, 1, 1], [], []>} : vector<32x128xbf16>, vector<128x256xbf16>, vector<32x256xf32> -> vector<32x256xf32>
    %301 = arith.addf %295, %300 : vector<32x256xf32>
    %c5_192 = arith.constant 5 : index
    %c0_193 = arith.constant 0 : index
    %c17_194 = arith.constant 17 : index
    %302 = vector.load %arg1[%c5_192, %c0_193, %c17_194] : memref<8x128x288xbf16, #tpu.memory_space<vmem>>, vector<1x128x256xbf16>
    %303 = vector.shape_cast %302 : vector<1x128x256xbf16> to vector<128x256xbf16>
    %c3_195 = arith.constant 3 : index
    %c0_196 = arith.constant 0 : index
    %c0_197 = arith.constant 0 : index
    %304 = vector.load %arg2[%c3_195, %c0_196, %c0_197] : memref<4x32x128xbf16, #tpu.memory_space<vmem>>, vector<1x32x128xbf16>
    %305 = vector.shape_cast %304 : vector<1x32x128xbf16> to vector<32x128xbf16>
    %cst_198 = arith.constant dense<0.000000e+00> : vector<32x256xf32>
    %306 = tpu.matmul %305, %303, %cst_198 {dimension_numbers = #tpu.dot_dimension_numbers<[1], [0], [0], [1], [0, 0, 1, 1], [], []>} : vector<32x128xbf16>, vector<128x256xbf16>, vector<32x256xf32> -> vector<32x256xf32>
    %307 = arith.addf %301, %306 : vector<32x256xf32>
    %308 = vector.extract_strided_slice %307 {offsets = [0, 0], sizes = [8, 256], strides = [1, 1]} : vector<32x256xf32> to vector<8x256xf32>
    %309 = vector.extract_strided_slice %307 {offsets = [8, 0], sizes = [8, 256], strides = [1, 1]} : vector<32x256xf32> to vector<8x256xf32>
    %310 = arith.maximumf %308, %309 : vector<8x256xf32>
    %311 = vector.extract_strided_slice %307 {offsets = [16, 0], sizes = [8, 256], strides = [1, 1]} : vector<32x256xf32> to vector<8x256xf32>
    %312 = vector.extract_strided_slice %307 {offsets = [24, 0], sizes = [8, 256], strides = [1, 1]} : vector<32x256xf32> to vector<8x256xf32>
    %313 = arith.maximumf %311, %312 : vector<8x256xf32>
    %314 = arith.maximumf %310, %313 : vector<8x256xf32>
    %c0_199 = arith.constant 0 : index
    %c0_200 = arith.constant 0 : index
    %315 = vector.load %arg3[%c0_199, %c0_200] : memref<8x1xf32, #tpu.memory_space<vmem>>, vector<8x1xf32>
    %316 = vector.broadcast %315 : vector<8x1xf32> to vector<8x256xf32>
    %317 = arith.addf %314, %316 : vector<8x256xf32>
    %cst_201 = arith.constant 0.000000e+00 : f32
    %318 = vector.broadcast %cst_201 : f32 to vector<8x256xf32>
    %319 = arith.maximumf %317, %318 : vector<8x256xf32>
    %320 = vector.extract_strided_slice %319 {offsets = [0, 0], sizes = [8, 192], strides = [1, 1]} : vector<8x256xf32> to vector<8x192xf32>
    %321 = vector.extract_strided_slice %319 {offsets = [0, 1], sizes = [8, 192], strides = [1, 1]} : vector<8x256xf32> to vector<8x192xf32>
    %322 = vector.extract_strided_slice %319 {offsets = [0, 2], sizes = [8, 192], strides = [1, 1]} : vector<8x256xf32> to vector<8x192xf32>
    %323 = vector.extract_strided_slice %319 {offsets = [0, 3], sizes = [8, 192], strides = [1, 1]} : vector<8x256xf32> to vector<8x192xf32>
    %324 = vector.extract_strided_slice %319 {offsets = [0, 16], sizes = [8, 192], strides = [1, 1]} : vector<8x256xf32> to vector<8x192xf32>
    %325 = vector.extract_strided_slice %319 {offsets = [0, 17], sizes = [8, 192], strides = [1, 1]} : vector<8x256xf32> to vector<8x192xf32>
    %326 = vector.extract_strided_slice %319 {offsets = [0, 18], sizes = [8, 192], strides = [1, 1]} : vector<8x256xf32> to vector<8x192xf32>
    %327 = vector.extract_strided_slice %319 {offsets = [0, 19], sizes = [8, 192], strides = [1, 1]} : vector<8x256xf32> to vector<8x192xf32>
    %328 = vector.extract_strided_slice %319 {offsets = [0, 32], sizes = [8, 192], strides = [1, 1]} : vector<8x256xf32> to vector<8x192xf32>
    %329 = vector.extract_strided_slice %319 {offsets = [0, 33], sizes = [8, 192], strides = [1, 1]} : vector<8x256xf32> to vector<8x192xf32>
    %330 = vector.extract_strided_slice %319 {offsets = [0, 34], sizes = [8, 192], strides = [1, 1]} : vector<8x256xf32> to vector<8x192xf32>
    %331 = vector.extract_strided_slice %319 {offsets = [0, 35], sizes = [8, 192], strides = [1, 1]} : vector<8x256xf32> to vector<8x192xf32>
    %332 = vector.extract_strided_slice %319 {offsets = [0, 48], sizes = [8, 192], strides = [1, 1]} : vector<8x256xf32> to vector<8x192xf32>
    %333 = vector.extract_strided_slice %319 {offsets = [0, 49], sizes = [8, 192], strides = [1, 1]} : vector<8x256xf32> to vector<8x192xf32>
    %334 = vector.extract_strided_slice %319 {offsets = [0, 50], sizes = [8, 192], strides = [1, 1]} : vector<8x256xf32> to vector<8x192xf32>
    %335 = vector.extract_strided_slice %319 {offsets = [0, 51], sizes = [8, 192], strides = [1, 1]} : vector<8x256xf32> to vector<8x192xf32>
    %336 = tpu.concatenate %320, %321, %322, %323, %324, %325, %326, %327, %328, %329, %330, %331, %332, %333, %334, %335 in 0 : vector<8x192xf32>, vector<8x192xf32>, vector<8x192xf32>, vector<8x192xf32>, vector<8x192xf32>, vector<8x192xf32>, vector<8x192xf32>, vector<8x192xf32>, vector<8x192xf32>, vector<8x192xf32>, vector<8x192xf32>, vector<8x192xf32>, vector<8x192xf32>, vector<8x192xf32>, vector<8x192xf32>, vector<8x192xf32> -> vector<128x192xf32>
    %c0_202 = arith.constant 0 : index
    %c0_203 = arith.constant 0 : index
    %337 = vector.load %arg4[%c0_202, %c0_203] : memref<16x128xf32, #tpu.memory_space<vmem>>, vector<16x128xf32>
    %cst_204 = arith.constant dense<0.000000e+00> : vector<16x192xf32>
    %338 = tpu.matmul %337, %336, %cst_204 {dimension_numbers = #tpu.dot_dimension_numbers<[1], [0], [0], [1], [0, 0, 1, 1], [], []>} : vector<16x128xf32>, vector<128x192xf32>, vector<16x192xf32> -> vector<16x192xf32>
    %c0_205 = arith.constant 0 : index
    %c0_206 = arith.constant 0 : index
    %339 = vector.load %arg5[%c0_205, %c0_206] : memref<16x1xf32, #tpu.memory_space<vmem>>, vector<16x1xf32>
    %340 = vector.broadcast %339 : vector<16x1xf32> to vector<16x192xf32>
    %341 = arith.addf %338, %340 : vector<16x192xf32>
    %c6 = arith.constant 6 : index
    %c0_207 = arith.constant 0 : index
    %c0_208 = arith.constant 0 : index
    %342 = vector.load %arg1[%c6, %c0_207, %c0_208] : memref<8x128x288xbf16, #tpu.memory_space<vmem>>, vector<1x128x256xbf16>
    %343 = vector.shape_cast %342 : vector<1x128x256xbf16> to vector<128x256xbf16>
    %c0_209 = arith.constant 0 : index
    %c0_210 = arith.constant 0 : index
    %c0_211 = arith.constant 0 : index
    %344 = vector.load %arg2[%c0_209, %c0_210, %c0_211] : memref<4x32x128xbf16, #tpu.memory_space<vmem>>, vector<1x32x128xbf16>
    %345 = vector.shape_cast %344 : vector<1x32x128xbf16> to vector<32x128xbf16>
    %cst_212 = arith.constant dense<0.000000e+00> : vector<32x256xf32>
    %346 = tpu.matmul %345, %343, %cst_212 {dimension_numbers = #tpu.dot_dimension_numbers<[1], [0], [0], [1], [0, 0, 1, 1], [], []>} : vector<32x128xbf16>, vector<128x256xbf16>, vector<32x256xf32> -> vector<32x256xf32>
    %c6_213 = arith.constant 6 : index
    %c0_214 = arith.constant 0 : index
    %c1_215 = arith.constant 1 : index
    %347 = vector.load %arg1[%c6_213, %c0_214, %c1_215] : memref<8x128x288xbf16, #tpu.memory_space<vmem>>, vector<1x128x256xbf16>
    %348 = vector.shape_cast %347 : vector<1x128x256xbf16> to vector<128x256xbf16>
    %c1_216 = arith.constant 1 : index
    %c0_217 = arith.constant 0 : index
    %c0_218 = arith.constant 0 : index
    %349 = vector.load %arg2[%c1_216, %c0_217, %c0_218] : memref<4x32x128xbf16, #tpu.memory_space<vmem>>, vector<1x32x128xbf16>
    %350 = vector.shape_cast %349 : vector<1x32x128xbf16> to vector<32x128xbf16>
    %cst_219 = arith.constant dense<0.000000e+00> : vector<32x256xf32>
    %351 = tpu.matmul %350, %348, %cst_219 {dimension_numbers = #tpu.dot_dimension_numbers<[1], [0], [0], [1], [0, 0, 1, 1], [], []>} : vector<32x128xbf16>, vector<128x256xbf16>, vector<32x256xf32> -> vector<32x256xf32>
    %352 = arith.addf %346, %351 : vector<32x256xf32>
    %c6_220 = arith.constant 6 : index
    %c0_221 = arith.constant 0 : index
    %c16_222 = arith.constant 16 : index
    %353 = vector.load %arg1[%c6_220, %c0_221, %c16_222] : memref<8x128x288xbf16, #tpu.memory_space<vmem>>, vector<1x128x256xbf16>
    %354 = vector.shape_cast %353 : vector<1x128x256xbf16> to vector<128x256xbf16>
    %c2_223 = arith.constant 2 : index
    %c0_224 = arith.constant 0 : index
    %c0_225 = arith.constant 0 : index
    %355 = vector.load %arg2[%c2_223, %c0_224, %c0_225] : memref<4x32x128xbf16, #tpu.memory_space<vmem>>, vector<1x32x128xbf16>
    %356 = vector.shape_cast %355 : vector<1x32x128xbf16> to vector<32x128xbf16>
    %cst_226 = arith.constant dense<0.000000e+00> : vector<32x256xf32>
    %357 = tpu.matmul %356, %354, %cst_226 {dimension_numbers = #tpu.dot_dimension_numbers<[1], [0], [0], [1], [0, 0, 1, 1], [], []>} : vector<32x128xbf16>, vector<128x256xbf16>, vector<32x256xf32> -> vector<32x256xf32>
    %358 = arith.addf %352, %357 : vector<32x256xf32>
    %c6_227 = arith.constant 6 : index
    %c0_228 = arith.constant 0 : index
    %c17_229 = arith.constant 17 : index
    %359 = vector.load %arg1[%c6_227, %c0_228, %c17_229] : memref<8x128x288xbf16, #tpu.memory_space<vmem>>, vector<1x128x256xbf16>
    %360 = vector.shape_cast %359 : vector<1x128x256xbf16> to vector<128x256xbf16>
    %c3_230 = arith.constant 3 : index
    %c0_231 = arith.constant 0 : index
    %c0_232 = arith.constant 0 : index
    %361 = vector.load %arg2[%c3_230, %c0_231, %c0_232] : memref<4x32x128xbf16, #tpu.memory_space<vmem>>, vector<1x32x128xbf16>
    %362 = vector.shape_cast %361 : vector<1x32x128xbf16> to vector<32x128xbf16>
    %cst_233 = arith.constant dense<0.000000e+00> : vector<32x256xf32>
    %363 = tpu.matmul %362, %360, %cst_233 {dimension_numbers = #tpu.dot_dimension_numbers<[1], [0], [0], [1], [0, 0, 1, 1], [], []>} : vector<32x128xbf16>, vector<128x256xbf16>, vector<32x256xf32> -> vector<32x256xf32>
    %364 = arith.addf %358, %363 : vector<32x256xf32>
    %365 = vector.extract_strided_slice %364 {offsets = [0, 0], sizes = [8, 256], strides = [1, 1]} : vector<32x256xf32> to vector<8x256xf32>
    %366 = vector.extract_strided_slice %364 {offsets = [8, 0], sizes = [8, 256], strides = [1, 1]} : vector<32x256xf32> to vector<8x256xf32>
    %367 = arith.maximumf %365, %366 : vector<8x256xf32>
    %368 = vector.extract_strided_slice %364 {offsets = [16, 0], sizes = [8, 256], strides = [1, 1]} : vector<32x256xf32> to vector<8x256xf32>
    %369 = vector.extract_strided_slice %364 {offsets = [24, 0], sizes = [8, 256], strides = [1, 1]} : vector<32x256xf32> to vector<8x256xf32>
    %370 = arith.maximumf %368, %369 : vector<8x256xf32>
    %371 = arith.maximumf %367, %370 : vector<8x256xf32>
    %c0_234 = arith.constant 0 : index
    %c0_235 = arith.constant 0 : index
    %372 = vector.load %arg3[%c0_234, %c0_235] : memref<8x1xf32, #tpu.memory_space<vmem>>, vector<8x1xf32>
    %373 = vector.broadcast %372 : vector<8x1xf32> to vector<8x256xf32>
    %374 = arith.addf %371, %373 : vector<8x256xf32>
    %cst_236 = arith.constant 0.000000e+00 : f32
    %375 = vector.broadcast %cst_236 : f32 to vector<8x256xf32>
    %376 = arith.maximumf %374, %375 : vector<8x256xf32>
    %377 = vector.extract_strided_slice %376 {offsets = [0, 0], sizes = [8, 192], strides = [1, 1]} : vector<8x256xf32> to vector<8x192xf32>
    %378 = vector.extract_strided_slice %376 {offsets = [0, 1], sizes = [8, 192], strides = [1, 1]} : vector<8x256xf32> to vector<8x192xf32>
    %379 = vector.extract_strided_slice %376 {offsets = [0, 2], sizes = [8, 192], strides = [1, 1]} : vector<8x256xf32> to vector<8x192xf32>
    %380 = vector.extract_strided_slice %376 {offsets = [0, 3], sizes = [8, 192], strides = [1, 1]} : vector<8x256xf32> to vector<8x192xf32>
    %381 = vector.extract_strided_slice %376 {offsets = [0, 16], sizes = [8, 192], strides = [1, 1]} : vector<8x256xf32> to vector<8x192xf32>
    %382 = vector.extract_strided_slice %376 {offsets = [0, 17], sizes = [8, 192], strides = [1, 1]} : vector<8x256xf32> to vector<8x192xf32>
    %383 = vector.extract_strided_slice %376 {offsets = [0, 18], sizes = [8, 192], strides = [1, 1]} : vector<8x256xf32> to vector<8x192xf32>
    %384 = vector.extract_strided_slice %376 {offsets = [0, 19], sizes = [8, 192], strides = [1, 1]} : vector<8x256xf32> to vector<8x192xf32>
    %385 = vector.extract_strided_slice %376 {offsets = [0, 32], sizes = [8, 192], strides = [1, 1]} : vector<8x256xf32> to vector<8x192xf32>
    %386 = vector.extract_strided_slice %376 {offsets = [0, 33], sizes = [8, 192], strides = [1, 1]} : vector<8x256xf32> to vector<8x192xf32>
    %387 = vector.extract_strided_slice %376 {offsets = [0, 34], sizes = [8, 192], strides = [1, 1]} : vector<8x256xf32> to vector<8x192xf32>
    %388 = vector.extract_strided_slice %376 {offsets = [0, 35], sizes = [8, 192], strides = [1, 1]} : vector<8x256xf32> to vector<8x192xf32>
    %389 = vector.extract_strided_slice %376 {offsets = [0, 48], sizes = [8, 192], strides = [1, 1]} : vector<8x256xf32> to vector<8x192xf32>
    %390 = vector.extract_strided_slice %376 {offsets = [0, 49], sizes = [8, 192], strides = [1, 1]} : vector<8x256xf32> to vector<8x192xf32>
    %391 = vector.extract_strided_slice %376 {offsets = [0, 50], sizes = [8, 192], strides = [1, 1]} : vector<8x256xf32> to vector<8x192xf32>
    %392 = vector.extract_strided_slice %376 {offsets = [0, 51], sizes = [8, 192], strides = [1, 1]} : vector<8x256xf32> to vector<8x192xf32>
    %393 = tpu.concatenate %377, %378, %379, %380, %381, %382, %383, %384, %385, %386, %387, %388, %389, %390, %391, %392 in 0 : vector<8x192xf32>, vector<8x192xf32>, vector<8x192xf32>, vector<8x192xf32>, vector<8x192xf32>, vector<8x192xf32>, vector<8x192xf32>, vector<8x192xf32>, vector<8x192xf32>, vector<8x192xf32>, vector<8x192xf32>, vector<8x192xf32>, vector<8x192xf32>, vector<8x192xf32>, vector<8x192xf32>, vector<8x192xf32> -> vector<128x192xf32>
    %c0_237 = arith.constant 0 : index
    %c0_238 = arith.constant 0 : index
    %394 = vector.load %arg4[%c0_237, %c0_238] : memref<16x128xf32, #tpu.memory_space<vmem>>, vector<16x128xf32>
    %cst_239 = arith.constant dense<0.000000e+00> : vector<16x192xf32>
    %395 = tpu.matmul %394, %393, %cst_239 {dimension_numbers = #tpu.dot_dimension_numbers<[1], [0], [0], [1], [0, 0, 1, 1], [], []>} : vector<16x128xf32>, vector<128x192xf32>, vector<16x192xf32> -> vector<16x192xf32>
    %c0_240 = arith.constant 0 : index
    %c0_241 = arith.constant 0 : index
    %396 = vector.load %arg5[%c0_240, %c0_241] : memref<16x1xf32, #tpu.memory_space<vmem>>, vector<16x1xf32>
    %397 = vector.broadcast %396 : vector<16x1xf32> to vector<16x192xf32>
    %398 = arith.addf %395, %397 : vector<16x192xf32>
    %c7 = arith.constant 7 : index
    %c0_242 = arith.constant 0 : index
    %c0_243 = arith.constant 0 : index
    %399 = vector.load %arg1[%c7, %c0_242, %c0_243] : memref<8x128x288xbf16, #tpu.memory_space<vmem>>, vector<1x128x256xbf16>
    %400 = vector.shape_cast %399 : vector<1x128x256xbf16> to vector<128x256xbf16>
    %c0_244 = arith.constant 0 : index
    %c0_245 = arith.constant 0 : index
    %c0_246 = arith.constant 0 : index
    %401 = vector.load %arg2[%c0_244, %c0_245, %c0_246] : memref<4x32x128xbf16, #tpu.memory_space<vmem>>, vector<1x32x128xbf16>
    %402 = vector.shape_cast %401 : vector<1x32x128xbf16> to vector<32x128xbf16>
    %cst_247 = arith.constant dense<0.000000e+00> : vector<32x256xf32>
    %403 = tpu.matmul %402, %400, %cst_247 {dimension_numbers = #tpu.dot_dimension_numbers<[1], [0], [0], [1], [0, 0, 1, 1], [], []>} : vector<32x128xbf16>, vector<128x256xbf16>, vector<32x256xf32> -> vector<32x256xf32>
    %c7_248 = arith.constant 7 : index
    %c0_249 = arith.constant 0 : index
    %c1_250 = arith.constant 1 : index
    %404 = vector.load %arg1[%c7_248, %c0_249, %c1_250] : memref<8x128x288xbf16, #tpu.memory_space<vmem>>, vector<1x128x256xbf16>
    %405 = vector.shape_cast %404 : vector<1x128x256xbf16> to vector<128x256xbf16>
    %c1_251 = arith.constant 1 : index
    %c0_252 = arith.constant 0 : index
    %c0_253 = arith.constant 0 : index
    %406 = vector.load %arg2[%c1_251, %c0_252, %c0_253] : memref<4x32x128xbf16, #tpu.memory_space<vmem>>, vector<1x32x128xbf16>
    %407 = vector.shape_cast %406 : vector<1x32x128xbf16> to vector<32x128xbf16>
    %cst_254 = arith.constant dense<0.000000e+00> : vector<32x256xf32>
    %408 = tpu.matmul %407, %405, %cst_254 {dimension_numbers = #tpu.dot_dimension_numbers<[1], [0], [0], [1], [0, 0, 1, 1], [], []>} : vector<32x128xbf16>, vector<128x256xbf16>, vector<32x256xf32> -> vector<32x256xf32>
    %409 = arith.addf %403, %408 : vector<32x256xf32>
    %c7_255 = arith.constant 7 : index
    %c0_256 = arith.constant 0 : index
    %c16_257 = arith.constant 16 : index
    %410 = vector.load %arg1[%c7_255, %c0_256, %c16_257] : memref<8x128x288xbf16, #tpu.memory_space<vmem>>, vector<1x128x256xbf16>
    %411 = vector.shape_cast %410 : vector<1x128x256xbf16> to vector<128x256xbf16>
    %c2_258 = arith.constant 2 : index
    %c0_259 = arith.constant 0 : index
    %c0_260 = arith.constant 0 : index
    %412 = vector.load %arg2[%c2_258, %c0_259, %c0_260] : memref<4x32x128xbf16, #tpu.memory_space<vmem>>, vector<1x32x128xbf16>
    %413 = vector.shape_cast %412 : vector<1x32x128xbf16> to vector<32x128xbf16>
    %cst_261 = arith.constant dense<0.000000e+00> : vector<32x256xf32>
    %414 = tpu.matmul %413, %411, %cst_261 {dimension_numbers = #tpu.dot_dimension_numbers<[1], [0], [0], [1], [0, 0, 1, 1], [], []>} : vector<32x128xbf16>, vector<128x256xbf16>, vector<32x256xf32> -> vector<32x256xf32>
    %415 = arith.addf %409, %414 : vector<32x256xf32>
    %c7_262 = arith.constant 7 : index
    %c0_263 = arith.constant 0 : index
    %c17_264 = arith.constant 17 : index
    %416 = vector.load %arg1[%c7_262, %c0_263, %c17_264] : memref<8x128x288xbf16, #tpu.memory_space<vmem>>, vector<1x128x256xbf16>
    %417 = vector.shape_cast %416 : vector<1x128x256xbf16> to vector<128x256xbf16>
    %c3_265 = arith.constant 3 : index
    %c0_266 = arith.constant 0 : index
    %c0_267 = arith.constant 0 : index
    %418 = vector.load %arg2[%c3_265, %c0_266, %c0_267] : memref<4x32x128xbf16, #tpu.memory_space<vmem>>, vector<1x32x128xbf16>
    %419 = vector.shape_cast %418 : vector<1x32x128xbf16> to vector<32x128xbf16>
    %cst_268 = arith.constant dense<0.000000e+00> : vector<32x256xf32>
    %420 = tpu.matmul %419, %417, %cst_268 {dimension_numbers = #tpu.dot_dimension_numbers<[1], [0], [0], [1], [0, 0, 1, 1], [], []>} : vector<32x128xbf16>, vector<128x256xbf16>, vector<32x256xf32> -> vector<32x256xf32>
    %421 = arith.addf %415, %420 : vector<32x256xf32>
    %422 = vector.extract_strided_slice %421 {offsets = [0, 0], sizes = [8, 256], strides = [1, 1]} : vector<32x256xf32> to vector<8x256xf32>
    %423 = vector.extract_strided_slice %421 {offsets = [8, 0], sizes = [8, 256], strides = [1, 1]} : vector<32x256xf32> to vector<8x256xf32>
    %424 = arith.maximumf %422, %423 : vector<8x256xf32>
    %425 = vector.extract_strided_slice %421 {offsets = [16, 0], sizes = [8, 256], strides = [1, 1]} : vector<32x256xf32> to vector<8x256xf32>
    %426 = vector.extract_strided_slice %421 {offsets = [24, 0], sizes = [8, 256], strides = [1, 1]} : vector<32x256xf32> to vector<8x256xf32>
    %427 = arith.maximumf %425, %426 : vector<8x256xf32>
    %428 = arith.maximumf %424, %427 : vector<8x256xf32>
    %c0_269 = arith.constant 0 : index
    %c0_270 = arith.constant 0 : index
    %429 = vector.load %arg3[%c0_269, %c0_270] : memref<8x1xf32, #tpu.memory_space<vmem>>, vector<8x1xf32>
    %430 = vector.broadcast %429 : vector<8x1xf32> to vector<8x256xf32>
    %431 = arith.addf %428, %430 : vector<8x256xf32>
    %cst_271 = arith.constant 0.000000e+00 : f32
    %432 = vector.broadcast %cst_271 : f32 to vector<8x256xf32>
    %433 = arith.maximumf %431, %432 : vector<8x256xf32>
    %434 = vector.extract_strided_slice %433 {offsets = [0, 0], sizes = [8, 192], strides = [1, 1]} : vector<8x256xf32> to vector<8x192xf32>
    %435 = vector.extract_strided_slice %433 {offsets = [0, 1], sizes = [8, 192], strides = [1, 1]} : vector<8x256xf32> to vector<8x192xf32>
    %436 = vector.extract_strided_slice %433 {offsets = [0, 2], sizes = [8, 192], strides = [1, 1]} : vector<8x256xf32> to vector<8x192xf32>
    %437 = vector.extract_strided_slice %433 {offsets = [0, 3], sizes = [8, 192], strides = [1, 1]} : vector<8x256xf32> to vector<8x192xf32>
    %438 = vector.extract_strided_slice %433 {offsets = [0, 16], sizes = [8, 192], strides = [1, 1]} : vector<8x256xf32> to vector<8x192xf32>
    %439 = vector.extract_strided_slice %433 {offsets = [0, 17], sizes = [8, 192], strides = [1, 1]} : vector<8x256xf32> to vector<8x192xf32>
    %440 = vector.extract_strided_slice %433 {offsets = [0, 18], sizes = [8, 192], strides = [1, 1]} : vector<8x256xf32> to vector<8x192xf32>
    %441 = vector.extract_strided_slice %433 {offsets = [0, 19], sizes = [8, 192], strides = [1, 1]} : vector<8x256xf32> to vector<8x192xf32>
    %442 = vector.extract_strided_slice %433 {offsets = [0, 32], sizes = [8, 192], strides = [1, 1]} : vector<8x256xf32> to vector<8x192xf32>
    %443 = vector.extract_strided_slice %433 {offsets = [0, 33], sizes = [8, 192], strides = [1, 1]} : vector<8x256xf32> to vector<8x192xf32>
    %444 = vector.extract_strided_slice %433 {offsets = [0, 34], sizes = [8, 192], strides = [1, 1]} : vector<8x256xf32> to vector<8x192xf32>
    %445 = vector.extract_strided_slice %433 {offsets = [0, 35], sizes = [8, 192], strides = [1, 1]} : vector<8x256xf32> to vector<8x192xf32>
    %446 = vector.extract_strided_slice %433 {offsets = [0, 48], sizes = [8, 192], strides = [1, 1]} : vector<8x256xf32> to vector<8x192xf32>
    %447 = vector.extract_strided_slice %433 {offsets = [0, 49], sizes = [8, 192], strides = [1, 1]} : vector<8x256xf32> to vector<8x192xf32>
    %448 = vector.extract_strided_slice %433 {offsets = [0, 50], sizes = [8, 192], strides = [1, 1]} : vector<8x256xf32> to vector<8x192xf32>
    %449 = vector.extract_strided_slice %433 {offsets = [0, 51], sizes = [8, 192], strides = [1, 1]} : vector<8x256xf32> to vector<8x192xf32>
    %450 = tpu.concatenate %434, %435, %436, %437, %438, %439, %440, %441, %442, %443, %444, %445, %446, %447, %448, %449 in 0 : vector<8x192xf32>, vector<8x192xf32>, vector<8x192xf32>, vector<8x192xf32>, vector<8x192xf32>, vector<8x192xf32>, vector<8x192xf32>, vector<8x192xf32>, vector<8x192xf32>, vector<8x192xf32>, vector<8x192xf32>, vector<8x192xf32>, vector<8x192xf32>, vector<8x192xf32>, vector<8x192xf32>, vector<8x192xf32> -> vector<128x192xf32>
    %c0_272 = arith.constant 0 : index
    %c0_273 = arith.constant 0 : index
    %451 = vector.load %arg4[%c0_272, %c0_273] : memref<16x128xf32, #tpu.memory_space<vmem>>, vector<16x128xf32>
    %cst_274 = arith.constant dense<0.000000e+00> : vector<16x192xf32>
    %452 = tpu.matmul %451, %450, %cst_274 {dimension_numbers = #tpu.dot_dimension_numbers<[1], [0], [0], [1], [0, 0, 1, 1], [], []>} : vector<16x128xf32>, vector<128x192xf32>, vector<16x192xf32> -> vector<16x192xf32>
    %c0_275 = arith.constant 0 : index
    %c0_276 = arith.constant 0 : index
    %453 = vector.load %arg5[%c0_275, %c0_276] : memref<16x1xf32, #tpu.memory_space<vmem>>, vector<16x1xf32>
    %454 = vector.broadcast %453 : vector<16x1xf32> to vector<16x192xf32>
    %455 = arith.addf %452, %454 : vector<16x192xf32>
    %456 = tpu.concatenate %56, %113, %170, %227, %284, %341, %398, %455 in 0 : vector<16x192xf32>, vector<16x192xf32>, vector<16x192xf32>, vector<16x192xf32>, vector<16x192xf32>, vector<16x192xf32>, vector<16x192xf32>, vector<16x192xf32> -> vector<128x192xf32>
    %457 = vector.extract_strided_slice %456 {offsets = [0, 0], sizes = [128, 171], strides = [1, 1]} : vector<128x192xf32> to vector<128x171xf32>
    %458 = vector.extract_strided_slice %456 {offsets = [0, 1], sizes = [128, 171], strides = [1, 1]} : vector<128x192xf32> to vector<128x171xf32>
    %459 = arith.maximumf %457, %458 : vector<128x171xf32>
    %460 = vector.extract_strided_slice %456 {offsets = [0, 16], sizes = [128, 171], strides = [1, 1]} : vector<128x192xf32> to vector<128x171xf32>
    %461 = vector.extract_strided_slice %456 {offsets = [0, 17], sizes = [128, 171], strides = [1, 1]} : vector<128x192xf32> to vector<128x171xf32>
    %462 = arith.maximumf %460, %461 : vector<128x171xf32>
    %463 = arith.maximumf %459, %462 : vector<128x171xf32>
    %cst_277 = arith.constant 0.000000e+00 : f32
    %464 = vector.broadcast %cst_277 : f32 to vector<128x171xf32>
    %465 = arith.maximumf %463, %464 : vector<128x171xf32>
    %c0_278 = arith.constant 0 : index
    %c0_279 = arith.constant 0 : index
    %466 = vector.load %arg6[%c0_278, %c0_279] : memref<171x36xf32, #tpu.memory_space<vmem>>, vector<171x36xf32>
    %cst_280 = arith.constant dense<0.000000e+00> : vector<128x36xf32>
    %467 = tpu.matmul %465, %466, %cst_280 {dimension_numbers = #tpu.dot_dimension_numbers<[1], [0], [0], [1], [0, 0, 1, 1], [], []>} : vector<128x171xf32>, vector<171x36xf32>, vector<128x36xf32> -> vector<128x36xf32>
    %468 = vector.extract_strided_slice %467 {offsets = [0, 0], sizes = [16, 36], strides = [1, 1]} : vector<128x36xf32> to vector<16x36xf32>
    %469 = vector.extract_strided_slice %468 {offsets = [0, 0], sizes = [1, 36], strides = [1, 1]} : vector<16x36xf32> to vector<1x36xf32>
    %470 = vector.extract_strided_slice %468 {offsets = [1, 0], sizes = [1, 36], strides = [1, 1]} : vector<16x36xf32> to vector<1x36xf32>
    %471 = vector.extract_strided_slice %468 {offsets = [2, 0], sizes = [1, 36], strides = [1, 1]} : vector<16x36xf32> to vector<1x36xf32>
    %472 = vector.extract_strided_slice %468 {offsets = [3, 0], sizes = [1, 36], strides = [1, 1]} : vector<16x36xf32> to vector<1x36xf32>
    %473 = vector.extract_strided_slice %468 {offsets = [4, 0], sizes = [1, 36], strides = [1, 1]} : vector<16x36xf32> to vector<1x36xf32>
    %474 = vector.extract_strided_slice %468 {offsets = [5, 0], sizes = [1, 36], strides = [1, 1]} : vector<16x36xf32> to vector<1x36xf32>
    %475 = vector.extract_strided_slice %468 {offsets = [6, 0], sizes = [1, 36], strides = [1, 1]} : vector<16x36xf32> to vector<1x36xf32>
    %476 = vector.extract_strided_slice %468 {offsets = [7, 0], sizes = [1, 36], strides = [1, 1]} : vector<16x36xf32> to vector<1x36xf32>
    %477 = vector.extract_strided_slice %468 {offsets = [8, 0], sizes = [1, 36], strides = [1, 1]} : vector<16x36xf32> to vector<1x36xf32>
    %478 = vector.extract_strided_slice %468 {offsets = [9, 0], sizes = [1, 36], strides = [1, 1]} : vector<16x36xf32> to vector<1x36xf32>
    %479 = vector.extract_strided_slice %468 {offsets = [10, 0], sizes = [1, 36], strides = [1, 1]} : vector<16x36xf32> to vector<1x36xf32>
    %480 = vector.extract_strided_slice %468 {offsets = [11, 0], sizes = [1, 36], strides = [1, 1]} : vector<16x36xf32> to vector<1x36xf32>
    %481 = tpu.concatenate %469, %470, %471, %472, %473, %474, %475, %476, %477, %478, %479, %480 in 1 : vector<1x36xf32>, vector<1x36xf32>, vector<1x36xf32>, vector<1x36xf32>, vector<1x36xf32>, vector<1x36xf32>, vector<1x36xf32>, vector<1x36xf32>, vector<1x36xf32>, vector<1x36xf32>, vector<1x36xf32>, vector<1x36xf32> -> vector<1x432xf32>
    %482 = vector.extract_strided_slice %467 {offsets = [16, 0], sizes = [16, 36], strides = [1, 1]} : vector<128x36xf32> to vector<16x36xf32>
    %483 = vector.extract_strided_slice %482 {offsets = [0, 0], sizes = [1, 36], strides = [1, 1]} : vector<16x36xf32> to vector<1x36xf32>
    %484 = vector.extract_strided_slice %482 {offsets = [1, 0], sizes = [1, 36], strides = [1, 1]} : vector<16x36xf32> to vector<1x36xf32>
    %485 = vector.extract_strided_slice %482 {offsets = [2, 0], sizes = [1, 36], strides = [1, 1]} : vector<16x36xf32> to vector<1x36xf32>
    %486 = vector.extract_strided_slice %482 {offsets = [3, 0], sizes = [1, 36], strides = [1, 1]} : vector<16x36xf32> to vector<1x36xf32>
    %487 = vector.extract_strided_slice %482 {offsets = [4, 0], sizes = [1, 36], strides = [1, 1]} : vector<16x36xf32> to vector<1x36xf32>
    %488 = vector.extract_strided_slice %482 {offsets = [5, 0], sizes = [1, 36], strides = [1, 1]} : vector<16x36xf32> to vector<1x36xf32>
    %489 = vector.extract_strided_slice %482 {offsets = [6, 0], sizes = [1, 36], strides = [1, 1]} : vector<16x36xf32> to vector<1x36xf32>
    %490 = vector.extract_strided_slice %482 {offsets = [7, 0], sizes = [1, 36], strides = [1, 1]} : vector<16x36xf32> to vector<1x36xf32>
    %491 = vector.extract_strided_slice %482 {offsets = [8, 0], sizes = [1, 36], strides = [1, 1]} : vector<16x36xf32> to vector<1x36xf32>
    %492 = vector.extract_strided_slice %482 {offsets = [9, 0], sizes = [1, 36], strides = [1, 1]} : vector<16x36xf32> to vector<1x36xf32>
    %493 = vector.extract_strided_slice %482 {offsets = [10, 0], sizes = [1, 36], strides = [1, 1]} : vector<16x36xf32> to vector<1x36xf32>
    %494 = vector.extract_strided_slice %482 {offsets = [11, 0], sizes = [1, 36], strides = [1, 1]} : vector<16x36xf32> to vector<1x36xf32>
    %495 = tpu.concatenate %483, %484, %485, %486, %487, %488, %489, %490, %491, %492, %493, %494 in 1 : vector<1x36xf32>, vector<1x36xf32>, vector<1x36xf32>, vector<1x36xf32>, vector<1x36xf32>, vector<1x36xf32>, vector<1x36xf32>, vector<1x36xf32>, vector<1x36xf32>, vector<1x36xf32>, vector<1x36xf32>, vector<1x36xf32> -> vector<1x432xf32>
    %496 = vector.extract_strided_slice %467 {offsets = [32, 0], sizes = [16, 36], strides = [1, 1]} : vector<128x36xf32> to vector<16x36xf32>
    %497 = vector.extract_strided_slice %496 {offsets = [0, 0], sizes = [1, 36], strides = [1, 1]} : vector<16x36xf32> to vector<1x36xf32>
    %498 = vector.extract_strided_slice %496 {offsets = [1, 0], sizes = [1, 36], strides = [1, 1]} : vector<16x36xf32> to vector<1x36xf32>
    %499 = vector.extract_strided_slice %496 {offsets = [2, 0], sizes = [1, 36], strides = [1, 1]} : vector<16x36xf32> to vector<1x36xf32>
    %500 = vector.extract_strided_slice %496 {offsets = [3, 0], sizes = [1, 36], strides = [1, 1]} : vector<16x36xf32> to vector<1x36xf32>
    %501 = vector.extract_strided_slice %496 {offsets = [4, 0], sizes = [1, 36], strides = [1, 1]} : vector<16x36xf32> to vector<1x36xf32>
    %502 = vector.extract_strided_slice %496 {offsets = [5, 0], sizes = [1, 36], strides = [1, 1]} : vector<16x36xf32> to vector<1x36xf32>
    %503 = vector.extract_strided_slice %496 {offsets = [6, 0], sizes = [1, 36], strides = [1, 1]} : vector<16x36xf32> to vector<1x36xf32>
    %504 = vector.extract_strided_slice %496 {offsets = [7, 0], sizes = [1, 36], strides = [1, 1]} : vector<16x36xf32> to vector<1x36xf32>
    %505 = vector.extract_strided_slice %496 {offsets = [8, 0], sizes = [1, 36], strides = [1, 1]} : vector<16x36xf32> to vector<1x36xf32>
    %506 = vector.extract_strided_slice %496 {offsets = [9, 0], sizes = [1, 36], strides = [1, 1]} : vector<16x36xf32> to vector<1x36xf32>
    %507 = vector.extract_strided_slice %496 {offsets = [10, 0], sizes = [1, 36], strides = [1, 1]} : vector<16x36xf32> to vector<1x36xf32>
    %508 = vector.extract_strided_slice %496 {offsets = [11, 0], sizes = [1, 36], strides = [1, 1]} : vector<16x36xf32> to vector<1x36xf32>
    %509 = tpu.concatenate %497, %498, %499, %500, %501, %502, %503, %504, %505, %506, %507, %508 in 1 : vector<1x36xf32>, vector<1x36xf32>, vector<1x36xf32>, vector<1x36xf32>, vector<1x36xf32>, vector<1x36xf32>, vector<1x36xf32>, vector<1x36xf32>, vector<1x36xf32>, vector<1x36xf32>, vector<1x36xf32>, vector<1x36xf32> -> vector<1x432xf32>
    %510 = vector.extract_strided_slice %467 {offsets = [48, 0], sizes = [16, 36], strides = [1, 1]} : vector<128x36xf32> to vector<16x36xf32>
    %511 = vector.extract_strided_slice %510 {offsets = [0, 0], sizes = [1, 36], strides = [1, 1]} : vector<16x36xf32> to vector<1x36xf32>
    %512 = vector.extract_strided_slice %510 {offsets = [1, 0], sizes = [1, 36], strides = [1, 1]} : vector<16x36xf32> to vector<1x36xf32>
    %513 = vector.extract_strided_slice %510 {offsets = [2, 0], sizes = [1, 36], strides = [1, 1]} : vector<16x36xf32> to vector<1x36xf32>
    %514 = vector.extract_strided_slice %510 {offsets = [3, 0], sizes = [1, 36], strides = [1, 1]} : vector<16x36xf32> to vector<1x36xf32>
    %515 = vector.extract_strided_slice %510 {offsets = [4, 0], sizes = [1, 36], strides = [1, 1]} : vector<16x36xf32> to vector<1x36xf32>
    %516 = vector.extract_strided_slice %510 {offsets = [5, 0], sizes = [1, 36], strides = [1, 1]} : vector<16x36xf32> to vector<1x36xf32>
    %517 = vector.extract_strided_slice %510 {offsets = [6, 0], sizes = [1, 36], strides = [1, 1]} : vector<16x36xf32> to vector<1x36xf32>
    %518 = vector.extract_strided_slice %510 {offsets = [7, 0], sizes = [1, 36], strides = [1, 1]} : vector<16x36xf32> to vector<1x36xf32>
    %519 = vector.extract_strided_slice %510 {offsets = [8, 0], sizes = [1, 36], strides = [1, 1]} : vector<16x36xf32> to vector<1x36xf32>
    %520 = vector.extract_strided_slice %510 {offsets = [9, 0], sizes = [1, 36], strides = [1, 1]} : vector<16x36xf32> to vector<1x36xf32>
    %521 = vector.extract_strided_slice %510 {offsets = [10, 0], sizes = [1, 36], strides = [1, 1]} : vector<16x36xf32> to vector<1x36xf32>
    %522 = vector.extract_strided_slice %510 {offsets = [11, 0], sizes = [1, 36], strides = [1, 1]} : vector<16x36xf32> to vector<1x36xf32>
    %523 = tpu.concatenate %511, %512, %513, %514, %515, %516, %517, %518, %519, %520, %521, %522 in 1 : vector<1x36xf32>, vector<1x36xf32>, vector<1x36xf32>, vector<1x36xf32>, vector<1x36xf32>, vector<1x36xf32>, vector<1x36xf32>, vector<1x36xf32>, vector<1x36xf32>, vector<1x36xf32>, vector<1x36xf32>, vector<1x36xf32> -> vector<1x432xf32>
    %524 = vector.extract_strided_slice %467 {offsets = [64, 0], sizes = [16, 36], strides = [1, 1]} : vector<128x36xf32> to vector<16x36xf32>
    %525 = vector.extract_strided_slice %524 {offsets = [0, 0], sizes = [1, 36], strides = [1, 1]} : vector<16x36xf32> to vector<1x36xf32>
    %526 = vector.extract_strided_slice %524 {offsets = [1, 0], sizes = [1, 36], strides = [1, 1]} : vector<16x36xf32> to vector<1x36xf32>
    %527 = vector.extract_strided_slice %524 {offsets = [2, 0], sizes = [1, 36], strides = [1, 1]} : vector<16x36xf32> to vector<1x36xf32>
    %528 = vector.extract_strided_slice %524 {offsets = [3, 0], sizes = [1, 36], strides = [1, 1]} : vector<16x36xf32> to vector<1x36xf32>
    %529 = vector.extract_strided_slice %524 {offsets = [4, 0], sizes = [1, 36], strides = [1, 1]} : vector<16x36xf32> to vector<1x36xf32>
    %530 = vector.extract_strided_slice %524 {offsets = [5, 0], sizes = [1, 36], strides = [1, 1]} : vector<16x36xf32> to vector<1x36xf32>
    %531 = vector.extract_strided_slice %524 {offsets = [6, 0], sizes = [1, 36], strides = [1, 1]} : vector<16x36xf32> to vector<1x36xf32>
    %532 = vector.extract_strided_slice %524 {offsets = [7, 0], sizes = [1, 36], strides = [1, 1]} : vector<16x36xf32> to vector<1x36xf32>
    %533 = vector.extract_strided_slice %524 {offsets = [8, 0], sizes = [1, 36], strides = [1, 1]} : vector<16x36xf32> to vector<1x36xf32>
    %534 = vector.extract_strided_slice %524 {offsets = [9, 0], sizes = [1, 36], strides = [1, 1]} : vector<16x36xf32> to vector<1x36xf32>
    %535 = vector.extract_strided_slice %524 {offsets = [10, 0], sizes = [1, 36], strides = [1, 1]} : vector<16x36xf32> to vector<1x36xf32>
    %536 = vector.extract_strided_slice %524 {offsets = [11, 0], sizes = [1, 36], strides = [1, 1]} : vector<16x36xf32> to vector<1x36xf32>
    %537 = tpu.concatenate %525, %526, %527, %528, %529, %530, %531, %532, %533, %534, %535, %536 in 1 : vector<1x36xf32>, vector<1x36xf32>, vector<1x36xf32>, vector<1x36xf32>, vector<1x36xf32>, vector<1x36xf32>, vector<1x36xf32>, vector<1x36xf32>, vector<1x36xf32>, vector<1x36xf32>, vector<1x36xf32>, vector<1x36xf32> -> vector<1x432xf32>
    %538 = vector.extract_strided_slice %467 {offsets = [80, 0], sizes = [16, 36], strides = [1, 1]} : vector<128x36xf32> to vector<16x36xf32>
    %539 = vector.extract_strided_slice %538 {offsets = [0, 0], sizes = [1, 36], strides = [1, 1]} : vector<16x36xf32> to vector<1x36xf32>
    %540 = vector.extract_strided_slice %538 {offsets = [1, 0], sizes = [1, 36], strides = [1, 1]} : vector<16x36xf32> to vector<1x36xf32>
    %541 = vector.extract_strided_slice %538 {offsets = [2, 0], sizes = [1, 36], strides = [1, 1]} : vector<16x36xf32> to vector<1x36xf32>
    %542 = vector.extract_strided_slice %538 {offsets = [3, 0], sizes = [1, 36], strides = [1, 1]} : vector<16x36xf32> to vector<1x36xf32>
    %543 = vector.extract_strided_slice %538 {offsets = [4, 0], sizes = [1, 36], strides = [1, 1]} : vector<16x36xf32> to vector<1x36xf32>
    %544 = vector.extract_strided_slice %538 {offsets = [5, 0], sizes = [1, 36], strides = [1, 1]} : vector<16x36xf32> to vector<1x36xf32>
    %545 = vector.extract_strided_slice %538 {offsets = [6, 0], sizes = [1, 36], strides = [1, 1]} : vector<16x36xf32> to vector<1x36xf32>
    %546 = vector.extract_strided_slice %538 {offsets = [7, 0], sizes = [1, 36], strides = [1, 1]} : vector<16x36xf32> to vector<1x36xf32>
    %547 = vector.extract_strided_slice %538 {offsets = [8, 0], sizes = [1, 36], strides = [1, 1]} : vector<16x36xf32> to vector<1x36xf32>
    %548 = vector.extract_strided_slice %538 {offsets = [9, 0], sizes = [1, 36], strides = [1, 1]} : vector<16x36xf32> to vector<1x36xf32>
    %549 = vector.extract_strided_slice %538 {offsets = [10, 0], sizes = [1, 36], strides = [1, 1]} : vector<16x36xf32> to vector<1x36xf32>
    %550 = vector.extract_strided_slice %538 {offsets = [11, 0], sizes = [1, 36], strides = [1, 1]} : vector<16x36xf32> to vector<1x36xf32>
    %551 = tpu.concatenate %539, %540, %541, %542, %543, %544, %545, %546, %547, %548, %549, %550 in 1 : vector<1x36xf32>, vector<1x36xf32>, vector<1x36xf32>, vector<1x36xf32>, vector<1x36xf32>, vector<1x36xf32>, vector<1x36xf32>, vector<1x36xf32>, vector<1x36xf32>, vector<1x36xf32>, vector<1x36xf32>, vector<1x36xf32> -> vector<1x432xf32>
    %552 = vector.extract_strided_slice %467 {offsets = [96, 0], sizes = [16, 36], strides = [1, 1]} : vector<128x36xf32> to vector<16x36xf32>
    %553 = vector.extract_strided_slice %552 {offsets = [0, 0], sizes = [1, 36], strides = [1, 1]} : vector<16x36xf32> to vector<1x36xf32>
    %554 = vector.extract_strided_slice %552 {offsets = [1, 0], sizes = [1, 36], strides = [1, 1]} : vector<16x36xf32> to vector<1x36xf32>
    %555 = vector.extract_strided_slice %552 {offsets = [2, 0], sizes = [1, 36], strides = [1, 1]} : vector<16x36xf32> to vector<1x36xf32>
    %556 = vector.extract_strided_slice %552 {offsets = [3, 0], sizes = [1, 36], strides = [1, 1]} : vector<16x36xf32> to vector<1x36xf32>
    %557 = vector.extract_strided_slice %552 {offsets = [4, 0], sizes = [1, 36], strides = [1, 1]} : vector<16x36xf32> to vector<1x36xf32>
    %558 = vector.extract_strided_slice %552 {offsets = [5, 0], sizes = [1, 36], strides = [1, 1]} : vector<16x36xf32> to vector<1x36xf32>
    %559 = vector.extract_strided_slice %552 {offsets = [6, 0], sizes = [1, 36], strides = [1, 1]} : vector<16x36xf32> to vector<1x36xf32>
    %560 = vector.extract_strided_slice %552 {offsets = [7, 0], sizes = [1, 36], strides = [1, 1]} : vector<16x36xf32> to vector<1x36xf32>
    %561 = vector.extract_strided_slice %552 {offsets = [8, 0], sizes = [1, 36], strides = [1, 1]} : vector<16x36xf32> to vector<1x36xf32>
    %562 = vector.extract_strided_slice %552 {offsets = [9, 0], sizes = [1, 36], strides = [1, 1]} : vector<16x36xf32> to vector<1x36xf32>
    %563 = vector.extract_strided_slice %552 {offsets = [10, 0], sizes = [1, 36], strides = [1, 1]} : vector<16x36xf32> to vector<1x36xf32>
    %564 = vector.extract_strided_slice %552 {offsets = [11, 0], sizes = [1, 36], strides = [1, 1]} : vector<16x36xf32> to vector<1x36xf32>
    %565 = tpu.concatenate %553, %554, %555, %556, %557, %558, %559, %560, %561, %562, %563, %564 in 1 : vector<1x36xf32>, vector<1x36xf32>, vector<1x36xf32>, vector<1x36xf32>, vector<1x36xf32>, vector<1x36xf32>, vector<1x36xf32>, vector<1x36xf32>, vector<1x36xf32>, vector<1x36xf32>, vector<1x36xf32>, vector<1x36xf32> -> vector<1x432xf32>
    %566 = vector.extract_strided_slice %467 {offsets = [112, 0], sizes = [16, 36], strides = [1, 1]} : vector<128x36xf32> to vector<16x36xf32>
    %567 = vector.extract_strided_slice %566 {offsets = [0, 0], sizes = [1, 36], strides = [1, 1]} : vector<16x36xf32> to vector<1x36xf32>
    %568 = vector.extract_strided_slice %566 {offsets = [1, 0], sizes = [1, 36], strides = [1, 1]} : vector<16x36xf32> to vector<1x36xf32>
    %569 = vector.extract_strided_slice %566 {offsets = [2, 0], sizes = [1, 36], strides = [1, 1]} : vector<16x36xf32> to vector<1x36xf32>
    %570 = vector.extract_strided_slice %566 {offsets = [3, 0], sizes = [1, 36], strides = [1, 1]} : vector<16x36xf32> to vector<1x36xf32>
    %571 = vector.extract_strided_slice %566 {offsets = [4, 0], sizes = [1, 36], strides = [1, 1]} : vector<16x36xf32> to vector<1x36xf32>
    %572 = vector.extract_strided_slice %566 {offsets = [5, 0], sizes = [1, 36], strides = [1, 1]} : vector<16x36xf32> to vector<1x36xf32>
    %573 = vector.extract_strided_slice %566 {offsets = [6, 0], sizes = [1, 36], strides = [1, 1]} : vector<16x36xf32> to vector<1x36xf32>
    %574 = vector.extract_strided_slice %566 {offsets = [7, 0], sizes = [1, 36], strides = [1, 1]} : vector<16x36xf32> to vector<1x36xf32>
    %575 = vector.extract_strided_slice %566 {offsets = [8, 0], sizes = [1, 36], strides = [1, 1]} : vector<16x36xf32> to vector<1x36xf32>
    %576 = vector.extract_strided_slice %566 {offsets = [9, 0], sizes = [1, 36], strides = [1, 1]} : vector<16x36xf32> to vector<1x36xf32>
    %577 = vector.extract_strided_slice %566 {offsets = [10, 0], sizes = [1, 36], strides = [1, 1]} : vector<16x36xf32> to vector<1x36xf32>
    %578 = vector.extract_strided_slice %566 {offsets = [11, 0], sizes = [1, 36], strides = [1, 1]} : vector<16x36xf32> to vector<1x36xf32>
    %579 = tpu.concatenate %567, %568, %569, %570, %571, %572, %573, %574, %575, %576, %577, %578 in 1 : vector<1x36xf32>, vector<1x36xf32>, vector<1x36xf32>, vector<1x36xf32>, vector<1x36xf32>, vector<1x36xf32>, vector<1x36xf32>, vector<1x36xf32>, vector<1x36xf32>, vector<1x36xf32>, vector<1x36xf32>, vector<1x36xf32> -> vector<1x432xf32>
    %580 = tpu.concatenate %481, %495, %509, %523, %537, %551, %565, %579 in 0 : vector<1x432xf32>, vector<1x432xf32>, vector<1x432xf32>, vector<1x432xf32>, vector<1x432xf32>, vector<1x432xf32>, vector<1x432xf32>, vector<1x432xf32> -> vector<8x432xf32>
    %c0_281 = arith.constant 0 : index
    %c0_282 = arith.constant 0 : index
    %581 = vector.load %arg7[%c0_281, %c0_282] : memref<432x216xf32, #tpu.memory_space<vmem>>, vector<432x216xf32>
    %cst_283 = arith.constant dense<0.000000e+00> : vector<8x216xf32>
    %582 = tpu.matmul %580, %581, %cst_283 {dimension_numbers = #tpu.dot_dimension_numbers<[1], [0], [0], [1], [0, 0, 1, 1], [], []>} : vector<8x432xf32>, vector<432x216xf32>, vector<8x216xf32> -> vector<8x216xf32>
    %c0_284 = arith.constant 0 : index
    %c0_285 = arith.constant 0 : index
    %583 = vector.load %arg8[%c0_284, %c0_285] : memref<1x216xf32, #tpu.memory_space<vmem>>, vector<1x216xf32>
    %584 = vector.broadcast %583 : vector<1x216xf32> to vector<8x216xf32>
    %585 = arith.addf %582, %584 : vector<8x216xf32>
    %cst_286 = arith.constant 0.000000e+00 : f32
    %586 = vector.broadcast %cst_286 : f32 to vector<8x216xf32>
    %587 = arith.maximumf %585, %586 : vector<8x216xf32>
    %c0_287 = arith.constant 0 : index
    %c0_288 = arith.constant 0 : index
    %588 = vector.load %arg9[%c0_287, %c0_288] : memref<216x12xf32, #tpu.memory_space<vmem>>, vector<216x12xf32>
    %cst_289 = arith.constant dense<0.000000e+00> : vector<8x12xf32>
    %589 = tpu.matmul %587, %588, %cst_289 {dimension_numbers = #tpu.dot_dimension_numbers<[1], [0], [0], [1], [0, 0, 1, 1], [], []>} : vector<8x216xf32>, vector<216x12xf32>, vector<8x12xf32> -> vector<8x12xf32>
    %c0_290 = arith.constant 0 : index
    %c0_291 = arith.constant 0 : index
    %590 = vector.load %arg10[%c0_290, %c0_291] : memref<1x12xf32, #tpu.memory_space<vmem>>, vector<1x12xf32>
    %591 = vector.broadcast %590 : vector<1x12xf32> to vector<8x12xf32>
    %592 = arith.addf %589, %591 : vector<8x12xf32>
    %c0_292 = arith.constant 0 : index
    %c0_293 = arith.constant 0 : index
    %593 = vector.load %arg11[%c0_292, %c0_293] : memref<8x12xf32, #tpu.memory_space<vmem>>, vector<8x12xf32>
    tpu.vector_store %arg11[%c0_292, %c0_293], %592 {strides = array<i32>} : memref<8x12xf32, #tpu.memory_space<vmem>>, vector<8x12xf32>,
    return
  }
  func.func @transform_0(%arg0: i32) -> (i32, i32, i32) {
    %c0_i32 = arith.constant 0 : i32
    %c0_i32_0 = arith.constant 0 : i32
    %c0_i32_1 = arith.constant 0 : i32
    return %arg0, %c0_i32, %c0_i32_0 : i32, i32, i32
  }
  func.func @transform_1(%arg0: i32) -> (i32, i32, i32) {
    %c0_i32 = arith.constant 0 : i32
    %c0_i32_0 = arith.constant 0 : i32
    %c0_i32_1 = arith.constant 0 : i32
    %c0_i32_2 = arith.constant 0 : i32
    return %c0_i32, %c0_i32_0, %c0_i32_1 : i32, i32, i32
  }
  func.func @transform_2(%arg0: i32) -> (i32, i32) {
    %c0_i32 = arith.constant 0 : i32
    %c0_i32_0 = arith.constant 0 : i32
    %c0_i32_1 = arith.constant 0 : i32
    return %c0_i32, %c0_i32_0 : i32, i32
  }
  func.func @transform_3(%arg0: i32) -> (i32, i32) {
    %c0_i32 = arith.constant 0 : i32
    %c0_i32_0 = arith.constant 0 : i32
    %c0_i32_1 = arith.constant 0 : i32
    return %c0_i32, %c0_i32_0 : i32, i32
  }
  func.func @transform_4(%arg0: i32) -> (i32, i32) {
    %c0_i32 = arith.constant 0 : i32
    %c0_i32_0 = arith.constant 0 : i32
    %c0_i32_1 = arith.constant 0 : i32
    return %c0_i32, %c0_i32_0 : i32, i32
  }
  func.func @transform_5(%arg0: i32) -> (i32, i32) {
    %c0_i32 = arith.constant 0 : i32
    %c0_i32_0 = arith.constant 0 : i32
    %c0_i32_1 = arith.constant 0 : i32
    return %c0_i32, %c0_i32_0 : i32, i32
  }
  func.func @transform_6(%arg0: i32) -> (i32, i32) {
    %c0_i32 = arith.constant 0 : i32
    %c0_i32_0 = arith.constant 0 : i32
    %c0_i32_1 = arith.constant 0 : i32
    return %c0_i32, %c0_i32_0 : i32, i32
  }
  func.func @transform_7(%arg0: i32) -> (i32, i32) {
    %c0_i32 = arith.constant 0 : i32
    %c0_i32_0 = arith.constant 0 : i32
    %c0_i32_1 = arith.constant 0 : i32
    return %c0_i32, %c0_i32_0 : i32, i32
  }
  func.func @transform_8(%arg0: i32) -> (i32, i32) {
    %c0_i32 = arith.constant 0 : i32
    %c0_i32_0 = arith.constant 0 : i32
    %c0_i32_1 = arith.constant 0 : i32
    return %c0_i32, %c0_i32_0 : i32, i32
  }
  func.func @transform_9(%arg0: i32) -> (i32, i32) {
    %c0_i32 = arith.constant 0 : i32
    %c0_i32_0 = arith.constant 0 : i32
    %c0_i32_1 = arith.constant 0 : i32
    return %c0_i32, %c0_i32_0 : i32, i32
  }
  func.func @transform_10(%arg0: i32) -> (i32, i32) {
    %c0_i32 = arith.constant 0 : i32
    %c0_i32_0 = arith.constant 0 : i32
    return %arg0, %c0_i32 : i32, i32
  }
}

</mosaic_0001>

<bundles_post_ra>
// kernel: forward.1
= control target key start
LH: loop header
LB: loop body
LE: loop exit
PB: predicated region body
PF: predicated region fallthrough
CT: control target
= control target key end

     0   :  { %s15794_s0 = inlined_call_operand.vmem [shape: bf16[16,128,288], index: 0, kind: input, shape index: {}]   ;;  %s15795_s1 = inlined_call_operand.vmem [shape: bf16[4,32,128], index: 1, kind: input, shape index: {}]   ;;  %s15796_s2 = inlined_call_operand.vmem [shape: f32[8,1], index: 2, kind: input, shape index: {}]   ;;  %s15797_s3 = inlined_call_operand.vmem [shape: f32[16,128], index: 3, kind: input, shape index: {}]   ;;  %s15798_s4 = inlined_call_operand.vmem [shape: f32[16,1], index: 4, kind: input, shape index: {}]   ;;  %s15799_s5 = inlined_call_operand.vmem [shape: f32[171,36], index: 5, kind: input, shape index: {}]   ;;  %s15800_s6 = inlined_call_operand.vmem [shape: f32[432,216], index: 6, kind: input, shape index: {}]   ;;  %s15801_s7 = inlined_call_operand.vmem [shape: f32[1,216], index: 7, kind: input, shape index: {}]   ;;  %s15802_s8 = inlined_call_operand.vmem [shape: f32[216,12], index: 8, kind: input, shape index: {}]   ;;  %s15803_s9 = inlined_call_operand.vmem [shape: f32[1,12], index: 9, kind: input, shape index: {}]   ;;  %s15804_s10 = inlined_call_operand.hbm [shape: f32[16,12], index: 10, kind: output, shape index: {}]  }
   0x1   :  { %15849 = sst [smem:[#allocation30_spill]] %s15794_s0 }
   0x2   :  { %15850 = sst [smem:[#allocation31_spill]] %s15796_s2 }
   0x3   :  { %15851 = sst [smem:[#allocation32_spill]] %s15804_s10 }
   0x4   :  { %15 = vsyncpa [#allocation3], 0 }
   0x5   :  { %17 = vsyncpa [#allocation3 + $0x1], 0  ;;  %s11074_s13 = smov 0   ;;  %s11076_s14 = smov 0  }
   0x6   :  { %s11078_s15 = smov 0   ;;  %s11080_s16 = smov 0  }
   0x7 LB: > { %15852 = sst [smem:[#allocation5_spill]] %s10974_s13  ;;  %s11095_s17 = sadd.s32 4294967295, %s10986_s16   ;;  %s10986_s16 = sphi %s11080_s16, %s15924_s16   ;;  %s10982_s15 = sphi %s11078_s15, %s15926_s15   ;;  %s10978_s14 = sphi %s11076_s14, %s15928_s14   ;;  %s10974_s13 = sphi %s11074_s13, %s15927_s13  }
   0x8   : > { %15853 = sst [smem:[#allocation6_spill]] %s10982_s15  ;;  %s8618_s18 = sadd.s32 4294967294, %s10986_s16  }
   0x9   : > { %15854 = sst [smem:[#allocation7_spill]] %s10986_s16  ;;  %s11099_s19 = sadd.s32 1, %s10986_s16  }
   0xa   : > { %15855 = sst [smem:[#allocation8_spill]] %s11099_s19  ;;  %s245_s20 = sadd.s32 1, %s10982_s15 }
   0xb   : > { %s242_s21 = ssub.s32 %s10986_s16, %s11099_s19  ;;  %p255_p0 = scmp.ne.s32.totalorder %s10982_s15, %s10978_s14 }
   0xc   : > { %p243_p1 = scmp.eq.s32.totalorder %s242_s21, 0  ;;  %p256_p2 = scmp.eq.s32.totalorder %s11095_s17, 1 }
   0xd   : > { %p261_p3 = scmp.ne.s32.totalorder %s10978_s14, %s10974_s13  ;;  %p262_p4 = scmp.eq.s32.totalorder %s8618_s18, 1 }
   0xe   : > { %s11110_s22 = scalar_select %p243_p1, %s10982_s15, %s245_s20  }
   0xf   : > { %p11112_p5 = por %p256_p2, %p255_p0  ;;  %p11116_p6 = por %p262_p4, %p261_p3 }
  0x10   : > { %15856 = sst [smem:[#allocation9_spill]] %s11110_s22  ;;  %p8621_p7 = scmp.ge.s32.totalorder %s10986_s16, 1 }
  0x11   : > { %s15858_s24 = scalar_select %p11116_p6, 1, 0 }
  0x12   : > { %p317_p8 = scmp.lt.s32.totalorder %s10986_s16, 3 }
  0x13   : > { %15859 = sst [smem:[#allocation10_spill]] %s15858_s24 }
  0x14   : > { %p318_p9 = pnand %p8621_p7, %p317_p8 }
  0x16   : > { %321 = sbr.rel (%p318_p9) target bundleno = 5566 (0x15be), region = 60 }
  0x1d   : > { %s8623_s25 = sshll.u32 %s11095_s17, 3  ;;  %s15860_s0 = sld [smem:[#allocation30_spill]]  ;;  %v15839_v22 = vmov 0   ;;  %vm569_vm0 = vcmask 1039360   ;;  %vm801_vm1 = vcmask 916480   ;;  %vm960_vm2 = vcmask 908288  }
  0x1e   : > { %p357_p10 = scmp.lt.s32.totalorder %s8623_s25, 15  ;;  %s15823_s30 = smov 127   ;;  %634 = vmatprep.mubr.bf16.mxu0 %v15839_v22  ;;  %9788 = vset.pattern.permute.xlu0 %v15839_v22  ;;  %vm1084_vm3 = vcmask 1031168   ;;  %vm1092_vm4 = vcmask 1022976   ;;  %vm1116_vm5 = vcmask 900096   ;;  %vm1124_vm6 = vcmask 891904  }
  0x1f   : > { %10389 = vset.pattern.permute.xlu1 %v15839_v22  ;;  %s15825_s11 = smov 112   ;;  %s15833_s12 = smov 111   ;;  %vm1140_vm7 = vcmask 777216   ;;  %vm1132_vm8 = vcmask 785408   ;;  %vm1148_vm9 = vcmask 769024   ;;  %vm1156_vm10 = vcmask 760832  }
  0x20   : > { %s15930_s25 = smov (!%p357_p10, %s8623_s25), 15  ;;  %s15861_s2 = sld [smem:[#allocation31_spill]]  ;;  %vm1172_vm11 = vcmask 646144   ;;  %vm1164_vm12 = vcmask 654336   ;;  %vm1180_vm13 = vcmask 637952   ;;  %vm1188_vm14 = vcmask 629760  }
  0x21   : > { %s9718_s26 = smul.u32 192, %s15930_s25  ;;  %s15809_s27 = smov 126   ;;  %vm7443_vm15 = vcmask 1042432  }
  0x22   : > { %s15807_s28 = smov 109   ;;  %s15811_s18 = smov 95  }
  0x23   : > { %s11126_s29 = scalar_lea.vmem %s15860_s0, %s9718_s26  ;;  %s15805_s26 = smov 125  }
  0x24   : > { %v11129_v0 = vld [vmem:[%s11126_s29 + $0x4] ss:$12 sps:$4 sm:$0xff]   ;;  %v11132_v1 = vld [vmem:[%s11126_s29] ss:$12 sps:$4 sm:$0xff]   ;;  %v11137_v2 = vld [vmem:[%s11126_s29 + $0x8] ss:$12 sps:$4 sm:$0xff]  }
  0x25   : > { %523 = vrot.lane.b32.xlu0 %v11129_v0, %s15823_s30  ;;  %521 = vrot.lane.b32.xlu1 %v11132_v1, %s15823_s30  ;;  %v11142_v3 = vld [vmem:[%s11126_s29 + $0x1c] ss:$12 sps:$4 sm:$0xff]   ;;  %v11147_v4 = vld [vmem:[%s11126_s29 + $0x20] ss:$12 sps:$4 sm:$0xff]   ;;  %s15827_s20 = smov 110   ;;  %s15819_s21 = smov 93  }
  0x26   : > { %v11152_v5 = vld [vmem:[%s11126_s29 + $0x18] ss:$12 sps:$4 sm:$0xff]   ;;  %v11157_v6 = vld [vmem:[%s11126_s29 + $0x34] ss:$12 sps:$4 sm:$0xff]   ;;  %v11167_v8 = vld [vmem:[%s11126_s29 + $0x30] ss:$12 sps:$4 sm:$0xff]  }
  0x27   : > { %v11162_v7 = vld [vmem:[%s11126_s29 + $0x38] ss:$12 sps:$4 sm:$0xff]   ;;  %v11177_v10 = vld [vmem:[%s11126_s29 + $0x50] ss:$12 sps:$4 sm:$0xff]   ;;  %v11180_v11 = vld [vmem:[%s11126_s29 + $0x48] ss:$12 sps:$4 sm:$0xff]  }
  0x28   : > { %v11172_v9 = vld [vmem:[%s11126_s29 + $0x4c] ss:$12 sps:$4 sm:$0xff]   ;;  %v11185_v12 = vld [vmem:[%s11126_s29 + $0x64] ss:$12 sps:$4 sm:$0xff]   ;;  %v11188_v13 = vld [vmem:[%s11126_s29 + $0x68] ss:$12 sps:$4 sm:$0xff]  }
  0x29   : > { %525 = vrot.lane.b32.xlu0 %v11137_v2, %s15823_s30  ;;  %529 = vrot.lane.b32.xlu1 %v11142_v3, %s15823_s30  ;;  %v11195_v14 = vld [vmem:[%s11126_s29 + $0x60] ss:$12 sps:$4 sm:$0xff]   ;;  %v11198_v15 = vld [vmem:[%s11126_s29 + $0x7c] ss:$12 sps:$4 sm:$0xff]   ;;  %s15829_s25 = smov 96   ;;  %s15869_s0 = smov 78  }
  0x2a   : > { %v11205_v16 = vld [vmem:[%s11126_s29 + $0x80] ss:$12 sps:$4 sm:$0xff]   ;;  %v11208_v17 = vld [vmem:[%s11126_s29 + $0x78] ss:$12 sps:$4 sm:$0xff]   ;;  %v11225_v20 = vld [vmem:[%s11126_s29 + $0x90] ss:$12 sps:$4 sm:$0xff]  }
  0x2b   : > { %v11215_v18 = vld [vmem:[%s11126_s29 + $0x94] ss:$12 sps:$4 sm:$0xff]   ;;  %v11218_v19 = vld [vmem:[%s11126_s29 + $0x98] ss:$12 sps:$4 sm:$0xff]   ;;  %v11237_v23 = vld [vmem:[%s11126_s29 + $0xb0] ss:$12 sps:$4 sm:$0xff]  }
  0x2c   : > { %v11228_v21 = vld [vmem:[%s11126_s29 + $0xac] ss:$12 sps:$4 sm:$0xff]   ;;  %v11241_v24 = vld [vmem:[%s11126_s29 + $0xa8] ss:$12 sps:$4 sm:$0xff]   ;;  %v1060_v48 = vld [vmem:[%s15861_s2] sm:$0xff]  ;;  %s15874_s2 = smov 111  }
  0x2d   : > { %531 = vrot.lane.b32.xlu0 %v11147_v4, %s15823_s30  ;;  %527 = vrot.lane.b32.xlu1 %v11152_v5, %s15823_s30  ;;  %s15877_s24 = smov 110   ;;  %s15878_s15 = smov 96  }
  0x2e   : > { %s15879_s19 = smov 94   ;;  %s11010_s22 = smov 88  }
  0x2f   : > { %s11012_s10 = smov 72   ;;  %s11013_s13 = smov 124  }
  0x31   : > { %535 = vrot.lane.b32.xlu0 %v11157_v6, %s15823_s30  ;;  %537 = vrot.lane.b32.xlu1 %v11162_v7, %s15823_s30 }
  0x35   : > { %533 = vrot.lane.b32.xlu0 %v11167_v8, %s15823_s30  ;;  %541 = vrot.lane.b32.xlu1 %v11172_v9, %s15823_s30 }
  0x39   : > { %543 = vrot.lane.b32.xlu0 %v11177_v10, %s15823_s30  ;;  %539 = vrot.lane.b32.xlu1 %v11180_v11, %s15823_s30 }
  0x3d   : > { %547 = vrot.lane.b32.xlu0 %v11185_v12, %s15823_s30  ;;  %549 = vrot.lane.b32.xlu1 %v11188_v13, %s15823_s30 }
  0x41   : > { %545 = vrot.lane.b32.xlu0 %v11195_v14, %s15823_s30  ;;  %553 = vrot.lane.b32.xlu1 %v11198_v15, %s15823_s30 }
  0x45   : > { %555 = vrot.lane.b32.xlu0 %v11205_v16, %s15823_s30  ;;  %551 = vrot.lane.b32.xlu1 %v11208_v17, %s15823_s30 }
  0x49   : > { %559 = vrot.lane.b32.xlu0 %v11215_v18, %s15823_s30  ;;  %561 = vrot.lane.b32.xlu1 %v11218_v19, %s15823_s30 }
  0x4d   : > { %557 = vrot.lane.b32.xlu0 %v11225_v20, %s15823_s30  ;;  %565 = vrot.lane.b32.xlu1 %v11228_v21, %s15823_s30 }
  0x51   : > { %567 = vrot.lane.b32.xlu0 %v11237_v23, %s15823_s30  ;;  %563 = vrot.lane.b32.xlu1 %v11241_v24, %s15823_s30 }
  0x55   : > { %755 = vrot.lane.b32.xlu0 %v11129_v0, %s15825_s11  ;;  %757 = vrot.lane.b32.xlu1 %v11137_v2, %s15825_s11 }
  0x59   : > { %753 = vrot.lane.b32.xlu0 %v11132_v1, %s15825_s11  ;;  %761 = vrot.lane.b32.xlu1 %v11142_v3, %s15825_s11 }
  0x5d   : > { %763 = vrot.lane.b32.xlu0 %v11147_v4, %s15825_s11  ;;  %759 = vrot.lane.b32.xlu1 %v11152_v5, %s15825_s11 }
  0x61   : > { %767 = vrot.lane.b32.xlu0 %v11157_v6, %s15825_s11  ;;  %769 = vrot.lane.b32.xlu1 %v11162_v7, %s15825_s11 }
  0x65   : > { %765 = vrot.lane.b32.xlu0 %v11167_v8, %s15825_s11  ;;  %773 = vrot.lane.b32.xlu1 %v11172_v9, %s15825_s11 }
  0x69   : > { %775 = vrot.lane.b32.xlu0 %v11177_v10, %s15825_s11  ;;  %771 = vrot.lane.b32.xlu1 %v11180_v11, %s15825_s11 }
  0x6d   : > { %779 = vrot.lane.b32.xlu0 %v11185_v12, %s15825_s11  ;;  %781 = vrot.lane.b32.xlu1 %v11188_v13, %s15825_s11 }
  0x71   : > { %777 = vrot.lane.b32.xlu0 %v11195_v14, %s15825_s11  ;;  %785 = vrot.lane.b32.xlu1 %v11198_v15, %s15825_s11 }
  0x75   : > { %787 = vrot.lane.b32.xlu0 %v11205_v16, %s15825_s11  ;;  %783 = vrot.lane.b32.xlu1 %v11208_v17, %s15825_s11 }
  0x79   : > { %791 = vrot.lane.b32.xlu0 %v11215_v18, %s15825_s11  ;;  %793 = vrot.lane.b32.xlu1 %v11218_v19, %s15825_s11 }
  0x7d   : > { %789 = vrot.lane.b32.xlu0 %v11225_v20, %s15825_s11  ;;  %797 = vrot.lane.b32.xlu1 %v11228_v21, %s15825_s11 }
  0x81   : > { %799 = vrot.lane.b32.xlu0 %v11237_v23, %s15825_s11  ;;  %795 = vrot.lane.b32.xlu1 %v11241_v24, %s15825_s11 }
  0x85   : > { %914 = vrot.lane.b32.xlu0 %v11129_v0, %s15833_s12  ;;  %916 = vrot.lane.b32.xlu1 %v11137_v2, %s15833_s12 }
  0x89   : > { %912 = vrot.lane.b32.xlu0 %v11132_v1, %s15833_s12  ;;  %920 = vrot.lane.b32.xlu1 %v11142_v3, %s15833_s12 }
  0x8d   : > { %922 = vrot.lane.b32.xlu0 %v11147_v4, %s15833_s12  ;;  %918 = vrot.lane.b32.xlu1 %v11152_v5, %s15833_s12 }
  0x91   : > { %926 = vrot.lane.b32.xlu0 %v11157_v6, %s15833_s12  ;;  %928 = vrot.lane.b32.xlu1 %v11162_v7, %s15833_s12  ;;  %v11369_v7 = vld [vmem:[%s15795_s1 + $0x10] sm:$0xff]  }
  0x95   : > { %924 = vrot.lane.b32.xlu0 %v11167_v8, %s15833_s12  ;;  %932 = vrot.lane.b32.xlu1 %v11172_v9, %s15833_s12 }
  0x97   : > { %v524_v25 = vpop.permute.xlu0 %523  ;;  %v522_v26 = vpop.permute.xlu1 %521 }
  0x98   : > { %v570_v30 = vsel %vm569_vm0, %v522_v26, %v524_v25 }
  0x99   : > { %934 = vrot.lane.b32.xlu0 %v11177_v10, %s15833_s12  ;;  %930 = vrot.lane.b32.xlu1 %v11180_v11, %s15833_s12 }
  0x9b   : > { %v526_v27 = vpop.permute.xlu0 %525  ;;  %v530_v28 = vpop.permute.xlu1 %529 }
  0x9c   : > { %v571_v29 = vsel %vm569_vm0, %v524_v25, %v526_v27 }
  0x9d   : > { %602 = vmatprep.subr.bf16.mxu0 %v571_v29  ;;  %938 = vrot.lane.b32.xlu0 %v11185_v12, %s15833_s12 }
  0x9e   : > { %940 = vrot.lane.b32.xlu1 %v11188_v13, %s15833_s12  ;;  %603 = vmatpush1.bf16.msra.mxu0 %v570_v30 }
  0x9f   : > { %v532_v31 = vpop.permute.xlu0 %531  ;;  %v528_v32 = vpop.permute.xlu1 %527 }
  0xa0   : > { %v573_v33 = vsel %vm569_vm0, %v530_v28, %v532_v31  ;;  %v572_v34 = vsel %vm569_vm0, %v528_v32, %v530_v28 }
  0xa1   : > { %936 = vrot.lane.b32.xlu0 %v11195_v14, %s15833_s12  ;;  %604 = vmatprep.subr.bf16.mxu0 %v573_v33 }
  0xa2   : > { %944 = vrot.lane.b32.xlu1 %v11198_v15, %s15833_s12  ;;  %605 = vmatpush1.bf16.msra.mxu0 %v572_v34 }
  0xa3   : > { %v536_v35 = vpop.permute.xlu0 %535  ;;  %v538_v36 = vpop.permute.xlu1 %537 }
  0xa4   : > { %v575_v37 = vsel %vm569_vm0, %v536_v35, %v538_v36 }
  0xa5   : > { %946 = vrot.lane.b32.xlu0 %v11205_v16, %s15833_s12  ;;  %606 = vmatprep.subr.bf16.mxu0 %v575_v37 }
  0xa6   : > { %942 = vrot.lane.b32.xlu1 %v11208_v17, %s15833_s12 }
  0xa7   : > { %v534_v38 = vpop.permute.xlu0 %533  ;;  %v542_v39 = vpop.permute.xlu1 %541 }
  0xa8   : > { %v574_v40 = vsel %vm569_vm0, %v534_v38, %v536_v35 }
  0xa9   : > { %950 = vrot.lane.b32.xlu0 %v11215_v18, %s15833_s12  ;;  %607 = vmatpush1.bf16.msra.mxu0 %v574_v40 }
  0xaa   : > { %952 = vrot.lane.b32.xlu1 %v11218_v19, %s15833_s12 }
  0xab   : > { %v544_v41 = vpop.permute.xlu0 %543  ;;  %v540_v42 = vpop.permute.xlu1 %539 }
  0xac   : > { %v577_v43 = vsel %vm569_vm0, %v542_v39, %v544_v41  ;;  %v576_v44 = vsel %vm569_vm0, %v540_v42, %v542_v39 }
  0xad   : > { %948 = vrot.lane.b32.xlu0 %v11225_v20, %s15833_s12  ;;  %608 = vmatprep.subr.bf16.mxu0 %v577_v43 }
  0xae   : > { %956 = vrot.lane.b32.xlu1 %v11228_v21, %s15833_s12  ;;  %609 = vmatpush1.bf16.msra.mxu0 %v576_v44 }
  0xaf   : > { %v548_v45 = vpop.permute.xlu0 %547  ;;  %v550_v46 = vpop.permute.xlu1 %549 }
  0xb0   : > { %v579_v47 = vsel %vm569_vm0, %v548_v45, %v550_v46 }
  0xb1   : > { %958 = vrot.lane.b32.xlu0 %v11237_v23, %s15833_s12  ;;  %610 = vmatprep.subr.bf16.mxu0 %v579_v47  ;;  %v11379_v23 = vld [vmem:[%s15795_s1 + $0x18] sm:$0xff]  }
  0xb2   : > { %954 = vrot.lane.b32.xlu1 %v11241_v24, %s15833_s12 }
  0xb3   : > { %v546_v49 = vpop.permute.xlu0 %545  ;;  %v554_v50 = vpop.permute.xlu1 %553 }
  0xb4   : > { %v578_v51 = vsel %vm569_vm0, %v546_v49, %v548_v45 }
  0xb5   : > { %611 = vmatpush1.bf16.msra.mxu0 %v578_v51  ;;  %1063 = vperm.xlu0 %9788, %v1060_v48  }
  0xb7   : > { %v556_v52 = vpop.permute.xlu0 %555  ;;  %v552_v53 = vpop.permute.xlu1 %551 }
  0xb8   : > { %v581_v54 = vsel %vm569_vm0, %v554_v50, %v556_v52  ;;  %v580_v55 = vsel %vm569_vm0, %v552_v53, %v554_v50 }
  0xb9   : > { %612 = vmatprep.subr.bf16.mxu0 %v581_v54 }
  0xba   : > { %613 = vmatpush1.bf16.msra.mxu0 %v580_v55  ;;  %v11429_v55 = vld [vmem:[%s15795_s1 + $0x20] sm:$0xff]  }
  0xbb   : > { %v560_v56 = vpop.permute.xlu0 %559  ;;  %v562_v57 = vpop.permute.xlu1 %561 }
  0xbc   : > { %v583_v58 = vsel %vm569_vm0, %v560_v56, %v562_v57 }
  0xbd   : > { %614 = vmatprep.subr.bf16.mxu0 %v583_v58 }
  0xbf   : > { %v558_v59 = vpop.permute.xlu0 %557  ;;  %v566_v60 = vpop.permute.xlu1 %565 }
  0xc0   : > { %v582_v61 = vsel %vm569_vm0, %v558_v59, %v560_v56 }
  0xc1   : > { %615 = vmatpush1.bf16.msra.mxu0 %v582_v61 }
  0xc3   : > { %v568_v62 = vpop.permute.xlu0 %567  ;;  %v564_v63 = vpop.permute.xlu1 %563 }
  0xc4   : > { %v585_v2 = vsel %vm569_vm0, %v566_v60, %v568_v62  ;;  %v584_v4 = vsel %vm569_vm0, %v564_v63, %v566_v60 }
  0xc5   : > { %616 = vmatprep.subr.bf16.mxu0 %v585_v2  ;;  %v11440_v2 = vld [vmem:[%s15795_s1 + $0x28] sm:$0xff]  }
  0xc6   : > { %617 = vmatpush1.bf16.msra.mxu0 %v584_v4 }
  0xc7   : > { %v756_v10 = vpop.permute.xlu0 %755  ;;  %683 = vmatprep.subr.bf16.mxu0 %v11129_v0  ;;  %v758_v13 = vpop.permute.xlu1 %757 }
  0xc9   : > { %635 = vmatmul.mubr.bf16.vlgmr.msra.gmra.mrb[0].mxu0 %v11369_v7 }
  0xca   : > { %684 = vmatpush1.bf16.msra.mxu0 %v11132_v1  ;;  %644 = vmatprep.mubr.bf16.mxu0 %v15839_v22 }
  0xcb   : > { %v754_v16 = vpop.permute.xlu0 %753  ;;  %685 = vmatprep.subr.bf16.mxu0 %v11142_v3  ;;  %v762_v19 = vpop.permute.xlu1 %761 }
  0xce   : > { %686 = vmatpush1.bf16.msra.mxu0 %v11152_v5 }
  0xcf   : > { %v764_v25 = vpop.permute.xlu0 %763  ;;  %687 = vmatprep.subr.bf16.mxu0 %v11157_v6  ;;  %v760_v0 = vpop.permute.xlu1 %759 }
  0xd0   : > { %v804_v30 = vsel %vm801_vm1, %v760_v0, %v762_v19 }
  0xd1   : > { %645 = vmatmul.mubr.bf16.gmra.mrb[4].mxu0 %v11379_v23 }
  0xd2   : > { %688 = vmatpush1.bf16.msra.mxu0 %v11167_v8  ;;  %715 = vmatprep.mubr.bf16.mxu0 %v15839_v22 }
  0xd3   : > { %v768_v1 = vpop.permute.xlu0 %767  ;;  %689 = vmatprep.subr.bf16.mxu0 %v11172_v9  ;;  %v770_v3 = vpop.permute.xlu1 %769 }
  0xd4   : > { %v807_v31 = vsel %vm801_vm1, %v768_v1, %v770_v3 }
  0xd6   : > { %690 = vmatpush1.bf16.msra.mxu0 %v11180_v11 }
  0xd7   : > { %v766_v26 = vpop.permute.xlu0 %765  ;;  %691 = vmatprep.subr.bf16.mxu0 %v11185_v12  ;;  %v774_v5 = vpop.permute.xlu1 %773  ;;  %v11398_v12 = vld [vmem:[%s15795_s1] sm:$0xff]  }
  0xd8   : > { %v806_v34 = vsel %vm801_vm1, %v766_v26, %v768_v1 }
  0xda   : > { %692 = vmatpush1.bf16.msra.mxu0 %v11195_v14  ;;  %v803_v14 = vsel %vm801_vm1, %v756_v10, %v758_v13 }
  0xdb   : > { %v776_v6 = vpop.permute.xlu0 %775  ;;  %693 = vmatprep.subr.bf16.mxu0 %v11198_v15  ;;  %v772_v27 = vpop.permute.xlu1 %771 }
  0xdc   : > { %v809_v35 = vsel %vm801_vm1, %v774_v5, %v776_v6  ;;  %v808_v38 = vsel %vm801_vm1, %v772_v27, %v774_v5 }
  0xde   : > { %694 = vmatpush1.bf16.msra.mxu0 %v11208_v17 }
  0xdf   : > { %v780_v8 = vpop.permute.xlu0 %779  ;;  %695 = vmatprep.subr.bf16.mxu0 %v11215_v18  ;;  %v782_v28 = vpop.permute.xlu1 %781  ;;  %v802_v18 = vsel %vm801_vm1, %v754_v16, %v756_v10 }
  0xe0   : > { %v811_v39 = vsel %vm801_vm1, %v780_v8, %v782_v28 }
  0xe2   : > { %696 = vmatpush1.bf16.msra.mxu0 %v11225_v20  ;;  %v805_v20 = vsel %vm801_vm1, %v762_v19, %v764_v25 }
  0xe3   : > { %v778_v9 = vpop.permute.xlu0 %777  ;;  %697 = vmatprep.subr.bf16.mxu0 %v11228_v21  ;;  %v786_v11 = vpop.permute.xlu1 %785 }
  0xe4   : > { %v810_v42 = vsel %vm801_vm1, %v778_v9, %v780_v8 }
  0xe6   : > { %698 = vmatpush1.bf16.msra.mxu0 %v11241_v24  ;;  %v11410_v24 = vld [vmem:[%s15795_s1 + $0x8] sm:$0xff]  }
  0xe7   : > { %v788_v15 = vpop.permute.xlu0 %787  ;;  %834 = vmatprep.subr.bf16.mxu0 %v803_v14  ;;  %v784_v17 = vpop.permute.xlu1 %783 }
  0xe8   : > { %v813_v43 = vsel %vm801_vm1, %v786_v11, %v788_v15  ;;  %v812_v46 = vsel %vm801_vm1, %v784_v17, %v786_v11 }
  0xe9   : > { %716 = vmatmul.mubr.bf16.vlgmr.msra.gmra.mrb[0].mxu0 %v11398_v12 }
  0xea   : > { %835 = vmatpush1.bf16.msra.mxu0 %v802_v18  ;;  %725 = vmatprep.mubr.bf16.mxu0 %v15839_v22 }
  0xeb   : > { %v792_v21 = vpop.permute.xlu0 %791  ;;  %836 = vmatprep.subr.bf16.mxu0 %v805_v20  ;;  %v794_v29 = vpop.permute.xlu1 %793 }
  0xec   : > { %v815_v47 = vsel %vm801_vm1, %v792_v21, %v794_v29 }
  0xee   : > { %837 = vmatpush1.bf16.msra.mxu0 %v804_v30  ;;  %v11459_v30 = vld [vmem:[%s15795_s1 + $0x30] sm:$0xff]  }
  0xef   : > { %v790_v32 = vpop.permute.xlu0 %789  ;;  %838 = vmatprep.subr.bf16.mxu0 %v807_v31  ;;  %v798_v33 = vpop.permute.xlu1 %797  ;;  %v11466_v31 = vld [vmem:[%s15795_s1 + $0x38] sm:$0xff]  }
  0xf0   : > { %v814_v50 = vsel %vm801_vm1, %v790_v32, %v792_v21  ;;  %v11470_v32 = vld [vmem:[%s11126_s29 + $0xc4] ss:$12 sps:$4 sm:$0xff]  }
  0xf1   : > { %726 = vmatmul.mubr.bf16.gmra.mrb[4].mxu0 %v11410_v24  ;;  %1422 = vrot.lane.b32.xlu1 %v11470_v32, %s15823_s30 }
  0xf2   : > { %839 = vmatpush1.bf16.msra.mxu0 %v806_v34  ;;  %866 = vmatprep.mubr.bf16.mxu0 %v15839_v22  ;;  %v11478_v34 = vld [vmem:[%s11126_s29 + $0xc0] ss:$12 sps:$4 sm:$0xff]  }
  0xf3   : > { %v800_v36 = vpop.permute.xlu0 %799  ;;  %840 = vmatprep.subr.bf16.mxu0 %v809_v35  ;;  %v796_v37 = vpop.permute.xlu1 %795  ;;  %v11485_v35 = vld [vmem:[%s11126_s29 + $0xdc] ss:$12 sps:$4 sm:$0xff]  }
  0xf4   : > { %v817_v51 = vsel %vm801_vm1, %v798_v33, %v800_v36  ;;  %v816_v54 = vsel %vm801_vm1, %v796_v37, %v798_v33  ;;  %v11475_v33 = vld [vmem:[%s11126_s29 + $0xc8] ss:$12 sps:$4 sm:$0xff]   ;;  %v11490_v36 = vld [vmem:[%s11126_s29 + $0xd8] ss:$12 sps:$4 sm:$0xff]   ;;  %v11493_v37 = vld [vmem:[%s11126_s29 + $0xe0] ss:$12 sps:$4 sm:$0xff]  }
  0xf5   : > { %1424 = vrot.lane.b32.xlu0 %v11475_v33, %s15823_s30  ;;  %1420 = vrot.lane.b32.xlu1 %v11478_v34, %s15823_s30 }
  0xf6   : > { %841 = vmatpush1.bf16.msra.mxu0 %v808_v38 }
  0xf7   : > { %v915_v40 = vpop.permute.xlu0 %914  ;;  %842 = vmatprep.subr.bf16.mxu0 %v811_v39  ;;  %v917_v41 = vpop.permute.xlu1 %916 }
  0xf8   : > { %v962_v56 = vsel %vm960_vm2, %v915_v40, %v917_v41 }
  0xf9   : > { %1428 = vrot.lane.b32.xlu0 %v11485_v35, %s15823_s30  ;;  %1430 = vrot.lane.b32.xlu1 %v11493_v37, %s15823_s30 }
  0xfa   : > { %843 = vmatpush1.bf16.msra.mxu0 %v810_v42 }
  0xfb   : > { %v913_v44 = vpop.permute.xlu0 %912  ;;  %844 = vmatprep.subr.bf16.mxu0 %v813_v43  ;;  %v921_v45 = vpop.permute.xlu1 %920 }
  0xfc   : > { %v961_v59 = vsel %vm960_vm2, %v913_v44, %v915_v40 }
  0xfd   : > { %1426 = vrot.lane.b32.xlu0 %v11490_v36, %s15823_s30 }
  0xfe   : > { %845 = vmatpush1.bf16.msra.mxu0 %v812_v46 }
  0xff   : > { %v923_v48 = vpop.permute.xlu0 %922  ;;  %846 = vmatprep.subr.bf16.mxu0 %v815_v47  ;;  %v919_v49 = vpop.permute.xlu1 %918 }
 0x100   : > { %v964_v60 = vsel %vm960_vm2, %v921_v45, %v923_v48  ;;  %v963_v63 = vsel %vm960_vm2, %v919_v49, %v921_v45 }
 0x102   : > { %847 = vmatpush1.bf16.msra.mxu0 %v814_v50 }
 0x103   : > { %v927_v52 = vpop.permute.xlu0 %926  ;;  %848 = vmatprep.subr.bf16.mxu0 %v817_v51  ;;  %v929_v53 = vpop.permute.xlu1 %928 }
 0x104   : > { %v966_v4 = vsel %vm960_vm2, %v927_v52, %v929_v53 }
 0x106   : > { %849 = vmatpush1.bf16.msra.mxu0 %v816_v54 }
 0x107   : > { %v925_v57 = vpop.permute.xlu0 %924  ;;  %993 = vmatprep.subr.bf16.mxu0 %v962_v56  ;;  %v933_v58 = vpop.permute.xlu1 %932 }
 0x108   : > { %v965_v16 = vsel %vm960_vm2, %v925_v57, %v927_v52 }
 0x109   : > { %867 = vmatmul.mubr.bf16.vlgmr.msra.gmra.mrb[0].mxu0 %v11429_v55 }
 0x10a   : > { %994 = vmatpush1.bf16.msra.mxu0 %v961_v59  ;;  %876 = vmatprep.mubr.bf16.mxu0 %v15839_v22  ;;  %v11528_v59 = vld [vmem:[%s11126_s29 + $0xf8] ss:$12 sps:$4 sm:$0xff]  }
 0x10b   : > { %v935_v61 = vpop.permute.xlu0 %934  ;;  %995 = vmatprep.subr.bf16.mxu0 %v964_v60  ;;  %v931_v62 = vpop.permute.xlu1 %930  ;;  %v15841_v60 = vmov 0.0  }
 0x10c   : > { %v968_v19 = vsel %vm960_vm2, %v933_v58, %v935_v61  ;;  %v967_v1 = vsel %vm960_vm2, %v931_v62, %v933_v58  ;;  %1270 = vmatprep.mubr.f32.mxu1 %v15841_v60  ;;  %v11536_v61 = vld [vmem:[%s11126_s29 + $0xf4] ss:$12 sps:$4 sm:$0xff]   ;;  %v11539_v62 = vld [vmem:[%s11126_s29 + $0x10c] ss:$12 sps:$4 sm:$0xff]  }
 0x10e   : > { %996 = vmatpush1.bf16.msra.mxu0 %v963_v63  ;;  %v11546_v63 = vld [vmem:[%s11126_s29 + $0xf0] ss:$12 sps:$4 sm:$0xff]  }
 0x10f   : > { %v939_v10 = vpop.permute.xlu0 %938  ;;  %997 = vmatprep.subr.bf16.mxu0 %v966_v4  ;;  %v11549_v4 = vld [vmem:[%s11126_s29 + $0x108] ss:$12 sps:$4 sm:$0xff]  }
 0x110   : > { %v941_v13 = vpop.permute.xlu1 %940 }
 0x111   : > { %877 = vmatmul.mubr.bf16.gmra.mrb[4].mxu0 %v11440_v2  ;;  %v970_v3 = vsel %vm960_vm2, %v939_v10, %v941_v13  ;;  %v11559_v13 = vld [vmem:[%s11126_s29 + $0x128] ss:$12 sps:$4 sm:$0xff]  }
 0x112   : > { %998 = vmatpush1.bf16.msra.mxu0 %v965_v16  ;;  %1025 = vmatprep.mubr.bf16.mxu0 %v15839_v22  ;;  %v11566_v16 = vld [vmem:[%s11126_s29 + $0x124] ss:$12 sps:$4 sm:$0xff]  }
 0x113   : > { %v937_v25 = vpop.permute.xlu0 %936  ;;  %999 = vmatprep.subr.bf16.mxu0 %v968_v19  ;;  %v11569_v19 = vld [vmem:[%s11126_s29 + $0x13c] ss:$12 sps:$4 sm:$0xff]  }
 0x114   : > { %v945_v0 = vpop.permute.xlu1 %944  ;;  %v969_v6 = vsel %vm960_vm2, %v937_v25, %v939_v10  ;;  %v11556_v10 = vld [vmem:[%s11126_s29 + $0x110] ss:$12 sps:$4 sm:$0xff]   ;;  %v11576_v25 = vld [vmem:[%s11126_s29 + $0x120] ss:$12 sps:$4 sm:$0xff]  }
 0x116   : > { %1000 = vmatpush1.bf16.msra.mxu0 %v967_v1  ;;  %v11586_v1 = vld [vmem:[%s11126_s29 + $0x140] ss:$12 sps:$4 sm:$0xff]  }
 0x117   : > { %v947_v26 = vpop.permute.xlu0 %946  ;;  %1001 = vmatprep.subr.bf16.mxu0 %v970_v3  ;;  %v11589_v3 = vld [vmem:[%s11126_s29 + $0x158] ss:$12 sps:$4 sm:$0xff]  }
 0x118   : > { %v943_v5 = vpop.permute.xlu1 %942  ;;  %v972_v27 = vsel %vm960_vm2, %v945_v0, %v947_v26  ;;  %v11596_v26 = vld [vmem:[%s11126_s29 + $0x154] ss:$12 sps:$4 sm:$0xff]  }
 0x119   : > { %v971_v9 = vsel %vm960_vm2, %v943_v5, %v945_v0  ;;  %v11579_v0 = vld [vmem:[%s11126_s29 + $0x138] ss:$12 sps:$4 sm:$0xff]  }
 0x11a   : > { %1002 = vmatpush1.bf16.msra.mxu0 %v969_v6  ;;  %v11599_v5 = vld [vmem:[%s11126_s29 + $0x16c] ss:$12 sps:$4 sm:$0xff]   ;;  %v11606_v6 = vld [vmem:[%s11126_s29 + $0x150] ss:$12 sps:$4 sm:$0xff]  }
 0x11b   : > { %v951_v8 = vpop.permute.xlu0 %950  ;;  %1003 = vmatprep.subr.bf16.mxu0 %v972_v27  ;;  %v11609_v27 = vld [vmem:[%s11126_s29 + $0x168] ss:$12 sps:$4 sm:$0xff]  }
 0x11c   : > { %v953_v28 = vpop.permute.xlu1 %952 }
 0x11d   : > { %v974_v11 = vsel %vm960_vm2, %v951_v8, %v953_v28 }
 0x11e   : > { %1004 = vmatpush1.bf16.msra.mxu0 %v971_v9 }
 0x11f   : > { %v949_v14 = vpop.permute.xlu0 %948  ;;  %1005 = vmatprep.subr.bf16.mxu0 %v974_v11 }
 0x120   : > { %v973_v15 = vsel %vm960_vm2, %v949_v14, %v951_v8  ;;  %v957_v17 = vpop.permute.xlu1 %956  ;;  %v11616_v8 = vld [vmem:[%s11126_s29 + $0x170] ss:$12 sps:$4 sm:$0xff]  }
 0x122   : > { %1006 = vmatpush1.bf16.msra.mxu0 %v973_v15 }
 0x123   : > { %v959_v18 = vpop.permute.xlu0 %958 }
 0x124   : > { %v955_v20 = vpop.permute.xlu1 %954  ;;  %v976_v21 = vsel %vm960_vm2, %v957_v17, %v959_v18 }
 0x125   : > { %v975_v29 = vsel %vm960_vm2, %v955_v20, %v957_v17  ;;  %1007 = vmatprep.subr.bf16.mxu0 %v976_v21 }
 0x126   : > { %1008 = vmatpush1.bf16.msra.mxu0 %v975_v29 }
 0x129   : > { %1026 = vmatmul.mubr.bf16.vlgmr.msra.gmra.mrb[0].mxu0 %v11459_v30 }
 0x12a   : > { %1035 = vmatprep.mubr.bf16.mxu0 %v15839_v22 }
 0x131   : > { %1036 = vmatmul.mubr.bf16.gmra.mrb[4].mxu0 %v11466_v31 }
 0x132   : > { %2085 = vmatprep.mubr.f32.mxu0 %v15841_v60 }
 0x134   : > { %v11499_v50 = vpop.permute.xlu0 %1063 }
 0x163   : > { %v11656_v9 = vpop.permute.xlu1 %1422 }
 0x167   : > { %v11654_v28 = vpop.permute.xlu0 %1424  ;;  %v11664_v14 = vpop.permute.xlu1 %1420 }
 0x16b   : > { %v11662_v11 = vpop.permute.xlu0 %1428  ;;  %v11676_v17 = vpop.permute.xlu1 %1430 }
 0x16f   : > { %v11674_v15 = vpop.permute.xlu0 %1426 }
 0x1fc   : > { %v1027_v38 = vpop.f32.mrb[0].mxu0 }
 0x1fd   : > { %v1029_v39 = vpop.f32.mrb[1].mxu0 }
 0x1fe   : > { %v1031_v40 = vpop.f32.mrb[2].mxu0 }
 0x1ff   : > { %v1054_v41 = vmax.f32 %v1027_v38, %v1031_v40  ;;  %v1033_v42 = vpop.f32.mrb[3].mxu0 }
 0x200   : > { %v1055_v43 = vmax.f32 %v1029_v39, %v1033_v42 }
 0x204   : > { %v1037_v44 = vpop.f32.mrb[4].mxu0 }
 0x205   : > { %v1039_v45 = vpop.f32.mrb[5].mxu0 }
 0x206   : > { %v1041_v46 = vpop.f32.mrb[6].mxu0 }
 0x207   : > { %v1056_v47 = vmax.f32 %v1037_v44, %v1041_v46  ;;  %v1043_v48 = vpop.f32.mrb[7].mxu0 }
 0x208   : > { %v1057_v49 = vmax.f32 %v1039_v45, %v1043_v48 }
 0x209   : > { %v1058_v51 = vmax.f32 %v1054_v41, %v1056_v47 }
 0x20a   : > { %v1059_v52 = vmax.f32 %v1055_v43, %v1057_v49 }
 0x20b   : > { %v11502_v53 = vadd.f32 %v11499_v50, %v1058_v51 }
 0x20c   : > { %v11505_v54 = vadd.f32 %v11499_v50, %v1059_v52 }
 0x20d   : > { %v1068_v56 = vmax.f32 %v11502_v53, 0.0 }
 0x20e   : > { %v1069_v57 = vmax.f32 %v11505_v54, 0.0 }
 0x210   : > { %v9799_v58 = vpack.i.bf16 %v1069_v57, %v1068_v56 }
 0x212   : > { %9800 = vrot.lane.b32.xlu0 %v9799_v58, %s15805_s26  ;;  %9790 = vrot.lane.b32.xlu1 %v9799_v58, %s15823_s30  ;;  %s15813_s26 = smov 79  }
 0x216   : > { %9810 = vrot.lane.b32.xlu0 %v9799_v58, %s15833_s12  ;;  %9795 = vrot.lane.b32.xlu1 %v9799_v58, %s15809_s27  ;;  %s15815_s27 = smov 77  }
 0x21a   : > { %9820 = vrot.lane.b32.xlu0 %v9799_v58, %s15807_s28  ;;  %9805 = vrot.lane.b32.xlu1 %v9799_v58, %s15825_s11  ;;  %s15831_s28 = smov 94  }
 0x21e   : > { %9830 = vrot.lane.b32.xlu0 %v9799_v58, %s15811_s18  ;;  %9815 = vrot.lane.b32.xlu1 %v9799_v58, %s15827_s20  ;;  %s15821_s18 = smov 80  }
 0x222   : > { %9840 = vrot.lane.b32.xlu0 %v9799_v58, %s15819_s21  ;;  %9825 = vrot.lane.b32.xlu1 %v9799_v58, %s15829_s25  ;;  %s15865_s21 = smov 109  }
 0x226   : > { %9850 = vrot.lane.b32.xlu0 %v9799_v58, %s15813_s26  ;;  %9835 = vrot.lane.b32.xlu1 %v9799_v58, %s15831_s28  ;;  %s15817_s26 = smov 78  }
 0x22a   : > { %9860 = vrot.lane.b32.xlu0 %v9799_v58, %s15815_s27  ;;  %9845 = vrot.lane.b32.xlu1 %v9799_v58, %s15821_s18  ;;  %s15864_s27 = smov 125   ;;  %s15866_s18 = smov 95  }
 0x22e   : > { %9855 = vrot.lane.b32.xlu1 %v9799_v58, %s15817_s26  ;;  %1436 = vrot.lane.b32.xlu0 %v11528_v59, %s15823_s30  ;;  %s15863_s26 = smov 126  }
 0x232   : > { %1434 = vrot.lane.b32.xlu1 %v11536_v61, %s15823_s30  ;;  %1440 = vrot.lane.b32.xlu0 %v11539_v62, %s15823_s30 }
 0x236   : > { %1432 = vrot.lane.b32.xlu1 %v11546_v63, %s15823_s30  ;;  %1438 = vrot.lane.b32.xlu0 %v11549_v4, %s15823_s30 }
 0x23a   : > { %1442 = vrot.lane.b32.xlu1 %v11556_v10, %s15823_s30  ;;  %1448 = vrot.lane.b32.xlu0 %v11559_v13, %s15823_s30 }
 0x23e   : > { %1446 = vrot.lane.b32.xlu1 %v11566_v16, %s15823_s30  ;;  %1452 = vrot.lane.b32.xlu0 %v11569_v19, %s15823_s30 }
 0x242   : > { %1444 = vrot.lane.b32.xlu1 %v11576_v25, %s15823_s30  ;;  %1450 = vrot.lane.b32.xlu0 %v11579_v0, %s15823_s30 }
 0x246   : > { %1454 = vrot.lane.b32.xlu1 %v11586_v1, %s15823_s30  ;;  %1460 = vrot.lane.b32.xlu0 %v11589_v3, %s15823_s30 }
 0x24a   : > { %1458 = vrot.lane.b32.xlu1 %v11596_v26, %s15823_s30  ;;  %1464 = vrot.lane.b32.xlu0 %v11599_v5, %s15823_s30 }
 0x24e   : > { %1456 = vrot.lane.b32.xlu1 %v11606_v6, %s15823_s30  ;;  %1462 = vrot.lane.b32.xlu0 %v11609_v27, %s15823_s30 }
 0x252   : > { %1466 = vrot.lane.b32.xlu1 %v11616_v8, %s15823_s30  ;;  %1626 = vrot.lane.b32.xlu0 %v11475_v33, %s15825_s11 }
 0x256   : > { %1624 = vrot.lane.b32.xlu1 %v11470_v32, %s15825_s11  ;;  %1630 = vrot.lane.b32.xlu0 %v11485_v35, %s15825_s11 }
 0x25a   : > { %1622 = vrot.lane.b32.xlu1 %v11478_v34, %s15825_s11  ;;  %1628 = vrot.lane.b32.xlu0 %v11490_v36, %s15825_s11 }
 0x25e   : > { %1632 = vrot.lane.b32.xlu1 %v11493_v37, %s15825_s11  ;;  %1638 = vrot.lane.b32.xlu0 %v11528_v59, %s15825_s11 }
 0x262   : > { %1636 = vrot.lane.b32.xlu1 %v11536_v61, %s15825_s11  ;;  %1642 = vrot.lane.b32.xlu0 %v11539_v62, %s15825_s11 }
 0x266   : > { %1634 = vrot.lane.b32.xlu1 %v11546_v63, %s15825_s11  ;;  %1640 = vrot.lane.b32.xlu0 %v11549_v4, %s15825_s11 }
 0x26a   : > { %1644 = vrot.lane.b32.xlu1 %v11556_v10, %s15825_s11  ;;  %1650 = vrot.lane.b32.xlu0 %v11559_v13, %s15825_s11 }
 0x26e   : > { %1648 = vrot.lane.b32.xlu1 %v11566_v16, %s15825_s11  ;;  %1654 = vrot.lane.b32.xlu0 %v11569_v19, %s15825_s11 }
 0x272   : > { %1646 = vrot.lane.b32.xlu1 %v11576_v25, %s15825_s11  ;;  %1652 = vrot.lane.b32.xlu0 %v11579_v0, %s15825_s11 }
 0x276   : > { %1656 = vrot.lane.b32.xlu1 %v11586_v1, %s15825_s11  ;;  %1662 = vrot.lane.b32.xlu0 %v11589_v3, %s15825_s11 }
 0x27a   : > { %1660 = vrot.lane.b32.xlu1 %v11596_v26, %s15825_s11  ;;  %1666 = vrot.lane.b32.xlu0 %v11599_v5, %s15825_s11 }
 0x27e   : > { %1658 = vrot.lane.b32.xlu1 %v11606_v6, %s15825_s11  ;;  %1664 = vrot.lane.b32.xlu0 %v11609_v27, %s15825_s11 }
 0x282   : > { %1668 = vrot.lane.b32.xlu1 %v11616_v8, %s15825_s11  ;;  %1767 = vrot.lane.b32.xlu0 %v11475_v33, %s15833_s12 }
 0x284   : > { %v9801_v18 = vpop.permute.xlu0 %9800  ;;  %v9791_v20 = vpop.permute.xlu1 %9790 }
 0x285   : > { %v9792_v21 = vunpack.i.l.bf16 %v9791_v20  ;;  %v9793_v29 = vunpack.i.h.bf16 %v9791_v20  ;;  %v9803_v38 = vunpack.i.h.bf16 %v9801_v18  ;;  %v9802_v39 = vunpack.i.l.bf16 %v9801_v18 }
 0x286   : > { %1765 = vrot.lane.b32.xlu1 %v11470_v32, %s15833_s12  ;;  %1771 = vrot.lane.b32.xlu0 %v11485_v35, %s15833_s12 }
 0x287   : > { %v9085_v40 = vpack.c.bf16 %v9793_v29, %v1069_v57  ;;  %v1077_v41 = vsel %vm569_vm0, %v9792_v21, %v9793_v29  ;;  %v1093_v51 = vsel %vm1092_vm4, %v9802_v39, %v9803_v38 }
 0x288   : > { %v9811_v42 = vpop.permute.xlu0 %9810  ;;  %v9796_v43 = vpop.permute.xlu1 %9795  ;;  %v9087_v33 = vpack.c.bf16 %v1077_v41, %v1068_v56 }
 0x289   : > { %v9798_v44 = vunpack.i.h.bf16 %v9796_v43  ;;  %v9797_v45 = vunpack.i.l.bf16 %v9796_v43  ;;  %9086 = vmatprep.subr.bf16.mxu1 %v9085_v40  ;;  %v9813_v46 = vunpack.i.h.bf16 %v9811_v42  ;;  %v9812_v47 = vunpack.i.l.bf16 %v9811_v42 }
 0x28a   : > { %1763 = vrot.lane.b32.xlu1 %v11478_v34, %s15833_s12  ;;  %9088 = vmatpush1.bf16.msra.mxu1 %v9087_v33 }
 0x28b   : > { %1769 = vrot.lane.b32.xlu0 %v11490_v36, %s15833_s12  ;;  %v9089_v48 = vpack.c.bf16 %v9803_v38, %v9798_v44  ;;  %v1085_v49 = vsel %vm1084_vm3, %v9797_v45, %v9798_v44  ;;  %v1109_v58 = vsel %vm960_vm2, %v9812_v47, %v9813_v46 }
 0x28c   : > { %v9821_v52 = vpop.permute.xlu0 %9820  ;;  %v9806_v53 = vpop.permute.xlu1 %9805  ;;  %v9091_v54 = vpack.c.bf16 %v1093_v51, %v1085_v49 }
 0x28d   : > { %v9808_v56 = vunpack.i.h.bf16 %v9806_v53  ;;  %v9807_v57 = vunpack.i.l.bf16 %v9806_v53  ;;  %9090 = vmatprep.subr.bf16.mxu1 %v9089_v48  ;;  %v9823_v18 = vunpack.i.h.bf16 %v9821_v52  ;;  %v9822_v20 = vunpack.i.l.bf16 %v9821_v52 }
 0x28e   : > { %1773 = vrot.lane.b32.xlu1 %v11493_v37, %s15833_s12  ;;  %9092 = vmatpush1.bf16.msra.mxu1 %v9091_v54 }
 0x28f   : > { %1779 = vrot.lane.b32.xlu0 %v11528_v59, %s15833_s12  ;;  %v9093_v21 = vpack.c.bf16 %v9813_v46, %v9808_v56  ;;  %v1101_v29 = vsel %vm801_vm1, %v9807_v57, %v9808_v56  ;;  %v1125_v44 = vsel %vm1124_vm6, %v9822_v20, %v9823_v18 }
 0x290   : > { %v9831_v38 = vpop.permute.xlu0 %9830  ;;  %v9816_v39 = vpop.permute.xlu1 %9815  ;;  %v9095_v40 = vpack.c.bf16 %v1109_v58, %v1101_v29 }
 0x291   : > { %v9818_v41 = vunpack.i.h.bf16 %v9816_v39  ;;  %v9817_v42 = vunpack.i.l.bf16 %v9816_v39  ;;  %9094 = vmatprep.subr.bf16.mxu1 %v9093_v21  ;;  %v9833_v37 = vunpack.i.h.bf16 %v9831_v38  ;;  %v9832_v43 = vunpack.i.l.bf16 %v9831_v38 }
 0x292   : > { %1777 = vrot.lane.b32.xlu1 %v11536_v61, %s15833_s12  ;;  %9096 = vmatpush1.bf16.msra.mxu1 %v9095_v40 }
 0x293   : > { %1783 = vrot.lane.b32.xlu0 %v11539_v62, %s15833_s12  ;;  %v9097_v59 = vpack.c.bf16 %v9823_v18, %v9818_v41  ;;  %v1117_v33 = vsel %vm1116_vm5, %v9817_v42, %v9818_v41  ;;  %v1141_v51 = vsel %vm1140_vm7, %v9832_v43, %v9833_v37 }
 0x294   : > { %v9841_v45 = vpop.permute.xlu0 %9840  ;;  %v9826_v46 = vpop.permute.xlu1 %9825  ;;  %v9099_v47 = vpack.c.bf16 %v1125_v44, %v1117_v33 }
 0x295   : > { %v9828_v48 = vunpack.i.h.bf16 %v9826_v46  ;;  %v9827_v49 = vunpack.i.l.bf16 %v9826_v46  ;;  %9098 = vmatprep.subr.bf16.mxu1 %v9097_v59  ;;  %v9843_v52 = vunpack.i.h.bf16 %v9841_v45  ;;  %v9842_v53 = vunpack.i.l.bf16 %v9841_v45 }
 0x296   : > { %1775 = vrot.lane.b32.xlu1 %v11546_v63, %s15833_s12  ;;  %9100 = vmatpush1.bf16.msra.mxu1 %v9099_v47 }
 0x297   : > { %1781 = vrot.lane.b32.xlu0 %v11549_v4, %s15833_s12  ;;  %v9101_v54 = vpack.c.bf16 %v9833_v37, %v9828_v48  ;;  %v1133_v56 = vsel %vm1132_vm8, %v9827_v49, %v9828_v48  ;;  %v1157_v41 = vsel %vm1156_vm10, %v9842_v53, %v9843_v52 }
 0x298   : > { %v9851_v57 = vpop.permute.xlu0 %9850  ;;  %v9836_v58 = vpop.permute.xlu1 %9835  ;;  %v9103_v18 = vpack.c.bf16 %v1141_v51, %v1133_v56 }
 0x299   : > { %v9838_v20 = vunpack.i.h.bf16 %v9836_v58  ;;  %v9837_v21 = vunpack.i.l.bf16 %v9836_v58  ;;  %9102 = vmatprep.subr.bf16.mxu1 %v9101_v54  ;;  %v9853_v29 = vunpack.i.h.bf16 %v9851_v57  ;;  %v9852_v38 = vunpack.i.l.bf16 %v9851_v57 }
 0x29a   : > { %1785 = vrot.lane.b32.xlu1 %v11556_v10, %s15833_s12  ;;  %9104 = vmatpush1.bf16.msra.mxu1 %v9103_v18 }
 0x29b   : > { %1791 = vrot.lane.b32.xlu0 %v11559_v13, %s15833_s12  ;;  %v9105_v39 = vpack.c.bf16 %v9843_v52, %v9838_v20  ;;  %v1149_v40 = vsel %vm1148_vm9, %v9837_v21, %v9838_v20  ;;  %v1173_v10 = vsel %vm1172_vm11, %v9852_v38, %v9853_v29  ;;  %v1469_v20 = vsel %vm569_vm0, %v11656_v9, %v11654_v28  ;;  %v11741_v21 = vld [vmem:[%s15797_s3] sm:$0xff] }
 0x29c   : > { %v9861_v42 = vpop.permute.xlu0 %9860  ;;  %v9846_v37 = vpop.permute.xlu1 %9845  ;;  %v9107_v43 = vpack.c.bf16 %v1157_v41, %v1149_v40  ;;  %v1471_v28 = vsel %vm569_vm0, %v11662_v11, %v11676_v17 }
 0x29d   : > { %v9848_v59 = vunpack.i.h.bf16 %v9846_v37  ;;  %v9847_v33 = vunpack.i.l.bf16 %v9846_v37  ;;  %9106 = vmatprep.subr.bf16.mxu1 %v9105_v39  ;;  %v9863_v13 = vunpack.i.h.bf16 %v9861_v42  ;;  %v9862_v44 = vunpack.i.l.bf16 %v9861_v42 }
 0x29e   : > { %1789 = vrot.lane.b32.xlu1 %v11566_v16, %s15833_s12  ;;  %9108 = vmatpush1.bf16.msra.mxu1 %v9107_v43  ;;  %v1470_v39 = vsel %vm569_vm0, %v11674_v15, %v11662_v11 }
 0x29f   : > { %1795 = vrot.lane.b32.xlu0 %v11569_v19, %s15833_s12  ;;  %v9109_v45 = vpack.c.bf16 %v9853_v29, %v9848_v59  ;;  %v1165_v46 = vsel %vm1164_vm12, %v9847_v33, %v9848_v59  ;;  %v1189_v56 = vsel %vm1188_vm14, %v9862_v44, %v9863_v13 }
 0x2a0   : > { %v9856_v47 = vpop.permute.xlu1 %9855  ;;  %v1437_v48 = vpop.permute.xlu0 %1436  ;;  %v9111_v49 = vpack.c.bf16 %v1173_v10, %v1165_v46 }
 0x2a1   : > { %v9858_v51 = vunpack.i.h.bf16 %v9856_v47  ;;  %v9857_v52 = vunpack.i.l.bf16 %v9856_v47  ;;  %9110 = vmatprep.subr.bf16.mxu1 %v9109_v45 }
 0x2a2   : > { %1787 = vrot.lane.b32.xlu1 %v11576_v25, %s15833_s12  ;;  %9112 = vmatpush1.bf16.msra.mxu1 %v9111_v49 }
 0x2a3   : > { %1793 = vrot.lane.b32.xlu0 %v11579_v0, %s15833_s12  ;;  %v9113_v53 = vpack.c.bf16 %v9863_v13, %v9858_v51  ;;  %v1181_v54 = vsel %vm1180_vm13, %v9857_v52, %v9858_v51 }
 0x2a4   : > { %v1435_v57 = vpop.permute.xlu1 %1434  ;;  %v1441_v58 = vpop.permute.xlu0 %1440  ;;  %v9115_v18 = vpack.c.bf16 %v1189_v56, %v1181_v54 }
 0x2a5   : > { %9114 = vmatprep.subr.bf16.mxu1 %v9113_v53  ;;  %v1473_v17 = vsel %vm569_vm0, %v1435_v57, %v1437_v48 }
 0x2a6   : > { %1797 = vrot.lane.b32.xlu1 %v11586_v1, %s15833_s12  ;;  %9116 = vmatpush1.bf16.msra.mxu1 %v9115_v18  ;;  %v1468_v1 = vsel %vm569_vm0, %v11664_v14, %v11656_v9 }
 0x2a7   : > { %1803 = vrot.lane.b32.xlu0 %v11589_v3, %s15833_s12  ;;  %1500 = vmatprep.subr.bf16.mxu1 %v1469_v20  ;;  %v11757_v3 = vld [vmem:[%s15797_s3 + $0x8] sm:$0xff] }
 0x2a8   : > { %v1433_v29 = vpop.permute.xlu1 %1432  ;;  %v1439_v38 = vpop.permute.xlu0 %1438 }
 0x2a9   : > { %1271 = vmatmul.mubr.f32.vlgmr.msra.gmra.mrb[0].mxu1 %v11741_v21  ;;  %v1472_v42 = vsel %vm569_vm0, %v1433_v29, %v1435_v57  ;;  %v1474_v43 = vsel %vm569_vm0, %v1439_v38, %v1441_v58 }
 0x2aa   : > { %1801 = vrot.lane.b32.xlu1 %v11596_v26, %s15833_s12  ;;  %1501 = vmatpush1.bf16.msra.mxu1 %v1468_v1 }
 0x2ab   : > { %1807 = vrot.lane.b32.xlu0 %v11599_v5, %s15833_s12  ;;  %1502 = vmatprep.subr.bf16.mxu1 %v1471_v28 }
 0x2ac   : > { %v1443_v9 = vpop.permute.xlu1 %1442  ;;  %v1449_v14 = vpop.permute.xlu0 %1448  ;;  %1276 = vmatprep.mubr.f32.mxu1 %v15841_v60 }
 0x2ad   : > { %1277 = vmatmul.mubr.f32.gmra.mrb[2].mxu1 %v11757_v3  ;;  %v1475_v11 = vsel %vm569_vm0, %v1441_v58, %v1443_v9 }
 0x2ae   : > { %1799 = vrot.lane.b32.xlu1 %v11606_v6, %s15833_s12  ;;  %1503 = vmatpush1.bf16.msra.mxu1 %v1470_v39 }
 0x2af   : > { %1805 = vrot.lane.b32.xlu0 %v11609_v27, %s15833_s12  ;;  %1504 = vmatprep.subr.bf16.mxu1 %v1473_v17 }
 0x2b0   : > { %v1447_v40 = vpop.permute.xlu1 %1446  ;;  %v1453_v41 = vpop.permute.xlu0 %1452  ;;  %1532 = vmatprep.mubr.bf16.mxu1 %v15839_v22 }
 0x2b1   : > { %v1477_v59 = vsel %vm569_vm0, %v1447_v40, %v1449_v14 }
 0x2b2   : > { %1809 = vrot.lane.b32.xlu1 %v11616_v8, %s15833_s12  ;;  %1505 = vmatpush1.bf16.msra.mxu1 %v1472_v42 }
 0x2b3   : > { %1506 = vmatprep.subr.bf16.mxu1 %v1475_v11 }
 0x2b4   : > { %v1445_v15 = vpop.permute.xlu1 %1444  ;;  %v1451_v37 = vpop.permute.xlu0 %1450 }
 0x2b5   : > { %v1476_v13 = vsel %vm569_vm0, %v1445_v15, %v1447_v40  ;;  %v1478_v46 = vsel %vm569_vm0, %v1451_v37, %v1453_v41 }
 0x2b6   : > { %1507 = vmatpush1.bf16.msra.mxu1 %v1474_v43 }
 0x2b7   : > { %1508 = vmatprep.subr.bf16.mxu1 %v1477_v59 }
 0x2b8   : > { %v1455_v33 = vpop.permute.xlu1 %1454  ;;  %v1461_v10 = vpop.permute.xlu0 %1460 }
 0x2b9   : > { %v1479_v44 = vsel %vm569_vm0, %v1453_v41, %v1455_v33 }
 0x2ba   : > { %1509 = vmatpush1.bf16.msra.mxu1 %v1476_v13 }
 0x2bb   : > { %1510 = vmatprep.subr.bf16.mxu1 %v1479_v44 }
 0x2bc   : > { %v1459_v8 = vpop.permute.xlu1 %1458  ;;  %v1465_v45 = vpop.permute.xlu0 %1464 }
 0x2bd   : > { %v1481_v47 = vsel %vm569_vm0, %v1459_v8, %v1461_v10 }
 0x2be   : > { %1511 = vmatpush1.bf16.msra.mxu1 %v1478_v46 }
 0x2bf   : > { %1512 = vmatprep.subr.bf16.mxu1 %v1481_v47 }
 0x2c0   : > { %v1457_v48 = vpop.permute.xlu1 %1456  ;;  %v1463_v49 = vpop.permute.xlu0 %1462 }
 0x2c1   : > { %v1480_v51 = vsel %vm569_vm0, %v1457_v48, %v1459_v8  ;;  %v1482_v56 = vsel %vm569_vm0, %v1463_v49, %v1465_v45 }
 0x2c2   : > { %1513 = vmatpush1.bf16.msra.mxu1 %v1480_v51 }
 0x2c4   : > { %v1467_v52 = vpop.permute.xlu1 %1466  ;;  %v1627_v53 = vpop.permute.xlu0 %1626 }
 0x2c5   : > { %v1483_v54 = vsel %vm569_vm0, %v1465_v45, %v1467_v52 }
 0x2c6   : > { %1514 = vmatprep.subr.bf16.mxu1 %v1483_v54 }
 0x2c7   : > { %1515 = vmatpush1.bf16.msra.mxu1 %v1482_v56 }
 0x2c8   : > { %v1625_v57 = vpop.permute.xlu1 %1624  ;;  %v1631_v58 = vpop.permute.xlu0 %1630  ;;  %1569 = vmatprep.subr.bf16.mxu1 %v11470_v32 }
 0x2ca   : > { %1533 = vmatmul.mubr.bf16.vlgmr.msra.gmra.mrb[4].mxu1 %v11369_v7 }
 0x2cb   : > { %1570 = vmatpush1.bf16.msra.mxu1 %v11478_v34  ;;  %1542 = vmatprep.mubr.bf16.mxu1 %v15839_v22 }
 0x2cc   : > { %v1623_v18 = vpop.permute.xlu1 %1622  ;;  %v1629_v20 = vpop.permute.xlu0 %1628  ;;  %1571 = vmatprep.subr.bf16.mxu1 %v11485_v35 }
 0x2cf   : > { %1572 = vmatpush1.bf16.msra.mxu1 %v11490_v36 }
 0x2d0   : > { %v1633_v29 = vpop.permute.xlu1 %1632  ;;  %v1639_v38 = vpop.permute.xlu0 %1638  ;;  %1573 = vmatprep.subr.bf16.mxu1 %v11536_v61 }
 0x2d2   : > { %1543 = vmatmul.mubr.bf16.gmra.mrb[8].mxu1 %v11379_v23 }
 0x2d3   : > { %1574 = vmatpush1.bf16.msra.mxu1 %v11546_v63  ;;  %1601 = vmatprep.mubr.bf16.mxu1 %v15839_v22 }
 0x2d4   : > { %v1637_v7 = vpop.permute.xlu1 %1636  ;;  %v1643_v32 = vpop.permute.xlu0 %1642  ;;  %1575 = vmatprep.subr.bf16.mxu1 %v11539_v62 }
 0x2d7   : > { %1576 = vmatpush1.bf16.msra.mxu1 %v11549_v4 }
 0x2d8   : > { %v1635_v34 = vpop.permute.xlu1 %1634  ;;  %v1641_v35 = vpop.permute.xlu0 %1640  ;;  %1577 = vmatprep.subr.bf16.mxu1 %v11566_v16  ;;  %v1671_v16 = vsel %vm801_vm1, %v1625_v57, %v1627_v53 }
 0x2d9   : > { %v1674_v14 = vsel %vm801_vm1, %v1635_v34, %v1637_v7  ;;  %v1676_v40 = vsel %vm801_vm1, %v1641_v35, %v1643_v32 }
 0x2db   : > { %1578 = vmatpush1.bf16.msra.mxu1 %v11576_v25 }
 0x2dc   : > { %v1645_v36 = vpop.permute.xlu1 %1644  ;;  %v1651_v61 = vpop.permute.xlu0 %1650  ;;  %1579 = vmatprep.subr.bf16.mxu1 %v11569_v19  ;;  %v1670_v19 = vsel %vm801_vm1, %v1623_v18, %v1625_v57 }
 0x2df   : > { %1580 = vmatpush1.bf16.msra.mxu1 %v11579_v0  ;;  %v1673_v0 = vsel %vm801_vm1, %v1631_v58, %v1633_v29 }
 0x2e0   : > { %v1649_v23 = vpop.permute.xlu1 %1648  ;;  %v1655_v63 = vpop.permute.xlu0 %1654  ;;  %1581 = vmatprep.subr.bf16.mxu1 %v11596_v26 }
 0x2e1   : > { %v1679_v41 = vsel %vm801_vm1, %v1649_v23, %v1651_v61 }
 0x2e3   : > { %1582 = vmatpush1.bf16.msra.mxu1 %v11606_v6 }
 0x2e4   : > { %v1647_v62 = vpop.permute.xlu1 %1646  ;;  %v1653_v4 = vpop.permute.xlu0 %1652  ;;  %1583 = vmatprep.subr.bf16.mxu1 %v11599_v5  ;;  %v1672_v5 = vsel %vm801_vm1, %v1629_v20, %v1631_v58 }
 0x2e5   : > { %v1678_v15 = vsel %vm801_vm1, %v1647_v62, %v1649_v23  ;;  %v1680_v59 = vsel %vm801_vm1, %v1653_v4, %v1655_v63 }
 0x2e7   : > { %1584 = vmatpush1.bf16.msra.mxu1 %v11609_v27  ;;  %v1675_v27 = vsel %vm801_vm1, %v1637_v7, %v1639_v38 }
 0x2e8   : > { %v1657_v25 = vpop.permute.xlu1 %1656  ;;  %1702 = vmatprep.subr.bf16.mxu1 %v1671_v16  ;;  %v1663_v1 = vpop.permute.xlu0 %1662 }
 0x2ea   : > { %1602 = vmatmul.mubr.bf16.vlgmr.msra.gmra.mrb[4].mxu1 %v11398_v12  ;;  %v1677_v12 = vsel %vm801_vm1, %v1643_v32, %v1645_v36 }
 0x2eb   : > { %1703 = vmatpush1.bf16.msra.mxu1 %v1670_v19  ;;  %1611 = vmatprep.mubr.bf16.mxu1 %v15839_v22 }
 0x2ec   : > { %v1661_v26 = vpop.permute.xlu1 %1660  ;;  %1704 = vmatprep.subr.bf16.mxu1 %v1673_v0  ;;  %v1667_v6 = vpop.permute.xlu0 %1666 }
 0x2ed   : > { %v1683_v33 = vsel %vm801_vm1, %v1661_v26, %v1663_v1 }
 0x2ef   : > { %1705 = vmatpush1.bf16.msra.mxu1 %v1672_v5 }
 0x2f0   : > { %v1659_v28 = vpop.permute.xlu1 %1658  ;;  %1706 = vmatprep.subr.bf16.mxu1 %v1675_v27  ;;  %v1665_v9 = vpop.permute.xlu0 %1664 }
 0x2f1   : > { %v1682_v44 = vsel %vm801_vm1, %v1659_v28, %v1661_v26  ;;  %v1684_v47 = vsel %vm801_vm1, %v1665_v9, %v1667_v6  ;;  %v11858_v9 = vld [vmem:[%s11126_s29 + $0x184] ss:$12 sps:$4 sm:$0xff]  }
 0x2f2   : > { %1612 = vmatmul.mubr.bf16.gmra.mrb[8].mxu1 %v11410_v24  ;;  %v1681_v24 = vsel %vm801_vm1, %v1655_v63, %v1657_v25  ;;  %2237 = vrot.lane.b32.xlu0 %v11858_v9, %s15823_s30 }
 0x2f3   : > { %1707 = vmatpush1.bf16.msra.mxu1 %v1674_v14  ;;  %1734 = vmatprep.mubr.bf16.mxu1 %v15839_v22  ;;  %v11861_v14 = vld [vmem:[%s11126_s29 + $0x188] ss:$12 sps:$4 sm:$0xff]  }
 0x2f4   : > { %v1669_v39 = vpop.permute.xlu1 %1668  ;;  %1708 = vmatprep.subr.bf16.mxu1 %v1677_v12  ;;  %v1768_v17 = vpop.permute.xlu0 %1767  ;;  %2239 = vrot.lane.b32.xlu1 %v11861_v14, %s15823_s30  ;;  %v11878_v12 = vld [vmem:[%s11126_s29 + $0x1a0] ss:$12 sps:$4 sm:$0xff]  }
 0x2f5   : > { %v1685_v8 = vsel %vm801_vm1, %v1667_v6, %v1669_v39  ;;  %v11881_v39 = vld [vmem:[%s11126_s29 + $0x198] ss:$12 sps:$4 sm:$0xff]  }
 0x2f7   : > { %1709 = vmatpush1.bf16.msra.mxu1 %v1676_v40 }
 0x2f8   : > { %v1766_v42 = vpop.permute.xlu1 %1765  ;;  %1710 = vmatprep.subr.bf16.mxu1 %v1679_v41  ;;  %v1772_v11 = vpop.permute.xlu0 %1771 }
 0x2f9   : > { %v1812_v48 = vsel %vm960_vm2, %v1766_v42, %v1768_v17 }
 0x2fb   : > { %1711 = vmatpush1.bf16.msra.mxu1 %v1678_v15 }
 0x2fc   : > { %v1764_v37 = vpop.permute.xlu1 %1763  ;;  %1712 = vmatprep.subr.bf16.mxu1 %v1681_v24 }
 0x2fd   : > { %v1770_v43 = vpop.permute.xlu0 %1769  ;;  %v1811_v52 = vsel %vm960_vm2, %v1764_v37, %v1766_v42 }
 0x2fe   : > { %v1813_v57 = vsel %vm960_vm2, %v1770_v43, %v1772_v11 }
 0x2ff   : > { %1713 = vmatpush1.bf16.msra.mxu1 %v1680_v59 }
 0x300   : > { %v1774_v10 = vpop.permute.xlu1 %1773  ;;  %1714 = vmatprep.subr.bf16.mxu1 %v1683_v33 }
 0x301   : > { %v1780_v13 = vpop.permute.xlu0 %1779  ;;  %v1814_v53 = vsel %vm960_vm2, %v1772_v11, %v1774_v10 }
 0x303   : > { %1715 = vmatpush1.bf16.msra.mxu1 %v1682_v44 }
 0x304   : > { %v1778_v45 = vpop.permute.xlu1 %1777  ;;  %1716 = vmatprep.subr.bf16.mxu1 %v1685_v8 }
 0x305   : > { %v1784_v46 = vpop.permute.xlu0 %1783  ;;  %v1816_v58 = vsel %vm960_vm2, %v1778_v45, %v1780_v13 }
 0x307   : > { %1717 = vmatpush1.bf16.msra.mxu1 %v1684_v47 }
 0x308   : > { %v1776_v49 = vpop.permute.xlu1 %1775  ;;  %1843 = vmatprep.subr.bf16.mxu1 %v1812_v48 }
 0x309   : > { %v1782_v51 = vpop.permute.xlu0 %1781  ;;  %v1815_v29 = vsel %vm960_vm2, %v1776_v49, %v1778_v45  ;;  %v11914_v49 = vld [vmem:[%s11126_s29 + $0x1b4] ss:$12 sps:$4 sm:$0xff]  }
 0x30a   : > { %1735 = vmatmul.mubr.bf16.vlgmr.msra.gmra.mrb[4].mxu1 %v11429_v55  ;;  %v1817_v32 = vsel %vm960_vm2, %v1782_v51, %v1784_v46  ;;  %v11920_v51 = vld [vmem:[%s11126_s29 + $0x1b0] ss:$12 sps:$4 sm:$0xff]  }
 0x30b   : > { %1844 = vmatpush1.bf16.msra.mxu1 %v1811_v52  ;;  %1744 = vmatprep.mubr.bf16.mxu1 %v15839_v22  ;;  %v11923_v52 = vld [vmem:[%s11126_s29 + $0x1b8] ss:$12 sps:$4 sm:$0xff]  }
 0x30c   : > { %v1786_v54 = vpop.permute.xlu1 %1785  ;;  %1845 = vmatprep.subr.bf16.mxu1 %v1814_v53  ;;  %v11930_v53 = vld [vmem:[%s11126_s29 + $0x1d0] ss:$12 sps:$4 sm:$0xff]  }
 0x30d   : > { %v1792_v56 = vpop.permute.xlu0 %1791  ;;  %v1818_v55 = vsel %vm960_vm2, %v1784_v46, %v1786_v54  ;;  %v11933_v54 = vld [vmem:[%s11126_s29 + $0x1cc] ss:$12 sps:$4 sm:$0xff]  }
 0x30f   : > { %1846 = vmatpush1.bf16.msra.mxu1 %v1813_v57  ;;  %v11943_v57 = vld [vmem:[%s11126_s29 + $0x1c8] ss:$12 sps:$4 sm:$0xff]  }
 0x310   : > { %v1790_v18 = vpop.permute.xlu1 %1789  ;;  %1847 = vmatprep.subr.bf16.mxu1 %v1816_v58  ;;  %v11950_v58 = vld [vmem:[%s11126_s29 + $0x1e0] ss:$12 sps:$4 sm:$0xff]  }
 0x311   : > { %v1796_v20 = vpop.permute.xlu0 %1795  ;;  %v1820_v34 = vsel %vm960_vm2, %v1790_v18, %v1792_v56  ;;  %v11940_v56 = vld [vmem:[%s11126_s29 + $0x1e4] ss:$12 sps:$4 sm:$0xff]  }
 0x312   : > { %1745 = vmatmul.mubr.bf16.gmra.mrb[8].mxu1 %v11440_v2 }
 0x313   : > { %1848 = vmatpush1.bf16.msra.mxu1 %v1815_v29  ;;  %1875 = vmatprep.mubr.bf16.mxu1 %v15839_v22  ;;  %v11963_v29 = vld [vmem:[%s11126_s29 + $0x1fc] ss:$12 sps:$4 sm:$0xff]  }
 0x314   : > { %v1788_v38 = vpop.permute.xlu1 %1787  ;;  %1849 = vmatprep.subr.bf16.mxu1 %v1818_v55  ;;  %v11970_v55 = vld [vmem:[%s11126_s29 + $0x214] ss:$12 sps:$4 sm:$0xff]  }
 0x315   : > { %v1794_v7 = vpop.permute.xlu0 %1793  ;;  %v1819_v61 = vsel %vm960_vm2, %v1788_v38, %v1790_v18  ;;  %v11953_v18 = vld [vmem:[%s11126_s29 + $0x1e8] ss:$12 sps:$4 sm:$0xff]   ;;  %v11973_v38 = vld [vmem:[%s11126_s29 + $0x1f8] ss:$12 sps:$4 sm:$0xff]  }
 0x316   : > { %v1821_v62 = vsel %vm960_vm2, %v1794_v7, %v1796_v20  ;;  %v11980_v7 = vld [vmem:[%s11126_s29 + $0x210] ss:$12 sps:$4 sm:$0xff]  }
 0x317   : > { %1850 = vmatpush1.bf16.msra.mxu1 %v1817_v32  ;;  %v11983_v32 = vld [vmem:[%s11126_s29 + $0x218] ss:$12 sps:$4 sm:$0xff]  }
 0x318   : > { %v1798_v35 = vpop.permute.xlu1 %1797  ;;  %1851 = vmatprep.subr.bf16.mxu1 %v1820_v34  ;;  %v11990_v34 = vld [vmem:[%s11126_s29 + $0x230] ss:$12 sps:$4 sm:$0xff]  }
 0x319   : > { %v1804_v36 = vpop.permute.xlu0 %1803  ;;  %v1822_v2 = vsel %vm960_vm2, %v1796_v20, %v1798_v35  ;;  %v11960_v20 = vld [vmem:[%s11126_s29 + $0x200] ss:$12 sps:$4 sm:$0xff]  }
 0x31a   : > { %v11993_v35 = vld [vmem:[%s11126_s29 + $0x22c] ss:$12 sps:$4 sm:$0xff]  }
 0x31b   : > { %1852 = vmatpush1.bf16.msra.mxu1 %v1819_v61 }
 0x31c   : > { %v1802_v23 = vpop.permute.xlu1 %1801  ;;  %1853 = vmatprep.subr.bf16.mxu1 %v1822_v2 }
 0x31d   : > { %v1808_v63 = vpop.permute.xlu0 %1807  ;;  %v1824_v4 = vsel %vm960_vm2, %v1802_v23, %v1804_v36  ;;  %v12000_v36 = vld [vmem:[%s11126_s29 + $0x228] ss:$12 sps:$4 sm:$0xff]  }
 0x31f   : > { %1854 = vmatpush1.bf16.msra.mxu1 %v1821_v62 }
 0x320   : > { %v1800_v16 = vpop.permute.xlu1 %1799  ;;  %1855 = vmatprep.subr.bf16.mxu1 %v1824_v4 }
 0x321   : > { %v1823_v25 = vsel %vm960_vm2, %v1800_v16, %v1802_v23  ;;  %v1806_v1 = vpop.permute.xlu0 %1805 }
 0x322   : > { %v1825_v26 = vsel %vm960_vm2, %v1806_v1, %v1808_v63 }
 0x323   : > { %1856 = vmatpush1.bf16.msra.mxu1 %v1823_v25 }
 0x324   : > { %v1810_v19 = vpop.permute.xlu1 %1809 }
 0x325   : > { %v1826_v0 = vsel %vm960_vm2, %v1808_v63, %v1810_v19 }
 0x326   : > { %1857 = vmatprep.subr.bf16.mxu1 %v1826_v0 }
 0x327   : > { %1858 = vmatpush1.bf16.msra.mxu1 %v1825_v26 }
 0x32a   : > { %1876 = vmatmul.mubr.bf16.vlgmr.msra.gmra.mrb[4].mxu1 %v11459_v30  ;;  %v11868_v30 = vld [vmem:[%s11126_s29 + $0x180] ss:$12 sps:$4 sm:$0xff]  }
 0x32b   : > { %1885 = vmatprep.mubr.bf16.mxu1 %v15839_v22  ;;  %2235 = vrot.lane.b32.xlu0 %v11868_v30, %s15823_s30 }
 0x32f   : > { %2245 = vrot.lane.b32.xlu0 %v11878_v12, %s15823_s30 }
 0x332   : > { %1886 = vmatmul.mubr.bf16.gmra.mrb[8].mxu1 %v11466_v31  ;;  %v11871_v31 = vld [vmem:[%s11126_s29 + $0x19c] ss:$12 sps:$4 sm:$0xff]  }
 0x333   : > { %2900 = vmatprep.mubr.f32.mxu1 %v15841_v60  ;;  %2243 = vrot.lane.b32.xlu1 %v11871_v31, %s15823_s30 }
 0x337   : > { %2241 = vrot.lane.b32.xlu1 %v11881_v39, %s15823_s30 }
 0x364   : > { %v12038_v61 = vpop.permute.xlu0 %2237 }
 0x366   : > { %v12040_v2 = vpop.permute.xlu1 %2239 }
 0x37c   : > { %v11849_v6 = vpop.f32.mrb[0].mxu1 }
 0x37d   : > { %v11851_v5 = vpop.f32.mrb[1].mxu1 }
 0x380   : > { %v11853_v27 = vpop.f32.mrb[2].mxu1 }
 0x381   : > { %v11855_v28 = vpop.f32.mrb[3].mxu1 }
 0x382   : > { %15862 = vst [vmem:[#allocation11_spill] sm:$0xff] %v11855_v28 }
 0x39d   : > { %v12046_v23 = vpop.permute.xlu0 %2235 }
 0x3a1   : > { %v12058_v62 = vpop.permute.xlu0 %2245 }
 0x3a5   : > { %v12048_v63 = vpop.permute.xlu1 %2243 }
 0x3a9   : > { %v12060_v4 = vpop.permute.xlu1 %2241 }
 0x3fd   : > { %v1877_v17 = vpop.f32.mrb[4].mxu1 }
 0x3fe   : > { %v1879_v40 = vpop.f32.mrb[5].mxu1 }
 0x3ff   : > { %v1881_v41 = vpop.f32.mrb[6].mxu1 }
 0x400   : > { %v1904_v42 = vmax.f32 %v1877_v17, %v1881_v41  ;;  %v1883_v11 = vpop.f32.mrb[7].mxu1 }
 0x401   : > { %v1905_v15 = vmax.f32 %v1879_v40, %v1883_v11 }
 0x405   : > { %v1887_v24 = vpop.f32.mrb[8].mxu1 }
 0x406   : > { %v1889_v37 = vpop.f32.mrb[9].mxu1 }
 0x407   : > { %v1891_v43 = vpop.f32.mrb[10].mxu1 }
 0x408   : > { %v1906_v59 = vmax.f32 %v1887_v24, %v1891_v43  ;;  %v1893_v33 = vpop.f32.mrb[11].mxu1 }
 0x409   : > { %v1907_v10 = vmax.f32 %v1889_v37, %v1893_v33 }
 0x40a   : > { %v1908_v13 = vmax.f32 %v1904_v42, %v1906_v59 }
 0x40b   : > { %v1909_v44 = vmax.f32 %v1905_v15, %v1907_v10 }
 0x40c   : > { %v11888_v8 = vadd.f32 %v1908_v13, %v11499_v50 }
 0x40d   : > { %v11891_v45 = vadd.f32 %v1909_v44, %v11499_v50 }
 0x40e   : > { %v1912_v46 = vmax.f32 %v11888_v8, 0.0 }
 0x40f   : > { %v1913_v47 = vmax.f32 %v11891_v45, 0.0 }
 0x411   : > { %v9869_v48 = vpack.i.bf16 %v1913_v47, %v1912_v46 }
 0x413   : > { %9870 = vrot.lane.b32.xlu0 %v9869_v48, %s15863_s26  ;;  %9865 = vrot.lane.b32.xlu1 %v9869_v48, %s15823_s30  ;;  %s15867_s30 = smov 80  }
 0x417   : > { %9880 = vrot.lane.b32.xlu0 %v9869_v48, %s15825_s11  ;;  %9875 = vrot.lane.b32.xlu1 %v9869_v48, %s15864_s27  ;;  %s15868_s11 = smov 93  }
 0x41b   : > { %9890 = vrot.lane.b32.xlu0 %v9869_v48, %s15827_s20  ;;  %9885 = vrot.lane.b32.xlu1 %v9869_v48, %s15833_s12  ;;  %s15870_s20 = smov 79   ;;  %s15873_s12 = smov 112  }
 0x41f   : > { %9900 = vrot.lane.b32.xlu0 %v9869_v48, %s15829_s25  ;;  %9895 = vrot.lane.b32.xlu1 %v9869_v48, %s15865_s21  ;;  %s15871_s25 = smov 127  }
 0x423   : > { %9910 = vrot.lane.b32.xlu0 %v9869_v48, %s15831_s28  ;;  %9905 = vrot.lane.b32.xlu1 %v9869_v48, %s15866_s18  ;;  %s15872_s28 = smov 77  }
 0x427   : > { %9920 = vrot.lane.b32.xlu0 %v9869_v48, %s15867_s30  ;;  %9915 = vrot.lane.b32.xlu1 %v9869_v48, %s15868_s11 }
 0x42b   : > { %9930 = vrot.lane.b32.xlu0 %v9869_v48, %s15869_s0  ;;  %9925 = vrot.lane.b32.xlu1 %v9869_v48, %s15870_s20 }
 0x42f   : > { %2249 = vrot.lane.b32.xlu0 %v11914_v49, %s15871_s25  ;;  %9935 = vrot.lane.b32.xlu1 %v9869_v48, %s15872_s28 }
 0x433   : > { %2247 = vrot.lane.b32.xlu0 %v11920_v51, %s15871_s25  ;;  %2251 = vrot.lane.b32.xlu1 %v11923_v52, %s15871_s25 }
 0x437   : > { %2257 = vrot.lane.b32.xlu0 %v11930_v53, %s15871_s25  ;;  %2255 = vrot.lane.b32.xlu1 %v11933_v54, %s15871_s25 }
 0x43b   : > { %2261 = vrot.lane.b32.xlu0 %v11940_v56, %s15871_s25  ;;  %2253 = vrot.lane.b32.xlu1 %v11943_v57, %s15871_s25 }
 0x43f   : > { %2259 = vrot.lane.b32.xlu0 %v11950_v58, %s15871_s25  ;;  %2263 = vrot.lane.b32.xlu1 %v11953_v18, %s15871_s25 }
 0x443   : > { %2269 = vrot.lane.b32.xlu0 %v11960_v20, %s15871_s25  ;;  %2267 = vrot.lane.b32.xlu1 %v11963_v29, %s15871_s25 }
 0x447   : > { %2273 = vrot.lane.b32.xlu0 %v11970_v55, %s15871_s25  ;;  %2265 = vrot.lane.b32.xlu1 %v11973_v38, %s15871_s25 }
 0x44b   : > { %2271 = vrot.lane.b32.xlu0 %v11980_v7, %s15871_s25  ;;  %2275 = vrot.lane.b32.xlu1 %v11983_v32, %s15871_s25 }
 0x44f   : > { %2281 = vrot.lane.b32.xlu0 %v11990_v34, %s15871_s25  ;;  %2279 = vrot.lane.b32.xlu1 %v11993_v35, %s15871_s25 }
 0x453   : > { %2439 = vrot.lane.b32.xlu0 %v11858_v9, %s15873_s12  ;;  %2277 = vrot.lane.b32.xlu1 %v12000_v36, %s15871_s25 }
 0x457   : > { %2437 = vrot.lane.b32.xlu0 %v11868_v30, %s15873_s12  ;;  %2441 = vrot.lane.b32.xlu1 %v11861_v14, %s15873_s12 }
 0x45b   : > { %2447 = vrot.lane.b32.xlu0 %v11878_v12, %s15873_s12  ;;  %2445 = vrot.lane.b32.xlu1 %v11871_v31, %s15873_s12 }
 0x45f   : > { %2451 = vrot.lane.b32.xlu0 %v11914_v49, %s15873_s12  ;;  %2443 = vrot.lane.b32.xlu1 %v11881_v39, %s15873_s12 }
 0x463   : > { %2449 = vrot.lane.b32.xlu0 %v11920_v51, %s15873_s12  ;;  %2453 = vrot.lane.b32.xlu1 %v11923_v52, %s15873_s12 }
 0x467   : > { %2459 = vrot.lane.b32.xlu0 %v11930_v53, %s15873_s12  ;;  %2457 = vrot.lane.b32.xlu1 %v11933_v54, %s15873_s12 }
 0x46b   : > { %2463 = vrot.lane.b32.xlu0 %v11940_v56, %s15873_s12  ;;  %2455 = vrot.lane.b32.xlu1 %v11943_v57, %s15873_s12 }
 0x46f   : > { %2461 = vrot.lane.b32.xlu0 %v11950_v58, %s15873_s12  ;;  %2465 = vrot.lane.b32.xlu1 %v11953_v18, %s15873_s12 }
 0x473   : > { %2471 = vrot.lane.b32.xlu0 %v11960_v20, %s15873_s12  ;;  %2469 = vrot.lane.b32.xlu1 %v11963_v29, %s15873_s12 }
 0x477   : > { %2475 = vrot.lane.b32.xlu0 %v11970_v55, %s15873_s12  ;;  %2467 = vrot.lane.b32.xlu1 %v11973_v38, %s15873_s12 }
 0x47b   : > { %2473 = vrot.lane.b32.xlu0 %v11980_v7, %s15873_s12  ;;  %2477 = vrot.lane.b32.xlu1 %v11983_v32, %s15873_s12 }
 0x47f   : > { %2483 = vrot.lane.b32.xlu0 %v11990_v34, %s15873_s12  ;;  %2481 = vrot.lane.b32.xlu1 %v11993_v35, %s15873_s12 }
 0x483   : > { %2580 = vrot.lane.b32.xlu0 %v11858_v9, %s15874_s2  ;;  %2479 = vrot.lane.b32.xlu1 %v12000_v36, %s15873_s12 }
 0x485   : > { %v9871_v16 = vpop.permute.xlu0 %9870  ;;  %v9866_v25 = vpop.permute.xlu1 %9865 }
 0x486   : > { %v9868_v1 = vunpack.i.h.bf16 %v9866_v25  ;;  %v9867_v19 = vunpack.i.l.bf16 %v9866_v25  ;;  %v9873_v0 = vunpack.i.h.bf16 %v9871_v16  ;;  %v9872_v26 = vunpack.i.l.bf16 %v9871_v16 }
 0x487   : > { %2578 = vrot.lane.b32.xlu0 %v11868_v30, %s15874_s2  ;;  %2582 = vrot.lane.b32.xlu1 %v11861_v14, %s15874_s2 }
 0x488   : > { %v1920_v17 = vsel %vm569_vm0, %v9867_v19, %v9868_v1  ;;  %v9117_v40 = vpack.c.bf16 %v9868_v1, %v1913_v47  ;;  %v1927_v14 = vsel %vm1084_vm3, %v9872_v26, %v9873_v0 }
 0x489   : > { %v9881_v41 = vpop.permute.xlu0 %9880  ;;  %v9876_v42 = vpop.permute.xlu1 %9875  ;;  %v9119_v11 = vpack.c.bf16 %v1920_v17, %v1912_v46 }
 0x48a   : > { %v9878_v15 = vunpack.i.h.bf16 %v9876_v42  ;;  %v9877_v24 = vunpack.i.l.bf16 %v9876_v42  ;;  %9118 = vmatprep.subr.bf16.mxu0 %v9117_v40  ;;  %v9883_v37 = vunpack.i.h.bf16 %v9881_v41  ;;  %v9882_v43 = vunpack.i.l.bf16 %v9881_v41 }
 0x48b   : > { %2588 = vrot.lane.b32.xlu0 %v11878_v12, %s15874_s2  ;;  %2586 = vrot.lane.b32.xlu1 %v11871_v31, %s15874_s2 }
 0x48c   : > { %v1934_v59 = vsel %vm1092_vm4, %v9877_v24, %v9878_v15  ;;  %9120 = vmatpush1.bf16.msra.mxu0 %v9119_v11  ;;  %v9121_v33 = vpack.c.bf16 %v9878_v15, %v9873_v0  ;;  %v1941_v46 = vsel %vm801_vm1, %v9882_v43, %v9883_v37 }
 0x48d   : > { %v9891_v10 = vpop.permute.xlu0 %9890  ;;  %v9886_v13 = vpop.permute.xlu1 %9885  ;;  %v9123_v44 = vpack.c.bf16 %v1934_v59, %v1927_v14 }
 0x48e   : > { %v9888_v8 = vunpack.i.h.bf16 %v9886_v13  ;;  %v9887_v45 = vunpack.i.l.bf16 %v9886_v13  ;;  %9122 = vmatprep.subr.bf16.mxu0 %v9121_v33  ;;  %v9893_v12 = vunpack.i.h.bf16 %v9891_v10  ;;  %v9892_v47 = vunpack.i.l.bf16 %v9891_v10 }
 0x48f   : > { %2592 = vrot.lane.b32.xlu0 %v11914_v49, %s15874_s2  ;;  %2584 = vrot.lane.b32.xlu1 %v11881_v39, %s15874_s2 }
 0x490   : > { %v1948_v48 = vsel %vm960_vm2, %v9887_v45, %v9888_v8  ;;  %9124 = vmatpush1.bf16.msra.mxu0 %v9123_v44  ;;  %v9125_v16 = vpack.c.bf16 %v9888_v8, %v9883_v37  ;;  %v1955_v41 = vsel %vm1116_vm5, %v9892_v47, %v9893_v12 }
 0x491   : > { %v9901_v25 = vpop.permute.xlu0 %9900  ;;  %v9896_v1 = vpop.permute.xlu1 %9895  ;;  %v9127_v19 = vpack.c.bf16 %v1948_v48, %v1941_v46 }
 0x492   : > { %v9898_v0 = vunpack.i.h.bf16 %v9896_v1  ;;  %v9897_v26 = vunpack.i.l.bf16 %v9896_v1  ;;  %9126 = vmatprep.subr.bf16.mxu0 %v9125_v16  ;;  %v9903_v17 = vunpack.i.h.bf16 %v9901_v25  ;;  %v9902_v40 = vunpack.i.l.bf16 %v9901_v25 }
 0x493   : > { %2590 = vrot.lane.b32.xlu0 %v11920_v51, %s15874_s2  ;;  %2594 = vrot.lane.b32.xlu1 %v11923_v52, %s15874_s2 }
 0x494   : > { %v1962_v42 = vsel %vm1124_vm6, %v9897_v26, %v9898_v0  ;;  %9128 = vmatpush1.bf16.msra.mxu0 %v9127_v19  ;;  %v9129_v11 = vpack.c.bf16 %v9898_v0, %v9893_v12  ;;  %v1969_v59 = vsel %vm1132_vm8, %v9902_v40, %v9903_v17 }
 0x495   : > { %v9911_v15 = vpop.permute.xlu0 %9910  ;;  %v9906_v24 = vpop.permute.xlu1 %9905  ;;  %v9131_v37 = vpack.c.bf16 %v1962_v42, %v1955_v41 }
 0x496   : > { %v9908_v43 = vunpack.i.h.bf16 %v9906_v24  ;;  %v9907_v14 = vunpack.i.l.bf16 %v9906_v24  ;;  %9130 = vmatprep.subr.bf16.mxu0 %v9129_v11  ;;  %v9913_v52 = vunpack.i.h.bf16 %v9911_v15  ;;  %v9912_v33 = vunpack.i.l.bf16 %v9911_v15 }
 0x497   : > { %2600 = vrot.lane.b32.xlu0 %v11930_v53, %s15874_s2  ;;  %2598 = vrot.lane.b32.xlu1 %v11933_v54, %s15874_s2 }
 0x498   : > { %v1976_v10 = vsel %vm1140_vm7, %v9907_v14, %v9908_v43  ;;  %9132 = vmatpush1.bf16.msra.mxu0 %v9131_v37  ;;  %v9133_v13 = vpack.c.bf16 %v9908_v43, %v9903_v17  ;;  %v1983_v53 = vsel %vm1148_vm9, %v9912_v33, %v9913_v52 }
 0x499   : > { %v9921_v44 = vpop.permute.xlu0 %9920  ;;  %v9916_v8 = vpop.permute.xlu1 %9915  ;;  %v9135_v45 = vpack.c.bf16 %v1976_v10, %v1969_v59 }
 0x49a   : > { %v9918_v46 = vunpack.i.h.bf16 %v9916_v8  ;;  %v9917_v12 = vunpack.i.l.bf16 %v9916_v8  ;;  %9134 = vmatprep.subr.bf16.mxu0 %v9133_v13  ;;  %v9923_v47 = vunpack.i.h.bf16 %v9921_v44  ;;  %v9922_v48 = vunpack.i.l.bf16 %v9921_v44 }
 0x49b   : > { %2604 = vrot.lane.b32.xlu0 %v11940_v56, %s15874_s2  ;;  %2596 = vrot.lane.b32.xlu1 %v11943_v57, %s15874_s2 }
 0x49c   : > { %v1990_v16 = vsel %vm1156_vm10, %v9917_v12, %v9918_v46  ;;  %9136 = vmatpush1.bf16.msra.mxu0 %v9135_v45  ;;  %v9137_v25 = vpack.c.bf16 %v9918_v46, %v9913_v52  ;;  %v1997_v40 = vsel %vm1164_vm12, %v9922_v48, %v9923_v47  ;;  %v2283_v46 = vsel %vm569_vm0, %v12046_v23, %v12038_v61 }
 0x49d   : > { %v9931_v1 = vpop.permute.xlu0 %9930  ;;  %v9926_v19 = vpop.permute.xlu1 %9925  ;;  %v9139_v0 = vpack.c.bf16 %v1990_v16, %v1983_v53 }
 0x49e   : > { %v9928_v26 = vunpack.i.h.bf16 %v9926_v19  ;;  %v9927_v17 = vunpack.i.l.bf16 %v9926_v19  ;;  %9138 = vmatprep.subr.bf16.mxu0 %v9137_v25  ;;  %v9933_v41 = vunpack.i.h.bf16 %v9931_v1  ;;  %v9932_v42 = vunpack.i.l.bf16 %v9931_v1 }
 0x49f   : > { %2602 = vrot.lane.b32.xlu0 %v11950_v58, %s15874_s2  ;;  %2606 = vrot.lane.b32.xlu1 %v11953_v18, %s15874_s2 }
 0x4a0   : > { %v2004_v11 = vsel %vm1172_vm11, %v9927_v17, %v9928_v26  ;;  %9140 = vmatpush1.bf16.msra.mxu0 %v9139_v0  ;;  %v9141_v15 = vpack.c.bf16 %v9928_v26, %v9923_v47  ;;  %v2011_v18 = vsel %vm1180_vm13, %v9932_v42, %v9933_v41 }
 0x4a1   : > { %v2250_v24 = vpop.permute.xlu0 %2249  ;;  %v9936_v37 = vpop.permute.xlu1 %9935  ;;  %v9143_v43 = vpack.c.bf16 %v2004_v11, %v1997_v40 }
 0x4a2   : > { %v9938_v14 = vunpack.i.h.bf16 %v9936_v37  ;;  %v9937_v59 = vunpack.i.l.bf16 %v9936_v37  ;;  %9142 = vmatprep.subr.bf16.mxu0 %v9141_v15 }
 0x4a3   : > { %2612 = vrot.lane.b32.xlu0 %v11960_v20, %s15874_s2  ;;  %2610 = vrot.lane.b32.xlu1 %v11963_v29, %s15874_s2  ;;  %v2284_v20 = vsel %vm569_vm0, %v12038_v61, %v12040_v2  ;;  %v2286_v2 = vsel %vm569_vm0, %v12048_v63, %v12058_v62 }
 0x4a4   : > { %v2018_v52 = vsel %vm1188_vm14, %v9937_v59, %v9938_v14  ;;  %9144 = vmatpush1.bf16.msra.mxu0 %v9143_v43  ;;  %v9145_v33 = vpack.c.bf16 %v9938_v14, %v9933_v41  ;;  %v12163_v59 = vld [vmem:[%s15795_s1 + $0x10] sm:$0xff]  }
 0x4a5   : > { %v2248_v10 = vpop.permute.xlu0 %2247  ;;  %v2252_v13 = vpop.permute.xlu1 %2251  ;;  %v9147_v44 = vpack.c.bf16 %v2018_v52, %v2011_v18 }
 0x4a6   : > { %9146 = vmatprep.subr.bf16.mxu0 %v9145_v33  ;;  %v2287_v62 = vsel %vm569_vm0, %v2248_v10, %v2250_v24 }
 0x4a7   : > { %2616 = vrot.lane.b32.xlu0 %v11970_v55, %s15874_s2  ;;  %2608 = vrot.lane.b32.xlu1 %v11973_v38, %s15874_s2 }
 0x4a8   : > { %9148 = vmatpush1.bf16.msra.mxu0 %v9147_v44 }
 0x4a9   : > { %2315 = vmatprep.subr.bf16.mxu0 %v2284_v20  ;;  %v2258_v8 = vpop.permute.xlu0 %2257  ;;  %v2256_v45 = vpop.permute.xlu1 %2255 }
 0x4ab   : > { %2086 = vmatmul.mubr.f32.vlgmr.msra.gmra.mrb[8].mxu0 %v11741_v21  ;;  %2614 = vrot.lane.b32.xlu0 %v11980_v7, %s15874_s2  ;;  %v2285_v21 = vsel %vm569_vm0, %v12060_v4, %v12048_v63 }
 0x4ac   : > { %2618 = vrot.lane.b32.xlu1 %v11983_v32, %s15874_s2  ;;  %2316 = vmatpush1.bf16.msra.mxu0 %v2283_v46  ;;  %v2288_v32 = vsel %vm569_vm0, %v2250_v24, %v2252_v13 }
 0x4ad   : > { %2317 = vmatprep.subr.bf16.mxu0 %v2286_v2  ;;  %v2262_v12 = vpop.permute.xlu0 %2261  ;;  %v2254_v47 = vpop.permute.xlu1 %2253  ;;  %2091 = vmatprep.mubr.f32.mxu0 %v15841_v60 }
 0x4ae   : > { %v2289_v4 = vsel %vm569_vm0, %v2254_v47, %v2256_v45  ;;  %v12205_v47 = vld [vmem:[%s15795_s1 + $0x8] sm:$0xff]  }
 0x4af   : > { %2624 = vrot.lane.b32.xlu0 %v11990_v34, %s15874_s2  ;;  %2092 = vmatmul.mubr.f32.gmra.mrb[10].mxu0 %v11757_v3  ;;  %v2290_v34 = vsel %vm569_vm0, %v2256_v45, %v2258_v8 }
 0x4b0   : > { %2622 = vrot.lane.b32.xlu1 %v11993_v35, %s15874_s2  ;;  %2318 = vmatpush1.bf16.msra.mxu0 %v2285_v21 }
 0x4b1   : > { %2319 = vmatprep.subr.bf16.mxu0 %v2288_v32  ;;  %v2260_v61 = vpop.permute.xlu0 %2259  ;;  %v2264_v23 = vpop.permute.xlu1 %2263  ;;  %2347 = vmatprep.mubr.bf16.mxu0 %v15839_v22 }
 0x4b2   : > { %v2292_v48 = vsel %vm569_vm0, %v2262_v12, %v2264_v23  ;;  %v2291_v25 = vsel %vm569_vm0, %v2260_v61, %v2262_v12 }
 0x4b4   : > { %2620 = vrot.lane.b32.xlu1 %v12000_v36, %s15874_s2  ;;  %2320 = vmatpush1.bf16.msra.mxu0 %v2287_v62 }
 0x4b5   : > { %2321 = vmatprep.subr.bf16.mxu0 %v2290_v34  ;;  %v2270_v3 = vpop.permute.xlu0 %2269  ;;  %v2268_v63 = vpop.permute.xlu1 %2267 }
 0x4b6   : > { %v2294_v1 = vsel %vm569_vm0, %v2268_v63, %v2270_v3 }
 0x4b8   : > { %2322 = vmatpush1.bf16.msra.mxu0 %v2289_v4 }
 0x4b9   : > { %2323 = vmatprep.subr.bf16.mxu0 %v2292_v48  ;;  %v2274_v53 = vpop.permute.xlu0 %2273  ;;  %v2266_v16 = vpop.permute.xlu1 %2265 }
 0x4ba   : > { %v2293_v17 = vsel %vm569_vm0, %v2266_v16, %v2268_v63 }
 0x4bc   : > { %2324 = vmatpush1.bf16.msra.mxu0 %v2291_v25 }
 0x4bd   : > { %2325 = vmatprep.subr.bf16.mxu0 %v2294_v1  ;;  %v2272_v19 = vpop.permute.xlu0 %2271  ;;  %v2276_v0 = vpop.permute.xlu1 %2275 }
 0x4be   : > { %v2296_v26 = vsel %vm569_vm0, %v2274_v53, %v2276_v0  ;;  %v2295_v11 = vsel %vm569_vm0, %v2272_v19, %v2274_v53 }
 0x4c0   : > { %2326 = vmatpush1.bf16.msra.mxu0 %v2293_v17 }
 0x4c1   : > { %2327 = vmatprep.subr.bf16.mxu0 %v2296_v26  ;;  %v2282_v40 = vpop.permute.xlu0 %2281  ;;  %v2280_v41 = vpop.permute.xlu1 %2279 }
 0x4c2   : > { %v2298_v42 = vsel %vm569_vm0, %v2280_v41, %v2282_v40 }
 0x4c4   : > { %2328 = vmatpush1.bf16.msra.mxu0 %v2295_v11 }
 0x4c5   : > { %2329 = vmatprep.subr.bf16.mxu0 %v2298_v42  ;;  %v2440_v15 = vpop.permute.xlu0 %2439  ;;  %v2278_v24 = vpop.permute.xlu1 %2277 }
 0x4c6   : > { %v2297_v37 = vsel %vm569_vm0, %v2278_v24, %v2280_v41 }
 0x4c8   : > { %2330 = vmatpush1.bf16.msra.mxu0 %v2297_v37  ;;  %v12224_v37 = vld [vmem:[%s15795_s1 + $0x20] sm:$0xff]  }
 0x4c9   : > { %v2438_v43 = vpop.permute.xlu0 %2437  ;;  %v2442_v14 = vpop.permute.xlu1 %2441  ;;  %2384 = vmatprep.subr.bf16.mxu0 %v11858_v9  ;;  %v12174_v9 = vld [vmem:[%s15795_s1 + $0x18] sm:$0xff]  }
 0x4cb   : > { %2348 = vmatmul.mubr.bf16.vlgmr.msra.gmra.mrb[12].mxu0 %v12163_v59 }
 0x4cc   : > { %2385 = vmatpush1.bf16.msra.mxu0 %v11868_v30  ;;  %2357 = vmatprep.mubr.bf16.mxu0 %v15839_v22 }
 0x4cd   : > { %v2448_v18 = vpop.permute.xlu0 %2447  ;;  %v2446_v52 = vpop.permute.xlu1 %2445  ;;  %2386 = vmatprep.subr.bf16.mxu0 %v11871_v31 }
 0x4d0   : > { %2387 = vmatpush1.bf16.msra.mxu0 %v11881_v39 }
 0x4d1   : > { %v2452_v33 = vpop.permute.xlu0 %2451  ;;  %v2444_v10 = vpop.permute.xlu1 %2443  ;;  %2388 = vmatprep.subr.bf16.mxu0 %v11914_v49 }
 0x4d3   : > { %2358 = vmatmul.mubr.bf16.gmra.mrb[16].mxu0 %v12174_v9 }
 0x4d4   : > { %2389 = vmatpush1.bf16.msra.mxu0 %v11920_v51  ;;  %2416 = vmatprep.mubr.bf16.mxu0 %v15839_v22 }
 0x4d5   : > { %v2450_v30 = vpop.permute.xlu0 %2449  ;;  %v2454_v13 = vpop.permute.xlu1 %2453  ;;  %2390 = vmatprep.subr.bf16.mxu0 %v11933_v54 }
 0x4d6   : > { %v2490_v45 = vsel %vm801_vm1, %v2452_v33, %v2454_v13  ;;  %v2489_v12 = vsel %vm801_vm1, %v2450_v30, %v2452_v33 }
 0x4d8   : > { %2391 = vmatpush1.bf16.msra.mxu0 %v11943_v57 }
 0x4d9   : > { %v2460_v31 = vpop.permute.xlu0 %2459  ;;  %v2458_v39 = vpop.permute.xlu1 %2457  ;;  %2392 = vmatprep.subr.bf16.mxu0 %v11940_v56  ;;  %v2486_v56 = vsel %vm801_vm1, %v2440_v15, %v2442_v14 }
 0x4da   : > { %v2492_v21 = vsel %vm801_vm1, %v2458_v39, %v2460_v31  ;;  %v12235_v31 = vld [vmem:[%s15795_s1 + $0x28] sm:$0xff]  }
 0x4dc   : > { %2393 = vmatpush1.bf16.msra.mxu0 %v11950_v58 }
 0x4dd   : > { %v2464_v49 = vpop.permute.xlu0 %2463  ;;  %v2456_v44 = vpop.permute.xlu1 %2455  ;;  %2394 = vmatprep.subr.bf16.mxu0 %v11963_v29  ;;  %v2485_v29 = vsel %vm801_vm1, %v2438_v43, %v2440_v15 }
 0x4de   : > { %v2491_v23 = vsel %vm801_vm1, %v2456_v44, %v2458_v39 }
 0x4e0   : > { %2395 = vmatpush1.bf16.msra.mxu0 %v11973_v38  ;;  %v12194_v38 = vld [vmem:[%s15795_s1] sm:$0xff]  }
 0x4e1   : > { %v2462_v51 = vpop.permute.xlu0 %2461  ;;  %v2466_v20 = vpop.permute.xlu1 %2465  ;;  %2396 = vmatprep.subr.bf16.mxu0 %v11970_v55  ;;  %v2488_v55 = vsel %vm801_vm1, %v2446_v52, %v2448_v18 }
 0x4e2   : > { %v2494_v62 = vsel %vm801_vm1, %v2464_v49, %v2466_v20  ;;  %v2493_v63 = vsel %vm801_vm1, %v2462_v51, %v2464_v49 }
 0x4e4   : > { %2397 = vmatpush1.bf16.msra.mxu0 %v11980_v7 }
 0x4e5   : > { %v2472_v54 = vpop.permute.xlu0 %2471  ;;  %v2470_v57 = vpop.permute.xlu1 %2469  ;;  %2398 = vmatprep.subr.bf16.mxu0 %v11993_v35 }
 0x4e6   : > { %v2496_v4 = vsel %vm801_vm1, %v2470_v57, %v2472_v54 }
 0x4e8   : > { %2399 = vmatpush1.bf16.msra.mxu0 %v12000_v36  ;;  %v2487_v36 = vsel %vm801_vm1, %v2444_v10, %v2446_v52 }
 0x4e9   : > { %2517 = vmatprep.subr.bf16.mxu0 %v2486_v56  ;;  %v2476_v58 = vpop.permute.xlu0 %2475  ;;  %v2468_v8 = vpop.permute.xlu1 %2467 }
 0x4ea   : > { %v2495_v16 = vsel %vm801_vm1, %v2468_v8, %v2470_v57 }
 0x4eb   : > { %2417 = vmatmul.mubr.bf16.vlgmr.msra.gmra.mrb[12].mxu0 %v12194_v38 }
 0x4ec   : > { %2518 = vmatpush1.bf16.msra.mxu0 %v2485_v29  ;;  %2426 = vmatprep.mubr.bf16.mxu0 %v15839_v22 }
 0x4ed   : > { %2519 = vmatprep.subr.bf16.mxu0 %v2488_v55  ;;  %v2474_v7 = vpop.permute.xlu0 %2473  ;;  %v2478_v35 = vpop.permute.xlu1 %2477 }
 0x4ee   : > { %v2498_v25 = vsel %vm801_vm1, %v2476_v58, %v2478_v35  ;;  %v2497_v0 = vsel %vm801_vm1, %v2474_v7, %v2476_v58 }
 0x4f0   : > { %2520 = vmatpush1.bf16.msra.mxu0 %v2487_v36 }
 0x4f1   : > { %2521 = vmatprep.subr.bf16.mxu0 %v2490_v45  ;;  %v2484_v46 = vpop.permute.xlu0 %2483  ;;  %v2482_v2 = vpop.permute.xlu1 %2481 }
 0x4f2   : > { %v2500_v26 = vsel %vm801_vm1, %v2482_v2, %v2484_v46 }
 0x4f3   : > { %2427 = vmatmul.mubr.bf16.gmra.mrb[16].mxu0 %v12205_v47 }
 0x4f4   : > { %2522 = vmatpush1.bf16.msra.mxu0 %v2489_v12  ;;  %2549 = vmatprep.mubr.bf16.mxu0 %v15839_v22 }
 0x4f5   : > { %2523 = vmatprep.subr.bf16.mxu0 %v2492_v21  ;;  %v2581_v32 = vpop.permute.xlu0 %2580  ;;  %v2480_v61 = vpop.permute.xlu1 %2479  ;;  %v12252_v21 = vld [vmem:[%s15795_s1 + $0x30] sm:$0xff]  }
 0x4f6   : > { %v2499_v41 = vsel %vm801_vm1, %v2480_v61, %v2482_v2 }
 0x4f8   : > { %2524 = vmatpush1.bf16.msra.mxu0 %v2491_v23 }
 0x4f9   : > { %2525 = vmatprep.subr.bf16.mxu0 %v2494_v62  ;;  %v2579_v34 = vpop.permute.xlu0 %2578  ;;  %v2583_v3 = vpop.permute.xlu1 %2582 }
 0x4fa   : > { %v2627_v42 = vsel %vm960_vm2, %v2581_v32, %v2583_v3  ;;  %v2626_v24 = vsel %vm960_vm2, %v2579_v34, %v2581_v32  ;;  %v12259_v32 = vld [vmem:[%s15795_s1 + $0x38] sm:$0xff]   ;;  %v12270_v34 = vld [vmem:[%s11126_s29 + $0x248] ss:$12 sps:$4 sm:$0xff]   ;;  %v12273_v3 = vld [vmem:[%s11126_s29 + $0x244] ss:$12 sps:$4 sm:$0xff]  }
 0x4fb   : > { %3054 = vrot.lane.b32.xlu0 %v12270_v34, %s15871_s25  ;;  %3052 = vrot.lane.b32.xlu1 %v12273_v3, %s15871_s25 }
 0x4fc   : > { %2526 = vmatpush1.bf16.msra.mxu0 %v2493_v63 }
 0x4fd   : > { %2527 = vmatprep.subr.bf16.mxu0 %v2496_v4  ;;  %v2589_v48 = vpop.permute.xlu0 %2588  ;;  %v2587_v53 = vpop.permute.xlu1 %2586  ;;  %v12282_v4 = vld [vmem:[%s11126_s29 + $0x25c] ss:$12 sps:$4 sm:$0xff]  }
 0x4fe   : > { %v2629_v43 = vsel %vm960_vm2, %v2587_v53, %v2589_v48  ;;  %v12285_v48 = vld [vmem:[%s11126_s29 + $0x240] ss:$12 sps:$4 sm:$0xff]  }
 0x4ff   : > { %3058 = vrot.lane.b32.xlu0 %v12282_v4, %s15871_s25  ;;  %3050 = vrot.lane.b32.xlu1 %v12285_v48, %s15871_s25 }
 0x500   : > { %2528 = vmatpush1.bf16.msra.mxu0 %v2495_v16  ;;  %v12295_v16 = vld [vmem:[%s11126_s29 + $0x260] ss:$12 sps:$4 sm:$0xff]  }
 0x501   : > { %2529 = vmatprep.subr.bf16.mxu0 %v2498_v25  ;;  %v2593_v1 = vpop.permute.xlu0 %2592  ;;  %v2585_v19 = vpop.permute.xlu1 %2584 }
 0x502   : > { %v2628_v52 = vsel %vm960_vm2, %v2585_v19, %v2587_v53  ;;  %v12292_v53 = vld [vmem:[%s11126_s29 + $0x258] ss:$12 sps:$4 sm:$0xff]  }
 0x503   : > { %3056 = vrot.lane.b32.xlu0 %v12292_v53, %s15871_s25  ;;  %3060 = vrot.lane.b32.xlu1 %v12295_v16, %s15871_s25 }
 0x504   : > { %2530 = vmatpush1.bf16.msra.mxu0 %v2497_v0 }
 0x505   : > { %2531 = vmatprep.subr.bf16.mxu0 %v2500_v26  ;;  %v2591_v17 = vpop.permute.xlu0 %2590  ;;  %v2595_v40 = vpop.permute.xlu1 %2594 }
 0x506   : > { %v2631_v33 = vsel %vm960_vm2, %v2593_v1, %v2595_v40  ;;  %v2630_v13 = vsel %vm960_vm2, %v2591_v17, %v2593_v1 }
 0x508   : > { %2532 = vmatpush1.bf16.msra.mxu0 %v2499_v41 }
 0x509   : > { %2658 = vmatprep.subr.bf16.mxu0 %v2627_v42  ;;  %v2601_v11 = vpop.permute.xlu0 %2600  ;;  %v2599_v15 = vpop.permute.xlu1 %2598 }
 0x50a   : > { %v2633_v39 = vsel %vm960_vm2, %v2599_v15, %v2601_v11 }
 0x50b   : > { %2550 = vmatmul.mubr.bf16.vlgmr.msra.gmra.mrb[12].mxu0 %v12224_v37 }
 0x50c   : > { %2659 = vmatpush1.bf16.msra.mxu0 %v2626_v24  ;;  %2559 = vmatprep.mubr.bf16.mxu0 %v15839_v22 }
 0x50d   : > { %2660 = vmatprep.subr.bf16.mxu0 %v2629_v43  ;;  %v2605_v14 = vpop.permute.xlu0 %2604  ;;  %v2597_v18 = vpop.permute.xlu1 %2596 }
 0x50e   : > { %v2632_v51 = vsel %vm960_vm2, %v2597_v18, %v2599_v15 }
 0x510   : > { %2661 = vmatpush1.bf16.msra.mxu0 %v2628_v52 }
 0x511   : > { %2662 = vmatprep.subr.bf16.mxu0 %v2631_v33  ;;  %v2603_v10 = vpop.permute.xlu0 %2602  ;;  %v2607_v30 = vpop.permute.xlu1 %2606 }
 0x512   : > { %v2635_v20 = vsel %vm960_vm2, %v2605_v14, %v2607_v30  ;;  %v2634_v56 = vsel %vm960_vm2, %v2603_v10, %v2605_v14 }
 0x513   : > { %2560 = vmatmul.mubr.bf16.gmra.mrb[16].mxu0 %v12235_v31 }
 0x514   : > { %2663 = vmatpush1.bf16.msra.mxu0 %v2630_v13  ;;  %2690 = vmatprep.mubr.bf16.mxu0 %v15839_v22  ;;  %v12328_v13 = vld [vmem:[%s11126_s29 + $0x274] ss:$12 sps:$4 sm:$0xff]  }
 0x515   : > { %2664 = vmatprep.subr.bf16.mxu0 %v2633_v39  ;;  %v2613_v49 = vpop.permute.xlu0 %2612  ;;  %v2611_v44 = vpop.permute.xlu1 %2610  ;;  %v12334_v39 = vld [vmem:[%s11126_s29 + $0x270] ss:$12 sps:$4 sm:$0xff]  }
 0x516   : > { %v2637_v58 = vsel %vm960_vm2, %v2611_v44, %v2613_v49  ;;  %v12337_v49 = vld [vmem:[%s11126_s29 + $0x278] ss:$12 sps:$4 sm:$0xff]  }
 0x518   : > { %2665 = vmatpush1.bf16.msra.mxu0 %v2632_v51  ;;  %v12347_v51 = vld [vmem:[%s11126_s29 + $0x28c] ss:$12 sps:$4 sm:$0xff]  }
 0x519   : > { %2666 = vmatprep.subr.bf16.mxu0 %v2635_v20  ;;  %v2617_v54 = vpop.permute.xlu0 %2616  ;;  %v2609_v57 = vpop.permute.xlu1 %2608  ;;  %v12354_v20 = vld [vmem:[%s11126_s29 + $0x2a4] ss:$12 sps:$4 sm:$0xff]  }
 0x51a   : > { %v2636_v55 = vsel %vm960_vm2, %v2609_v57, %v2611_v44  ;;  %v12344_v44 = vld [vmem:[%s11126_s29 + $0x290] ss:$12 sps:$4 sm:$0xff]   ;;  %v12364_v57 = vld [vmem:[%s11126_s29 + $0x2a0] ss:$12 sps:$4 sm:$0xff]  }
 0x51c   : > { %2667 = vmatpush1.bf16.msra.mxu0 %v2634_v56  ;;  %v12367_v56 = vld [vmem:[%s11126_s29 + $0x2a8] ss:$12 sps:$4 sm:$0xff]  }
 0x51d   : > { %2668 = vmatprep.subr.bf16.mxu0 %v2637_v58  ;;  %v2615_v8 = vpop.permute.xlu0 %2614  ;;  %v12374_v58 = vld [vmem:[%s11126_s29 + $0x2c0] ss:$12 sps:$4 sm:$0xff]  }
 0x51e   : > { %v2619_v29 = vpop.permute.xlu1 %2618  ;;  %v2638_v45 = vsel %vm960_vm2, %v2615_v8, %v2617_v54  ;;  %v12377_v8 = vld [vmem:[%s11126_s29 + $0x2bc] ss:$12 sps:$4 sm:$0xff]  }
 0x51f   : > { %v2639_v7 = vsel %vm960_vm2, %v2617_v54, %v2619_v29  ;;  %v12357_v54 = vld [vmem:[%s11126_s29 + $0x288] ss:$12 sps:$4 sm:$0xff]  }
 0x520   : > { %2669 = vmatpush1.bf16.msra.mxu0 %v2636_v55  ;;  %v12384_v29 = vld [vmem:[%s11126_s29 + $0x2d4] ss:$12 sps:$4 sm:$0xff]   ;;  %v12387_v55 = vld [vmem:[%s11126_s29 + $0x2b8] ss:$12 sps:$4 sm:$0xff]  }
 0x521   : > { %2670 = vmatprep.subr.bf16.mxu0 %v2639_v7  ;;  %v2625_v35 = vpop.permute.xlu0 %2624  ;;  %v12394_v7 = vld [vmem:[%s11126_s29 + $0x2d0] ss:$12 sps:$4 sm:$0xff]  }
 0x522   : > { %v2623_v36 = vpop.permute.xlu1 %2622 }
 0x523   : > { %v2641_v46 = vsel %vm960_vm2, %v2623_v36, %v2625_v35  ;;  %v12397_v35 = vld [vmem:[%s11126_s29 + $0x2d8] ss:$12 sps:$4 sm:$0xff]  }
 0x524   : > { %2671 = vmatpush1.bf16.msra.mxu0 %v2638_v45  ;;  %v12407_v45 = vld [vmem:[%s11126_s29 + $0x2ec] ss:$12 sps:$4 sm:$0xff]  }
 0x525   : > { %2672 = vmatprep.subr.bf16.mxu0 %v2641_v46  ;;  %v12414_v46 = vld [vmem:[%s11126_s29 + $0x2e8] ss:$12 sps:$4 sm:$0xff]  }
 0x526   : > { %v2621_v2 = vpop.permute.xlu1 %2620 }
 0x527   : > { %v2640_v12 = vsel %vm960_vm2, %v2621_v2, %v2623_v36  ;;  %v12404_v36 = vld [vmem:[%s11126_s29 + $0x2f0] ss:$12 sps:$4 sm:$0xff]  }
 0x528   : > { %2673 = vmatpush1.bf16.msra.mxu0 %v2640_v12 }
 0x52b   : > { %2691 = vmatmul.mubr.bf16.vlgmr.msra.gmra.mrb[12].mxu0 %v12252_v21 }
 0x52c   : > { %2700 = vmatprep.mubr.bf16.mxu0 %v15839_v22 }
 0x533   : > { %2701 = vmatmul.mubr.bf16.gmra.mrb[16].mxu0 %v12259_v32 }
 0x534   : > { %3715 = vmatprep.mubr.f32.mxu0 %v15841_v60 }
 0x56d   : > { %v12452_v2 = vpop.permute.xlu0 %3054  ;;  %v12454_v12 = vpop.permute.xlu1 %3052 }
 0x57e   : > { %v12263_v61 = vpop.f32.mrb[8].mxu0 }
 0x57f   : > { %v12265_v23 = vpop.f32.mrb[9].mxu0 }
 0x580   : > { %15875 = vst [vmem:[#allocation12_spill] sm:$0xff] %v12265_v23 }
 0x582   : > { %v12267_v62 = vpop.f32.mrb[10].mxu0 }
 0x583   : > { %v12275_v63 = vpop.f32.mrb[11].mxu0 }
 0x584   : > { %15876 = vst [vmem:[#allocation13_spill] sm:$0xff] %v12275_v63 }
 0x5fe   : > { %v2692_v25 = vpop.f32.mrb[12].mxu0 }
 0x5ff   : > { %v2694_v1 = vpop.f32.mrb[13].mxu0 }
 0x600   : > { %v2696_v19 = vpop.f32.mrb[14].mxu0 }
 0x601   : > { %v2719_v0 = vmax.f32 %v2692_v25, %v2696_v19  ;;  %v2698_v26 = vpop.f32.mrb[15].mxu0  ;;  %v12460_v25 = vpop.permute.xlu0 %3058 }
 0x602   : > { %v2720_v17 = vmax.f32 %v2694_v1, %v2698_v26  ;;  %v12462_v1 = vpop.permute.xlu1 %3050 }
 0x605   : > { %v12472_v19 = vpop.permute.xlu0 %3056 }
 0x606   : > { %v2702_v40 = vpop.f32.mrb[16].mxu0 }
 0x607   : > { %v2704_v41 = vpop.f32.mrb[17].mxu0 }
 0x608   : > { %v2706_v42 = vpop.f32.mrb[18].mxu0 }
 0x609   : > { %v2721_v11 = vmax.f32 %v2702_v40, %v2706_v42  ;;  %v2708_v15 = vpop.f32.mrb[19].mxu0 }
 0x60a   : > { %v2722_v24 = vmax.f32 %v2704_v41, %v2708_v15 }
 0x60b   : > { %v2723_v43 = vmax.f32 %v2719_v0, %v2721_v11  ;;  %v12474_v0 = vpop.permute.xlu1 %3060 }
 0x60c   : > { %v2724_v14 = vmax.f32 %v2720_v17, %v2722_v24 }
 0x60d   : > { %v12302_v18 = vadd.f32 %v2723_v43, %v11499_v50 }
 0x60e   : > { %v12305_v52 = vadd.f32 %v2724_v14, %v11499_v50 }
 0x60f   : > { %v2727_v33 = vmax.f32 %v12302_v18, 0.0 }
 0x610   : > { %v2728_v10 = vmax.f32 %v12305_v52, 0.0 }
 0x612   : > { %v9944_v30 = vpack.i.bf16 %v2728_v10, %v2727_v33 }
 0x614   : > { %9945 = vrot.lane.b32.xlu1 %v9944_v30, %s15863_s26  ;;  %9940 = vrot.lane.b32.xlu0 %v9944_v30, %s15871_s25 }
 0x618   : > { %9955 = vrot.lane.b32.xlu1 %v9944_v30, %s15873_s12  ;;  %9950 = vrot.lane.b32.xlu0 %v9944_v30, %s15864_s27 }
 0x61c   : > { %9965 = vrot.lane.b32.xlu1 %v9944_v30, %s15877_s24  ;;  %9960 = vrot.lane.b32.xlu0 %v9944_v30, %s15874_s2 }
 0x620   : > { %9975 = vrot.lane.b32.xlu1 %v9944_v30, %s15878_s15  ;;  %9970 = vrot.lane.b32.xlu0 %v9944_v30, %s15865_s21 }
 0x624   : > { %9985 = vrot.lane.b32.xlu1 %v9944_v30, %s15879_s19  ;;  %9980 = vrot.lane.b32.xlu0 %v9944_v30, %s15866_s18 }
 0x628   : > { %9995 = vrot.lane.b32.xlu1 %v9944_v30, %s15867_s30  ;;  %9990 = vrot.lane.b32.xlu0 %v9944_v30, %s15868_s11 }
 0x62c   : > { %10005 = vrot.lane.b32.xlu1 %v9944_v30, %s15869_s0  ;;  %10000 = vrot.lane.b32.xlu0 %v9944_v30, %s15870_s20 }
 0x630   : > { %3064 = vrot.lane.b32.xlu1 %v12328_v13, %s15871_s25  ;;  %10010 = vrot.lane.b32.xlu0 %v9944_v30, %s15872_s28 }
 0x634   : > { %3062 = vrot.lane.b32.xlu1 %v12334_v39, %s15871_s25  ;;  %3066 = vrot.lane.b32.xlu0 %v12337_v49, %s15871_s25 }
 0x638   : > { %3072 = vrot.lane.b32.xlu1 %v12344_v44, %s15871_s25  ;;  %3070 = vrot.lane.b32.xlu0 %v12347_v51, %s15871_s25 }
 0x63c   : > { %3076 = vrot.lane.b32.xlu1 %v12354_v20, %s15871_s25  ;;  %3068 = vrot.lane.b32.xlu0 %v12357_v54, %s15871_s25 }
 0x640   : > { %3074 = vrot.lane.b32.xlu1 %v12364_v57, %s15871_s25  ;;  %3078 = vrot.lane.b32.xlu0 %v12367_v56, %s15871_s25 }
 0x644   : > { %3084 = vrot.lane.b32.xlu1 %v12374_v58, %s15871_s25  ;;  %3082 = vrot.lane.b32.xlu0 %v12377_v8, %s15871_s25 }
 0x648   : > { %3088 = vrot.lane.b32.xlu1 %v12384_v29, %s15871_s25  ;;  %3080 = vrot.lane.b32.xlu0 %v12387_v55, %s15871_s25 }
 0x64c   : > { %3086 = vrot.lane.b32.xlu1 %v12394_v7, %s15871_s25  ;;  %3090 = vrot.lane.b32.xlu0 %v12397_v35, %s15871_s25 }
 0x650   : > { %3096 = vrot.lane.b32.xlu1 %v12404_v36, %s15871_s25  ;;  %3094 = vrot.lane.b32.xlu0 %v12407_v45, %s15871_s25 }
 0x654   : > { %3254 = vrot.lane.b32.xlu1 %v12273_v3, %s15873_s12  ;;  %3092 = vrot.lane.b32.xlu0 %v12414_v46, %s15871_s25 }
 0x658   : > { %3252 = vrot.lane.b32.xlu1 %v12285_v48, %s15873_s12  ;;  %3256 = vrot.lane.b32.xlu0 %v12270_v34, %s15873_s12 }
 0x65c   : > { %3262 = vrot.lane.b32.xlu1 %v12295_v16, %s15873_s12  ;;  %3260 = vrot.lane.b32.xlu0 %v12282_v4, %s15873_s12 }
 0x660   : > { %3266 = vrot.lane.b32.xlu1 %v12328_v13, %s15873_s12  ;;  %3258 = vrot.lane.b32.xlu0 %v12292_v53, %s15873_s12 }
 0x664   : > { %3264 = vrot.lane.b32.xlu1 %v12334_v39, %s15873_s12  ;;  %3268 = vrot.lane.b32.xlu0 %v12337_v49, %s15873_s12 }
 0x668   : > { %3274 = vrot.lane.b32.xlu1 %v12344_v44, %s15873_s12  ;;  %3272 = vrot.lane.b32.xlu0 %v12347_v51, %s15873_s12 }
 0x66c   : > { %3278 = vrot.lane.b32.xlu1 %v12354_v20, %s15873_s12  ;;  %3270 = vrot.lane.b32.xlu0 %v12357_v54, %s15873_s12 }
 0x670   : > { %3276 = vrot.lane.b32.xlu1 %v12364_v57, %s15873_s12  ;;  %3280 = vrot.lane.b32.xlu0 %v12367_v56, %s15873_s12 }
 0x674   : > { %3286 = vrot.lane.b32.xlu1 %v12374_v58, %s15873_s12  ;;  %3284 = vrot.lane.b32.xlu0 %v12377_v8, %s15873_s12 }
 0x678   : > { %3290 = vrot.lane.b32.xlu1 %v12384_v29, %s15873_s12  ;;  %3282 = vrot.lane.b32.xlu0 %v12387_v55, %s15873_s12 }
 0x67c   : > { %3288 = vrot.lane.b32.xlu1 %v12394_v7, %s15873_s12  ;;  %3292 = vrot.lane.b32.xlu0 %v12397_v35, %s15873_s12 }
 0x680   : > { %3298 = vrot.lane.b32.xlu1 %v12404_v36, %s15873_s12  ;;  %3296 = vrot.lane.b32.xlu0 %v12407_v45, %s15873_s12 }
 0x684   : > { %3395 = vrot.lane.b32.xlu1 %v12273_v3, %s15874_s2  ;;  %3294 = vrot.lane.b32.xlu0 %v12414_v46, %s15873_s12 }
 0x686   : > { %v9946_v26 = vpop.permute.xlu1 %9945  ;;  %v9941_v17 = vpop.permute.xlu0 %9940 }
 0x687   : > { %v9943_v40 = vunpack.i.h.bf16 %v9941_v17  ;;  %v9942_v41 = vunpack.i.l.bf16 %v9941_v17  ;;  %v9948_v42 = vunpack.i.h.bf16 %v9946_v26  ;;  %v9947_v11 = vunpack.i.l.bf16 %v9946_v26 }
 0x688   : > { %3393 = vrot.lane.b32.xlu1 %v12285_v48, %s15874_s2  ;;  %3397 = vrot.lane.b32.xlu0 %v12270_v34, %s15874_s2 }
 0x689   : > { %v2735_v15 = vsel %vm569_vm0, %v9942_v41, %v9943_v40  ;;  %v9149_v24 = vpack.c.bf16 %v9943_v40, %v2728_v10  ;;  %v2742_v34 = vsel %vm1084_vm3, %v9947_v11, %v9948_v42 }
 0x68a   : > { %v9956_v43 = vpop.permute.xlu1 %9955  ;;  %v9951_v14 = vpop.permute.xlu0 %9950  ;;  %v9151_v30 = vpack.c.bf16 %v2735_v15, %v2727_v33 }
 0x68b   : > { %v9953_v22 = vunpack.i.h.bf16 %v9951_v14  ;;  %v9952_v17 = vunpack.i.l.bf16 %v9951_v14  ;;  %9150 = vmatprep.subr.bf16.mxu1 %v9149_v24  ;;  %v9958_v60 = vunpack.i.h.bf16 %v9956_v43  ;;  %v9957_v23 = vunpack.i.l.bf16 %v9956_v43 }
 0x68c   : > { %3403 = vrot.lane.b32.xlu1 %v12295_v16, %s15874_s2  ;;  %3401 = vrot.lane.b32.xlu0 %v12282_v4, %s15874_s2 }
 0x68d   : > { %v2749_v52 = vsel %vm1092_vm4, %v9952_v17, %v9953_v22  ;;  %9152 = vmatpush1.bf16.msra.mxu1 %v9151_v30  ;;  %v9153_v10 = vpack.c.bf16 %v9953_v22, %v9948_v42  ;;  %v2756_v15 = vsel %vm801_vm1, %v9957_v23, %v9958_v60 }
 0x68e   : > { %v9966_v26 = vpop.permute.xlu1 %9965  ;;  %v9961_v18 = vpop.permute.xlu0 %9960  ;;  %v9155_v33 = vpack.c.bf16 %v2749_v52, %v2742_v34 }
 0x68f   : > { %v9963_v40 = vunpack.i.h.bf16 %v9961_v18  ;;  %v9962_v41 = vunpack.i.l.bf16 %v9961_v18  ;;  %9154 = vmatprep.subr.bf16.mxu1 %v9153_v10  ;;  %v9968_v16 = vunpack.i.h.bf16 %v9966_v26  ;;  %v9967_v11 = vunpack.i.l.bf16 %v9966_v26 }
 0x690   : > { %3407 = vrot.lane.b32.xlu1 %v12328_v13, %s15874_s2  ;;  %3399 = vrot.lane.b32.xlu0 %v12292_v53, %s15874_s2 }
 0x691   : > { %v2763_v24 = vsel %vm960_vm2, %v9962_v41, %v9963_v40  ;;  %9156 = vmatpush1.bf16.msra.mxu1 %v9155_v33  ;;  %v9157_v22 = vpack.c.bf16 %v9963_v40, %v9958_v60  ;;  %v2770_v52 = vsel %vm1116_vm5, %v9967_v11, %v9968_v16 }
 0x692   : > { %v9976_v42 = vpop.permute.xlu1 %9975  ;;  %v9971_v43 = vpop.permute.xlu0 %9970  ;;  %v9159_v14 = vpack.c.bf16 %v2763_v24, %v2756_v15 }
 0x693   : > { %v9973_v30 = vunpack.i.h.bf16 %v9971_v43  ;;  %v9972_v17 = vunpack.i.l.bf16 %v9971_v43  ;;  %9158 = vmatprep.subr.bf16.mxu1 %v9157_v22  ;;  %v9978_v34 = vunpack.i.h.bf16 %v9976_v42  ;;  %v9977_v23 = vunpack.i.l.bf16 %v9976_v42 }
 0x694   : > { %3405 = vrot.lane.b32.xlu1 %v12334_v39, %s15874_s2  ;;  %3409 = vrot.lane.b32.xlu0 %v12337_v49, %s15874_s2 }
 0x695   : > { %v2777_v10 = vsel %vm1124_vm6, %v9972_v17, %v9973_v30  ;;  %9160 = vmatpush1.bf16.msra.mxu1 %v9159_v14  ;;  %v9161_v60 = vpack.c.bf16 %v9973_v30, %v9968_v16  ;;  %v2784_v15 = vsel %vm1132_vm8, %v9977_v23, %v9978_v34 }
 0x696   : > { %v9986_v26 = vpop.permute.xlu1 %9985  ;;  %v9981_v18 = vpop.permute.xlu0 %9980  ;;  %v9163_v33 = vpack.c.bf16 %v2777_v10, %v2770_v52 }
 0x697   : > { %v9983_v40 = vunpack.i.h.bf16 %v9981_v18  ;;  %v9982_v41 = vunpack.i.l.bf16 %v9981_v18  ;;  %9162 = vmatprep.subr.bf16.mxu1 %v9161_v60  ;;  %v9988_v49 = vunpack.i.h.bf16 %v9986_v26  ;;  %v9987_v11 = vunpack.i.l.bf16 %v9986_v26 }
 0x698   : > { %3415 = vrot.lane.b32.xlu1 %v12344_v44, %s15874_s2  ;;  %3413 = vrot.lane.b32.xlu0 %v12347_v51, %s15874_s2 }
 0x699   : > { %v2791_v24 = vsel %vm1140_vm7, %v9982_v41, %v9983_v40  ;;  %9164 = vmatpush1.bf16.msra.mxu1 %v9163_v33  ;;  %v9165_v16 = vpack.c.bf16 %v9983_v40, %v9978_v34  ;;  %v2798_v44 = vsel %vm1148_vm9, %v9987_v11, %v9988_v49 }
 0x69a   : > { %v9996_v22 = vpop.permute.xlu1 %9995  ;;  %v9991_v42 = vpop.permute.xlu0 %9990  ;;  %v9167_v43 = vpack.c.bf16 %v2791_v24, %v2784_v15 }
 0x69b   : > { %v9993_v14 = vunpack.i.h.bf16 %v9991_v42  ;;  %v9992_v30 = vunpack.i.l.bf16 %v9991_v42  ;;  %9166 = vmatprep.subr.bf16.mxu1 %v9165_v16  ;;  %v9998_v17 = vunpack.i.h.bf16 %v9996_v22  ;;  %v9997_v23 = vunpack.i.l.bf16 %v9996_v22 }
 0x69c   : > { %3419 = vrot.lane.b32.xlu1 %v12354_v20, %s15874_s2  ;;  %3411 = vrot.lane.b32.xlu0 %v12357_v54, %s15874_s2 }
 0x69d   : > { %v2805_v52 = vsel %vm1156_vm10, %v9992_v30, %v9993_v14  ;;  %9168 = vmatpush1.bf16.msra.mxu1 %v9167_v43  ;;  %v9169_v34 = vpack.c.bf16 %v9993_v14, %v9988_v49  ;;  %v2812_v40 = vsel %vm1164_vm12, %v9997_v23, %v9998_v17 }
 0x69e   : > { %v10006_v10 = vpop.permute.xlu1 %10005  ;;  %v10001_v60 = vpop.permute.xlu0 %10000  ;;  %v9171_v26 = vpack.c.bf16 %v2805_v52, %v2798_v44 }
 0x69f   : > { %v10003_v18 = vunpack.i.h.bf16 %v10001_v60  ;;  %v10002_v33 = vunpack.i.l.bf16 %v10001_v60  ;;  %9170 = vmatprep.subr.bf16.mxu1 %v9169_v34  ;;  %v10008_v41 = vunpack.i.h.bf16 %v10006_v10  ;;  %v10007_v15 = vunpack.i.l.bf16 %v10006_v10  ;;  %v12544_v60 = vld [vmem:[%s15797_s3] sm:$0xff] }
 0x6a0   : > { %3417 = vrot.lane.b32.xlu1 %v12364_v57, %s15874_s2  ;;  %3421 = vrot.lane.b32.xlu0 %v12367_v56, %s15874_s2  ;;  %v3098_v10 = vsel %vm569_vm0, %v12462_v1, %v12454_v12 }
 0x6a1   : > { %v2819_v11 = vsel %vm1172_vm11, %v10002_v33, %v10003_v18  ;;  %9172 = vmatpush1.bf16.msra.mxu1 %v9171_v26  ;;  %v9173_v49 = vpack.c.bf16 %v10003_v18, %v9998_v17  ;;  %v2826_v56 = vsel %vm1180_vm13, %v10007_v15, %v10008_v41  ;;  %v15880_v26 = vmov 0.0  }
 0x6a2   : > { %v3065_v24 = vpop.permute.xlu1 %3064  ;;  %v10011_v16 = vpop.permute.xlu0 %10010  ;;  %v9175_v22 = vpack.c.bf16 %v2819_v11, %v2812_v40  ;;  %v3100_v18 = vsel %vm569_vm0, %v12472_v19, %v12460_v25 }
 0x6a3   : > { %v10013_v42 = vunpack.i.h.bf16 %v10011_v16  ;;  %v10012_v43 = vunpack.i.l.bf16 %v10011_v16  ;;  %9174 = vmatprep.subr.bf16.mxu1 %v9173_v49 }
 0x6a4   : > { %3427 = vrot.lane.b32.xlu1 %v12374_v58, %s15874_s2  ;;  %3425 = vrot.lane.b32.xlu0 %v12377_v8, %s15874_s2  ;;  %v3099_v58 = vsel %vm569_vm0, %v12454_v12, %v12452_v2  ;;  %v3101_v2 = vsel %vm569_vm0, %v12460_v25, %v12474_v0  ;;  %v15881_v25 = vmov 0  }
 0x6a5   : > { %v2833_v14 = vsel %vm1188_vm14, %v10012_v43, %v10013_v42  ;;  %9176 = vmatpush1.bf16.msra.mxu1 %v9175_v22  ;;  %v9177_v30 = vpack.c.bf16 %v10013_v42, %v10008_v41 }
 0x6a6   : > { %v3063_v23 = vpop.permute.xlu1 %3062  ;;  %v3067_v17 = vpop.permute.xlu0 %3066  ;;  %v9179_v44 = vpack.c.bf16 %v2833_v14, %v2826_v56 }
 0x6a7   : > { %9178 = vmatprep.subr.bf16.mxu1 %v9177_v30  ;;  %v3103_v0 = vsel %vm569_vm0, %v3065_v24, %v3067_v17 }
 0x6a8   : > { %3431 = vrot.lane.b32.xlu1 %v12384_v29, %s15874_s2  ;;  %3423 = vrot.lane.b32.xlu0 %v12387_v55, %s15874_s2 }
 0x6a9   : > { %9180 = vmatpush1.bf16.msra.mxu1 %v9179_v44 }
 0x6aa   : > { %3130 = vmatprep.subr.bf16.mxu1 %v3099_v58  ;;  %v3073_v52 = vpop.permute.xlu1 %3072  ;;  %v3071_v34 = vpop.permute.xlu0 %3070 }
 0x6ab   : > { %v3105_v19 = vsel %vm569_vm0, %v3071_v34, %v3073_v52 }
 0x6ac   : > { %2901 = vmatmul.mubr.f32.vlgmr.msra.gmra.mrb[12].mxu1 %v12544_v60  ;;  %3429 = vrot.lane.b32.xlu1 %v12394_v7, %s15874_s2 }
 0x6ad   : > { %3433 = vrot.lane.b32.xlu0 %v12397_v35, %s15874_s2  ;;  %3131 = vmatpush1.bf16.msra.mxu1 %v3098_v10  ;;  %v12563_v35 = vld [vmem:[%s15797_s3 + $0x8] sm:$0xff] }
 0x6ae   : > { %3132 = vmatprep.subr.bf16.mxu1 %v3101_v2  ;;  %v3077_v12 = vpop.permute.xlu1 %3076  ;;  %v3069_v1 = vpop.permute.xlu0 %3068  ;;  %2906 = vmatprep.mubr.f32.mxu1 %v15880_v26 }
 0x6af   : > { %v3104_v11 = vsel %vm569_vm0, %v3069_v1, %v3071_v34 }
 0x6b0   : > { %3439 = vrot.lane.b32.xlu1 %v12404_v36, %s15874_s2  ;;  %2907 = vmatmul.mubr.f32.gmra.mrb[14].mxu1 %v12563_v35  ;;  %v3102_v36 = vsel %vm569_vm0, %v3063_v23, %v3065_v24 }
 0x6b1   : > { %3437 = vrot.lane.b32.xlu0 %v12407_v45, %s15874_s2  ;;  %3133 = vmatpush1.bf16.msra.mxu1 %v3100_v18 }
 0x6b2   : > { %3134 = vmatprep.subr.bf16.mxu1 %v3103_v0  ;;  %v3075_v33 = vpop.permute.xlu1 %3074  ;;  %v3079_v40 = vpop.permute.xlu0 %3078  ;;  %3162 = vmatprep.mubr.bf16.mxu1 %v15881_v25 }
 0x6b3   : > { %v3107_v49 = vsel %vm569_vm0, %v3077_v12, %v3079_v40  ;;  %v3106_v42 = vsel %vm569_vm0, %v3075_v33, %v3077_v12 }
 0x6b5   : > { %3435 = vrot.lane.b32.xlu0 %v12414_v46, %s15874_s2  ;;  %3135 = vmatpush1.bf16.msra.mxu1 %v3102_v36 }
 0x6b6   : > { %3136 = vmatprep.subr.bf16.mxu1 %v3105_v19  ;;  %v3085_v41 = vpop.permute.xlu1 %3084  ;;  %v3083_v15 = vpop.permute.xlu0 %3082 }
 0x6b7   : > { %v3109_v24 = vsel %vm569_vm0, %v3083_v15, %v3085_v41 }
 0x6b9   : > { %3137 = vmatpush1.bf16.msra.mxu1 %v3104_v11 }
 0x6ba   : > { %3138 = vmatprep.subr.bf16.mxu1 %v3107_v49  ;;  %v3089_v16 = vpop.permute.xlu1 %3088  ;;  %v3081_v22 = vpop.permute.xlu0 %3080 }
 0x6bb   : > { %v3108_v30 = vsel %vm569_vm0, %v3081_v22, %v3083_v15 }
 0x6bd   : > { %3139 = vmatpush1.bf16.msra.mxu1 %v3106_v42 }
 0x6be   : > { %3140 = vmatprep.subr.bf16.mxu1 %v3109_v24  ;;  %v3087_v43 = vpop.permute.xlu1 %3086  ;;  %v3091_v56 = vpop.permute.xlu0 %3090 }
 0x6bf   : > { %v3111_v14 = vsel %vm569_vm0, %v3089_v16, %v3091_v56  ;;  %v3110_v58 = vsel %vm569_vm0, %v3087_v43, %v3089_v16 }
 0x6c1   : > { %3141 = vmatpush1.bf16.msra.mxu1 %v3108_v30 }
 0x6c2   : > { %3142 = vmatprep.subr.bf16.mxu1 %v3111_v14  ;;  %v3097_v23 = vpop.permute.xlu1 %3096  ;;  %v3095_v17 = vpop.permute.xlu0 %3094 }
 0x6c3   : > { %v3113_v44 = vsel %vm569_vm0, %v3095_v17, %v3097_v23 }
 0x6c5   : > { %3143 = vmatpush1.bf16.msra.mxu1 %v3110_v58 }
 0x6c6   : > { %3144 = vmatprep.subr.bf16.mxu1 %v3113_v44  ;;  %v3255_v52 = vpop.permute.xlu1 %3254  ;;  %v3093_v34 = vpop.permute.xlu0 %3092 }
 0x6c7   : > { %v3112_v10 = vsel %vm569_vm0, %v3093_v34, %v3095_v17 }
 0x6c9   : > { %3145 = vmatpush1.bf16.msra.mxu1 %v3112_v10 }
 0x6ca   : > { %v3253_v2 = vpop.permute.xlu1 %3252  ;;  %v3257_v12 = vpop.permute.xlu0 %3256  ;;  %3199 = vmatprep.subr.bf16.mxu1 %v12273_v3 }
 0x6cc   : > { %3163 = vmatmul.mubr.bf16.vlgmr.msra.gmra.mrb[16].mxu1 %v12163_v59 }
 0x6cd   : > { %3200 = vmatpush1.bf16.msra.mxu1 %v12285_v48  ;;  %3172 = vmatprep.mubr.bf16.mxu1 %v15881_v25 }
 0x6ce   : > { %v3263_v1 = vpop.permute.xlu1 %3262  ;;  %v3261_v18 = vpop.permute.xlu0 %3260  ;;  %3201 = vmatprep.subr.bf16.mxu1 %v12282_v4 }
 0x6d1   : > { %3202 = vmatpush1.bf16.msra.mxu1 %v12292_v53 }
 0x6d2   : > { %v3267_v0 = vpop.permute.xlu1 %3266  ;;  %v3259_v33 = vpop.permute.xlu0 %3258  ;;  %3203 = vmatprep.subr.bf16.mxu1 %v12328_v13 }
 0x6d4   : > { %3173 = vmatmul.mubr.bf16.gmra.mrb[20].mxu1 %v12174_v9 }
 0x6d5   : > { %3204 = vmatpush1.bf16.msra.mxu1 %v12334_v39  ;;  %3231 = vmatprep.mubr.bf16.mxu1 %v15881_v25 }
 0x6d6   : > { %v3265_v59 = vpop.permute.xlu1 %3264  ;;  %v3269_v3 = vpop.permute.xlu0 %3268  ;;  %3205 = vmatprep.subr.bf16.mxu1 %v12347_v51 }
 0x6d7   : > { %v3304_v41 = vsel %vm801_vm1, %v3265_v59, %v3267_v0 }
 0x6d9   : > { %3206 = vmatpush1.bf16.msra.mxu1 %v12357_v54 }
 0x6da   : > { %v3275_v48 = vpop.permute.xlu1 %3274  ;;  %v3273_v4 = vpop.permute.xlu0 %3272  ;;  %3207 = vmatprep.subr.bf16.mxu1 %v12354_v20  ;;  %v3301_v20 = vsel %vm801_vm1, %v3255_v52, %v3257_v12 }
 0x6dd   : > { %3208 = vmatpush1.bf16.msra.mxu1 %v12364_v57 }
 0x6de   : > { %v3279_v53 = vpop.permute.xlu1 %3278  ;;  %v3271_v13 = vpop.permute.xlu0 %3270  ;;  %3209 = vmatprep.subr.bf16.mxu1 %v12377_v8  ;;  %v3300_v8 = vsel %vm801_vm1, %v3253_v2, %v3255_v52 }
 0x6df   : > { %v3306_v49 = vsel %vm801_vm1, %v3271_v13, %v3273_v4 }
 0x6e1   : > { %3210 = vmatpush1.bf16.msra.mxu1 %v12387_v55 }
 0x6e2   : > { %v3277_v9 = vpop.permute.xlu1 %3276  ;;  %v3281_v39 = vpop.permute.xlu0 %3280  ;;  %3211 = vmatprep.subr.bf16.mxu1 %v12384_v29  ;;  %v3303_v29 = vsel %vm801_vm1, %v3261_v18, %v3263_v1 }
 0x6e3   : > { %v3309_v16 = vsel %vm801_vm1, %v3279_v53, %v3281_v39  ;;  %v3308_v24 = vsel %vm801_vm1, %v3277_v9, %v3279_v53 }
 0x6e5   : > { %3212 = vmatpush1.bf16.msra.mxu1 %v12394_v7 }
 0x6e6   : > { %v3287_v51 = vpop.permute.xlu1 %3286  ;;  %v3285_v54 = vpop.permute.xlu0 %3284  ;;  %3213 = vmatprep.subr.bf16.mxu1 %v12407_v45  ;;  %v3302_v45 = vsel %vm801_vm1, %v3259_v33, %v3261_v18 }
 0x6e9   : > { %3214 = vmatpush1.bf16.msra.mxu1 %v12414_v46  ;;  %v3305_v46 = vsel %vm801_vm1, %v3267_v0, %v3269_v3 }
 0x6ea   : > { %3332 = vmatprep.subr.bf16.mxu1 %v3301_v20  ;;  %v3291_v57 = vpop.permute.xlu1 %3290  ;;  %v3283_v40 = vpop.permute.xlu0 %3282 }
 0x6eb   : > { %v3310_v14 = vsel %vm801_vm1, %v3283_v40, %v3285_v54 }
 0x6ec   : > { %3232 = vmatmul.mubr.bf16.vlgmr.msra.gmra.mrb[16].mxu1 %v12194_v38  ;;  %v3307_v38 = vsel %vm801_vm1, %v3273_v4, %v3275_v48 }
 0x6ed   : > { %3333 = vmatpush1.bf16.msra.mxu1 %v3300_v8  ;;  %3241 = vmatprep.mubr.bf16.mxu1 %v15881_v25 }
 0x6ee   : > { %3334 = vmatprep.subr.bf16.mxu1 %v3303_v29  ;;  %v3289_v55 = vpop.permute.xlu1 %3288  ;;  %v3293_v7 = vpop.permute.xlu0 %3292 }
 0x6ef   : > { %v3313_v30 = vsel %vm801_vm1, %v3291_v57, %v3293_v7  ;;  %v3312_v44 = vsel %vm801_vm1, %v3289_v55, %v3291_v57 }
 0x6f1   : > { %3335 = vmatpush1.bf16.msra.mxu1 %v3302_v45 }
 0x6f2   : > { %3336 = vmatprep.subr.bf16.mxu1 %v3305_v46  ;;  %v3299_v36 = vpop.permute.xlu1 %3298  ;;  %v3297_v19 = vpop.permute.xlu0 %3296 }
 0x6f3   : > { %v3315_v58 = vsel %vm801_vm1, %v3297_v19, %v3299_v36 }
 0x6f4   : > { %3242 = vmatmul.mubr.bf16.gmra.mrb[20].mxu1 %v12205_v47  ;;  %v3311_v47 = vsel %vm801_vm1, %v3285_v54, %v3287_v51 }
 0x6f5   : > { %3337 = vmatpush1.bf16.msra.mxu1 %v3304_v41  ;;  %3364 = vmatprep.mubr.bf16.mxu1 %v15881_v25 }
 0x6f6   : > { %3338 = vmatprep.subr.bf16.mxu1 %v3307_v38  ;;  %v3396_v15 = vpop.permute.xlu1 %3395  ;;  %v3295_v11 = vpop.permute.xlu0 %3294 }
 0x6f7   : > { %v3314_v10 = vsel %vm801_vm1, %v3295_v11, %v3297_v19 }
 0x6f9   : > { %3339 = vmatpush1.bf16.msra.mxu1 %v3306_v49 }
 0x6fa   : > { %3340 = vmatprep.subr.bf16.mxu1 %v3309_v16  ;;  %v3394_v22 = vpop.permute.xlu1 %3393  ;;  %v3398_v42 = vpop.permute.xlu0 %3397  ;;  %v12654_v16 = vld [vmem:[%s11126_s29 + $0x308] ss:$12 sps:$4 sm:$0xff]  }
 0x6fb   : > { %v3442_v2 = vsel %vm960_vm2, %v3396_v15, %v3398_v42  ;;  %v3441_v18 = vsel %vm960_vm2, %v3394_v22, %v3396_v15  ;;  %v12657_v22 = vld [vmem:[%s11126_s29 + $0x304] ss:$12 sps:$4 sm:$0xff]   ;;  %3869 = vrot.lane.b32.xlu1 %v12654_v16, %s15871_s25 }
 0x6fc   : > { %3867 = vrot.lane.b32.xlu0 %v12657_v22, %s15871_s25 }
 0x6fd   : > { %3341 = vmatpush1.bf16.msra.mxu1 %v3308_v24  ;;  %v12676_v24 = vld [vmem:[%s11126_s29 + $0x318] ss:$12 sps:$4 sm:$0xff]  }
 0x6fe   : > { %3342 = vmatprep.subr.bf16.mxu1 %v3311_v47  ;;  %v3404_v43 = vpop.permute.xlu1 %3403  ;;  %v3402_v56 = vpop.permute.xlu0 %3401  ;;  %v12679_v47 = vld [vmem:[%s11126_s29 + $0x320] ss:$12 sps:$4 sm:$0xff]  }
 0x6ff   : > { %v3444_v0 = vsel %vm960_vm2, %v3402_v56, %v3404_v43 }
 0x701   : > { %3343 = vmatpush1.bf16.msra.mxu1 %v3310_v14 }
 0x702   : > { %3344 = vmatprep.subr.bf16.mxu1 %v3313_v30  ;;  %v3408_v23 = vpop.permute.xlu1 %3407  ;;  %v3400_v17 = vpop.permute.xlu0 %3399 }
 0x703   : > { %v3443_v3 = vsel %vm960_vm2, %v3400_v17, %v3402_v56 }
 0x705   : > { %3345 = vmatpush1.bf16.msra.mxu1 %v3312_v44 }
 0x706   : > { %3346 = vmatprep.subr.bf16.mxu1 %v3315_v58  ;;  %v3406_v52 = vpop.permute.xlu1 %3405  ;;  %v3410_v34 = vpop.permute.xlu0 %3409 }
 0x707   : > { %v3446_v48 = vsel %vm960_vm2, %v3408_v23, %v3410_v34  ;;  %v3445_v13 = vsel %vm960_vm2, %v3406_v52, %v3408_v23 }
 0x709   : > { %3347 = vmatpush1.bf16.msra.mxu1 %v3314_v10 }
 0x70a   : > { %3473 = vmatprep.subr.bf16.mxu1 %v3442_v2  ;;  %v3416_v12 = vpop.permute.xlu1 %3415  ;;  %v3414_v1 = vpop.permute.xlu0 %3413 }
 0x70c   : > { %3365 = vmatmul.mubr.bf16.vlgmr.msra.gmra.mrb[16].mxu1 %v12224_v37  ;;  %v3448_v37 = vsel %vm960_vm2, %v3414_v1, %v3416_v12 }
 0x70d   : > { %3474 = vmatpush1.bf16.msra.mxu1 %v3441_v18  ;;  %3374 = vmatprep.mubr.bf16.mxu1 %v15881_v25 }
 0x70e   : > { %3475 = vmatprep.subr.bf16.mxu1 %v3444_v0  ;;  %v3420_v33 = vpop.permute.xlu1 %3419  ;;  %v3412_v59 = vpop.permute.xlu0 %3411 }
 0x70f   : > { %v3447_v51 = vsel %vm960_vm2, %v3412_v59, %v3414_v1 }
 0x711   : > { %3476 = vmatpush1.bf16.msra.mxu1 %v3443_v3 }
 0x712   : > { %3477 = vmatprep.subr.bf16.mxu1 %v3446_v48  ;;  %v3418_v4 = vpop.permute.xlu1 %3417  ;;  %v3422_v53 = vpop.permute.xlu0 %3421  ;;  %v12712_v48 = vld [vmem:[%s11126_s29 + $0x334] ss:$12 sps:$4 sm:$0xff]  }
 0x713   : > { %v3450_v54 = vsel %vm960_vm2, %v3420_v33, %v3422_v53  ;;  %v3449_v40 = vsel %vm960_vm2, %v3418_v4, %v3420_v33  ;;  %v12718_v4 = vld [vmem:[%s11126_s29 + $0x330] ss:$12 sps:$4 sm:$0xff]   ;;  %v12721_v53 = vld [vmem:[%s11126_s29 + $0x338] ss:$12 sps:$4 sm:$0xff]  }
 0x714   : > { %3375 = vmatmul.mubr.bf16.gmra.mrb[20].mxu1 %v12235_v31 }
 0x715   : > { %3478 = vmatpush1.bf16.msra.mxu1 %v3445_v13  ;;  %3505 = vmatprep.mubr.bf16.mxu1 %v15881_v25  ;;  %v12728_v13 = vld [vmem:[%s11126_s29 + $0x350] ss:$12 sps:$4 sm:$0xff]  }
 0x716   : > { %3479 = vmatprep.subr.bf16.mxu1 %v3448_v37  ;;  %v3428_v9 = vpop.permute.xlu1 %3427  ;;  %v3426_v39 = vpop.permute.xlu0 %3425  ;;  %v12731_v37 = vld [vmem:[%s11126_s29 + $0x34c] ss:$12 sps:$4 sm:$0xff]  }
 0x717   : > { %v3452_v31 = vsel %vm960_vm2, %v3426_v39, %v3428_v9  ;;  %v12738_v9 = vld [vmem:[%s11126_s29 + $0x364] ss:$12 sps:$4 sm:$0xff]  }
 0x719   : > { %3480 = vmatpush1.bf16.msra.mxu1 %v3447_v51  ;;  %v12748_v51 = vld [vmem:[%s11126_s29 + $0x360] ss:$12 sps:$4 sm:$0xff]  }
 0x71a   : > { %3481 = vmatprep.subr.bf16.mxu1 %v3450_v54  ;;  %v3432_v20 = vpop.permute.xlu1 %3431  ;;  %v3424_v57 = vpop.permute.xlu0 %3423  ;;  %v12751_v54 = vld [vmem:[%s11126_s29 + $0x368] ss:$12 sps:$4 sm:$0xff]  }
 0x71b   : > { %v3451_v55 = vsel %vm960_vm2, %v3424_v57, %v3426_v39  ;;  %v12741_v39 = vld [vmem:[%s11126_s29 + $0x348] ss:$12 sps:$4 sm:$0xff]  }
 0x71c   : > { %v12761_v57 = vld [vmem:[%s11126_s29 + $0x37c] ss:$12 sps:$4 sm:$0xff]  }
 0x71d   : > { %3482 = vmatpush1.bf16.msra.mxu1 %v3449_v40  ;;  %v12768_v40 = vld [vmem:[%s11126_s29 + $0x394] ss:$12 sps:$4 sm:$0xff]  }
 0x71e   : > { %3483 = vmatprep.subr.bf16.mxu1 %v3452_v31  ;;  %v3430_v8 = vpop.permute.xlu1 %3429  ;;  %v12771_v31 = vld [vmem:[%s11126_s29 + $0x378] ss:$12 sps:$4 sm:$0xff]  }
 0x71f   : > { %v3434_v29 = vpop.permute.xlu0 %3433  ;;  %v3453_v36 = vsel %vm960_vm2, %v3430_v8, %v3432_v20  ;;  %v12778_v8 = vld [vmem:[%s11126_s29 + $0x390] ss:$12 sps:$4 sm:$0xff]  }
 0x720   : > { %v3454_v7 = vsel %vm960_vm2, %v3432_v20, %v3434_v29  ;;  %v12758_v20 = vld [vmem:[%s11126_s29 + $0x380] ss:$12 sps:$4 sm:$0xff]   ;;  %v12781_v29 = vld [vmem:[%s11126_s29 + $0x398] ss:$12 sps:$4 sm:$0xff]  }
 0x721   : > { %3484 = vmatpush1.bf16.msra.mxu1 %v3451_v55  ;;  %v12788_v55 = vld [vmem:[%s11126_s29 + $0x3b0] ss:$12 sps:$4 sm:$0xff]  }
 0x722   : > { %3485 = vmatprep.subr.bf16.mxu1 %v3454_v7  ;;  %v3440_v45 = vpop.permute.xlu1 %3439  ;;  %v12791_v7 = vld [vmem:[%s11126_s29 + $0x3ac] ss:$12 sps:$4 sm:$0xff]  }
 0x723   : > { %v3438_v46 = vpop.permute.xlu0 %3437 }
 0x724   : > { %v3456_v19 = vsel %vm960_vm2, %v3438_v46, %v3440_v45  ;;  %v12798_v45 = vld [vmem:[%s11126_s29 + $0x3a8] ss:$12 sps:$4 sm:$0xff]  }
 0x725   : > { %3486 = vmatpush1.bf16.msra.mxu1 %v3453_v36 }
 0x726   : > { %3487 = vmatprep.subr.bf16.mxu1 %v3456_v19 }
 0x727   : > { %v3436_v41 = vpop.permute.xlu0 %3435 }
 0x728   : > { %v3455_v38 = vsel %vm960_vm2, %v3436_v41, %v3438_v46 }
 0x729   : > { %3488 = vmatpush1.bf16.msra.mxu1 %v3455_v38 }
 0x72c   : > { %3506 = vmatmul.mubr.bf16.vlgmr.msra.gmra.mrb[16].mxu1 %v12252_v21  ;;  %v12666_v21 = vld [vmem:[%s11126_s29 + $0x31c] ss:$12 sps:$4 sm:$0xff]  }
 0x72d   : > { %3515 = vmatprep.mubr.bf16.mxu1 %v15881_v25  ;;  %3873 = vrot.lane.b32.xlu1 %v12666_v21, %s15871_s25 }
 0x731   : > { %3871 = vrot.lane.b32.xlu1 %v12676_v24, %s15871_s25 }
 0x734   : > { %3516 = vmatmul.mubr.bf16.gmra.mrb[20].mxu1 %v12259_v32  ;;  %v12669_v32 = vld [vmem:[%s11126_s29 + $0x300] ss:$12 sps:$4 sm:$0xff]  }
 0x735   : > { %4530 = vmatprep.mubr.f32.mxu1 %v15880_v26  ;;  %3865 = vrot.lane.b32.xlu0 %v12669_v32, %s15871_s25 }
 0x739   : > { %3875 = vrot.lane.b32.xlu0 %v12679_v47, %s15871_s25 }
 0x76d   : > { %v12836_v46 = vpop.permute.xlu1 %3869 }
 0x76e   : > { %v12838_v36 = vpop.permute.xlu0 %3867 }
 0x77f   : > { %v12647_v15 = vpop.f32.mrb[12].mxu1 }
 0x780   : > { %15882 = vst [vmem:[#allocation14_spill] sm:$0xff] %v12647_v15  ;;  %v12649_v11 = vpop.f32.mrb[13].mxu1 }
 0x781   : > { %15883 = vst [vmem:[#allocation15_spill] sm:$0xff] %v12649_v11 }
 0x783   : > { %v12651_v49 = vpop.f32.mrb[14].mxu1 }
 0x784   : > { %15884 = vst [vmem:[#allocation16_spill] sm:$0xff] %v12651_v49  ;;  %v12659_v42 = vpop.f32.mrb[15].mxu1 }
 0x785   : > { %15885 = vst [vmem:[#allocation17_spill] sm:$0xff] %v12659_v42 }
 0x79f   : > { %v12844_v19 = vpop.permute.xlu1 %3873 }
 0x7a3   : > { %v12856_v38 = vpop.permute.xlu1 %3871 }
 0x7a7   : > { %v12846_v41 = vpop.permute.xlu0 %3865 }
 0x7ff   : > { %v3507_v43 = vpop.f32.mrb[16].mxu1 }
 0x800   : > { %v3509_v56 = vpop.f32.mrb[17].mxu1 }
 0x801   : > { %v3511_v14 = vpop.f32.mrb[18].mxu1 }
 0x802   : > { %v3534_v30 = vmax.f32 %v3507_v43, %v3511_v14  ;;  %v3513_v23 = vpop.f32.mrb[19].mxu1  ;;  %v12858_v43 = vpop.permute.xlu0 %3875 }
 0x803   : > { %v3535_v17 = vmax.f32 %v3509_v56, %v3513_v23 }
 0x807   : > { %v3517_v44 = vpop.f32.mrb[20].mxu1 }
 0x808   : > { %v3519_v58 = vpop.f32.mrb[21].mxu1 }
 0x809   : > { %v3521_v52 = vpop.f32.mrb[22].mxu1 }
 0x80a   : > { %v3536_v34 = vmax.f32 %v3517_v44, %v3521_v52  ;;  %v3523_v10 = vpop.f32.mrb[23].mxu1 }
 0x80b   : > { %v3537_v2 = vmax.f32 %v3519_v58, %v3523_v10 }
 0x80c   : > { %v3538_v12 = vmax.f32 %v3534_v30, %v3536_v34 }
 0x80d   : > { %v3539_v1 = vmax.f32 %v3535_v17, %v3537_v2 }
 0x80e   : > { %v12686_v18 = vadd.f32 %v3538_v12, %v11499_v50 }
 0x80f   : > { %v12689_v0 = vadd.f32 %v3539_v1, %v11499_v50 }
 0x810   : > { %v3542_v33 = vmax.f32 %v12686_v18, 0.0 }
 0x811   : > { %v3543_v59 = vmax.f32 %v12689_v0, 0.0 }
 0x813   : > { %v10019_v3 = vpack.i.bf16 %v3543_v59, %v3542_v33 }
 0x815   : > { %10020 = vrot.lane.b32.xlu0 %v10019_v3, %s15863_s26  ;;  %10015 = vrot.lane.b32.xlu1 %v10019_v3, %s15871_s25 }
 0x819   : > { %10030 = vrot.lane.b32.xlu0 %v10019_v3, %s15873_s12  ;;  %10025 = vrot.lane.b32.xlu1 %v10019_v3, %s15864_s27 }
 0x81d   : > { %10040 = vrot.lane.b32.xlu0 %v10019_v3, %s15877_s24  ;;  %10035 = vrot.lane.b32.xlu1 %v10019_v3, %s15874_s2 }
 0x821   : > { %10050 = vrot.lane.b32.xlu0 %v10019_v3, %s15878_s15  ;;  %10045 = vrot.lane.b32.xlu1 %v10019_v3, %s15865_s21 }
 0x825   : > { %10060 = vrot.lane.b32.xlu0 %v10019_v3, %s15879_s19  ;;  %10055 = vrot.lane.b32.xlu1 %v10019_v3, %s15866_s18 }
 0x829   : > { %10070 = vrot.lane.b32.xlu0 %v10019_v3, %s15867_s30  ;;  %10065 = vrot.lane.b32.xlu1 %v10019_v3, %s15868_s11 }
 0x82d   : > { %10080 = vrot.lane.b32.xlu0 %v10019_v3, %s15869_s0  ;;  %10075 = vrot.lane.b32.xlu1 %v10019_v3, %s15870_s20 }
 0x831   : > { %3879 = vrot.lane.b32.xlu0 %v12712_v48, %s15871_s25  ;;  %10085 = vrot.lane.b32.xlu1 %v10019_v3, %s15872_s28 }
 0x835   : > { %3877 = vrot.lane.b32.xlu0 %v12718_v4, %s15871_s25  ;;  %3881 = vrot.lane.b32.xlu1 %v12721_v53, %s15871_s25 }
 0x839   : > { %3887 = vrot.lane.b32.xlu0 %v12728_v13, %s15871_s25  ;;  %3885 = vrot.lane.b32.xlu1 %v12731_v37, %s15871_s25 }
 0x83d   : > { %3891 = vrot.lane.b32.xlu0 %v12738_v9, %s15871_s25  ;;  %3883 = vrot.lane.b32.xlu1 %v12741_v39, %s15871_s25 }
 0x841   : > { %3889 = vrot.lane.b32.xlu0 %v12748_v51, %s15871_s25  ;;  %3893 = vrot.lane.b32.xlu1 %v12751_v54, %s15871_s25 }
 0x845   : > { %3899 = vrot.lane.b32.xlu0 %v12758_v20, %s15871_s25  ;;  %3897 = vrot.lane.b32.xlu1 %v12761_v57, %s15871_s25 }
 0x849   : > { %3903 = vrot.lane.b32.xlu0 %v12768_v40, %s15871_s25  ;;  %3895 = vrot.lane.b32.xlu1 %v12771_v31, %s15871_s25 }
 0x84d   : > { %3901 = vrot.lane.b32.xlu0 %v12778_v8, %s15871_s25  ;;  %3905 = vrot.lane.b32.xlu1 %v12781_v29, %s15871_s25 }
 0x851   : > { %3911 = vrot.lane.b32.xlu0 %v12788_v55, %s15871_s25  ;;  %3909 = vrot.lane.b32.xlu1 %v12791_v7, %s15871_s25 }
 0x855   : > { %4069 = vrot.lane.b32.xlu0 %v12657_v22, %s15873_s12  ;;  %3907 = vrot.lane.b32.xlu1 %v12798_v45, %s15871_s25 }
 0x859   : > { %4067 = vrot.lane.b32.xlu0 %v12669_v32, %s15873_s12  ;;  %4071 = vrot.lane.b32.xlu1 %v12654_v16, %s15873_s12 }
 0x85d   : > { %4077 = vrot.lane.b32.xlu0 %v12679_v47, %s15873_s12  ;;  %4075 = vrot.lane.b32.xlu1 %v12666_v21, %s15873_s12 }
 0x861   : > { %4081 = vrot.lane.b32.xlu0 %v12712_v48, %s15873_s12  ;;  %4073 = vrot.lane.b32.xlu1 %v12676_v24, %s15873_s12 }
 0x865   : > { %4079 = vrot.lane.b32.xlu0 %v12718_v4, %s15873_s12  ;;  %4083 = vrot.lane.b32.xlu1 %v12721_v53, %s15873_s12 }
 0x869   : > { %4089 = vrot.lane.b32.xlu0 %v12728_v13, %s15873_s12  ;;  %4087 = vrot.lane.b32.xlu1 %v12731_v37, %s15873_s12 }
 0x86d   : > { %4093 = vrot.lane.b32.xlu0 %v12738_v9, %s15873_s12  ;;  %4085 = vrot.lane.b32.xlu1 %v12741_v39, %s15873_s12 }
 0x871   : > { %4091 = vrot.lane.b32.xlu0 %v12748_v51, %s15873_s12  ;;  %4095 = vrot.lane.b32.xlu1 %v12751_v54, %s15873_s12 }
 0x875   : > { %4101 = vrot.lane.b32.xlu0 %v12758_v20, %s15873_s12  ;;  %4099 = vrot.lane.b32.xlu1 %v12761_v57, %s15873_s12 }
 0x879   : > { %4105 = vrot.lane.b32.xlu0 %v12768_v40, %s15873_s12  ;;  %4097 = vrot.lane.b32.xlu1 %v12771_v31, %s15873_s12 }
 0x87d   : > { %4103 = vrot.lane.b32.xlu0 %v12778_v8, %s15873_s12  ;;  %4107 = vrot.lane.b32.xlu1 %v12781_v29, %s15873_s12 }
 0x881   : > { %4113 = vrot.lane.b32.xlu0 %v12788_v55, %s15873_s12  ;;  %4111 = vrot.lane.b32.xlu1 %v12791_v7, %s15873_s12 }
 0x885   : > { %4210 = vrot.lane.b32.xlu0 %v12657_v22, %s15874_s2  ;;  %4109 = vrot.lane.b32.xlu1 %v12798_v45, %s15873_s12 }
 0x887   : > { %v10021_v56 = vpop.permute.xlu0 %10020  ;;  %v10016_v14 = vpop.permute.xlu1 %10015 }
 0x888   : > { %v10018_v30 = vunpack.i.h.bf16 %v10016_v14  ;;  %v10017_v23 = vunpack.i.l.bf16 %v10016_v14  ;;  %v10023_v17 = vunpack.i.h.bf16 %v10021_v56  ;;  %v10022_v44 = vunpack.i.l.bf16 %v10021_v56 }
 0x889   : > { %4208 = vrot.lane.b32.xlu0 %v12669_v32, %s15874_s2  ;;  %4212 = vrot.lane.b32.xlu1 %v12654_v16, %s15874_s2 }
 0x88a   : > { %v3550_v58 = vsel %vm569_vm0, %v10017_v23, %v10018_v30  ;;  %v9181_v52 = vpack.c.bf16 %v10018_v30, %v3543_v59  ;;  %v3557_v16 = vsel %vm1084_vm3, %v10022_v44, %v10023_v17 }
 0x88b   : > { %v10031_v34 = vpop.permute.xlu0 %10030  ;;  %v10026_v10 = vpop.permute.xlu1 %10025  ;;  %v9183_v2 = vpack.c.bf16 %v3550_v58, %v3542_v33 }
 0x88c   : > { %v10028_v12 = vunpack.i.h.bf16 %v10026_v10  ;;  %v10027_v1 = vunpack.i.l.bf16 %v10026_v10  ;;  %9182 = vmatprep.subr.bf16.mxu0 %v9181_v52  ;;  %v10033_v3 = vunpack.i.h.bf16 %v10031_v34  ;;  %v10032_v14 = vunpack.i.l.bf16 %v10031_v34 }
 0x88d   : > { %4218 = vrot.lane.b32.xlu0 %v12679_v47, %s15874_s2  ;;  %4216 = vrot.lane.b32.xlu1 %v12666_v21, %s15874_s2 }
 0x88e   : > { %v3564_v0 = vsel %vm1092_vm4, %v10027_v1, %v10028_v12  ;;  %9184 = vmatpush1.bf16.msra.mxu0 %v9183_v2  ;;  %v9185_v59 = vpack.c.bf16 %v10028_v12, %v10023_v17  ;;  %v3571_v58 = vsel %vm801_vm1, %v10032_v14, %v10033_v3 }
 0x88f   : > { %v10041_v56 = vpop.permute.xlu0 %10040  ;;  %v10036_v18 = vpop.permute.xlu1 %10035  ;;  %v9187_v33 = vpack.c.bf16 %v3564_v0, %v3557_v16 }
 0x890   : > { %v10038_v30 = vunpack.i.h.bf16 %v10036_v18  ;;  %v10037_v23 = vunpack.i.l.bf16 %v10036_v18  ;;  %9186 = vmatprep.subr.bf16.mxu0 %v9185_v59  ;;  %v10043_v47 = vunpack.i.h.bf16 %v10041_v56  ;;  %v10042_v44 = vunpack.i.l.bf16 %v10041_v56 }
 0x891   : > { %4222 = vrot.lane.b32.xlu0 %v12712_v48, %s15874_s2  ;;  %4214 = vrot.lane.b32.xlu1 %v12676_v24, %s15874_s2 }
 0x892   : > { %v3578_v52 = vsel %vm960_vm2, %v10037_v23, %v10038_v30  ;;  %9188 = vmatpush1.bf16.msra.mxu0 %v9187_v33  ;;  %v9189_v17 = vpack.c.bf16 %v10038_v30, %v10033_v3  ;;  %v3585_v0 = vsel %vm1116_vm5, %v10042_v44, %v10043_v47 }
 0x893   : > { %v10051_v34 = vpop.permute.xlu0 %10050  ;;  %v10046_v10 = vpop.permute.xlu1 %10045  ;;  %v9191_v2 = vpack.c.bf16 %v3578_v52, %v3571_v58 }
 0x894   : > { %v10048_v12 = vunpack.i.h.bf16 %v10046_v10  ;;  %v10047_v1 = vunpack.i.l.bf16 %v10046_v10  ;;  %9190 = vmatprep.subr.bf16.mxu0 %v9189_v17  ;;  %v10053_v16 = vunpack.i.h.bf16 %v10051_v34  ;;  %v10052_v14 = vunpack.i.l.bf16 %v10051_v34 }
 0x895   : > { %4220 = vrot.lane.b32.xlu0 %v12718_v4, %s15874_s2  ;;  %4224 = vrot.lane.b32.xlu1 %v12721_v53, %s15874_s2 }
 0x896   : > { %v3592_v59 = vsel %vm1124_vm6, %v10047_v1, %v10048_v12  ;;  %9192 = vmatpush1.bf16.msra.mxu0 %v9191_v2  ;;  %v9193_v3 = vpack.c.bf16 %v10048_v12, %v10043_v47  ;;  %v3599_v58 = vsel %vm1132_vm8, %v10052_v14, %v10053_v16 }
 0x897   : > { %v10061_v56 = vpop.permute.xlu0 %10060  ;;  %v10056_v18 = vpop.permute.xlu1 %10055  ;;  %v9195_v33 = vpack.c.bf16 %v3592_v59, %v3585_v0 }
 0x898   : > { %v10058_v30 = vunpack.i.h.bf16 %v10056_v18  ;;  %v10057_v23 = vunpack.i.l.bf16 %v10056_v18  ;;  %9194 = vmatprep.subr.bf16.mxu0 %v9193_v3  ;;  %v10063_v53 = vunpack.i.h.bf16 %v10061_v56  ;;  %v10062_v44 = vunpack.i.l.bf16 %v10061_v56 }
 0x899   : > { %4230 = vrot.lane.b32.xlu0 %v12728_v13, %s15874_s2  ;;  %4228 = vrot.lane.b32.xlu1 %v12731_v37, %s15874_s2 }
 0x89a   : > { %v3606_v52 = vsel %vm1140_vm7, %v10057_v23, %v10058_v30  ;;  %9196 = vmatpush1.bf16.msra.mxu0 %v9195_v33  ;;  %v9197_v47 = vpack.c.bf16 %v10058_v30, %v10053_v16  ;;  %v3613_v13 = vsel %vm1148_vm9, %v10062_v44, %v10063_v53 }
 0x89b   : > { %v10071_v17 = vpop.permute.xlu0 %10070  ;;  %v10066_v34 = vpop.permute.xlu1 %10065  ;;  %v9199_v10 = vpack.c.bf16 %v3606_v52, %v3599_v58 }
 0x89c   : > { %v10068_v2 = vunpack.i.h.bf16 %v10066_v34  ;;  %v10067_v12 = vunpack.i.l.bf16 %v10066_v34  ;;  %9198 = vmatprep.subr.bf16.mxu0 %v9197_v47  ;;  %v10073_v1 = vunpack.i.h.bf16 %v10071_v17  ;;  %v10072_v14 = vunpack.i.l.bf16 %v10071_v17 }
 0x89d   : > { %4234 = vrot.lane.b32.xlu0 %v12738_v9, %s15874_s2  ;;  %4226 = vrot.lane.b32.xlu1 %v12741_v39, %s15874_s2 }
 0x89e   : > { %v3620_v0 = vsel %vm1156_vm10, %v10067_v12, %v10068_v2  ;;  %9200 = vmatpush1.bf16.msra.mxu0 %v9199_v10  ;;  %v9201_v16 = vpack.c.bf16 %v10068_v2, %v10063_v53  ;;  %v3627_v30 = vsel %vm1164_vm12, %v10072_v14, %v10073_v1 }
 0x89f   : > { %v10081_v59 = vpop.permute.xlu0 %10080  ;;  %v10076_v3 = vpop.permute.xlu1 %10075  ;;  %v9203_v56 = vpack.c.bf16 %v3620_v0, %v3613_v13 }
 0x8a0   : > { %v10078_v18 = vunpack.i.h.bf16 %v10076_v3  ;;  %v10077_v33 = vunpack.i.l.bf16 %v10076_v3  ;;  %9202 = vmatprep.subr.bf16.mxu0 %v9201_v16  ;;  %v10083_v23 = vunpack.i.h.bf16 %v10081_v59  ;;  %v10082_v58 = vunpack.i.l.bf16 %v10081_v59 }
 0x8a1   : > { %4232 = vrot.lane.b32.xlu0 %v12748_v51, %s15874_s2  ;;  %4236 = vrot.lane.b32.xlu1 %v12751_v54, %s15874_s2  ;;  %v3913_v59 = vsel %vm569_vm0, %v12846_v41, %v12838_v36 }
 0x8a2   : > { %v3634_v44 = vsel %vm1172_vm11, %v10077_v33, %v10078_v18  ;;  %9204 = vmatpush1.bf16.msra.mxu0 %v9203_v56  ;;  %v9205_v53 = vpack.c.bf16 %v10078_v18, %v10073_v1  ;;  %v3641_v54 = vsel %vm1180_vm13, %v10082_v58, %v10083_v23 }
 0x8a3   : > { %v3880_v52 = vpop.permute.xlu0 %3879  ;;  %v10086_v47 = vpop.permute.xlu1 %10085  ;;  %v9207_v17 = vpack.c.bf16 %v3634_v44, %v3627_v30 }
 0x8a4   : > { %v10088_v34 = vunpack.i.h.bf16 %v10086_v47  ;;  %v10087_v10 = vunpack.i.l.bf16 %v10086_v47  ;;  %9206 = vmatprep.subr.bf16.mxu0 %v9205_v53 }
 0x8a5   : > { %4242 = vrot.lane.b32.xlu0 %v12758_v20, %s15874_s2  ;;  %4240 = vrot.lane.b32.xlu1 %v12761_v57, %s15874_s2  ;;  %v3914_v20 = vsel %vm569_vm0, %v12838_v36, %v12836_v46  ;;  %v3916_v46 = vsel %vm569_vm0, %v12844_v19, %v12858_v43 }
 0x8a6   : > { %v3648_v2 = vsel %vm1188_vm14, %v10087_v10, %v10088_v34  ;;  %9208 = vmatpush1.bf16.msra.mxu0 %v9207_v17  ;;  %v9209_v12 = vpack.c.bf16 %v10088_v34, %v10083_v23 }
 0x8a7   : > { %v3878_v14 = vpop.permute.xlu0 %3877  ;;  %v3882_v1 = vpop.permute.xlu1 %3881  ;;  %v9211_v13 = vpack.c.bf16 %v3648_v2, %v3641_v54 }
 0x8a8   : > { %9210 = vmatprep.subr.bf16.mxu0 %v9209_v12  ;;  %v3917_v43 = vsel %vm569_vm0, %v3878_v14, %v3880_v52 }
 0x8a9   : > { %4246 = vrot.lane.b32.xlu0 %v12768_v40, %s15874_s2  ;;  %4238 = vrot.lane.b32.xlu1 %v12771_v31, %s15874_s2 }
 0x8aa   : > { %9212 = vmatpush1.bf16.msra.mxu0 %v9211_v13 }
 0x8ab   : > { %3945 = vmatprep.subr.bf16.mxu0 %v3914_v20  ;;  %v3888_v0 = vpop.permute.xlu0 %3887  ;;  %v3886_v16 = vpop.permute.xlu1 %3885  ;;  %v12961_v20 = vld [vmem:[%s15795_s1 + $0x10] sm:$0xff]  }
 0x8ad   : > { %3716 = vmatmul.mubr.f32.vlgmr.msra.gmra.mrb[20].mxu0 %v12544_v60  ;;  %4244 = vrot.lane.b32.xlu0 %v12778_v8, %s15874_s2  ;;  %v3915_v60 = vsel %vm569_vm0, %v12856_v38, %v12844_v19 }
 0x8ae   : > { %4248 = vrot.lane.b32.xlu1 %v12781_v29, %s15874_s2  ;;  %3946 = vmatpush1.bf16.msra.mxu0 %v3913_v59  ;;  %v3918_v29 = vsel %vm569_vm0, %v3880_v52, %v3882_v1 }
 0x8af   : > { %3947 = vmatprep.subr.bf16.mxu0 %v3916_v46  ;;  %v3892_v3 = vpop.permute.xlu0 %3891  ;;  %v3884_v56 = vpop.permute.xlu1 %3883  ;;  %3721 = vmatprep.mubr.f32.mxu0 %v15880_v26 }
 0x8b0   : > { %v3919_v38 = vsel %vm569_vm0, %v3884_v56, %v3886_v16 }
 0x8b1   : > { %4254 = vrot.lane.b32.xlu0 %v12788_v55, %s15874_s2  ;;  %3722 = vmatmul.mubr.f32.gmra.mrb[22].mxu0 %v12563_v35  ;;  %v3920_v55 = vsel %vm569_vm0, %v3886_v16, %v3888_v0 }
 0x8b2   : > { %4252 = vrot.lane.b32.xlu1 %v12791_v7, %s15874_s2  ;;  %3948 = vmatpush1.bf16.msra.mxu0 %v3915_v60 }
 0x8b3   : > { %3949 = vmatprep.subr.bf16.mxu0 %v3918_v29  ;;  %v3890_v36 = vpop.permute.xlu0 %3889  ;;  %v3894_v41 = vpop.permute.xlu1 %3893  ;;  %3977 = vmatprep.mubr.bf16.mxu0 %v15881_v25 }
 0x8b4   : > { %v3922_v18 = vsel %vm569_vm0, %v3892_v3, %v3894_v41  ;;  %v3921_v23 = vsel %vm569_vm0, %v3890_v36, %v3892_v3 }
 0x8b6   : > { %4250 = vrot.lane.b32.xlu1 %v12798_v45, %s15874_s2  ;;  %3950 = vmatpush1.bf16.msra.mxu0 %v3917_v43 }
 0x8b7   : > { %3951 = vmatprep.subr.bf16.mxu0 %v3920_v55  ;;  %v3900_v35 = vpop.permute.xlu0 %3899  ;;  %v3898_v19 = vpop.permute.xlu1 %3897 }
 0x8b8   : > { %v3924_v58 = vsel %vm569_vm0, %v3898_v19, %v3900_v35  ;;  %v13003_v35 = vld [vmem:[%s15795_s1 + $0x8] sm:$0xff]  }
 0x8ba   : > { %3952 = vmatpush1.bf16.msra.mxu0 %v3919_v38 }
 0x8bb   : > { %3953 = vmatprep.subr.bf16.mxu0 %v3922_v18  ;;  %v3904_v33 = vpop.permute.xlu0 %3903  ;;  %v3896_v30 = vpop.permute.xlu1 %3895 }
 0x8bc   : > { %v3923_v47 = vsel %vm569_vm0, %v3896_v30, %v3898_v19 }
 0x8be   : > { %3954 = vmatpush1.bf16.msra.mxu0 %v3921_v23 }
 0x8bf   : > { %3955 = vmatprep.subr.bf16.mxu0 %v3924_v58  ;;  %v3902_v44 = vpop.permute.xlu0 %3901  ;;  %v3906_v53 = vpop.permute.xlu1 %3905 }
 0x8c0   : > { %v3926_v52 = vsel %vm569_vm0, %v3904_v33, %v3906_v53  ;;  %v3925_v54 = vsel %vm569_vm0, %v3902_v44, %v3904_v33 }
 0x8c2   : > { %3956 = vmatpush1.bf16.msra.mxu0 %v3923_v47 }
 0x8c3   : > { %3957 = vmatprep.subr.bf16.mxu0 %v3926_v52  ;;  %v3912_v17 = vpop.permute.xlu0 %3911  ;;  %v3910_v34 = vpop.permute.xlu1 %3909 }
 0x8c4   : > { %v3928_v10 = vsel %vm569_vm0, %v3910_v34, %v3912_v17 }
 0x8c6   : > { %3958 = vmatpush1.bf16.msra.mxu0 %v3925_v54 }
 0x8c7   : > { %3959 = vmatprep.subr.bf16.mxu0 %v3928_v10  ;;  %v4070_v2 = vpop.permute.xlu0 %4069  ;;  %v3908_v12 = vpop.permute.xlu1 %3907 }
 0x8c8   : > { %v3927_v14 = vsel %vm569_vm0, %v3908_v12, %v3910_v34 }
 0x8ca   : > { %3960 = vmatpush1.bf16.msra.mxu0 %v3927_v14 }
 0x8cb   : > { %v4068_v1 = vpop.permute.xlu0 %4067  ;;  %v4072_v13 = vpop.permute.xlu1 %4071  ;;  %4014 = vmatprep.subr.bf16.mxu0 %v12657_v22  ;;  %v12972_v22 = vld [vmem:[%s15795_s1 + $0x18] sm:$0xff]  }
 0x8cd   : > { %3978 = vmatmul.mubr.bf16.vlgmr.msra.gmra.mrb[24].mxu0 %v12961_v20 }
 0x8ce   : > { %4015 = vmatpush1.bf16.msra.mxu0 %v12669_v32  ;;  %3987 = vmatprep.mubr.bf16.mxu0 %v15881_v25 }
 0x8cf   : > { %v4078_v0 = vpop.permute.xlu0 %4077  ;;  %v4076_v16 = vpop.permute.xlu1 %4075  ;;  %4016 = vmatprep.subr.bf16.mxu0 %v12666_v21 }
 0x8d2   : > { %4017 = vmatpush1.bf16.msra.mxu0 %v12676_v24 }
 0x8d3   : > { %v4082_v59 = vpop.permute.xlu0 %4081  ;;  %v4074_v46 = vpop.permute.xlu1 %4073  ;;  %4018 = vmatprep.subr.bf16.mxu0 %v12712_v48 }
 0x8d5   : > { %3988 = vmatmul.mubr.bf16.gmra.mrb[28].mxu0 %v12972_v22 }
 0x8d6   : > { %4019 = vmatpush1.bf16.msra.mxu0 %v12718_v4  ;;  %4046 = vmatprep.mubr.bf16.mxu0 %v15881_v25 }
 0x8d7   : > { %v4080_v32 = vpop.permute.xlu0 %4079  ;;  %v4084_v3 = vpop.permute.xlu1 %4083  ;;  %4020 = vmatprep.subr.bf16.mxu0 %v12731_v37 }
 0x8d8   : > { %v4120_v36 = vsel %vm801_vm1, %v4082_v59, %v4084_v3  ;;  %v4119_v55 = vsel %vm801_vm1, %v4080_v32, %v4082_v59  ;;  %v13022_v32 = vld [vmem:[%s15795_s1 + $0x20] sm:$0xff]  }
 0x8da   : > { %4021 = vmatpush1.bf16.msra.mxu0 %v12741_v39 }
 0x8db   : > { %v4090_v21 = vpop.permute.xlu0 %4089  ;;  %v4088_v24 = vpop.permute.xlu1 %4087  ;;  %4022 = vmatprep.subr.bf16.mxu0 %v12738_v9  ;;  %v4116_v9 = vsel %vm801_vm1, %v4070_v2, %v4072_v13 }
 0x8dc   : > { %v4122_v19 = vsel %vm801_vm1, %v4088_v24, %v4090_v21 }
 0x8de   : > { %4023 = vmatpush1.bf16.msra.mxu0 %v12748_v51 }
 0x8df   : > { %v4094_v48 = vpop.permute.xlu0 %4093  ;;  %v4086_v56 = vpop.permute.xlu1 %4085  ;;  %4024 = vmatprep.subr.bf16.mxu0 %v12761_v57  ;;  %v4115_v57 = vsel %vm801_vm1, %v4068_v1, %v4070_v2 }
 0x8e0   : > { %v4121_v33 = vsel %vm801_vm1, %v4086_v56, %v4088_v24 }
 0x8e2   : > { %4025 = vmatpush1.bf16.msra.mxu0 %v12771_v31  ;;  %v12992_v31 = vld [vmem:[%s15795_s1] sm:$0xff]  }
 0x8e3   : > { %v4092_v4 = vpop.permute.xlu0 %4091  ;;  %v4096_v60 = vpop.permute.xlu1 %4095  ;;  %4026 = vmatprep.subr.bf16.mxu0 %v12768_v40  ;;  %v4118_v40 = vsel %vm801_vm1, %v4076_v16, %v4078_v0 }
 0x8e4   : > { %v4124_v30 = vsel %vm801_vm1, %v4094_v48, %v4096_v60  ;;  %v4123_v44 = vsel %vm801_vm1, %v4092_v4, %v4094_v48 }
 0x8e6   : > { %4027 = vmatpush1.bf16.msra.mxu0 %v12778_v8 }
 0x8e7   : > { %v4102_v37 = vpop.permute.xlu0 %4101  ;;  %v4100_v39 = vpop.permute.xlu1 %4099  ;;  %4028 = vmatprep.subr.bf16.mxu0 %v12791_v7 }
 0x8e8   : > { %v4126_v53 = vsel %vm801_vm1, %v4100_v39, %v4102_v37 }
 0x8ea   : > { %4029 = vmatpush1.bf16.msra.mxu0 %v12798_v45  ;;  %v4117_v45 = vsel %vm801_vm1, %v4074_v46, %v4076_v16 }
 0x8eb   : > { %4147 = vmatprep.subr.bf16.mxu0 %v4116_v9  ;;  %v4106_v51 = vpop.permute.xlu0 %4105  ;;  %v4098_v29 = vpop.permute.xlu1 %4097 }
 0x8ec   : > { %v4125_v17 = vsel %vm801_vm1, %v4098_v29, %v4100_v39  ;;  %v13033_v39 = vld [vmem:[%s15795_s1 + $0x28] sm:$0xff]  }
 0x8ed   : > { %4047 = vmatmul.mubr.bf16.vlgmr.msra.gmra.mrb[24].mxu0 %v12992_v31 }
 0x8ee   : > { %4148 = vmatpush1.bf16.msra.mxu0 %v4115_v57  ;;  %4056 = vmatprep.mubr.bf16.mxu0 %v15881_v25 }
 0x8ef   : > { %4149 = vmatprep.subr.bf16.mxu0 %v4118_v40  ;;  %v4104_v8 = vpop.permute.xlu0 %4103  ;;  %v4108_v7 = vpop.permute.xlu1 %4107 }
 0x8f0   : > { %v4128_v34 = vsel %vm801_vm1, %v4106_v51, %v4108_v7  ;;  %v4127_v2 = vsel %vm801_vm1, %v4104_v8, %v4106_v51 }
 0x8f2   : > { %4150 = vmatpush1.bf16.msra.mxu0 %v4117_v45 }
 0x8f3   : > { %4151 = vmatprep.subr.bf16.mxu0 %v4120_v36  ;;  %v4114_v41 = vpop.permute.xlu0 %4113  ;;  %v4112_v43 = vpop.permute.xlu1 %4111 }
 0x8f4   : > { %v4130_v12 = vsel %vm801_vm1, %v4112_v43, %v4114_v41 }
 0x8f5   : > { %4057 = vmatmul.mubr.bf16.gmra.mrb[28].mxu0 %v13003_v35 }
 0x8f6   : > { %4152 = vmatpush1.bf16.msra.mxu0 %v4119_v55  ;;  %4179 = vmatprep.mubr.bf16.mxu0 %v15881_v25 }
 0x8f7   : > { %4153 = vmatprep.subr.bf16.mxu0 %v4122_v19  ;;  %v4211_v38 = vpop.permute.xlu0 %4210  ;;  %v4110_v18 = vpop.permute.xlu1 %4109 }
 0x8f8   : > { %v4129_v13 = vsel %vm801_vm1, %v4110_v18, %v4112_v43 }
 0x8fa   : > { %4154 = vmatpush1.bf16.msra.mxu0 %v4121_v33 }
 0x8fb   : > { %4155 = vmatprep.subr.bf16.mxu0 %v4124_v30  ;;  %v4209_v23 = vpop.permute.xlu0 %4208  ;;  %v4213_v58 = vpop.permute.xlu1 %4212 }
 0x8fc   : > { %v4257_v0 = vsel %vm960_vm2, %v4211_v38, %v4213_v58  ;;  %v4256_v46 = vsel %vm960_vm2, %v4209_v23, %v4211_v38 }
 0x8fe   : > { %4156 = vmatpush1.bf16.msra.mxu0 %v4123_v44  ;;  %v13050_v44 = vld [vmem:[%s15795_s1 + $0x30] sm:$0xff]  }
 0x8ff   : > { %4157 = vmatprep.subr.bf16.mxu0 %v4126_v53  ;;  %v4219_v52 = vpop.permute.xlu0 %4218  ;;  %v4217_v47 = vpop.permute.xlu1 %4216  ;;  %v13057_v53 = vld [vmem:[%s15795_s1 + $0x38] sm:$0xff]  }
 0x900   : > { %v4259_v3 = vsel %vm960_vm2, %v4217_v47, %v4219_v52 }
 0x902   : > { %4158 = vmatpush1.bf16.msra.mxu0 %v4125_v17 }
 0x903   : > { %4159 = vmatprep.subr.bf16.mxu0 %v4128_v34  ;;  %v4223_v10 = vpop.permute.xlu0 %4222  ;;  %v4215_v54 = vpop.permute.xlu1 %4214  ;;  %v13068_v34 = vld [vmem:[%s11126_s29 + $0x3c8] ss:$12 sps:$4 sm:$0xff]  }
 0x904   : > { %v4258_v48 = vsel %vm960_vm2, %v4215_v54, %v4217_v47  ;;  %4684 = vrot.lane.b32.xlu0 %v13068_v34, %s15871_s25 }
 0x906   : > { %4160 = vmatpush1.bf16.msra.mxu0 %v4127_v2  ;;  %v13080_v2 = vld [vmem:[%s11126_s29 + $0x3dc] ss:$12 sps:$4 sm:$0xff]  }
 0x907   : > { %4161 = vmatprep.subr.bf16.mxu0 %v4130_v12  ;;  %v4221_v14 = vpop.permute.xlu0 %4220  ;;  %v4225_v1 = vpop.permute.xlu1 %4224  ;;  %v13083_v12 = vld [vmem:[%s11126_s29 + $0x3c0] ss:$12 sps:$4 sm:$0xff]  }
 0x908   : > { %v4261_v56 = vsel %vm960_vm2, %v4223_v10, %v4225_v1  ;;  %v4260_v37 = vsel %vm960_vm2, %v4221_v14, %v4223_v10  ;;  %v13071_v10 = vld [vmem:[%s11126_s29 + $0x3c4] ss:$12 sps:$4 sm:$0xff]   ;;  %4688 = vrot.lane.b32.xlu0 %v13080_v2, %s15871_s25  ;;  %v13093_v1 = vld [vmem:[%s11126_s29 + $0x3e0] ss:$12 sps:$4 sm:$0xff]  }
 0x909   : > { %4682 = vrot.lane.b32.xlu1 %v13071_v10, %s15871_s25  ;;  %v13090_v14 = vld [vmem:[%s11126_s29 + $0x3d8] ss:$12 sps:$4 sm:$0xff]  }
 0x90a   : > { %4162 = vmatpush1.bf16.msra.mxu0 %v4129_v13 }
 0x90b   : > { %4288 = vmatprep.subr.bf16.mxu0 %v4257_v0  ;;  %v4231_v16 = vpop.permute.xlu0 %4230  ;;  %v4229_v59 = vpop.permute.xlu1 %4228 }
 0x90c   : > { %v4263_v9 = vsel %vm960_vm2, %v4229_v59, %v4231_v16  ;;  %4686 = vrot.lane.b32.xlu0 %v13090_v14, %s15871_s25 }
 0x90d   : > { %4180 = vmatmul.mubr.bf16.vlgmr.msra.gmra.mrb[24].mxu0 %v13022_v32  ;;  %4680 = vrot.lane.b32.xlu1 %v13083_v12, %s15871_s25 }
 0x90e   : > { %4289 = vmatpush1.bf16.msra.mxu0 %v4256_v46  ;;  %4189 = vmatprep.mubr.bf16.mxu0 %v15881_v25 }
 0x90f   : > { %4290 = vmatprep.subr.bf16.mxu0 %v4259_v3  ;;  %v4235_v21 = vpop.permute.xlu0 %4234  ;;  %v4227_v24 = vpop.permute.xlu1 %4226 }
 0x910   : > { %v4262_v57 = vsel %vm960_vm2, %v4227_v24, %v4229_v59 }
 0x911   : > { %4690 = vrot.lane.b32.xlu1 %v13093_v1, %s15871_s25 }
 0x912   : > { %4291 = vmatpush1.bf16.msra.mxu0 %v4258_v48 }
 0x913   : > { %4292 = vmatprep.subr.bf16.mxu0 %v4261_v56  ;;  %v4233_v4 = vpop.permute.xlu0 %4232  ;;  %v4237_v60 = vpop.permute.xlu1 %4236 }
 0x914   : > { %v4265_v40 = vsel %vm960_vm2, %v4235_v21, %v4237_v60  ;;  %v4264_v45 = vsel %vm960_vm2, %v4233_v4, %v4235_v21 }
 0x915   : > { %4190 = vmatmul.mubr.bf16.gmra.mrb[28].mxu0 %v13033_v39 }
 0x916   : > { %4293 = vmatpush1.bf16.msra.mxu0 %v4260_v37  ;;  %4320 = vmatprep.mubr.bf16.mxu0 %v15881_v25 }
 0x917   : > { %4294 = vmatprep.subr.bf16.mxu0 %v4263_v9  ;;  %v4243_v51 = vpop.permute.xlu0 %4242  ;;  %v4241_v29 = vpop.permute.xlu1 %4240 }
 0x918   : > { %v4267_v36 = vsel %vm960_vm2, %v4241_v29, %v4243_v51 }
 0x91a   : > { %4295 = vmatpush1.bf16.msra.mxu0 %v4262_v57 }
 0x91b   : > { %4296 = vmatprep.subr.bf16.mxu0 %v4265_v40  ;;  %v4247_v8 = vpop.permute.xlu0 %4246  ;;  %v4239_v7 = vpop.permute.xlu1 %4238 }
 0x91c   : > { %v4266_v55 = vsel %vm960_vm2, %v4239_v7, %v4241_v29  ;;  %v13126_v7 = vld [vmem:[%s11126_s29 + $0x3f4] ss:$12 sps:$4 sm:$0xff]  }
 0x91e   : > { %4297 = vmatpush1.bf16.msra.mxu0 %v4264_v45  ;;  %v13132_v45 = vld [vmem:[%s11126_s29 + $0x3f0] ss:$12 sps:$4 sm:$0xff]  }
 0x91f   : > { %4298 = vmatprep.subr.bf16.mxu0 %v4267_v36  ;;  %v4245_v41 = vpop.permute.xlu0 %4244  ;;  %v13135_v36 = vld [vmem:[%s11126_s29 + $0x3f8] ss:$12 sps:$4 sm:$0xff]  }
 0x920   : > { %v4249_v43 = vpop.permute.xlu1 %4248  ;;  %v4268_v33 = vsel %vm960_vm2, %v4245_v41, %v4247_v8  ;;  %v13142_v41 = vld [vmem:[%s11126_s29 + $0x410] ss:$12 sps:$4 sm:$0xff]  }
 0x921   : > { %v4269_v19 = vsel %vm960_vm2, %v4247_v8, %v4249_v43  ;;  %v13145_v43 = vld [vmem:[%s11126_s29 + $0x40c] ss:$12 sps:$4 sm:$0xff]  }
 0x922   : > { %4299 = vmatpush1.bf16.msra.mxu0 %v4266_v55  ;;  %v13152_v55 = vld [vmem:[%s11126_s29 + $0x424] ss:$12 sps:$4 sm:$0xff]  }
 0x923   : > { %4300 = vmatprep.subr.bf16.mxu0 %v4269_v19  ;;  %v4255_v38 = vpop.permute.xlu0 %4254  ;;  %v13155_v19 = vld [vmem:[%s11126_s29 + $0x408] ss:$12 sps:$4 sm:$0xff]  }
 0x924   : > { %v4253_v18 = vpop.permute.xlu1 %4252 }
 0x925   : > { %v4271_v30 = vsel %vm960_vm2, %v4253_v18, %v4255_v38  ;;  %v13162_v38 = vld [vmem:[%s11126_s29 + $0x420] ss:$12 sps:$4 sm:$0xff]  }
 0x926   : > { %4301 = vmatpush1.bf16.msra.mxu0 %v4268_v33  ;;  %v13172_v33 = vld [vmem:[%s11126_s29 + $0x440] ss:$12 sps:$4 sm:$0xff]  }
 0x927   : > { %4302 = vmatprep.subr.bf16.mxu0 %v4271_v30  ;;  %v13175_v30 = vld [vmem:[%s11126_s29 + $0x43c] ss:$12 sps:$4 sm:$0xff]  }
 0x928   : > { %v4251_v23 = vpop.permute.xlu1 %4250 }
 0x929   : > { %v4270_v58 = vsel %vm960_vm2, %v4251_v23, %v4253_v18  ;;  %v13165_v18 = vld [vmem:[%s11126_s29 + $0x428] ss:$12 sps:$4 sm:$0xff]  }
 0x92a   : > { %4303 = vmatpush1.bf16.msra.mxu0 %v4270_v58  ;;  %v13182_v23 = vld [vmem:[%s11126_s29 + $0x454] ss:$12 sps:$4 sm:$0xff]   ;;  %v13185_v58 = vld [vmem:[%s11126_s29 + $0x438] ss:$12 sps:$4 sm:$0xff]  }
 0x92d   : > { %4321 = vmatmul.mubr.bf16.vlgmr.msra.gmra.mrb[24].mxu0 %v13050_v44 }
 0x92e   : > { %4330 = vmatprep.mubr.bf16.mxu0 %v15881_v25 }
 0x935   : > { %4331 = vmatmul.mubr.bf16.gmra.mrb[28].mxu0 %v13057_v53 }
 0x936   : > { %5345 = vmatprep.mubr.f32.mxu0 %v15880_v26 }
 0x980   : > { %v13061_v52 = vpop.f32.mrb[20].mxu0 }
 0x981   : > { %15886 = vst [vmem:[#allocation18_spill] sm:$0xff] %v13061_v52  ;;  %v13063_v47 = vpop.f32.mrb[21].mxu0 }
 0x982   : > { %15887 = vst [vmem:[#allocation19_spill] sm:$0xff] %v13063_v47 }
 0x984   : > { %v13065_v17 = vpop.f32.mrb[22].mxu0 }
 0x985   : > { %15888 = vst [vmem:[#allocation20_spill] sm:$0xff] %v13065_v17  ;;  %v13073_v54 = vpop.f32.mrb[23].mxu0 }
 0x986   : > { %15889 = vst [vmem:[#allocation21_spill] sm:$0xff] %v13073_v54 }
 0xa00   : > { %v4322_v13 = vpop.f32.mrb[24].mxu0 }
 0xa01   : > { %v4324_v0 = vpop.f32.mrb[25].mxu0 }
 0xa02   : > { %v4326_v16 = vpop.f32.mrb[26].mxu0 }
 0xa03   : > { %v4349_v59 = vmax.f32 %v4322_v13, %v4326_v16  ;;  %v4328_v46 = vpop.f32.mrb[27].mxu0  ;;  %v13192_v13 = vld [vmem:[%s11126_s29 + $0x450] ss:$12 sps:$4 sm:$0xff]  }
 0xa04   : > { %v4350_v3 = vmax.f32 %v4324_v0, %v4328_v46  ;;  %v13195_v0 = vld [vmem:[%s11126_s29 + $0x458] ss:$12 sps:$4 sm:$0xff]   ;;  %v13202_v16 = vld [vmem:[%s11126_s29 + $0x470] ss:$12 sps:$4 sm:$0xff]   ;;  %v13212_v46 = vld [vmem:[%s11126_s29 + $0x468] ss:$12 sps:$4 sm:$0xff]  }
 0xa08   : > { %v4332_v21 = vpop.f32.mrb[28].mxu0 }
 0xa09   : > { %v4334_v24 = vpop.f32.mrb[29].mxu0 }
 0xa0a   : > { %v4336_v48 = vpop.f32.mrb[30].mxu0 }
 0xa0b   : > { %v4351_v56 = vmax.f32 %v4332_v21, %v4336_v48  ;;  %v4338_v4 = vpop.f32.mrb[31].mxu0  ;;  %v13252_v21 = vpop.permute.xlu1 %4682 }
 0xa0c   : > { %v4352_v60 = vmax.f32 %v4334_v24, %v4338_v4 }
 0xa0d   : > { %v4353_v37 = vmax.f32 %v4349_v59, %v4351_v56  ;;  %v13205_v59 = vld [vmem:[%s11126_s29 + $0x46c] ss:$12 sps:$4 sm:$0xff]  }
 0xa0e   : > { %v4354_v9 = vmax.f32 %v4350_v3, %v4352_v60  ;;  %v13250_v3 = vpop.permute.xlu0 %4684 }
 0xa0f   : > { %v13100_v51 = vadd.f32 %v4353_v37, %v11499_v50  ;;  %v13260_v48 = vpop.permute.xlu1 %4680 }
 0xa10   : > { %v13103_v29 = vadd.f32 %v4354_v9, %v11499_v50 }
 0xa11   : > { %v15846_v57 = vmax.f32 %v13100_v51, 0.0  ;;  %v15891_v49 = vmax.f32 %v13100_v51, 0.0 }
 0xa12   : > { %v15847_v40 = vmax.f32 %v13103_v29, 0.0  ;;  %v13258_v24 = vpop.permute.xlu0 %4688  ;;  %v15890_v42 = vmax.f32 %v13103_v29, 0.0 }
 0xa13   : > { %v13272_v4 = vpop.permute.xlu1 %4690 }
 0xa14   : > { %v10094_v8 = vpack.i.bf16 %v15847_v40, %v15846_v57 }
 0xa16   : > { %10095 = vrot.lane.b32.xlu1 %v10094_v8, %s15863_s26  ;;  %10090 = vrot.lane.b32.xlu0 %v10094_v8, %s15871_s25  ;;  %v13270_v56 = vpop.permute.xlu0 %4686 }
 0xa1a   : > { %10105 = vrot.lane.b32.xlu1 %v10094_v8, %s15873_s12  ;;  %10100 = vrot.lane.b32.xlu0 %v10094_v8, %s15864_s27 }
 0xa1e   : > { %10115 = vrot.lane.b32.xlu1 %v10094_v8, %s15877_s24  ;;  %10110 = vrot.lane.b32.xlu0 %v10094_v8, %s15874_s2 }
 0xa22   : > { %10125 = vrot.lane.b32.xlu1 %v10094_v8, %s15878_s15  ;;  %10120 = vrot.lane.b32.xlu0 %v10094_v8, %s15865_s21 }
 0xa26   : > { %10135 = vrot.lane.b32.xlu1 %v10094_v8, %s15879_s19  ;;  %10130 = vrot.lane.b32.xlu0 %v10094_v8, %s15866_s18 }
 0xa2a   : > { %10145 = vrot.lane.b32.xlu1 %v10094_v8, %s15867_s30  ;;  %10140 = vrot.lane.b32.xlu0 %v10094_v8, %s15868_s11 }
 0xa2e   : > { %10155 = vrot.lane.b32.xlu1 %v10094_v8, %s15869_s0  ;;  %10150 = vrot.lane.b32.xlu0 %v10094_v8, %s15870_s20 }
 0xa32   : > { %4694 = vrot.lane.b32.xlu1 %v13126_v7, %s15871_s25  ;;  %10160 = vrot.lane.b32.xlu0 %v10094_v8, %s15872_s28 }
 0xa36   : > { %4692 = vrot.lane.b32.xlu1 %v13132_v45, %s15871_s25  ;;  %4696 = vrot.lane.b32.xlu0 %v13135_v36, %s15871_s25 }
 0xa3a   : > { %4702 = vrot.lane.b32.xlu1 %v13142_v41, %s15871_s25  ;;  %4700 = vrot.lane.b32.xlu0 %v13145_v43, %s15871_s25 }
 0xa3e   : > { %4706 = vrot.lane.b32.xlu1 %v13152_v55, %s15871_s25  ;;  %4698 = vrot.lane.b32.xlu0 %v13155_v19, %s15871_s25 }
 0xa42   : > { %4704 = vrot.lane.b32.xlu1 %v13162_v38, %s15871_s25  ;;  %4708 = vrot.lane.b32.xlu0 %v13165_v18, %s15871_s25 }
 0xa46   : > { %4714 = vrot.lane.b32.xlu1 %v13172_v33, %s15871_s25  ;;  %4712 = vrot.lane.b32.xlu0 %v13175_v30, %s15871_s25 }
 0xa4a   : > { %4718 = vrot.lane.b32.xlu1 %v13182_v23, %s15871_s25  ;;  %4710 = vrot.lane.b32.xlu0 %v13185_v58, %s15871_s25 }
 0xa4e   : > { %4716 = vrot.lane.b32.xlu1 %v13192_v13, %s15871_s25  ;;  %4720 = vrot.lane.b32.xlu0 %v13195_v0, %s15871_s25 }
 0xa52   : > { %4726 = vrot.lane.b32.xlu1 %v13202_v16, %s15871_s25  ;;  %4724 = vrot.lane.b32.xlu0 %v13205_v59, %s15871_s25 }
 0xa56   : > { %4884 = vrot.lane.b32.xlu1 %v13071_v10, %s15873_s12  ;;  %4722 = vrot.lane.b32.xlu0 %v13212_v46, %s15871_s25 }
 0xa5a   : > { %4882 = vrot.lane.b32.xlu1 %v13083_v12, %s15873_s12  ;;  %4886 = vrot.lane.b32.xlu0 %v13068_v34, %s15873_s12 }
 0xa5e   : > { %4892 = vrot.lane.b32.xlu1 %v13093_v1, %s15873_s12  ;;  %4890 = vrot.lane.b32.xlu0 %v13080_v2, %s15873_s12 }
 0xa62   : > { %4896 = vrot.lane.b32.xlu1 %v13126_v7, %s15873_s12  ;;  %4888 = vrot.lane.b32.xlu0 %v13090_v14, %s15873_s12 }
 0xa66   : > { %4894 = vrot.lane.b32.xlu1 %v13132_v45, %s15873_s12  ;;  %4898 = vrot.lane.b32.xlu0 %v13135_v36, %s15873_s12 }
 0xa6a   : > { %4904 = vrot.lane.b32.xlu1 %v13142_v41, %s15873_s12  ;;  %4902 = vrot.lane.b32.xlu0 %v13145_v43, %s15873_s12 }
 0xa6e   : > { %4908 = vrot.lane.b32.xlu1 %v13152_v55, %s15873_s12  ;;  %4900 = vrot.lane.b32.xlu0 %v13155_v19, %s15873_s12 }
 0xa72   : > { %4906 = vrot.lane.b32.xlu1 %v13162_v38, %s15873_s12  ;;  %4910 = vrot.lane.b32.xlu0 %v13165_v18, %s15873_s12 }
 0xa76   : > { %4916 = vrot.lane.b32.xlu1 %v13172_v33, %s15873_s12  ;;  %4914 = vrot.lane.b32.xlu0 %v13175_v30, %s15873_s12 }
 0xa7a   : > { %4920 = vrot.lane.b32.xlu1 %v13182_v23, %s15873_s12  ;;  %4912 = vrot.lane.b32.xlu0 %v13185_v58, %s15873_s12 }
 0xa7e   : > { %4918 = vrot.lane.b32.xlu1 %v13192_v13, %s15873_s12  ;;  %4922 = vrot.lane.b32.xlu0 %v13195_v0, %s15873_s12 }
 0xa82   : > { %4928 = vrot.lane.b32.xlu1 %v13202_v16, %s15873_s12  ;;  %4926 = vrot.lane.b32.xlu0 %v13205_v59, %s15873_s12 }
 0xa86   : > { %5025 = vrot.lane.b32.xlu1 %v13071_v10, %s15874_s2  ;;  %4924 = vrot.lane.b32.xlu0 %v13212_v46, %s15873_s12 }
 0xa88   : > { %v10096_v60 = vpop.permute.xlu1 %10095  ;;  %v10091_v37 = vpop.permute.xlu0 %10090 }
 0xa89   : > { %v10093_v9 = vunpack.i.h.bf16 %v10091_v37  ;;  %v10092_v8 = vunpack.i.l.bf16 %v10091_v37  ;;  %v10098_v57 = vunpack.i.h.bf16 %v10096_v60  ;;  %v10097_v40 = vunpack.i.l.bf16 %v10096_v60 }
 0xa8a   : > { %5023 = vrot.lane.b32.xlu1 %v13083_v12, %s15874_s2  ;;  %5027 = vrot.lane.b32.xlu0 %v13068_v34, %s15874_s2 }
 0xa8b   : > { %v4365_v47 = vsel %vm569_vm0, %v10092_v8, %v10093_v9  ;;  %v9213_v54 = vpack.c.bf16 %v10093_v9, %v15890_v42  ;;  %v4372_v34 = vsel %vm1084_vm3, %v10097_v40, %v10098_v57 }
 0xa8c   : > { %v10106_v15 = vpop.permute.xlu1 %10105  ;;  %v10101_v52 = vpop.permute.xlu0 %10100  ;;  %v9215_v17 = vpack.c.bf16 %v4365_v47, %v15891_v49 }
 0xa8d   : > { %v10103_v11 = vunpack.i.h.bf16 %v10101_v52  ;;  %v10102_v37 = vunpack.i.l.bf16 %v10101_v52  ;;  %9214 = vmatprep.subr.bf16.mxu1 %v9213_v54  ;;  %v10108_v28 = vunpack.i.h.bf16 %v10106_v15  ;;  %v10107_v63 = vunpack.i.l.bf16 %v10106_v15 }
 0xa8e   : > { %5033 = vrot.lane.b32.xlu1 %v13093_v1, %s15874_s2  ;;  %5031 = vrot.lane.b32.xlu0 %v13080_v2, %s15874_s2 }
 0xa8f   : > { %v4379_v42 = vsel %vm1092_vm4, %v10102_v37, %v10103_v11  ;;  %9216 = vmatpush1.bf16.msra.mxu1 %v9215_v17  ;;  %v9217_v29 = vpack.c.bf16 %v10103_v11, %v10098_v57  ;;  %v4386_v15 = vsel %vm801_vm1, %v10107_v63, %v10108_v28 }
 0xa90   : > { %v10116_v60 = vpop.permute.xlu1 %10115  ;;  %v10111_v51 = vpop.permute.xlu0 %10110  ;;  %v9219_v49 = vpack.c.bf16 %v4379_v42, %v4372_v34 }
 0xa91   : > { %v10113_v47 = vunpack.i.h.bf16 %v10111_v51  ;;  %v10112_v52 = vunpack.i.l.bf16 %v10111_v51  ;;  %9218 = vmatprep.subr.bf16.mxu1 %v9217_v29  ;;  %v10118_v54 = vunpack.i.h.bf16 %v10116_v60  ;;  %v10117_v1 = vunpack.i.l.bf16 %v10116_v60 }
 0xa92   : > { %5037 = vrot.lane.b32.xlu1 %v13126_v7, %s15874_s2  ;;  %5029 = vrot.lane.b32.xlu0 %v13090_v14, %s15874_s2 }
 0xa93   : > { %v4393_v40 = vsel %vm960_vm2, %v10112_v52, %v10113_v47  ;;  %9220 = vmatpush1.bf16.msra.mxu1 %v9219_v49  ;;  %v9221_v11 = vpack.c.bf16 %v10113_v47, %v10108_v28  ;;  %v4400_v42 = vsel %vm1116_vm5, %v10117_v1, %v10118_v54 }
 0xa94   : > { %v10126_v17 = vpop.permute.xlu1 %10125  ;;  %v10121_v57 = vpop.permute.xlu0 %10120  ;;  %v9223_v9 = vpack.c.bf16 %v4393_v40, %v4386_v15 }
 0xa95   : > { %v10123_v8 = vunpack.i.h.bf16 %v10121_v57  ;;  %v10122_v37 = vunpack.i.l.bf16 %v10121_v57  ;;  %9222 = vmatprep.subr.bf16.mxu1 %v9221_v11  ;;  %v10128_v34 = vunpack.i.h.bf16 %v10126_v17  ;;  %v10127_v63 = vunpack.i.l.bf16 %v10126_v17 }
 0xa96   : > { %5035 = vrot.lane.b32.xlu1 %v13132_v45, %s15874_s2  ;;  %5039 = vrot.lane.b32.xlu0 %v13135_v36, %s15874_s2 }
 0xa97   : > { %v4407_v29 = vsel %vm1124_vm6, %v10122_v37, %v10123_v8  ;;  %9224 = vmatpush1.bf16.msra.mxu1 %v9223_v9  ;;  %v9225_v28 = vpack.c.bf16 %v10123_v8, %v10118_v54  ;;  %v4414_v15 = vsel %vm1132_vm8, %v10127_v63, %v10128_v34 }
 0xa98   : > { %v10136_v60 = vpop.permute.xlu1 %10135  ;;  %v10131_v51 = vpop.permute.xlu0 %10130  ;;  %v9227_v49 = vpack.c.bf16 %v4407_v29, %v4400_v42 }
 0xa99   : > { %v10133_v47 = vunpack.i.h.bf16 %v10131_v51  ;;  %v10132_v52 = vunpack.i.l.bf16 %v10131_v51  ;;  %9226 = vmatprep.subr.bf16.mxu1 %v9225_v28  ;;  %v10138_v36 = vunpack.i.h.bf16 %v10136_v60  ;;  %v10137_v1 = vunpack.i.l.bf16 %v10136_v60 }
 0xa9a   : > { %5045 = vrot.lane.b32.xlu1 %v13142_v41, %s15874_s2  ;;  %5043 = vrot.lane.b32.xlu0 %v13145_v43, %s15874_s2 }
 0xa9b   : > { %v4421_v40 = vsel %vm1140_vm7, %v10132_v52, %v10133_v47  ;;  %9228 = vmatpush1.bf16.msra.mxu1 %v9227_v49  ;;  %v9229_v54 = vpack.c.bf16 %v10133_v47, %v10128_v34  ;;  %v4428_v41 = vsel %vm1148_vm9, %v10137_v1, %v10138_v36 }
 0xa9c   : > { %v10146_v11 = vpop.permute.xlu1 %10145  ;;  %v10141_v17 = vpop.permute.xlu0 %10140  ;;  %v9231_v57 = vpack.c.bf16 %v4421_v40, %v4414_v15 }
 0xa9d   : > { %v10143_v9 = vunpack.i.h.bf16 %v10141_v17  ;;  %v10142_v8 = vunpack.i.l.bf16 %v10141_v17  ;;  %9230 = vmatprep.subr.bf16.mxu1 %v9229_v54  ;;  %v10148_v37 = vunpack.i.h.bf16 %v10146_v11  ;;  %v10147_v63 = vunpack.i.l.bf16 %v10146_v11 }
 0xa9e   : > { %5049 = vrot.lane.b32.xlu1 %v13152_v55, %s15874_s2  ;;  %5041 = vrot.lane.b32.xlu0 %v13155_v19, %s15874_s2 }
 0xa9f   : > { %v4435_v42 = vsel %vm1156_vm10, %v10142_v8, %v10143_v9  ;;  %9232 = vmatpush1.bf16.msra.mxu1 %v9231_v57  ;;  %v9233_v34 = vpack.c.bf16 %v10143_v9, %v10138_v36  ;;  %v4442_v47 = vsel %vm1164_vm12, %v10147_v63, %v10148_v37 }
 0xaa0   : > { %v10156_v29 = vpop.permute.xlu1 %10155  ;;  %v10151_v28 = vpop.permute.xlu0 %10150  ;;  %v9235_v60 = vpack.c.bf16 %v4435_v42, %v4428_v41 }
 0xaa1   : > { %v10153_v51 = vunpack.i.h.bf16 %v10151_v28  ;;  %v10152_v49 = vunpack.i.l.bf16 %v10151_v28  ;;  %9234 = vmatprep.subr.bf16.mxu1 %v9233_v34  ;;  %v10158_v52 = vunpack.i.h.bf16 %v10156_v29  ;;  %v10157_v15 = vunpack.i.l.bf16 %v10156_v29  ;;  %v13342_v28 = vld [vmem:[%s15797_s3] sm:$0xff] }
 0xaa2   : > { %5047 = vrot.lane.b32.xlu1 %v13162_v38, %s15874_s2  ;;  %5051 = vrot.lane.b32.xlu0 %v13165_v18, %s15874_s2  ;;  %v4728_v29 = vsel %vm569_vm0, %v13260_v48, %v13252_v21 }
 0xaa3   : > { %v4449_v1 = vsel %vm1172_vm11, %v10152_v49, %v10153_v51  ;;  %9236 = vmatpush1.bf16.msra.mxu1 %v9235_v60  ;;  %v9237_v36 = vpack.c.bf16 %v10153_v51, %v10148_v37  ;;  %v4456_v18 = vsel %vm1180_vm13, %v10157_v15, %v10158_v52  ;;  %v4730_v60 = vsel %vm569_vm0, %v13270_v56, %v13258_v24 }
 0xaa4   : > { %v4695_v40 = vpop.permute.xlu1 %4694  ;;  %v10161_v54 = vpop.permute.xlu0 %10160  ;;  %v9239_v11 = vpack.c.bf16 %v4449_v1, %v4442_v47 }
 0xaa5   : > { %v10163_v17 = vunpack.i.h.bf16 %v10161_v54  ;;  %v10162_v57 = vunpack.i.l.bf16 %v10161_v54  ;;  %9238 = vmatprep.subr.bf16.mxu1 %v9237_v36 }
 0xaa6   : > { %5057 = vrot.lane.b32.xlu1 %v13172_v33, %s15874_s2  ;;  %5055 = vrot.lane.b32.xlu0 %v13175_v30, %s15874_s2  ;;  %v4729_v33 = vsel %vm569_vm0, %v13252_v21, %v13250_v3  ;;  %v4731_v3 = vsel %vm569_vm0, %v13258_v24, %v13272_v4 }
 0xaa7   : > { %v4463_v9 = vsel %vm1188_vm14, %v10162_v57, %v10163_v17  ;;  %9240 = vmatpush1.bf16.msra.mxu1 %v9239_v11  ;;  %v9241_v8 = vpack.c.bf16 %v10163_v17, %v10158_v52 }
 0xaa8   : > { %v4693_v63 = vpop.permute.xlu1 %4692  ;;  %v4697_v37 = vpop.permute.xlu0 %4696  ;;  %v9243_v41 = vpack.c.bf16 %v4463_v9, %v4456_v18 }
 0xaa9   : > { %9242 = vmatprep.subr.bf16.mxu1 %v9241_v8  ;;  %v4733_v4 = vsel %vm569_vm0, %v4695_v40, %v4697_v37 }
 0xaaa   : > { %5061 = vrot.lane.b32.xlu1 %v13182_v23, %s15874_s2  ;;  %5053 = vrot.lane.b32.xlu0 %v13185_v58, %s15874_s2 }
 0xaab   : > { %9244 = vmatpush1.bf16.msra.mxu1 %v9243_v41 }
 0xaac   : > { %4760 = vmatprep.subr.bf16.mxu1 %v4729_v33  ;;  %v4703_v42 = vpop.permute.xlu1 %4702  ;;  %v4701_v34 = vpop.permute.xlu0 %4700 }
 0xaad   : > { %v4735_v24 = vsel %vm569_vm0, %v4701_v34, %v4703_v42 }
 0xaae   : > { %4531 = vmatmul.mubr.f32.vlgmr.msra.gmra.mrb[24].mxu1 %v13342_v28  ;;  %5059 = vrot.lane.b32.xlu1 %v13192_v13, %s15874_s2 }
 0xaaf   : > { %5063 = vrot.lane.b32.xlu0 %v13195_v0, %s15874_s2  ;;  %4761 = vmatpush1.bf16.msra.mxu1 %v4728_v29  ;;  %v13361_v0 = vld [vmem:[%s15797_s3 + $0x8] sm:$0xff] }
 0xab0   : > { %4762 = vmatprep.subr.bf16.mxu1 %v4731_v3  ;;  %v4707_v21 = vpop.permute.xlu1 %4706  ;;  %v4699_v48 = vpop.permute.xlu0 %4698  ;;  %4536 = vmatprep.mubr.f32.mxu1 %v15880_v26 }
 0xab1   : > { %v4734_v52 = vsel %vm569_vm0, %v4699_v48, %v4701_v34 }
 0xab2   : > { %5069 = vrot.lane.b32.xlu1 %v13202_v16, %s15874_s2  ;;  %4537 = vmatmul.mubr.f32.gmra.mrb[26].mxu1 %v13361_v0  ;;  %v4732_v16 = vsel %vm569_vm0, %v4693_v63, %v4695_v40 }
 0xab3   : > { %5067 = vrot.lane.b32.xlu0 %v13205_v59, %s15874_s2  ;;  %4763 = vmatpush1.bf16.msra.mxu1 %v4730_v60 }
 0xab4   : > { %4764 = vmatprep.subr.bf16.mxu1 %v4733_v4  ;;  %v4705_v51 = vpop.permute.xlu1 %4704  ;;  %v4709_v49 = vpop.permute.xlu0 %4708  ;;  %4792 = vmatprep.mubr.bf16.mxu1 %v15881_v25 }
 0xab5   : > { %v4737_v15 = vsel %vm569_vm0, %v4707_v21, %v4709_v49  ;;  %v4736_v54 = vsel %vm569_vm0, %v4705_v51, %v4707_v21 }
 0xab7   : > { %5065 = vrot.lane.b32.xlu0 %v13212_v46, %s15874_s2  ;;  %4765 = vmatpush1.bf16.msra.mxu1 %v4732_v16 }
 0xab8   : > { %4766 = vmatprep.subr.bf16.mxu1 %v4735_v24  ;;  %v4715_v56 = vpop.permute.xlu1 %4714  ;;  %v4713_v47 = vpop.permute.xlu0 %4712 }
 0xab9   : > { %v4739_v40 = vsel %vm569_vm0, %v4713_v47, %v4715_v56 }
 0xabb   : > { %4767 = vmatpush1.bf16.msra.mxu1 %v4734_v52 }
 0xabc   : > { %4768 = vmatprep.subr.bf16.mxu1 %v4737_v15  ;;  %v4719_v1 = vpop.permute.xlu1 %4718  ;;  %v4711_v36 = vpop.permute.xlu0 %4710 }
 0xabd   : > { %v4738_v18 = vsel %vm569_vm0, %v4711_v36, %v4713_v47 }
 0xabf   : > { %4769 = vmatpush1.bf16.msra.mxu1 %v4736_v54 }
 0xac0   : > { %4770 = vmatprep.subr.bf16.mxu1 %v4739_v40  ;;  %v4717_v11 = vpop.permute.xlu1 %4716  ;;  %v4721_v17 = vpop.permute.xlu0 %4720 }
 0xac1   : > { %v4741_v57 = vsel %vm569_vm0, %v4719_v1, %v4721_v17  ;;  %v4740_v37 = vsel %vm569_vm0, %v4717_v11, %v4719_v1 }
 0xac3   : > { %4771 = vmatpush1.bf16.msra.mxu1 %v4738_v18 }
 0xac4   : > { %4772 = vmatprep.subr.bf16.mxu1 %v4741_v57  ;;  %v4727_v9 = vpop.permute.xlu1 %4726  ;;  %v4725_v8 = vpop.permute.xlu0 %4724 }
 0xac5   : > { %v4743_v63 = vsel %vm569_vm0, %v4725_v8, %v4727_v9 }
 0xac7   : > { %4773 = vmatpush1.bf16.msra.mxu1 %v4740_v37 }
 0xac8   : > { %4774 = vmatprep.subr.bf16.mxu1 %v4743_v63  ;;  %v4885_v41 = vpop.permute.xlu1 %4884  ;;  %v4723_v33 = vpop.permute.xlu0 %4722 }
 0xac9   : > { %v4742_v42 = vsel %vm569_vm0, %v4723_v33, %v4725_v8 }
 0xacb   : > { %4775 = vmatpush1.bf16.msra.mxu1 %v4742_v42 }
 0xacc   : > { %v4883_v34 = vpop.permute.xlu1 %4882  ;;  %v4887_v29 = vpop.permute.xlu0 %4886  ;;  %4829 = vmatprep.subr.bf16.mxu1 %v13071_v10 }
 0xace   : > { %4793 = vmatmul.mubr.bf16.vlgmr.msra.gmra.mrb[28].mxu1 %v12961_v20 }
 0xacf   : > { %4830 = vmatpush1.bf16.msra.mxu1 %v13083_v12  ;;  %4802 = vmatprep.mubr.bf16.mxu1 %v15881_v25 }
 0xad0   : > { %v4893_v3 = vpop.permute.xlu1 %4892  ;;  %v4891_v21 = vpop.permute.xlu0 %4890  ;;  %4831 = vmatprep.subr.bf16.mxu1 %v13080_v2 }
 0xad3   : > { %4832 = vmatpush1.bf16.msra.mxu1 %v13090_v14 }
 0xad4   : > { %v4897_v48 = vpop.permute.xlu1 %4896  ;;  %v4889_v60 = vpop.permute.xlu0 %4888  ;;  %4833 = vmatprep.subr.bf16.mxu1 %v13126_v7 }
 0xad6   : > { %4803 = vmatmul.mubr.bf16.gmra.mrb[32].mxu1 %v12972_v22 }
 0xad7   : > { %4834 = vmatpush1.bf16.msra.mxu1 %v13132_v45  ;;  %4861 = vmatprep.mubr.bf16.mxu1 %v15881_v25 }
 0xad8   : > { %v4895_v20 = vpop.permute.xlu1 %4894  ;;  %v4899_v10 = vpop.permute.xlu0 %4898  ;;  %4835 = vmatprep.subr.bf16.mxu1 %v13145_v43 }
 0xad9   : > { %v4934_v16 = vsel %vm801_vm1, %v4895_v20, %v4897_v48 }
 0xadb   : > { %4836 = vmatpush1.bf16.msra.mxu1 %v13155_v19 }
 0xadc   : > { %v4905_v12 = vpop.permute.xlu1 %4904  ;;  %v4903_v2 = vpop.permute.xlu0 %4902  ;;  %4837 = vmatprep.subr.bf16.mxu1 %v13152_v55  ;;  %v4931_v55 = vsel %vm801_vm1, %v4885_v41, %v4887_v29 }
 0xadf   : > { %4838 = vmatpush1.bf16.msra.mxu1 %v13162_v38 }
 0xae0   : > { %v4909_v14 = vpop.permute.xlu1 %4908  ;;  %v4901_v7 = vpop.permute.xlu0 %4900  ;;  %4839 = vmatprep.subr.bf16.mxu1 %v13175_v30  ;;  %v4930_v30 = vsel %vm801_vm1, %v4883_v34, %v4885_v41 }
 0xae1   : > { %v4936_v47 = vsel %vm801_vm1, %v4901_v7, %v4903_v2 }
 0xae3   : > { %4840 = vmatpush1.bf16.msra.mxu1 %v13185_v58 }
 0xae4   : > { %v4907_v22 = vpop.permute.xlu1 %4906  ;;  %v4911_v45 = vpop.permute.xlu0 %4910  ;;  %4841 = vmatprep.subr.bf16.mxu1 %v13182_v23  ;;  %v4933_v23 = vsel %vm801_vm1, %v4891_v21, %v4893_v3 }
 0xae5   : > { %v4939_v52 = vsel %vm801_vm1, %v4909_v14, %v4911_v45  ;;  %v4938_v36 = vsel %vm801_vm1, %v4907_v22, %v4909_v14 }
 0xae7   : > { %4842 = vmatpush1.bf16.msra.mxu1 %v13192_v13 }
 0xae8   : > { %v4917_v43 = vpop.permute.xlu1 %4916  ;;  %v4915_v19 = vpop.permute.xlu0 %4914  ;;  %4843 = vmatprep.subr.bf16.mxu1 %v13205_v59  ;;  %v4932_v59 = vsel %vm801_vm1, %v4889_v60, %v4891_v21 }
 0xaeb   : > { %4844 = vmatpush1.bf16.msra.mxu1 %v13212_v46  ;;  %v4935_v46 = vsel %vm801_vm1, %v4897_v48, %v4899_v10 }
 0xaec   : > { %4962 = vmatprep.subr.bf16.mxu1 %v4931_v55  ;;  %v4921_v38 = vpop.permute.xlu1 %4920  ;;  %v4913_v4 = vpop.permute.xlu0 %4912 }
 0xaed   : > { %v4940_v11 = vsel %vm801_vm1, %v4913_v4, %v4915_v19 }
 0xaee   : > { %4862 = vmatmul.mubr.bf16.vlgmr.msra.gmra.mrb[28].mxu1 %v12992_v31  ;;  %v4937_v31 = vsel %vm801_vm1, %v4903_v2, %v4905_v12 }
 0xaef   : > { %4963 = vmatpush1.bf16.msra.mxu1 %v4930_v30  ;;  %4871 = vmatprep.mubr.bf16.mxu1 %v15881_v25 }
 0xaf0   : > { %4964 = vmatprep.subr.bf16.mxu1 %v4933_v23  ;;  %v4919_v58 = vpop.permute.xlu1 %4918  ;;  %v4923_v13 = vpop.permute.xlu0 %4922 }
 0xaf1   : > { %v4943_v17 = vsel %vm801_vm1, %v4921_v38, %v4923_v13  ;;  %v4942_v9 = vsel %vm801_vm1, %v4919_v58, %v4921_v38 }
 0xaf3   : > { %4965 = vmatpush1.bf16.msra.mxu1 %v4932_v59 }
 0xaf4   : > { %4966 = vmatprep.subr.bf16.mxu1 %v4935_v46  ;;  %v4929_v51 = vpop.permute.xlu1 %4928  ;;  %v4927_v49 = vpop.permute.xlu0 %4926 }
 0xaf5   : > { %v4945_v8 = vsel %vm801_vm1, %v4927_v49, %v4929_v51 }
 0xaf6   : > { %4872 = vmatmul.mubr.bf16.gmra.mrb[32].mxu1 %v13003_v35  ;;  %v4941_v35 = vsel %vm801_vm1, %v4915_v19, %v4917_v43 }
 0xaf7   : > { %4967 = vmatpush1.bf16.msra.mxu1 %v4934_v16  ;;  %4994 = vmatprep.mubr.bf16.mxu1 %v15881_v25 }
 0xaf8   : > { %4968 = vmatprep.subr.bf16.mxu1 %v4937_v31  ;;  %v5026_v24 = vpop.permute.xlu1 %5025  ;;  %v4925_v56 = vpop.permute.xlu0 %4924 }
 0xaf9   : > { %v4944_v41 = vsel %vm801_vm1, %v4925_v56, %v4927_v49  ;;  %v13452_v56 = vld [vmem:[%s11126_s29 + $0x488] ss:$12 sps:$4 sm:$0xff]  }
 0xafa   : > { %5499 = vrot.lane.b32.xlu1 %v13452_v56, %s15871_s25 }
 0xafb   : > { %4969 = vmatpush1.bf16.msra.mxu1 %v4936_v47  ;;  %v13455_v47 = vld [vmem:[%s11126_s29 + $0x484] ss:$12 sps:$4 sm:$0xff]  }
 0xafc   : > { %4970 = vmatprep.subr.bf16.mxu1 %v4939_v52  ;;  %v5024_v15 = vpop.permute.xlu1 %5023  ;;  %v5028_v1 = vpop.permute.xlu0 %5027  ;;  %5497 = vrot.lane.b32.xlu0 %v13455_v47, %s15871_s25 }
 0xafd   : > { %v5072_v33 = vsel %vm960_vm2, %v5026_v24, %v5028_v1  ;;  %v5071_v29 = vsel %vm960_vm2, %v5024_v15, %v5026_v24  ;;  %v13474_v15 = vld [vmem:[%s11126_s29 + $0x498] ss:$12 sps:$4 sm:$0xff]   ;;  %v13477_v1 = vld [vmem:[%s11126_s29 + $0x4a0] ss:$12 sps:$4 sm:$0xff]  }
 0xaff   : > { %4971 = vmatpush1.bf16.msra.mxu1 %v4938_v36 }
 0xb00   : > { %4972 = vmatprep.subr.bf16.mxu1 %v4941_v35  ;;  %v5034_v54 = vpop.permute.xlu1 %5033  ;;  %v5032_v40 = vpop.permute.xlu0 %5031 }
 0xb01   : > { %v5074_v3 = vsel %vm960_vm2, %v5032_v40, %v5034_v54 }
 0xb03   : > { %4973 = vmatpush1.bf16.msra.mxu1 %v4940_v11 }
 0xb04   : > { %4974 = vmatprep.subr.bf16.mxu1 %v4943_v17  ;;  %v5038_v57 = vpop.permute.xlu1 %5037  ;;  %v5030_v18 = vpop.permute.xlu0 %5029 }
 0xb05   : > { %v5073_v60 = vsel %vm960_vm2, %v5030_v18, %v5032_v40 }
 0xb07   : > { %4975 = vmatpush1.bf16.msra.mxu1 %v4942_v9 }
 0xb08   : > { %4976 = vmatprep.subr.bf16.mxu1 %v4945_v8  ;;  %v5036_v63 = vpop.permute.xlu1 %5035  ;;  %v5040_v37 = vpop.permute.xlu0 %5039 }
 0xb09   : > { %v5076_v20 = vsel %vm960_vm2, %v5038_v57, %v5040_v37  ;;  %v5075_v2 = vsel %vm960_vm2, %v5036_v63, %v5038_v57 }
 0xb0b   : > { %4977 = vmatpush1.bf16.msra.mxu1 %v4944_v41 }
 0xb0c   : > { %5103 = vmatprep.subr.bf16.mxu1 %v5072_v33  ;;  %v5046_v42 = vpop.permute.xlu1 %5045  ;;  %v5044_v34 = vpop.permute.xlu0 %5043 }
 0xb0e   : > { %4995 = vmatmul.mubr.bf16.vlgmr.msra.gmra.mrb[28].mxu1 %v13022_v32  ;;  %v5078_v32 = vsel %vm960_vm2, %v5044_v34, %v5046_v42 }
 0xb0f   : > { %5104 = vmatpush1.bf16.msra.mxu1 %v5071_v29  ;;  %5004 = vmatprep.mubr.bf16.mxu1 %v15881_v25 }
 0xb10   : > { %5105 = vmatprep.subr.bf16.mxu1 %v5074_v3  ;;  %v5050_v21 = vpop.permute.xlu1 %5049  ;;  %v5042_v48 = vpop.permute.xlu0 %5041 }
 0xb11   : > { %v5077_v22 = vsel %vm960_vm2, %v5042_v48, %v5044_v34  ;;  %v13510_v48 = vld [vmem:[%s11126_s29 + $0x4b4] ss:$12 sps:$4 sm:$0xff]  }
 0xb13   : > { %5106 = vmatpush1.bf16.msra.mxu1 %v5073_v60  ;;  %v13516_v60 = vld [vmem:[%s11126_s29 + $0x4b0] ss:$12 sps:$4 sm:$0xff]  }
 0xb14   : > { %5107 = vmatprep.subr.bf16.mxu1 %v5076_v20  ;;  %v5048_v10 = vpop.permute.xlu1 %5047  ;;  %v5052_v12 = vpop.permute.xlu0 %5051  ;;  %v13519_v20 = vld [vmem:[%s11126_s29 + $0x4b8] ss:$12 sps:$4 sm:$0xff]  }
 0xb15   : > { %v5080_v45 = vsel %vm960_vm2, %v5050_v21, %v5052_v12  ;;  %v5079_v55 = vsel %vm960_vm2, %v5048_v10, %v5050_v21  ;;  %v13526_v10 = vld [vmem:[%s11126_s29 + $0x4d0] ss:$12 sps:$4 sm:$0xff]   ;;  %v13529_v12 = vld [vmem:[%s11126_s29 + $0x4cc] ss:$12 sps:$4 sm:$0xff]  }
 0xb16   : > { %5005 = vmatmul.mubr.bf16.gmra.mrb[32].mxu1 %v13033_v39 }
 0xb17   : > { %5108 = vmatpush1.bf16.msra.mxu1 %v5075_v2  ;;  %5135 = vmatprep.mubr.bf16.mxu1 %v15881_v25  ;;  %v13536_v2 = vld [vmem:[%s11126_s29 + $0x4e4] ss:$12 sps:$4 sm:$0xff]  }
 0xb18   : > { %5109 = vmatprep.subr.bf16.mxu1 %v5078_v32  ;;  %v5058_v14 = vpop.permute.xlu1 %5057  ;;  %v5056_v7 = vpop.permute.xlu0 %5055  ;;  %v13539_v32 = vld [vmem:[%s11126_s29 + $0x4c8] ss:$12 sps:$4 sm:$0xff]  }
 0xb19   : > { %v5082_v39 = vsel %vm960_vm2, %v5056_v7, %v5058_v14  ;;  %v13546_v14 = vld [vmem:[%s11126_s29 + $0x4e0] ss:$12 sps:$4 sm:$0xff]  }
 0xb1b   : > { %5110 = vmatpush1.bf16.msra.mxu1 %v5077_v22  ;;  %v13556_v22 = vld [vmem:[%s11126_s29 + $0x500] ss:$12 sps:$4 sm:$0xff]  }
 0xb1c   : > { %5111 = vmatprep.subr.bf16.mxu1 %v5080_v45  ;;  %v5062_v43 = vpop.permute.xlu1 %5061  ;;  %v5054_v19 = vpop.permute.xlu0 %5053  ;;  %v13559_v45 = vld [vmem:[%s11126_s29 + $0x4fc] ss:$12 sps:$4 sm:$0xff]  }
 0xb1d   : > { %v5081_v30 = vsel %vm960_vm2, %v5054_v19, %v5056_v7  ;;  %v13549_v7 = vld [vmem:[%s11126_s29 + $0x4e8] ss:$12 sps:$4 sm:$0xff]   ;;  %v13569_v19 = vld [vmem:[%s11126_s29 + $0x4f8] ss:$12 sps:$4 sm:$0xff]  }
 0xb1f   : > { %5112 = vmatpush1.bf16.msra.mxu1 %v5079_v55  ;;  %v13576_v55 = vld [vmem:[%s11126_s29 + $0x510] ss:$12 sps:$4 sm:$0xff]  }
 0xb20   : > { %5113 = vmatprep.subr.bf16.mxu1 %v5082_v39  ;;  %v5060_v38 = vpop.permute.xlu1 %5059  ;;  %v13579_v39 = vld [vmem:[%s11126_s29 + $0x518] ss:$12 sps:$4 sm:$0xff]  }
 0xb21   : > { %v5064_v4 = vpop.permute.xlu0 %5063  ;;  %v5083_v59 = vsel %vm960_vm2, %v5060_v38, %v5062_v43  ;;  %v13586_v38 = vld [vmem:[%s11126_s29 + $0x530] ss:$12 sps:$4 sm:$0xff]  }
 0xb22   : > { %v5084_v23 = vsel %vm960_vm2, %v5062_v43, %v5064_v4  ;;  %v13566_v43 = vld [vmem:[%s11126_s29 + $0x514] ss:$12 sps:$4 sm:$0xff]   ;;  %v13589_v4 = vld [vmem:[%s11126_s29 + $0x52c] ss:$12 sps:$4 sm:$0xff]  }
 0xb23   : > { %5114 = vmatpush1.bf16.msra.mxu1 %v5081_v30  ;;  %v13596_v30 = vld [vmem:[%s11126_s29 + $0x528] ss:$12 sps:$4 sm:$0xff]  }
 0xb24   : > { %5115 = vmatprep.subr.bf16.mxu1 %v5084_v23  ;;  %v5070_v58 = vpop.permute.xlu1 %5069 }
 0xb25   : > { %v5068_v13 = vpop.permute.xlu0 %5067 }
 0xb26   : > { %v5086_v46 = vsel %vm960_vm2, %v5068_v13, %v5070_v58 }
 0xb27   : > { %5116 = vmatpush1.bf16.msra.mxu1 %v5083_v59 }
 0xb28   : > { %5117 = vmatprep.subr.bf16.mxu1 %v5086_v46 }
 0xb29   : > { %v5066_v51 = vpop.permute.xlu0 %5065 }
 0xb2a   : > { %v5085_v49 = vsel %vm960_vm2, %v5066_v51, %v5068_v13 }
 0xb2b   : > { %5118 = vmatpush1.bf16.msra.mxu1 %v5085_v49 }
 0xb2e   : > { %5136 = vmatmul.mubr.bf16.vlgmr.msra.gmra.mrb[28].mxu1 %v13050_v44  ;;  %v13464_v44 = vld [vmem:[%s11126_s29 + $0x49c] ss:$12 sps:$4 sm:$0xff]  }
 0xb2f   : > { %5145 = vmatprep.mubr.bf16.mxu1 %v15881_v25  ;;  %5503 = vrot.lane.b32.xlu1 %v13464_v44, %s15871_s25 }
 0xb33   : > { %5501 = vrot.lane.b32.xlu1 %v13474_v15, %s15871_s25 }
 0xb36   : > { %5146 = vmatmul.mubr.bf16.gmra.mrb[32].mxu1 %v13057_v53  ;;  %v13467_v53 = vld [vmem:[%s11126_s29 + $0x480] ss:$12 sps:$4 sm:$0xff]  }
 0xb37   : > { %6160 = vmatprep.mubr.f32.mxu1 %v15880_v26  ;;  %5495 = vrot.lane.b32.xlu0 %v13467_v53, %s15871_s25 }
 0xb3b   : > { %5505 = vrot.lane.b32.xlu0 %v13477_v1, %s15871_s25 }
 0xb6c   : > { %v13634_v23 = vpop.permute.xlu1 %5499 }
 0xb6e   : > { %v13636_v58 = vpop.permute.xlu0 %5497 }
 0xb81   : > { %v13445_v16 = vpop.f32.mrb[24].mxu1 }
 0xb82   : > { %15892 = vst [vmem:[#allocation22_spill] sm:$0xff] %v13445_v16  ;;  %v13447_v31 = vpop.f32.mrb[25].mxu1 }
 0xb83   : > { %15893 = vst [vmem:[#allocation23_spill] sm:$0xff] %v13447_v31 }
 0xb85   : > { %v13449_v24 = vpop.f32.mrb[26].mxu1 }
 0xb86   : > { %15894 = vst [vmem:[#allocation24_spill] sm:$0xff] %v13449_v24  ;;  %v13457_v52 = vpop.f32.mrb[27].mxu1 }
 0xb87   : > { %15895 = vst [vmem:[#allocation25_spill] sm:$0xff] %v13457_v52 }
 0xba1   : > { %v13642_v13 = vpop.permute.xlu1 %5503 }
 0xba5   : > { %v13654_v46 = vpop.permute.xlu1 %5501 }
 0xba9   : > { %v13644_v59 = vpop.permute.xlu0 %5495 }
 0xbad   : > { %v13656_v51 = vpop.permute.xlu0 %5505 }
 0xc01   : > { %v5137_v36 = vpop.f32.mrb[28].mxu1 }
 0xc02   : > { %v5139_v35 = vpop.f32.mrb[29].mxu1 }
 0xc03   : > { %v5141_v54 = vpop.f32.mrb[30].mxu1 }
 0xc04   : > { %v5164_v40 = vmax.f32 %v5137_v36, %v5141_v54  ;;  %v5143_v11 = vpop.f32.mrb[31].mxu1 }
 0xc05   : > { %v5165_v17 = vmax.f32 %v5139_v35, %v5143_v11 }
 0xc09   : > { %v5147_v57 = vpop.f32.mrb[32].mxu1 }
 0xc0a   : > { %v5149_v18 = vpop.f32.mrb[33].mxu1 }
 0xc0b   : > { %v5151_v9 = vpop.f32.mrb[34].mxu1 }
 0xc0c   : > { %v5166_v8 = vmax.f32 %v5147_v57, %v5151_v9  ;;  %v5153_v63 = vpop.f32.mrb[35].mxu1 }
 0xc0d   : > { %v5167_v37 = vmax.f32 %v5149_v18, %v5153_v63 }
 0xc0e   : > { %v5168_v41 = vmax.f32 %v5164_v40, %v5166_v8 }
 0xc0f   : > { %v5169_v33 = vmax.f32 %v5165_v17, %v5167_v37 }
 0xc10   : > { %v13484_v42 = vadd.f32 %v5168_v41, %v11499_v50 }
 0xc11   : > { %v13487_v34 = vadd.f32 %v5169_v33, %v11499_v50 }
 0xc12   : > { %v5172_v29 = vmax.f32 %v13484_v42, 0.0 }
 0xc13   : > { %v5173_v3 = vmax.f32 %v13487_v34, 0.0 }
 0xc15   : > { %v10169_v21 = vpack.i.bf16 %v5173_v3, %v5172_v29 }
 0xc17   : > { %10170 = vrot.lane.b32.xlu0 %v10169_v21, %s15863_s26  ;;  %10165 = vrot.lane.b32.xlu1 %v10169_v21, %s15871_s25 }
 0xc1b   : > { %10180 = vrot.lane.b32.xlu0 %v10169_v21, %s15873_s12  ;;  %10175 = vrot.lane.b32.xlu1 %v10169_v21, %s15864_s27 }
 0xc1f   : > { %10190 = vrot.lane.b32.xlu0 %v10169_v21, %s15877_s24  ;;  %10185 = vrot.lane.b32.xlu1 %v10169_v21, %s15874_s2 }
 0xc23   : > { %10200 = vrot.lane.b32.xlu0 %v10169_v21, %s15878_s15  ;;  %10195 = vrot.lane.b32.xlu1 %v10169_v21, %s15865_s21 }
 0xc27   : > { %10210 = vrot.lane.b32.xlu0 %v10169_v21, %s15879_s19  ;;  %10205 = vrot.lane.b32.xlu1 %v10169_v21, %s15866_s18 }
 0xc2b   : > { %10220 = vrot.lane.b32.xlu0 %v10169_v21, %s15867_s30  ;;  %10215 = vrot.lane.b32.xlu1 %v10169_v21, %s15868_s11 }
 0xc2f   : > { %10230 = vrot.lane.b32.xlu0 %v10169_v21, %s15869_s0  ;;  %10225 = vrot.lane.b32.xlu1 %v10169_v21, %s15870_s20 }
 0xc33   : > { %5509 = vrot.lane.b32.xlu0 %v13510_v48, %s15871_s25  ;;  %10235 = vrot.lane.b32.xlu1 %v10169_v21, %s15872_s28 }
 0xc37   : > { %5507 = vrot.lane.b32.xlu0 %v13516_v60, %s15871_s25  ;;  %5511 = vrot.lane.b32.xlu1 %v13519_v20, %s15871_s25 }
 0xc3b   : > { %5517 = vrot.lane.b32.xlu0 %v13526_v10, %s15871_s25  ;;  %5515 = vrot.lane.b32.xlu1 %v13529_v12, %s15871_s25 }
 0xc3f   : > { %5521 = vrot.lane.b32.xlu0 %v13536_v2, %s15871_s25  ;;  %5513 = vrot.lane.b32.xlu1 %v13539_v32, %s15871_s25 }
 0xc43   : > { %5519 = vrot.lane.b32.xlu0 %v13546_v14, %s15871_s25  ;;  %5523 = vrot.lane.b32.xlu1 %v13549_v7, %s15871_s25 }
 0xc47   : > { %5529 = vrot.lane.b32.xlu0 %v13556_v22, %s15871_s25  ;;  %5527 = vrot.lane.b32.xlu1 %v13559_v45, %s15871_s25 }
 0xc4b   : > { %5533 = vrot.lane.b32.xlu0 %v13566_v43, %s15871_s25  ;;  %5525 = vrot.lane.b32.xlu1 %v13569_v19, %s15871_s25 }
 0xc4f   : > { %5531 = vrot.lane.b32.xlu0 %v13576_v55, %s15871_s25  ;;  %5535 = vrot.lane.b32.xlu1 %v13579_v39, %s15871_s25 }
 0xc53   : > { %5541 = vrot.lane.b32.xlu0 %v13586_v38, %s15871_s25  ;;  %5539 = vrot.lane.b32.xlu1 %v13589_v4, %s15871_s25 }
 0xc57   : > { %5699 = vrot.lane.b32.xlu0 %v13455_v47, %s15873_s12  ;;  %5537 = vrot.lane.b32.xlu1 %v13596_v30, %s15871_s25 }
 0xc5b   : > { %5697 = vrot.lane.b32.xlu0 %v13467_v53, %s15873_s12  ;;  %5701 = vrot.lane.b32.xlu1 %v13452_v56, %s15873_s12 }
 0xc5f   : > { %5707 = vrot.lane.b32.xlu0 %v13477_v1, %s15873_s12  ;;  %5705 = vrot.lane.b32.xlu1 %v13464_v44, %s15873_s12 }
 0xc63   : > { %5711 = vrot.lane.b32.xlu0 %v13510_v48, %s15873_s12  ;;  %5703 = vrot.lane.b32.xlu1 %v13474_v15, %s15873_s12 }
 0xc67   : > { %5709 = vrot.lane.b32.xlu0 %v13516_v60, %s15873_s12  ;;  %5713 = vrot.lane.b32.xlu1 %v13519_v20, %s15873_s12 }
 0xc6b   : > { %5719 = vrot.lane.b32.xlu0 %v13526_v10, %s15873_s12  ;;  %5717 = vrot.lane.b32.xlu1 %v13529_v12, %s15873_s12 }
 0xc6f   : > { %5723 = vrot.lane.b32.xlu0 %v13536_v2, %s15873_s12  ;;  %5715 = vrot.lane.b32.xlu1 %v13539_v32, %s15873_s12 }
 0xc73   : > { %5721 = vrot.lane.b32.xlu0 %v13546_v14, %s15873_s12  ;;  %5725 = vrot.lane.b32.xlu1 %v13549_v7, %s15873_s12 }
 0xc77   : > { %5731 = vrot.lane.b32.xlu0 %v13556_v22, %s15873_s12  ;;  %5729 = vrot.lane.b32.xlu1 %v13559_v45, %s15873_s12 }
 0xc7b   : > { %5735 = vrot.lane.b32.xlu0 %v13566_v43, %s15873_s12  ;;  %5727 = vrot.lane.b32.xlu1 %v13569_v19, %s15873_s12 }
 0xc7f   : > { %5733 = vrot.lane.b32.xlu0 %v13576_v55, %s15873_s12  ;;  %5737 = vrot.lane.b32.xlu1 %v13579_v39, %s15873_s12 }
 0xc83   : > { %5743 = vrot.lane.b32.xlu0 %v13586_v38, %s15873_s12  ;;  %5741 = vrot.lane.b32.xlu1 %v13589_v4, %s15873_s12 }
 0xc87   : > { %5840 = vrot.lane.b32.xlu0 %v13455_v47, %s15874_s2  ;;  %5739 = vrot.lane.b32.xlu1 %v13596_v30, %s15873_s12 }
 0xc89   : > { %v10171_v49 = vpop.permute.xlu0 %10170  ;;  %v10166_v36 = vpop.permute.xlu1 %10165 }
 0xc8a   : > { %v10168_v35 = vunpack.i.h.bf16 %v10166_v36  ;;  %v10167_v54 = vunpack.i.l.bf16 %v10166_v36  ;;  %v10173_v40 = vunpack.i.h.bf16 %v10171_v49  ;;  %v10172_v11 = vunpack.i.l.bf16 %v10171_v49 }
 0xc8b   : > { %5838 = vrot.lane.b32.xlu0 %v13467_v53, %s15874_s2  ;;  %5842 = vrot.lane.b32.xlu1 %v13452_v56, %s15874_s2 }
 0xc8c   : > { %v5180_v17 = vsel %vm569_vm0, %v10167_v54, %v10168_v35  ;;  %v9245_v57 = vpack.c.bf16 %v10168_v35, %v5173_v3  ;;  %v5187_v56 = vsel %vm1084_vm3, %v10172_v11, %v10173_v40 }
 0xc8d   : > { %v10181_v18 = vpop.permute.xlu0 %10180  ;;  %v10176_v9 = vpop.permute.xlu1 %10175  ;;  %v9247_v8 = vpack.c.bf16 %v5180_v17, %v5172_v29 }
 0xc8e   : > { %v10178_v63 = vunpack.i.h.bf16 %v10176_v9  ;;  %v10177_v37 = vunpack.i.l.bf16 %v10176_v9  ;;  %9246 = vmatprep.subr.bf16.mxu0 %v9245_v57  ;;  %v10183_v41 = vunpack.i.h.bf16 %v10181_v18  ;;  %v10182_v33 = vunpack.i.l.bf16 %v10181_v18 }
 0xc8f   : > { %5848 = vrot.lane.b32.xlu0 %v13477_v1, %s15874_s2  ;;  %5846 = vrot.lane.b32.xlu1 %v13464_v44, %s15874_s2 }
 0xc90   : > { %v5194_v34 = vsel %vm1092_vm4, %v10177_v37, %v10178_v63  ;;  %9248 = vmatpush1.bf16.msra.mxu0 %v9247_v8  ;;  %v9249_v3 = vpack.c.bf16 %v10178_v63, %v10173_v40  ;;  %v5201_v35 = vsel %vm801_vm1, %v10182_v33, %v10183_v41 }
 0xc91   : > { %v10191_v21 = vpop.permute.xlu0 %10190  ;;  %v10186_v42 = vpop.permute.xlu1 %10185  ;;  %v9251_v29 = vpack.c.bf16 %v5194_v34, %v5187_v56 }
 0xc92   : > { %v10188_v49 = vunpack.i.h.bf16 %v10186_v42  ;;  %v10187_v36 = vunpack.i.l.bf16 %v10186_v42  ;;  %9250 = vmatprep.subr.bf16.mxu0 %v9249_v3  ;;  %v10193_v1 = vunpack.i.h.bf16 %v10191_v21  ;;  %v10192_v54 = vunpack.i.l.bf16 %v10191_v21 }
 0xc93   : > { %5852 = vrot.lane.b32.xlu0 %v13510_v48, %s15874_s2  ;;  %5844 = vrot.lane.b32.xlu1 %v13474_v15, %s15874_s2 }
 0xc94   : > { %v5208_v11 = vsel %vm960_vm2, %v10187_v36, %v10188_v49  ;;  %9252 = vmatpush1.bf16.msra.mxu0 %v9251_v29  ;;  %v9253_v40 = vpack.c.bf16 %v10188_v49, %v10183_v41  ;;  %v5215_v33 = vsel %vm1116_vm5, %v10192_v54, %v10193_v1 }
 0xc95   : > { %v10201_v17 = vpop.permute.xlu0 %10200  ;;  %v10196_v57 = vpop.permute.xlu1 %10195  ;;  %v9255_v18 = vpack.c.bf16 %v5208_v11, %v5201_v35 }
 0xc96   : > { %v10198_v9 = vunpack.i.h.bf16 %v10196_v57  ;;  %v10197_v8 = vunpack.i.l.bf16 %v10196_v57  ;;  %9254 = vmatprep.subr.bf16.mxu0 %v9253_v40  ;;  %v10203_v63 = vunpack.i.h.bf16 %v10201_v17  ;;  %v10202_v37 = vunpack.i.l.bf16 %v10201_v17 }
 0xc97   : > { %5850 = vrot.lane.b32.xlu0 %v13516_v60, %s15874_s2  ;;  %5854 = vrot.lane.b32.xlu1 %v13519_v20, %s15874_s2 }
 0xc98   : > { %v5222_v56 = vsel %vm1124_vm6, %v10197_v8, %v10198_v9  ;;  %9256 = vmatpush1.bf16.msra.mxu0 %v9255_v18  ;;  %v9257_v41 = vpack.c.bf16 %v10198_v9, %v10193_v1  ;;  %v5229_v49 = vsel %vm1132_vm8, %v10202_v37, %v10203_v63 }
 0xc99   : > { %v10211_v34 = vpop.permute.xlu0 %10210  ;;  %v10206_v3 = vpop.permute.xlu1 %10205  ;;  %v9259_v21 = vpack.c.bf16 %v5222_v56, %v5215_v33 }
 0xc9a   : > { %v10208_v42 = vunpack.i.h.bf16 %v10206_v3  ;;  %v10207_v29 = vunpack.i.l.bf16 %v10206_v3  ;;  %9258 = vmatprep.subr.bf16.mxu0 %v9257_v41  ;;  %v10213_v20 = vunpack.i.h.bf16 %v10211_v34  ;;  %v10212_v36 = vunpack.i.l.bf16 %v10211_v34 }
 0xc9b   : > { %5860 = vrot.lane.b32.xlu0 %v13526_v10, %s15874_s2  ;;  %5858 = vrot.lane.b32.xlu1 %v13529_v12, %s15874_s2 }
 0xc9c   : > { %v5236_v35 = vsel %vm1140_vm7, %v10207_v29, %v10208_v42  ;;  %9260 = vmatpush1.bf16.msra.mxu0 %v9259_v21  ;;  %v9261_v1 = vpack.c.bf16 %v10208_v42, %v10203_v63  ;;  %v5243_v10 = vsel %vm1148_vm9, %v10212_v36, %v10213_v20 }
 0xc9d   : > { %v10221_v54 = vpop.permute.xlu0 %10220  ;;  %v10216_v11 = vpop.permute.xlu1 %10215  ;;  %v9263_v40 = vpack.c.bf16 %v5236_v35, %v5229_v49 }
 0xc9e   : > { %v10218_v17 = vunpack.i.h.bf16 %v10216_v11  ;;  %v10217_v57 = vunpack.i.l.bf16 %v10216_v11  ;;  %9262 = vmatprep.subr.bf16.mxu0 %v9261_v1  ;;  %v10223_v18 = vunpack.i.h.bf16 %v10221_v54  ;;  %v10222_v9 = vunpack.i.l.bf16 %v10221_v54 }
 0xc9f   : > { %5864 = vrot.lane.b32.xlu0 %v13536_v2, %s15874_s2  ;;  %5856 = vrot.lane.b32.xlu1 %v13539_v32, %s15874_s2 }
 0xca0   : > { %v5250_v8 = vsel %vm1156_vm10, %v10217_v57, %v10218_v17  ;;  %9264 = vmatpush1.bf16.msra.mxu0 %v9263_v40  ;;  %v9265_v63 = vpack.c.bf16 %v10218_v17, %v10213_v20  ;;  %v5257_v3 = vsel %vm1164_vm12, %v10222_v9, %v10223_v18 }
 0xca1   : > { %v10231_v37 = vpop.permute.xlu0 %10230  ;;  %v10226_v33 = vpop.permute.xlu1 %10225  ;;  %v9267_v56 = vpack.c.bf16 %v5250_v8, %v5243_v10  ;;  %v5543_v8 = vsel %vm569_vm0, %v13644_v59, %v13636_v58 }
 0xca2   : > { %v10228_v41 = vunpack.i.h.bf16 %v10226_v33  ;;  %v10227_v34 = vunpack.i.l.bf16 %v10226_v33  ;;  %9266 = vmatprep.subr.bf16.mxu0 %v9265_v63  ;;  %v10233_v21 = vunpack.i.h.bf16 %v10231_v37  ;;  %v10232_v42 = vunpack.i.l.bf16 %v10231_v37 }
 0xca3   : > { %5862 = vrot.lane.b32.xlu0 %v13546_v14, %s15874_s2  ;;  %5866 = vrot.lane.b32.xlu1 %v13549_v7, %s15874_s2 }
 0xca4   : > { %v5264_v29 = vsel %vm1172_vm11, %v10227_v34, %v10228_v41  ;;  %9268 = vmatpush1.bf16.msra.mxu0 %v9267_v56  ;;  %v9269_v49 = vpack.c.bf16 %v10228_v41, %v10223_v18  ;;  %v5271_v7 = vsel %vm1180_vm13, %v10232_v42, %v10233_v21 }
 0xca5   : > { %v5510_v20 = vpop.permute.xlu0 %5509  ;;  %v10236_v36 = vpop.permute.xlu1 %10235  ;;  %v9271_v35 = vpack.c.bf16 %v5264_v29, %v5257_v3 }
 0xca6   : > { %v10238_v1 = vunpack.i.h.bf16 %v10236_v36  ;;  %v10237_v54 = vunpack.i.l.bf16 %v10236_v36  ;;  %9270 = vmatprep.subr.bf16.mxu0 %v9269_v49 }
 0xca7   : > { %5872 = vrot.lane.b32.xlu0 %v13556_v22, %s15874_s2  ;;  %5870 = vrot.lane.b32.xlu1 %v13559_v45, %s15874_s2  ;;  %v5544_v22 = vsel %vm569_vm0, %v13636_v58, %v13634_v23  ;;  %v5546_v23 = vsel %vm569_vm0, %v13642_v13, %v13656_v51 }
 0xca8   : > { %v5278_v11 = vsel %vm1188_vm14, %v10237_v54, %v10238_v1  ;;  %9272 = vmatpush1.bf16.msra.mxu0 %v9271_v35  ;;  %v9273_v40 = vpack.c.bf16 %v10238_v1, %v10233_v21 }
 0xca9   : > { %v5508_v17 = vpop.permute.xlu0 %5507  ;;  %v5512_v57 = vpop.permute.xlu1 %5511  ;;  %v9275_v18 = vpack.c.bf16 %v5278_v11, %v5271_v7 }
 0xcaa   : > { %9274 = vmatprep.subr.bf16.mxu0 %v9273_v40  ;;  %v5547_v51 = vsel %vm569_vm0, %v5508_v17, %v5510_v20 }
 0xcab   : > { %5876 = vrot.lane.b32.xlu0 %v13566_v43, %s15874_s2  ;;  %5868 = vrot.lane.b32.xlu1 %v13569_v19, %s15874_s2 }
 0xcac   : > { %9276 = vmatpush1.bf16.msra.mxu0 %v9275_v18 }
 0xcad   : > { %5575 = vmatprep.subr.bf16.mxu0 %v5544_v22  ;;  %v5518_v9 = vpop.permute.xlu0 %5517  ;;  %v5516_v10 = vpop.permute.xlu1 %5515 }
 0xcaf   : > { %5346 = vmatmul.mubr.f32.vlgmr.msra.gmra.mrb[32].mxu0 %v13342_v28  ;;  %5874 = vrot.lane.b32.xlu0 %v13576_v55, %s15874_s2  ;;  %v5545_v28 = vsel %vm569_vm0, %v13654_v46, %v13642_v13 }
 0xcb0   : > { %5878 = vrot.lane.b32.xlu1 %v13579_v39, %s15874_s2  ;;  %5576 = vmatpush1.bf16.msra.mxu0 %v5543_v8  ;;  %v5548_v39 = vsel %vm569_vm0, %v5510_v20, %v5512_v57  ;;  %v13759_v57 = vld [vmem:[%s15795_s1 + $0x10] sm:$0xff]  }
 0xcb1   : > { %5577 = vmatprep.subr.bf16.mxu0 %v5546_v23  ;;  %v5522_v63 = vpop.permute.xlu0 %5521  ;;  %v5514_v37 = vpop.permute.xlu1 %5513  ;;  %5351 = vmatprep.mubr.f32.mxu0 %v15880_v26 }
 0xcb2   : > { %v5549_v46 = vsel %vm569_vm0, %v5514_v37, %v5516_v10 }
 0xcb3   : > { %5884 = vrot.lane.b32.xlu0 %v13586_v38, %s15874_s2  ;;  %5352 = vmatmul.mubr.f32.gmra.mrb[34].mxu0 %v13361_v0  ;;  %v5550_v38 = vsel %vm569_vm0, %v5516_v10, %v5518_v9 }
 0xcb4   : > { %5882 = vrot.lane.b32.xlu1 %v13589_v4, %s15874_s2  ;;  %5578 = vmatpush1.bf16.msra.mxu0 %v5545_v28 }
 0xcb5   : > { %5579 = vmatprep.subr.bf16.mxu0 %v5548_v39  ;;  %v5520_v58 = vpop.permute.xlu0 %5519  ;;  %v5524_v59 = vpop.permute.xlu1 %5523  ;;  %5607 = vmatprep.mubr.bf16.mxu0 %v15881_v25 }
 0xcb6   : > { %v5552_v33 = vsel %vm569_vm0, %v5522_v63, %v5524_v59  ;;  %v5551_v34 = vsel %vm569_vm0, %v5520_v58, %v5522_v63 }
 0xcb8   : > { %5880 = vrot.lane.b32.xlu1 %v13596_v30, %s15874_s2  ;;  %5580 = vmatpush1.bf16.msra.mxu0 %v5547_v51  ;;  %v13801_v51 = vld [vmem:[%s15795_s1 + $0x8] sm:$0xff]  }
 0xcb9   : > { %5581 = vmatprep.subr.bf16.mxu0 %v5550_v38  ;;  %v5530_v0 = vpop.permute.xlu0 %5529  ;;  %v5528_v13 = vpop.permute.xlu1 %5527 }
 0xcba   : > { %v5554_v3 = vsel %vm569_vm0, %v5528_v13, %v5530_v0 }
 0xcbc   : > { %5582 = vmatpush1.bf16.msra.mxu0 %v5549_v46 }
 0xcbd   : > { %5583 = vmatprep.subr.bf16.mxu0 %v5552_v33  ;;  %v5534_v56 = vpop.permute.xlu0 %5533  ;;  %v5526_v41 = vpop.permute.xlu1 %5525 }
 0xcbe   : > { %v5553_v49 = vsel %vm569_vm0, %v5526_v41, %v5528_v13 }
 0xcc0   : > { %5584 = vmatpush1.bf16.msra.mxu0 %v5551_v34 }
 0xcc1   : > { %5585 = vmatprep.subr.bf16.mxu0 %v5554_v3  ;;  %v5532_v21 = vpop.permute.xlu0 %5531  ;;  %v5536_v42 = vpop.permute.xlu1 %5535 }
 0xcc2   : > { %v5556_v29 = vsel %vm569_vm0, %v5534_v56, %v5536_v42  ;;  %v5555_v1 = vsel %vm569_vm0, %v5532_v21, %v5534_v56 }
 0xcc4   : > { %5586 = vmatpush1.bf16.msra.mxu0 %v5553_v49 }
 0xcc5   : > { %5587 = vmatprep.subr.bf16.mxu0 %v5556_v29  ;;  %v5542_v20 = vpop.permute.xlu0 %5541  ;;  %v5540_v36 = vpop.permute.xlu1 %5539 }
 0xcc6   : > { %v5558_v35 = vsel %vm569_vm0, %v5540_v36, %v5542_v20 }
 0xcc8   : > { %5588 = vmatpush1.bf16.msra.mxu0 %v5555_v1 }
 0xcc9   : > { %5589 = vmatprep.subr.bf16.mxu0 %v5558_v35  ;;  %v5700_v54 = vpop.permute.xlu0 %5699  ;;  %v5538_v7 = vpop.permute.xlu1 %5537 }
 0xcca   : > { %v5557_v11 = vsel %vm569_vm0, %v5538_v7, %v5540_v36 }
 0xccc   : > { %5590 = vmatpush1.bf16.msra.mxu0 %v5557_v11 }
 0xccd   : > { %v5698_v40 = vpop.permute.xlu0 %5697  ;;  %v5702_v17 = vpop.permute.xlu1 %5701  ;;  %5644 = vmatprep.subr.bf16.mxu0 %v13455_v47  ;;  %v13770_v47 = vld [vmem:[%s15795_s1 + $0x18] sm:$0xff]  }
 0xccf   : > { %5608 = vmatmul.mubr.bf16.vlgmr.msra.gmra.mrb[36].mxu0 %v13759_v57 }
 0xcd0   : > { %5645 = vmatpush1.bf16.msra.mxu0 %v13467_v53  ;;  %5617 = vmatprep.mubr.bf16.mxu0 %v15881_v25 }
 0xcd1   : > { %v5708_v18 = vpop.permute.xlu0 %5707  ;;  %v5706_v22 = vpop.permute.xlu1 %5705  ;;  %5646 = vmatprep.subr.bf16.mxu0 %v13464_v44 }
 0xcd4   : > { %5647 = vmatpush1.bf16.msra.mxu0 %v13474_v15 }
 0xcd5   : > { %v5712_v9 = vpop.permute.xlu0 %5711  ;;  %v5704_v10 = vpop.permute.xlu1 %5703  ;;  %5648 = vmatprep.subr.bf16.mxu0 %v13510_v48 }
 0xcd7   : > { %5618 = vmatmul.mubr.bf16.gmra.mrb[40].mxu0 %v13770_v47 }
 0xcd8   : > { %5649 = vmatpush1.bf16.msra.mxu0 %v13516_v60  ;;  %5676 = vmatprep.mubr.bf16.mxu0 %v15881_v25 }
 0xcd9   : > { %v5710_v53 = vpop.permute.xlu0 %5709  ;;  %v5714_v8 = vpop.permute.xlu1 %5713  ;;  %5650 = vmatprep.subr.bf16.mxu0 %v13529_v12 }
 0xcda   : > { %v5750_v28 = vsel %vm801_vm1, %v5712_v9, %v5714_v8  ;;  %v5749_v59 = vsel %vm801_vm1, %v5710_v53, %v5712_v9  ;;  %v13820_v9 = vld [vmem:[%s15795_s1 + $0x20] sm:$0xff]  }
 0xcdc   : > { %5651 = vmatpush1.bf16.msra.mxu0 %v13539_v32 }
 0xcdd   : > { %v5720_v44 = vpop.permute.xlu0 %5719  ;;  %v5718_v15 = vpop.permute.xlu1 %5717  ;;  %5652 = vmatprep.subr.bf16.mxu0 %v13536_v2  ;;  %v5746_v2 = vsel %vm801_vm1, %v5700_v54, %v5702_v17 }
 0xcde   : > { %v5752_v38 = vsel %vm801_vm1, %v5718_v15, %v5720_v44 }
 0xce0   : > { %5653 = vmatpush1.bf16.msra.mxu0 %v13546_v14 }
 0xce1   : > { %v5724_v48 = vpop.permute.xlu0 %5723  ;;  %v5716_v23 = vpop.permute.xlu1 %5715  ;;  %5654 = vmatprep.subr.bf16.mxu0 %v13559_v45  ;;  %v5745_v45 = vsel %vm801_vm1, %v5698_v40, %v5700_v54 }
 0xce2   : > { %v5751_v46 = vsel %vm801_vm1, %v5716_v23, %v5718_v15 }
 0xce4   : > { %5655 = vmatpush1.bf16.msra.mxu0 %v13569_v19  ;;  %v13790_v19 = vld [vmem:[%s15795_s1] sm:$0xff]  }
 0xce5   : > { %v5722_v60 = vpop.permute.xlu0 %5721  ;;  %v5726_v63 = vpop.permute.xlu1 %5725  ;;  %5656 = vmatprep.subr.bf16.mxu0 %v13566_v43  ;;  %v5748_v43 = vsel %vm801_vm1, %v5706_v22, %v5708_v18 }
 0xce6   : > { %v5754_v33 = vsel %vm801_vm1, %v5724_v48, %v5726_v63  ;;  %v5753_v34 = vsel %vm801_vm1, %v5722_v60, %v5724_v48  ;;  %v13831_v63 = vld [vmem:[%s15795_s1 + $0x28] sm:$0xff]  }
 0xce8   : > { %5657 = vmatpush1.bf16.msra.mxu0 %v13576_v55 }
 0xce9   : > { %v5732_v12 = vpop.permute.xlu0 %5731  ;;  %v5730_v32 = vpop.permute.xlu1 %5729  ;;  %5658 = vmatprep.subr.bf16.mxu0 %v13589_v4 }
 0xcea   : > { %v5756_v3 = vsel %vm801_vm1, %v5730_v32, %v5732_v12 }
 0xcec   : > { %5659 = vmatpush1.bf16.msra.mxu0 %v13596_v30  ;;  %v5747_v30 = vsel %vm801_vm1, %v5704_v10, %v5706_v22 }
 0xced   : > { %5777 = vmatprep.subr.bf16.mxu0 %v5746_v2  ;;  %v5736_v14 = vpop.permute.xlu0 %5735  ;;  %v5728_v37 = vpop.permute.xlu1 %5727 }
 0xcee   : > { %v5755_v29 = vsel %vm801_vm1, %v5728_v37, %v5730_v32 }
 0xcef   : > { %5677 = vmatmul.mubr.bf16.vlgmr.msra.gmra.mrb[36].mxu0 %v13790_v19 }
 0xcf0   : > { %5778 = vmatpush1.bf16.msra.mxu0 %v5745_v45  ;;  %5686 = vmatprep.mubr.bf16.mxu0 %v15881_v25 }
 0xcf1   : > { %5779 = vmatprep.subr.bf16.mxu0 %v5748_v43  ;;  %v5734_v55 = vpop.permute.xlu0 %5733  ;;  %v5738_v4 = vpop.permute.xlu1 %5737 }
 0xcf2   : > { %v5758_v49 = vsel %vm801_vm1, %v5736_v14, %v5738_v4  ;;  %v5757_v35 = vsel %vm801_vm1, %v5734_v55, %v5736_v14 }
 0xcf4   : > { %5780 = vmatpush1.bf16.msra.mxu0 %v5747_v30 }
 0xcf5   : > { %5781 = vmatprep.subr.bf16.mxu0 %v5750_v28  ;;  %v5744_v39 = vpop.permute.xlu0 %5743  ;;  %v5742_v58 = vpop.permute.xlu1 %5741 }
 0xcf6   : > { %v5760_v1 = vsel %vm801_vm1, %v5742_v58, %v5744_v39 }
 0xcf7   : > { %5687 = vmatmul.mubr.bf16.gmra.mrb[40].mxu0 %v13801_v51 }
 0xcf8   : > { %5782 = vmatpush1.bf16.msra.mxu0 %v5749_v59  ;;  %5809 = vmatprep.mubr.bf16.mxu0 %v15881_v25 }
 0xcf9   : > { %5783 = vmatprep.subr.bf16.mxu0 %v5752_v38  ;;  %v5841_v0 = vpop.permute.xlu0 %5840  ;;  %v5740_v13 = vpop.permute.xlu1 %5739 }
 0xcfa   : > { %v5759_v11 = vsel %vm801_vm1, %v5740_v13, %v5742_v58 }
 0xcfc   : > { %5784 = vmatpush1.bf16.msra.mxu0 %v5751_v46 }
 0xcfd   : > { %5785 = vmatprep.subr.bf16.mxu0 %v5754_v33  ;;  %v5839_v56 = vpop.permute.xlu0 %5838  ;;  %v5843_v41 = vpop.permute.xlu1 %5842 }
 0xcfe   : > { %v5887_v40 = vsel %vm960_vm2, %v5841_v0, %v5843_v41  ;;  %v5886_v22 = vsel %vm960_vm2, %v5839_v56, %v5841_v0  ;;  %v13848_v56 = vld [vmem:[%s15795_s1 + $0x30] sm:$0xff]   ;;  %v13855_v41 = vld [vmem:[%s15795_s1 + $0x38] sm:$0xff]  }
 0xd00   : > { %5786 = vmatpush1.bf16.msra.mxu0 %v5753_v34 }
 0xd01   : > { %5787 = vmatprep.subr.bf16.mxu0 %v5756_v3  ;;  %v5849_v21 = vpop.permute.xlu0 %5848  ;;  %v5847_v42 = vpop.permute.xlu1 %5846 }
 0xd02   : > { %v5889_v10 = vsel %vm960_vm2, %v5847_v42, %v5849_v21 }
 0xd04   : > { %5788 = vmatpush1.bf16.msra.mxu0 %v5755_v29  ;;  %v13869_v29 = vld [vmem:[%s11126_s29 + $0x544] ss:$12 sps:$4 sm:$0xff]  }
 0xd05   : > { %5789 = vmatprep.subr.bf16.mxu0 %v5758_v49  ;;  %v5853_v20 = vpop.permute.xlu0 %5852  ;;  %v5845_v36 = vpop.permute.xlu1 %5844  ;;  %6312 = vrot.lane.b32.xlu1 %v13869_v29, %s15871_s25 }
 0xd06   : > { %v5888_v44 = vsel %vm960_vm2, %v5845_v36, %v5847_v42  ;;  %v13866_v42 = vld [vmem:[%s11126_s29 + $0x548] ss:$12 sps:$4 sm:$0xff]   ;;  %v13881_v36 = vld [vmem:[%s11126_s29 + $0x540] ss:$12 sps:$4 sm:$0xff]  }
 0xd07   : > { %6314 = vrot.lane.b32.xlu0 %v13866_v42, %s15871_s25 }
 0xd08   : > { %5790 = vmatpush1.bf16.msra.mxu0 %v5757_v35  ;;  %v13888_v35 = vld [vmem:[%s11126_s29 + $0x558] ss:$12 sps:$4 sm:$0xff]  }
 0xd09   : > { %5791 = vmatprep.subr.bf16.mxu0 %v5760_v1  ;;  %v5851_v54 = vpop.permute.xlu0 %5850  ;;  %v5855_v7 = vpop.permute.xlu1 %5854  ;;  %6310 = vrot.lane.b32.xlu1 %v13881_v36, %s15871_s25  ;;  %v13891_v1 = vld [vmem:[%s11126_s29 + $0x560] ss:$12 sps:$4 sm:$0xff]  }
 0xd0a   : > { %v5891_v15 = vsel %vm960_vm2, %v5853_v20, %v5855_v7  ;;  %v5890_v60 = vsel %vm960_vm2, %v5851_v54, %v5853_v20  ;;  %v13878_v20 = vld [vmem:[%s11126_s29 + $0x55c] ss:$12 sps:$4 sm:$0xff]  }
 0xd0b   : > { %6318 = vrot.lane.b32.xlu0 %v13878_v20, %s15871_s25 }
 0xd0c   : > { %5792 = vmatpush1.bf16.msra.mxu0 %v5759_v11 }
 0xd0d   : > { %5918 = vmatprep.subr.bf16.mxu0 %v5887_v40  ;;  %v5861_v17 = vpop.permute.xlu0 %5860  ;;  %v5859_v18 = vpop.permute.xlu1 %5858  ;;  %6320 = vrot.lane.b32.xlu1 %v13891_v1, %s15871_s25 }
 0xd0e   : > { %v5893_v12 = vsel %vm960_vm2, %v5859_v18, %v5861_v17 }
 0xd0f   : > { %5810 = vmatmul.mubr.bf16.vlgmr.msra.gmra.mrb[36].mxu0 %v13820_v9  ;;  %6316 = vrot.lane.b32.xlu0 %v13888_v35, %s15871_s25 }
 0xd10   : > { %5919 = vmatpush1.bf16.msra.mxu0 %v5886_v22  ;;  %5819 = vmatprep.mubr.bf16.mxu0 %v15881_v25 }
 0xd11   : > { %5920 = vmatprep.subr.bf16.mxu0 %v5889_v10  ;;  %v5865_v53 = vpop.permute.xlu0 %5864  ;;  %v5857_v8 = vpop.permute.xlu1 %5856 }
 0xd12   : > { %v5892_v14 = vsel %vm960_vm2, %v5857_v8, %v5859_v18 }
 0xd14   : > { %5921 = vmatpush1.bf16.msra.mxu0 %v5888_v44 }
 0xd15   : > { %5922 = vmatprep.subr.bf16.mxu0 %v5891_v15  ;;  %v5863_v48 = vpop.permute.xlu0 %5862  ;;  %v5867_v23 = vpop.permute.xlu1 %5866 }
 0xd16   : > { %v5895_v37 = vsel %vm960_vm2, %v5865_v53, %v5867_v23  ;;  %v5894_v55 = vsel %vm960_vm2, %v5863_v48, %v5865_v53 }
 0xd17   : > { %5820 = vmatmul.mubr.bf16.gmra.mrb[40].mxu0 %v13831_v63 }
 0xd18   : > { %5923 = vmatpush1.bf16.msra.mxu0 %v5890_v60  ;;  %5950 = vmatprep.mubr.bf16.mxu0 %v15881_v25 }
 0xd19   : > { %5924 = vmatprep.subr.bf16.mxu0 %v5893_v12  ;;  %v5873_v32 = vpop.permute.xlu0 %5872  ;;  %v5871_v2 = vpop.permute.xlu1 %5870 }
 0xd1a   : > { %v5897_v4 = vsel %vm960_vm2, %v5871_v2, %v5873_v32 }
 0xd1c   : > { %5925 = vmatpush1.bf16.msra.mxu0 %v5892_v14 }
 0xd1d   : > { %5926 = vmatprep.subr.bf16.mxu0 %v5895_v37  ;;  %v5877_v45 = vpop.permute.xlu0 %5876  ;;  %v5869_v43 = vpop.permute.xlu1 %5868  ;;  %v13924_v37 = vld [vmem:[%s11126_s29 + $0x574] ss:$12 sps:$4 sm:$0xff]  }
 0xd1e   : > { %v5896_v39 = vsel %vm960_vm2, %v5869_v43, %v5871_v2  ;;  %v13933_v43 = vld [vmem:[%s11126_s29 + $0x578] ss:$12 sps:$4 sm:$0xff]  }
 0xd20   : > { %5927 = vmatpush1.bf16.msra.mxu0 %v5894_v55  ;;  %v13940_v55 = vld [vmem:[%s11126_s29 + $0x590] ss:$12 sps:$4 sm:$0xff]  }
 0xd21   : > { %5928 = vmatprep.subr.bf16.mxu0 %v5897_v4  ;;  %v5875_v30 = vpop.permute.xlu0 %5874  ;;  %v13943_v4 = vld [vmem:[%s11126_s29 + $0x58c] ss:$12 sps:$4 sm:$0xff]  }
 0xd22   : > { %v5879_v28 = vpop.permute.xlu1 %5878  ;;  %v5898_v0 = vsel %vm960_vm2, %v5875_v30, %v5877_v45  ;;  %v13950_v30 = vld [vmem:[%s11126_s29 + $0x5a4] ss:$12 sps:$4 sm:$0xff]  }
 0xd23   : > { %v5899_v58 = vsel %vm960_vm2, %v5877_v45, %v5879_v28  ;;  %v13930_v45 = vld [vmem:[%s11126_s29 + $0x570] ss:$12 sps:$4 sm:$0xff]   ;;  %v13953_v28 = vld [vmem:[%s11126_s29 + $0x588] ss:$12 sps:$4 sm:$0xff]  }
 0xd24   : > { %5929 = vmatpush1.bf16.msra.mxu0 %v5896_v39  ;;  %v13960_v39 = vld [vmem:[%s11126_s29 + $0x5a0] ss:$12 sps:$4 sm:$0xff]  }
 0xd25   : > { %5930 = vmatprep.subr.bf16.mxu0 %v5899_v58  ;;  %v5885_v59 = vpop.permute.xlu0 %5884  ;;  %v13963_v58 = vld [vmem:[%s11126_s29 + $0x5a8] ss:$12 sps:$4 sm:$0xff]  }
 0xd26   : > { %v5883_v38 = vpop.permute.xlu1 %5882 }
 0xd27   : > { %v5901_v13 = vsel %vm960_vm2, %v5883_v38, %v5885_v59  ;;  %v13970_v59 = vld [vmem:[%s11126_s29 + $0x5c0] ss:$12 sps:$4 sm:$0xff]  }
 0xd28   : > { %5931 = vmatpush1.bf16.msra.mxu0 %v5898_v0  ;;  %v13980_v0 = vld [vmem:[%s11126_s29 + $0x5d4] ss:$12 sps:$4 sm:$0xff]  }
 0xd29   : > { %5932 = vmatprep.subr.bf16.mxu0 %v5901_v13  ;;  %v13983_v13 = vld [vmem:[%s11126_s29 + $0x5b8] ss:$12 sps:$4 sm:$0xff]  }
 0xd2a   : > { %v5881_v46 = vpop.permute.xlu1 %5880 }
 0xd2b   : > { %v5900_v33 = vsel %vm960_vm2, %v5881_v46, %v5883_v38  ;;  %v13973_v38 = vld [vmem:[%s11126_s29 + $0x5bc] ss:$12 sps:$4 sm:$0xff]  }
 0xd2c   : > { %5933 = vmatpush1.bf16.msra.mxu0 %v5900_v33  ;;  %v13990_v46 = vld [vmem:[%s11126_s29 + $0x5d0] ss:$12 sps:$4 sm:$0xff]   ;;  %v13993_v33 = vld [vmem:[%s11126_s29 + $0x5d8] ss:$12 sps:$4 sm:$0xff]  }
 0xd2f   : > { %5951 = vmatmul.mubr.bf16.vlgmr.msra.gmra.mrb[36].mxu0 %v13848_v56 }
 0xd30   : > { %5960 = vmatprep.mubr.bf16.mxu0 %v15881_v25 }
 0xd37   : > { %5961 = vmatmul.mubr.bf16.gmra.mrb[40].mxu0 %v13855_v41 }
 0xd38   : > { %6975 = vmatprep.mubr.f32.mxu0 %v15880_v26 }
 0xd82   : > { %v13859_v34 = vpop.f32.mrb[32].mxu0 }
 0xd83   : > { %15896 = vst [vmem:[#allocation26_spill] sm:$0xff] %v13859_v34  ;;  %v13861_v3 = vpop.f32.mrb[33].mxu0 }
 0xd84   : > { %15897 = vst [vmem:[#allocation27_spill] sm:$0xff] %v13861_v3 }
 0xd86   : > { %v13863_v21 = vpop.f32.mrb[34].mxu0 }
 0xd87   : > { %15898 = vst [vmem:[#allocation28_spill] sm:$0xff] %v13863_v21  ;;  %v13871_v49 = vpop.f32.mrb[35].mxu0 }
 0xd88   : > { %15899 = vst [vmem:[#allocation29_spill] sm:$0xff] %v13871_v49 }
 0xe02   : > { %v5952_v54 = vpop.f32.mrb[36].mxu0 }
 0xe03   : > { %v5954_v7 = vpop.f32.mrb[37].mxu0 }
 0xe04   : > { %v5956_v11 = vpop.f32.mrb[38].mxu0 }
 0xe05   : > { %v5979_v40 = vmax.f32 %v5952_v54, %v5956_v11  ;;  %v5958_v17 = vpop.f32.mrb[39].mxu0  ;;  %v14000_v54 = vld [vmem:[%s11126_s29 + $0x5f0] ss:$12 sps:$4 sm:$0xff]   ;;  %v14010_v11 = vld [vmem:[%s11126_s29 + $0x5e8] ss:$12 sps:$4 sm:$0xff]  }
 0xe06   : > { %v5980_v18 = vmax.f32 %v5954_v7, %v5958_v17  ;;  %v14003_v7 = vld [vmem:[%s11126_s29 + $0x5ec] ss:$12 sps:$4 sm:$0xff]   ;;  %v14050_v17 = vpop.permute.xlu1 %6312  ;;  %s11011_s29 = smov 36  }
 0xe0a   : > { %v5962_v22 = vpop.f32.mrb[40].mxu0 }
 0xe0b   : > { %v5964_v10 = vpop.f32.mrb[41].mxu0 }
 0xe0c   : > { %v5966_v53 = vpop.f32.mrb[42].mxu0 }
 0xe0d   : > { %v5981_v8 = vmax.f32 %v5962_v22, %v5966_v53  ;;  %v5968_v44 = vpop.f32.mrb[43].mxu0  ;;  %v14058_v22 = vpop.permute.xlu1 %6310 }
 0xe0e   : > { %v5982_v15 = vmax.f32 %v5964_v10, %v5968_v44 }
 0xe0f   : > { %v5983_v48 = vmax.f32 %v5979_v40, %v5981_v8  ;;  %v14048_v40 = vpop.permute.xlu0 %6314 }
 0xe10   : > { %v5984_v23 = vmax.f32 %v5980_v18, %v5982_v15 }
 0xe11   : > { %v13898_v60 = vadd.f32 %v5983_v48, %v11499_v50  ;;  %v14070_v53 = vpop.permute.xlu1 %6320 }
 0xe12   : > { %v13901_v12 = vadd.f32 %v5984_v23, %v11499_v50 }
 0xe13   : > { %v15848_v32 = vmax.f32 %v13898_v60, 0.0  ;;  %v14056_v18 = vpop.permute.xlu0 %6318  ;;  %v15900_v16 = vmax.f32 %v13898_v60, 0.0 }
 0xe14   : > { %v5988_v2 = vmax.f32 %v13901_v12, 0.0 }
 0xe16   : > { %v10244_v14 = vpack.i.bf16 %v5988_v2, %v15848_v32 }
 0xe17   : > { %v14068_v10 = vpop.permute.xlu0 %6316 }
 0xe18   : > { %10245 = vrot.lane.b32.xlu1 %v10244_v14, %s15863_s26  ;;  %10240 = vrot.lane.b32.xlu0 %v10244_v14, %s15871_s25 }
 0xe1c   : > { %10255 = vrot.lane.b32.xlu1 %v10244_v14, %s15873_s12  ;;  %10250 = vrot.lane.b32.xlu0 %v10244_v14, %s15864_s27 }
 0xe20   : > { %10265 = vrot.lane.b32.xlu1 %v10244_v14, %s15877_s24  ;;  %10260 = vrot.lane.b32.xlu0 %v10244_v14, %s15874_s2 }
 0xe24   : > { %10275 = vrot.lane.b32.xlu1 %v10244_v14, %s15878_s15  ;;  %10270 = vrot.lane.b32.xlu0 %v10244_v14, %s15865_s21 }
 0xe28   : > { %10285 = vrot.lane.b32.xlu1 %v10244_v14, %s15879_s19  ;;  %10280 = vrot.lane.b32.xlu0 %v10244_v14, %s15866_s18 }
 0xe2c   : > { %10295 = vrot.lane.b32.xlu1 %v10244_v14, %s15867_s30  ;;  %10290 = vrot.lane.b32.xlu0 %v10244_v14, %s15868_s11 }
 0xe30   : > { %10305 = vrot.lane.b32.xlu1 %v10244_v14, %s15869_s0  ;;  %10300 = vrot.lane.b32.xlu0 %v10244_v14, %s15870_s20 }
 0xe34   : > { %6324 = vrot.lane.b32.xlu1 %v13924_v37, %s15871_s25  ;;  %10310 = vrot.lane.b32.xlu0 %v10244_v14, %s15872_s28 }
 0xe38   : > { %6322 = vrot.lane.b32.xlu1 %v13930_v45, %s15871_s25  ;;  %6326 = vrot.lane.b32.xlu0 %v13933_v43, %s15871_s25 }
 0xe3c   : > { %6332 = vrot.lane.b32.xlu1 %v13940_v55, %s15871_s25  ;;  %6330 = vrot.lane.b32.xlu0 %v13943_v4, %s15871_s25 }
 0xe40   : > { %6336 = vrot.lane.b32.xlu1 %v13950_v30, %s15871_s25  ;;  %6328 = vrot.lane.b32.xlu0 %v13953_v28, %s15871_s25 }
 0xe44   : > { %6334 = vrot.lane.b32.xlu1 %v13960_v39, %s15871_s25  ;;  %6338 = vrot.lane.b32.xlu0 %v13963_v58, %s15871_s25 }
 0xe48   : > { %6344 = vrot.lane.b32.xlu1 %v13970_v59, %s15871_s25  ;;  %6342 = vrot.lane.b32.xlu0 %v13973_v38, %s15871_s25 }
 0xe4c   : > { %6348 = vrot.lane.b32.xlu1 %v13980_v0, %s15871_s25  ;;  %6340 = vrot.lane.b32.xlu0 %v13983_v13, %s15871_s25 }
 0xe50   : > { %6346 = vrot.lane.b32.xlu1 %v13990_v46, %s15871_s25  ;;  %6350 = vrot.lane.b32.xlu0 %v13993_v33, %s15871_s25 }
 0xe54   : > { %6356 = vrot.lane.b32.xlu1 %v14000_v54, %s15871_s25  ;;  %6354 = vrot.lane.b32.xlu0 %v14003_v7, %s15871_s25 }
 0xe58   : > { %6514 = vrot.lane.b32.xlu1 %v13869_v29, %s15873_s12  ;;  %6352 = vrot.lane.b32.xlu0 %v14010_v11, %s15871_s25 }
 0xe5c   : > { %6512 = vrot.lane.b32.xlu1 %v13881_v36, %s15873_s12  ;;  %6516 = vrot.lane.b32.xlu0 %v13866_v42, %s15873_s12 }
 0xe60   : > { %6522 = vrot.lane.b32.xlu1 %v13891_v1, %s15873_s12  ;;  %6520 = vrot.lane.b32.xlu0 %v13878_v20, %s15873_s12 }
 0xe64   : > { %6526 = vrot.lane.b32.xlu1 %v13924_v37, %s15873_s12  ;;  %6518 = vrot.lane.b32.xlu0 %v13888_v35, %s15873_s12 }
 0xe68   : > { %6524 = vrot.lane.b32.xlu1 %v13930_v45, %s15873_s12  ;;  %6528 = vrot.lane.b32.xlu0 %v13933_v43, %s15873_s12 }
 0xe6c   : > { %6534 = vrot.lane.b32.xlu1 %v13940_v55, %s15873_s12  ;;  %6532 = vrot.lane.b32.xlu0 %v13943_v4, %s15873_s12 }
 0xe70   : > { %6538 = vrot.lane.b32.xlu1 %v13950_v30, %s15873_s12  ;;  %6530 = vrot.lane.b32.xlu0 %v13953_v28, %s15873_s12 }
 0xe74   : > { %6536 = vrot.lane.b32.xlu1 %v13960_v39, %s15873_s12  ;;  %6540 = vrot.lane.b32.xlu0 %v13963_v58, %s15873_s12 }
 0xe78   : > { %6546 = vrot.lane.b32.xlu1 %v13970_v59, %s15873_s12  ;;  %6544 = vrot.lane.b32.xlu0 %v13973_v38, %s15873_s12 }
 0xe7c   : > { %6550 = vrot.lane.b32.xlu1 %v13980_v0, %s15873_s12  ;;  %6542 = vrot.lane.b32.xlu0 %v13983_v13, %s15873_s12 }
 0xe80   : > { %6548 = vrot.lane.b32.xlu1 %v13990_v46, %s15873_s12  ;;  %6552 = vrot.lane.b32.xlu0 %v13993_v33, %s15873_s12 }
 0xe84   : > { %6558 = vrot.lane.b32.xlu1 %v14000_v54, %s15873_s12  ;;  %6556 = vrot.lane.b32.xlu0 %v14003_v7, %s15873_s12 }
 0xe88   : > { %6655 = vrot.lane.b32.xlu1 %v13869_v29, %s15874_s2  ;;  %6554 = vrot.lane.b32.xlu0 %v14010_v11, %s15873_s12 }
 0xe8a   : > { %v10246_v8 = vpop.permute.xlu1 %10245  ;;  %v10241_v44 = vpop.permute.xlu0 %10240 }
 0xe8b   : > { %v10243_v15 = vunpack.i.h.bf16 %v10241_v44  ;;  %v10242_v48 = vunpack.i.l.bf16 %v10241_v44  ;;  %v10248_v23 = vunpack.i.h.bf16 %v10246_v8  ;;  %v10247_v14 = vunpack.i.l.bf16 %v10246_v8 }
 0xe8c   : > { %6653 = vrot.lane.b32.xlu1 %v13881_v36, %s15874_s2  ;;  %6657 = vrot.lane.b32.xlu0 %v13866_v42, %s15874_s2 }
 0xe8d   : > { %v5995_v32 = vsel %vm569_vm0, %v10242_v48, %v10243_v15  ;;  %v9277_v3 = vpack.c.bf16 %v10243_v15, %v5988_v2  ;;  %v6002_v42 = vsel %vm1084_vm3, %v10247_v14, %v10248_v23 }
 0xe8e   : > { %v10256_v52 = vpop.permute.xlu1 %10255  ;;  %v10251_v49 = vpop.permute.xlu0 %10250  ;;  %v9279_v34 = vpack.c.bf16 %v5995_v32, %v15900_v16 }
 0xe8f   : > { %v10253_v24 = vunpack.i.h.bf16 %v10251_v49  ;;  %v10252_v44 = vunpack.i.l.bf16 %v10251_v49  ;;  %9278 = vmatprep.subr.bf16.mxu1 %v9277_v3  ;;  %v10258_v21 = vunpack.i.h.bf16 %v10256_v52  ;;  %v10257_v31 = vunpack.i.l.bf16 %v10256_v52 }
 0xe90   : > { %6663 = vrot.lane.b32.xlu1 %v13891_v1, %s15874_s2  ;;  %6661 = vrot.lane.b32.xlu0 %v13878_v20, %s15874_s2 }
 0xe91   : > { %v6009_v12 = vsel %vm1092_vm4, %v10252_v44, %v10253_v24  ;;  %9280 = vmatpush1.bf16.msra.mxu1 %v9279_v34  ;;  %v9281_v2 = vpack.c.bf16 %v10253_v24, %v10248_v23  ;;  %v6016_v52 = vsel %vm801_vm1, %v10257_v31, %v10258_v21 }
 0xe92   : > { %v10266_v8 = vpop.permute.xlu1 %10265  ;;  %v10261_v60 = vpop.permute.xlu0 %10260  ;;  %v9283_v16 = vpack.c.bf16 %v6009_v12, %v6002_v42 }
 0xe93   : > { %v10263_v32 = vunpack.i.h.bf16 %v10261_v60  ;;  %v10262_v49 = vunpack.i.l.bf16 %v10261_v60  ;;  %9282 = vmatprep.subr.bf16.mxu1 %v9281_v2  ;;  %v10268_v3 = vunpack.i.h.bf16 %v10266_v8  ;;  %v10267_v1 = vunpack.i.l.bf16 %v10266_v8 }
 0xe94   : > { %6667 = vrot.lane.b32.xlu1 %v13924_v37, %s15874_s2  ;;  %6659 = vrot.lane.b32.xlu0 %v13888_v35, %s15874_s2 }
 0xe95   : > { %v6023_v15 = vsel %vm960_vm2, %v10262_v49, %v10263_v32  ;;  %9284 = vmatpush1.bf16.msra.mxu1 %v9283_v16  ;;  %v9285_v24 = vpack.c.bf16 %v10263_v32, %v10258_v21  ;;  %v6030_v12 = vsel %vm1116_vm5, %v10267_v1, %v10268_v3 }
 0xe96   : > { %v10276_v34 = vpop.permute.xlu1 %10275  ;;  %v10271_v48 = vpop.permute.xlu0 %10270  ;;  %v9287_v23 = vpack.c.bf16 %v6023_v15, %v6016_v52 }
 0xe97   : > { %v10273_v14 = vunpack.i.h.bf16 %v10271_v48  ;;  %v10272_v44 = vunpack.i.l.bf16 %v10271_v48  ;;  %9286 = vmatprep.subr.bf16.mxu1 %v9285_v24  ;;  %v10278_v42 = vunpack.i.h.bf16 %v10276_v34  ;;  %v10277_v31 = vunpack.i.l.bf16 %v10276_v34 }
 0xe98   : > { %6665 = vrot.lane.b32.xlu1 %v13930_v45, %s15874_s2  ;;  %6669 = vrot.lane.b32.xlu0 %v13933_v43, %s15874_s2 }
 0xe99   : > { %v6037_v2 = vsel %vm1124_vm6, %v10272_v44, %v10273_v14  ;;  %9288 = vmatpush1.bf16.msra.mxu1 %v9287_v23  ;;  %v9289_v21 = vpack.c.bf16 %v10273_v14, %v10268_v3  ;;  %v6044_v52 = vsel %vm1132_vm8, %v10277_v31, %v10278_v42 }
 0xe9a   : > { %v10286_v8 = vpop.permute.xlu1 %10285  ;;  %v10281_v60 = vpop.permute.xlu0 %10280  ;;  %v9291_v16 = vpack.c.bf16 %v6037_v2, %v6030_v12 }
 0xe9b   : > { %v10283_v32 = vunpack.i.h.bf16 %v10281_v60  ;;  %v10282_v49 = vunpack.i.l.bf16 %v10281_v60  ;;  %9290 = vmatprep.subr.bf16.mxu1 %v9289_v21  ;;  %v10288_v43 = vunpack.i.h.bf16 %v10286_v8  ;;  %v10287_v1 = vunpack.i.l.bf16 %v10286_v8 }
 0xe9c   : > { %6675 = vrot.lane.b32.xlu1 %v13940_v55, %s15874_s2  ;;  %6673 = vrot.lane.b32.xlu0 %v13943_v4, %s15874_s2 }
 0xe9d   : > { %v6051_v15 = vsel %vm1140_vm7, %v10282_v49, %v10283_v32  ;;  %9292 = vmatpush1.bf16.msra.mxu1 %v9291_v16  ;;  %v9293_v3 = vpack.c.bf16 %v10283_v32, %v10278_v42  ;;  %v6058_v55 = vsel %vm1148_vm9, %v10287_v1, %v10288_v43 }
 0xe9e   : > { %v10296_v24 = vpop.permute.xlu1 %10295  ;;  %v10291_v34 = vpop.permute.xlu0 %10290  ;;  %v9295_v48 = vpack.c.bf16 %v6051_v15, %v6044_v52 }
 0xe9f   : > { %v10293_v23 = vunpack.i.h.bf16 %v10291_v34  ;;  %v10292_v14 = vunpack.i.l.bf16 %v10291_v34  ;;  %9294 = vmatprep.subr.bf16.mxu1 %v9293_v3  ;;  %v10298_v44 = vunpack.i.h.bf16 %v10296_v24  ;;  %v10297_v31 = vunpack.i.l.bf16 %v10296_v24 }
 0xea0   : > { %6679 = vrot.lane.b32.xlu1 %v13950_v30, %s15874_s2  ;;  %6671 = vrot.lane.b32.xlu0 %v13953_v28, %s15874_s2 }
 0xea1   : > { %v6065_v12 = vsel %vm1156_vm10, %v10292_v14, %v10293_v23  ;;  %9296 = vmatpush1.bf16.msra.mxu1 %v9295_v48  ;;  %v9297_v42 = vpack.c.bf16 %v10293_v23, %v10288_v43  ;;  %v6072_v32 = vsel %vm1164_vm12, %v10297_v31, %v10298_v44 }
 0xea2   : > { %v10306_v2 = vpop.permute.xlu1 %10305  ;;  %v10301_v21 = vpop.permute.xlu0 %10300  ;;  %v9299_v8 = vpack.c.bf16 %v6065_v12, %v6058_v55 }
 0xea3   : > { %v10303_v60 = vunpack.i.h.bf16 %v10301_v21  ;;  %v10302_v16 = vunpack.i.l.bf16 %v10301_v21  ;;  %9298 = vmatprep.subr.bf16.mxu1 %v9297_v42  ;;  %v10308_v49 = vunpack.i.h.bf16 %v10306_v2  ;;  %v10307_v52 = vunpack.i.l.bf16 %v10306_v2  ;;  %v14140_v21 = vld [vmem:[%s15797_s3] sm:$0xff] }
 0xea4   : > { %6677 = vrot.lane.b32.xlu1 %v13960_v39, %s15874_s2  ;;  %6681 = vrot.lane.b32.xlu0 %v13963_v58, %s15874_s2  ;;  %v6358_v2 = vsel %vm569_vm0, %v14058_v22, %v14050_v17 }
 0xea5   : > { %v6079_v1 = vsel %vm1172_vm11, %v10302_v16, %v10303_v60  ;;  %9300 = vmatpush1.bf16.msra.mxu1 %v9299_v8  ;;  %v9301_v43 = vpack.c.bf16 %v10303_v60, %v10298_v44  ;;  %v6086_v58 = vsel %vm1180_vm13, %v10307_v52, %v10308_v49  ;;  %v6360_v8 = vsel %vm569_vm0, %v14068_v10, %v14056_v18 }
 0xea6   : > { %v6325_v15 = vpop.permute.xlu1 %6324  ;;  %v10311_v3 = vpop.permute.xlu0 %10310  ;;  %v9303_v24 = vpack.c.bf16 %v6079_v1, %v6072_v32 }
 0xea7   : > { %v10313_v34 = vunpack.i.h.bf16 %v10311_v3  ;;  %v10312_v48 = vunpack.i.l.bf16 %v10311_v3  ;;  %9302 = vmatprep.subr.bf16.mxu1 %v9301_v43 }
 0xea8   : > { %6687 = vrot.lane.b32.xlu1 %v13970_v59, %s15874_s2  ;;  %6685 = vrot.lane.b32.xlu0 %v13973_v38, %s15874_s2  ;;  %v6359_v59 = vsel %vm569_vm0, %v14050_v17, %v14048_v40  ;;  %v6361_v40 = vsel %vm569_vm0, %v14056_v18, %v14070_v53 }
 0xea9   : > { %v6093_v23 = vsel %vm1188_vm14, %v10312_v48, %v10313_v34  ;;  %9304 = vmatpush1.bf16.msra.mxu1 %v9303_v24  ;;  %v9305_v14 = vpack.c.bf16 %v10313_v34, %v10308_v49 }
 0xeaa   : > { %v6323_v31 = vpop.permute.xlu1 %6322  ;;  %v6327_v44 = vpop.permute.xlu0 %6326  ;;  %v9307_v55 = vpack.c.bf16 %v6093_v23, %v6086_v58 }
 0xeab   : > { %9306 = vmatprep.subr.bf16.mxu1 %v9305_v14  ;;  %v6363_v53 = vsel %vm569_vm0, %v6325_v15, %v6327_v44 }
 0xeac   : > { %6691 = vrot.lane.b32.xlu1 %v13980_v0, %s15874_s2  ;;  %6683 = vrot.lane.b32.xlu0 %v13983_v13, %s15874_s2 }
 0xead   : > { %9308 = vmatpush1.bf16.msra.mxu1 %v9307_v55 }
 0xeae   : > { %6390 = vmatprep.subr.bf16.mxu1 %v6359_v59  ;;  %v6333_v12 = vpop.permute.xlu1 %6332  ;;  %v6331_v42 = vpop.permute.xlu0 %6330 }
 0xeaf   : > { %v6365_v18 = vsel %vm569_vm0, %v6331_v42, %v6333_v12 }
 0xeb0   : > { %6161 = vmatmul.mubr.f32.vlgmr.msra.gmra.mrb[36].mxu1 %v14140_v21  ;;  %6689 = vrot.lane.b32.xlu1 %v13990_v46, %s15874_s2 }
 0xeb1   : > { %6693 = vrot.lane.b32.xlu0 %v13993_v33, %s15874_s2  ;;  %6391 = vmatpush1.bf16.msra.mxu1 %v6358_v2  ;;  %v14159_v33 = vld [vmem:[%s15797_s3 + $0x8] sm:$0xff] }
 0xeb2   : > { %6392 = vmatprep.subr.bf16.mxu1 %v6361_v40  ;;  %v6337_v17 = vpop.permute.xlu1 %6336  ;;  %v6329_v22 = vpop.permute.xlu0 %6328  ;;  %6166 = vmatprep.mubr.f32.mxu1 %v15880_v26 }
 0xeb3   : > { %v6364_v49 = vsel %vm569_vm0, %v6329_v22, %v6331_v42 }
 0xeb4   : > { %6699 = vrot.lane.b32.xlu1 %v14000_v54, %s15874_s2  ;;  %6167 = vmatmul.mubr.f32.gmra.mrb[38].mxu1 %v14159_v33  ;;  %v6362_v54 = vsel %vm569_vm0, %v6323_v31, %v6325_v15 }
 0xeb5   : > { %6697 = vrot.lane.b32.xlu0 %v14003_v7, %s15874_s2  ;;  %6393 = vmatpush1.bf16.msra.mxu1 %v6360_v8 }
 0xeb6   : > { %6394 = vmatprep.subr.bf16.mxu1 %v6363_v53  ;;  %v6335_v60 = vpop.permute.xlu1 %6334  ;;  %v6339_v16 = vpop.permute.xlu0 %6338  ;;  %6422 = vmatprep.mubr.bf16.mxu1 %v15881_v25 }
 0xeb7   : > { %v6367_v52 = vsel %vm569_vm0, %v6337_v17, %v6339_v16  ;;  %v6366_v3 = vsel %vm569_vm0, %v6335_v60, %v6337_v17 }
 0xeb9   : > { %6695 = vrot.lane.b32.xlu0 %v14010_v11, %s15874_s2  ;;  %6395 = vmatpush1.bf16.msra.mxu1 %v6362_v54 }
 0xeba   : > { %6396 = vmatprep.subr.bf16.mxu1 %v6365_v18  ;;  %v6345_v10 = vpop.permute.xlu1 %6344  ;;  %v6343_v32 = vpop.permute.xlu0 %6342 }
 0xebb   : > { %v6369_v15 = vsel %vm569_vm0, %v6343_v32, %v6345_v10 }
 0xebd   : > { %6397 = vmatpush1.bf16.msra.mxu1 %v6364_v49 }
 0xebe   : > { %6398 = vmatprep.subr.bf16.mxu1 %v6367_v52  ;;  %v6349_v1 = vpop.permute.xlu1 %6348  ;;  %v6341_v43 = vpop.permute.xlu0 %6340 }
 0xebf   : > { %v6368_v58 = vsel %vm569_vm0, %v6341_v43, %v6343_v32 }
 0xec1   : > { %6399 = vmatpush1.bf16.msra.mxu1 %v6366_v3 }
 0xec2   : > { %6400 = vmatprep.subr.bf16.mxu1 %v6369_v15  ;;  %v6347_v24 = vpop.permute.xlu1 %6346  ;;  %v6351_v34 = vpop.permute.xlu0 %6350 }
 0xec3   : > { %v6371_v48 = vsel %vm569_vm0, %v6349_v1, %v6351_v34  ;;  %v6370_v44 = vsel %vm569_vm0, %v6347_v24, %v6349_v1 }
 0xec5   : > { %6401 = vmatpush1.bf16.msra.mxu1 %v6368_v58 }
 0xec6   : > { %6402 = vmatprep.subr.bf16.mxu1 %v6371_v48  ;;  %v6357_v23 = vpop.permute.xlu1 %6356  ;;  %v6355_v14 = vpop.permute.xlu0 %6354 }
 0xec7   : > { %v6373_v31 = vsel %vm569_vm0, %v6355_v14, %v6357_v23 }
 0xec9   : > { %6403 = vmatpush1.bf16.msra.mxu1 %v6370_v44 }
 0xeca   : > { %6404 = vmatprep.subr.bf16.mxu1 %v6373_v31  ;;  %v6515_v55 = vpop.permute.xlu1 %6514  ;;  %v6353_v59 = vpop.permute.xlu0 %6352 }
 0xecb   : > { %v6372_v12 = vsel %vm569_vm0, %v6353_v59, %v6355_v14 }
 0xecd   : > { %6405 = vmatpush1.bf16.msra.mxu1 %v6372_v12 }
 0xece   : > { %v6513_v42 = vpop.permute.xlu1 %6512  ;;  %v6517_v2 = vpop.permute.xlu0 %6516  ;;  %6459 = vmatprep.subr.bf16.mxu1 %v13869_v29 }
 0xed0   : > { %6423 = vmatmul.mubr.bf16.vlgmr.msra.gmra.mrb[40].mxu1 %v13759_v57 }
 0xed1   : > { %6460 = vmatpush1.bf16.msra.mxu1 %v13881_v36  ;;  %6432 = vmatprep.mubr.bf16.mxu1 %v15881_v25 }
 0xed2   : > { %v6523_v40 = vpop.permute.xlu1 %6522  ;;  %v6521_v17 = vpop.permute.xlu0 %6520  ;;  %6461 = vmatprep.subr.bf16.mxu1 %v13878_v20 }
 0xed5   : > { %6462 = vmatpush1.bf16.msra.mxu1 %v13888_v35 }
 0xed6   : > { %v6527_v22 = vpop.permute.xlu1 %6526  ;;  %v6519_v8 = vpop.permute.xlu0 %6518  ;;  %6463 = vmatprep.subr.bf16.mxu1 %v13924_v37 }
 0xed8   : > { %6433 = vmatmul.mubr.bf16.gmra.mrb[44].mxu1 %v13770_v47 }
 0xed9   : > { %6464 = vmatpush1.bf16.msra.mxu1 %v13930_v45  ;;  %6491 = vmatprep.mubr.bf16.mxu1 %v15881_v25 }
 0xeda   : > { %v6525_v57 = vpop.permute.xlu1 %6524  ;;  %v6529_v29 = vpop.permute.xlu0 %6528  ;;  %6465 = vmatprep.subr.bf16.mxu1 %v13943_v4 }
 0xedb   : > { %v6564_v54 = vsel %vm801_vm1, %v6525_v57, %v6527_v22 }
 0xedd   : > { %6466 = vmatpush1.bf16.msra.mxu1 %v13953_v28 }
 0xede   : > { %v6535_v36 = vpop.permute.xlu1 %6534  ;;  %v6533_v20 = vpop.permute.xlu0 %6532  ;;  %6467 = vmatprep.subr.bf16.mxu1 %v13950_v30  ;;  %v6561_v30 = vsel %vm801_vm1, %v6515_v55, %v6517_v2 }
 0xee1   : > { %6468 = vmatpush1.bf16.msra.mxu1 %v13960_v39 }
 0xee2   : > { %v6539_v35 = vpop.permute.xlu1 %6538  ;;  %v6531_v37 = vpop.permute.xlu0 %6530  ;;  %6469 = vmatprep.subr.bf16.mxu1 %v13973_v38  ;;  %v6560_v38 = vsel %vm801_vm1, %v6513_v42, %v6515_v55 }
 0xee3   : > { %v6566_v32 = vsel %vm801_vm1, %v6531_v37, %v6533_v20 }
 0xee5   : > { %6470 = vmatpush1.bf16.msra.mxu1 %v13983_v13 }
 0xee6   : > { %v6537_v47 = vpop.permute.xlu1 %6536  ;;  %v6541_v45 = vpop.permute.xlu0 %6540  ;;  %6471 = vmatprep.subr.bf16.mxu1 %v13980_v0  ;;  %v6563_v0 = vsel %vm801_vm1, %v6521_v17, %v6523_v40 }
 0xee7   : > { %v6569_v49 = vsel %vm801_vm1, %v6539_v35, %v6541_v45  ;;  %v6568_v43 = vsel %vm801_vm1, %v6537_v47, %v6539_v35 }
 0xee9   : > { %6472 = vmatpush1.bf16.msra.mxu1 %v13990_v46 }
 0xeea   : > { %v6547_v4 = vpop.permute.xlu1 %6546  ;;  %v6545_v28 = vpop.permute.xlu0 %6544  ;;  %6473 = vmatprep.subr.bf16.mxu1 %v14003_v7  ;;  %v6562_v7 = vsel %vm801_vm1, %v6519_v8, %v6521_v17 }
 0xeed   : > { %6474 = vmatpush1.bf16.msra.mxu1 %v14010_v11  ;;  %v6565_v11 = vsel %vm801_vm1, %v6527_v22, %v6529_v29 }
 0xeee   : > { %6592 = vmatprep.subr.bf16.mxu1 %v6561_v30  ;;  %v6551_v39 = vpop.permute.xlu1 %6550  ;;  %v6543_v53 = vpop.permute.xlu0 %6542 }
 0xeef   : > { %v6570_v24 = vsel %vm801_vm1, %v6543_v53, %v6545_v28 }
 0xef0   : > { %6492 = vmatmul.mubr.bf16.vlgmr.msra.gmra.mrb[40].mxu1 %v13790_v19  ;;  %v6567_v19 = vsel %vm801_vm1, %v6533_v20, %v6535_v36 }
 0xef1   : > { %6593 = vmatpush1.bf16.msra.mxu1 %v6560_v38  ;;  %6501 = vmatprep.mubr.bf16.mxu1 %v15881_v25 }
 0xef2   : > { %6594 = vmatprep.subr.bf16.mxu1 %v6563_v0  ;;  %v6549_v13 = vpop.permute.xlu1 %6548  ;;  %v6553_v46 = vpop.permute.xlu0 %6552 }
 0xef3   : > { %v6573_v34 = vsel %vm801_vm1, %v6551_v39, %v6553_v46  ;;  %v6572_v23 = vsel %vm801_vm1, %v6549_v13, %v6551_v39 }
 0xef5   : > { %6595 = vmatpush1.bf16.msra.mxu1 %v6562_v7 }
 0xef6   : > { %6596 = vmatprep.subr.bf16.mxu1 %v6565_v11  ;;  %v6559_v60 = vpop.permute.xlu1 %6558  ;;  %v6557_v16 = vpop.permute.xlu0 %6556 }
 0xef7   : > { %v6575_v14 = vsel %vm801_vm1, %v6557_v16, %v6559_v60 }
 0xef8   : > { %6502 = vmatmul.mubr.bf16.gmra.mrb[44].mxu1 %v13801_v51  ;;  %v6571_v51 = vsel %vm801_vm1, %v6545_v28, %v6547_v4 }
 0xef9   : > { %6597 = vmatpush1.bf16.msra.mxu1 %v6564_v54  ;;  %6624 = vmatprep.mubr.bf16.mxu1 %v15881_v25 }
 0xefa   : > { %6598 = vmatprep.subr.bf16.mxu1 %v6567_v19  ;;  %v6656_v18 = vpop.permute.xlu1 %6655  ;;  %v6555_v10 = vpop.permute.xlu0 %6554 }
 0xefb   : > { %v6574_v55 = vsel %vm801_vm1, %v6555_v10, %v6557_v16 }
 0xefd   : > { %6599 = vmatpush1.bf16.msra.mxu1 %v6566_v32 }
 0xefe   : > { %6600 = vmatprep.subr.bf16.mxu1 %v6569_v49  ;;  %v6654_v52 = vpop.permute.xlu1 %6653  ;;  %v6658_v1 = vpop.permute.xlu0 %6657 }
 0xeff   : > { %v6702_v59 = vsel %vm960_vm2, %v6656_v18, %v6658_v1  ;;  %v6701_v2 = vsel %vm960_vm2, %v6654_v52, %v6656_v18 }
 0xf01   : > { %6601 = vmatpush1.bf16.msra.mxu1 %v6568_v43 }
 0xf02   : > { %6602 = vmatprep.subr.bf16.mxu1 %v6571_v51  ;;  %v6664_v3 = vpop.permute.xlu1 %6663  ;;  %v6662_v15 = vpop.permute.xlu0 %6661 }
 0xf03   : > { %v6704_v40 = vsel %vm960_vm2, %v6662_v15, %v6664_v3 }
 0xf05   : > { %6603 = vmatpush1.bf16.msra.mxu1 %v6570_v24 }
 0xf06   : > { %6604 = vmatprep.subr.bf16.mxu1 %v6573_v34  ;;  %v6668_v48 = vpop.permute.xlu1 %6667  ;;  %v6660_v58 = vpop.permute.xlu0 %6659 }
 0xf07   : > { %v6703_v8 = vsel %vm960_vm2, %v6660_v58, %v6662_v15 }
 0xf09   : > { %6605 = vmatpush1.bf16.msra.mxu1 %v6572_v23 }
 0xf0a   : > { %6606 = vmatprep.subr.bf16.mxu1 %v6575_v14  ;;  %v6666_v31 = vpop.permute.xlu1 %6665  ;;  %v6670_v44 = vpop.permute.xlu0 %6669 }
 0xf0b   : > { %v6706_v57 = vsel %vm960_vm2, %v6668_v48, %v6670_v44  ;;  %v6705_v20 = vsel %vm960_vm2, %v6666_v31, %v6668_v48 }
 0xf0d   : > { %6607 = vmatpush1.bf16.msra.mxu1 %v6574_v55  ;;  %v1195_v55 = vld [vmem:[%s15798_s4 + $0x8] sm:$0xff] }
 0xf0e   : > { %6733 = vmatprep.subr.bf16.mxu1 %v6702_v59  ;;  %v6676_v12 = vpop.permute.xlu1 %6675  ;;  %v6674_v42 = vpop.permute.xlu0 %6673 }
 0xf10   : > { %6625 = vmatmul.mubr.bf16.vlgmr.msra.gmra.mrb[40].mxu1 %v13820_v9  ;;  %v6708_v9 = vsel %vm960_vm2, %v6674_v42, %v6676_v12 }
 0xf11   : > { %6734 = vmatpush1.bf16.msra.mxu1 %v6701_v2  ;;  %6634 = vmatprep.mubr.bf16.mxu1 %v15881_v25 }
 0xf12   : > { %6735 = vmatprep.subr.bf16.mxu1 %v6704_v40  ;;  %v6680_v17 = vpop.permute.xlu1 %6679  ;;  %v6672_v22 = vpop.permute.xlu0 %6671 }
 0xf13   : > { %v6707_v47 = vsel %vm960_vm2, %v6672_v22, %v6674_v42 }
 0xf15   : > { %6736 = vmatpush1.bf16.msra.mxu1 %v6703_v8 }
 0xf16   : > { %6737 = vmatprep.subr.bf16.mxu1 %v6706_v57  ;;  %v6678_v29 = vpop.permute.xlu1 %6677  ;;  %v6682_v36 = vpop.permute.xlu0 %6681 }
 0xf17   : > { %v6710_v45 = vsel %vm960_vm2, %v6680_v17, %v6682_v36  ;;  %v6709_v30 = vsel %vm960_vm2, %v6678_v29, %v6680_v17 }
 0xf18   : > { %6635 = vmatmul.mubr.bf16.gmra.mrb[44].mxu1 %v13831_v63 }
 0xf19   : > { %6738 = vmatpush1.bf16.msra.mxu1 %v6705_v20  ;;  %6765 = vmatprep.mubr.bf16.mxu1 %v15881_v25 }
 0xf1a   : > { %6739 = vmatprep.subr.bf16.mxu1 %v6708_v9  ;;  %v6688_v35 = vpop.permute.xlu1 %6687  ;;  %v6686_v37 = vpop.permute.xlu0 %6685 }
 0xf1b   : > { %v6712_v63 = vsel %vm960_vm2, %v6686_v37, %v6688_v35 }
 0xf1d   : > { %6740 = vmatpush1.bf16.msra.mxu1 %v6707_v47 }
 0xf1e   : > { %6741 = vmatprep.subr.bf16.mxu1 %v6710_v45  ;;  %v6692_v4 = vpop.permute.xlu1 %6691  ;;  %v6684_v28 = vpop.permute.xlu0 %6683 }
 0xf1f   : > { %v6711_v38 = vsel %vm960_vm2, %v6684_v28, %v6686_v37 }
 0xf21   : > { %6742 = vmatpush1.bf16.msra.mxu1 %v6709_v30 }
 0xf22   : > { %6743 = vmatprep.subr.bf16.mxu1 %v6712_v63  ;;  %v6690_v39 = vpop.permute.xlu1 %6689 }
 0xf23   : > { %v6694_v53 = vpop.permute.xlu0 %6693  ;;  %v6713_v7 = vsel %vm960_vm2, %v6690_v39, %v6692_v4 }
 0xf24   : > { %v6714_v0 = vsel %vm960_vm2, %v6692_v4, %v6694_v53 }
 0xf25   : > { %6744 = vmatpush1.bf16.msra.mxu1 %v6711_v38 }
 0xf26   : > { %6745 = vmatprep.subr.bf16.mxu1 %v6714_v0  ;;  %v6700_v13 = vpop.permute.xlu1 %6699 }
 0xf27   : > { %v6698_v46 = vpop.permute.xlu0 %6697 }
 0xf28   : > { %v6716_v11 = vsel %vm960_vm2, %v6698_v46, %v6700_v13 }
 0xf29   : > { %6746 = vmatpush1.bf16.msra.mxu1 %v6713_v7 }
 0xf2a   : > { %6747 = vmatprep.subr.bf16.mxu1 %v6716_v11 }
 0xf2b   : > { %v6696_v60 = vpop.permute.xlu0 %6695 }
 0xf2c   : > { %v6715_v16 = vsel %vm960_vm2, %v6696_v60, %v6698_v46 }
 0xf2d   : > { %6748 = vmatpush1.bf16.msra.mxu1 %v6715_v16 }
 0xf30   : > { %6766 = vmatmul.mubr.bf16.vlgmr.msra.gmra.mrb[40].mxu1 %v13848_v56 }
 0xf31   : > { %6775 = vmatprep.mubr.bf16.mxu1 %v15881_v25 }
 0xf38   : > { %6776 = vmatmul.mubr.bf16.gmra.mrb[44].mxu1 %v13855_v41 }
 0xf83   : > { %v14242_v54 = vpop.f32.mrb[36].mxu1 }
 0xf84   : > { %v14244_v19 = vpop.f32.mrb[37].mxu1 }
 0xf87   : > { %v14246_v18 = vpop.f32.mrb[38].mxu1 }
 0xf88   : > { %v14248_v10 = vpop.f32.mrb[39].mxu1 }
0x1003   : > { %v6767_v32 = vpop.f32.mrb[40].mxu1 }
0x1004   : > { %v6769_v49 = vpop.f32.mrb[41].mxu1 }
0x1005   : > { %v6771_v52 = vpop.f32.mrb[42].mxu1 }
0x1006   : > { %v6794_v1 = vmax.f32 %v6767_v32, %v6771_v52  ;;  %v6773_v43 = vpop.f32.mrb[43].mxu1 }
0x1007   : > { %v6795_v51 = vmax.f32 %v6769_v49, %v6773_v43 }
0x100b   : > { %v6777_v3 = vpop.f32.mrb[44].mxu1 }
0x100c   : > { %v6779_v56 = vpop.f32.mrb[45].mxu1 }
0x100d   : > { %v6781_v15 = vpop.f32.mrb[46].mxu1 }
0x100e   : > { %v6796_v25 = vmax.f32 %v6777_v3, %v6781_v15  ;;  %v6783_v24 = vpop.f32.mrb[47].mxu1 }
0x100f   : > { %v6797_v41 = vmax.f32 %v6779_v56, %v6783_v24 }
0x1010   : > { %v6798_v34 = vmax.f32 %v6794_v1, %v6796_v25 }
0x1011   : > { %v6799_v48 = vmax.f32 %v6795_v51, %v6797_v41 }
0x1012   : > { %v6800_v58 = vadd.f32 %v6798_v34, %v11499_v50 }
0x1013   : > { %v6801_v23 = vadd.f32 %v6799_v48, %v11499_v50  ;;  %v1194_v50 = vld [vmem:[%s15798_s4] sm:$0xff] }
0x1014   : > { %v6802_v14 = vmax.f32 %v6800_v58, 0.0 }
0x1015   : > { %v6803_v31 = vmax.f32 %v6801_v23, 0.0 }
0x1017   : > { %v10319_v44 = vpack.i.bf16 %v6803_v31, %v6802_v14 }
0x1019   : > { %10320 = vrot.lane.b32.xlu0 %v10319_v44, %s15863_s26  ;;  %10315 = vrot.lane.b32.xlu1 %v10319_v44, %s15871_s25 }
0x101d   : > { %10330 = vrot.lane.b32.xlu0 %v10319_v44, %s15873_s12  ;;  %10325 = vrot.lane.b32.xlu1 %v10319_v44, %s15864_s27  ;;  %s11014_s27 = smov 68  }
0x1021   : > { %10340 = vrot.lane.b32.xlu0 %v10319_v44, %s15877_s24  ;;  %10335 = vrot.lane.b32.xlu1 %v10319_v44, %s15874_s2  ;;  %s11015_s24 = smov 32  }
0x1025   : > { %10350 = vrot.lane.b32.xlu0 %v10319_v44, %s15878_s15  ;;  %10345 = vrot.lane.b32.xlu1 %v10319_v44, %s15865_s21 }
0x1029   : > { %10360 = vrot.lane.b32.xlu0 %v10319_v44, %s15879_s19  ;;  %10355 = vrot.lane.b32.xlu1 %v10319_v44, %s15866_s18  ;;  %s11009_s19 = smov 52  }
0x102d   : > { %10370 = vrot.lane.b32.xlu0 %v10319_v44, %s15867_s30  ;;  %10365 = vrot.lane.b32.xlu1 %v10319_v44, %s15868_s11  ;;  %s9082_s30 = sshll.u32 %s11095_s17, 7  ;;  %s11018_s17 = smov [#allocation2]  }
0x102e   : > { %s10928_s16 = sshll.u32 %s11018_s17, 4  ;;  %s10929_s16 = int_to_ptr.vmem [resolvable:$false] %s10928_s16 }
0x102f   : > { %s10930_s26 = scalar_lea.vmem %s10929_s16, 256 }
0x1031   : > { %10380 = vrot.lane.b32.xlu0 %v10319_v44, %s15869_s0  ;;  %10375 = vrot.lane.b32.xlu1 %v10319_v44, %s15870_s20 }
0x1035   : > { %1198 = vperm.xlu0 %9788, %v1194_v50   ;;  %10385 = vrot.lane.b32.xlu1 %v10319_v44, %s15872_s28 }
0x1039   : > { %1203 = vperm.xlu1 %10389, %v1195_v55  }
0x108b   : > { %v10321_v59 = vpop.permute.xlu0 %10320  ;;  %v10316_v12 = vpop.permute.xlu1 %10315 }
0x108c   : > { %v10318_v42 = vunpack.i.h.bf16 %v10316_v12  ;;  %v10317_v2 = vunpack.i.l.bf16 %v10316_v12  ;;  %v10323_v40 = vunpack.i.h.bf16 %v10321_v59  ;;  %v10322_v17 = vunpack.i.l.bf16 %v10321_v59 }
0x108e   : > { %v6810_v22 = vsel %vm569_vm0, %v10317_v2, %v10318_v42  ;;  %v9309_v8 = vpack.c.bf16 %v10318_v42, %v6803_v31  ;;  %v6817_v47 = vsel %vm1084_vm3, %v10322_v17, %v10323_v40 }
0x108f   : > { %v10331_v57 = vpop.permute.xlu0 %10330  ;;  %v10326_v29 = vpop.permute.xlu1 %10325  ;;  %v9311_v36 = vpack.c.bf16 %v6810_v22, %v6802_v14 }
0x1090   : > { %v10328_v20 = vunpack.i.h.bf16 %v10326_v29  ;;  %v10327_v9 = vunpack.i.l.bf16 %v10326_v29  ;;  %9310 = vmatprep.subr.bf16.mxu0 %v9309_v8  ;;  %v10333_v35 = vunpack.i.h.bf16 %v10331_v57  ;;  %v10332_v37 = vunpack.i.l.bf16 %v10331_v57 }
0x1091   : > { %9312 = vmatpush1.bf16.msra.mxu0 %v9311_v36 }
0x1092   : > { %v6824_v45 = vsel %vm1092_vm4, %v10327_v9, %v10328_v20  ;;  %v9313_v4 = vpack.c.bf16 %v10328_v20, %v10323_v40  ;;  %v6831_v38 = vsel %vm801_vm1, %v10332_v37, %v10333_v35  ;;  %vm7394_vm4 = vcmask 351232  }
0x1093   : > { %v10341_v28 = vpop.permute.xlu0 %10340  ;;  %v10336_v30 = vpop.permute.xlu1 %10335  ;;  %v9315_v63 = vpack.c.bf16 %v6824_v45, %v6817_v47 }
0x1094   : > { %v10338_v39 = vunpack.i.h.bf16 %v10336_v30  ;;  %v10337_v53 = vunpack.i.l.bf16 %v10336_v30  ;;  %9314 = vmatprep.subr.bf16.mxu0 %v9313_v4  ;;  %v10343_v0 = vunpack.i.h.bf16 %v10341_v28  ;;  %v10342_v13 = vunpack.i.l.bf16 %v10341_v28 }
0x1095   : > { %9316 = vmatpush1.bf16.msra.mxu0 %v9315_v63 }
0x1096   : > { %v6838_v46 = vsel %vm960_vm2, %v10337_v53, %v10338_v39  ;;  %v9317_v7 = vpack.c.bf16 %v10338_v39, %v10333_v35  ;;  %v6845_v43 = vsel %vm1116_vm5, %v10342_v13, %v10343_v0  ;;  %vm11006_vm2 = vmmov 1  }
0x1097   : > { %v10351_v11 = vpop.permute.xlu0 %10350  ;;  %v10346_v60 = vpop.permute.xlu1 %10345  ;;  %v9319_v16 = vpack.c.bf16 %v6838_v46, %v6831_v38  ;;  %vm9373_vm3 = vmpackc.low %vm7443_vm15, %vm11006_vm2  ;;  %vm7641_vm5 = vcmask 883712   ;;  %vm8164_vm2 = vcmask 1046528  }
0x1098   : > { %v10348_v32 = vunpack.i.h.bf16 %v10346_v60  ;;  %v10347_v49 = vunpack.i.l.bf16 %v10346_v60  ;;  %9318 = vmatprep.subr.bf16.mxu0 %v9317_v7  ;;  %v10353_v52 = vunpack.i.h.bf16 %v10351_v11  ;;  %v10352_v1 = vunpack.i.l.bf16 %v10351_v11 }
0x1099   : > { %9320 = vmatpush1.bf16.msra.mxu0 %v9319_v16 }
0x109a   : > { %v6852_v51 = vsel %vm1124_vm6, %v10347_v49, %v10348_v32  ;;  %v9321_v3 = vpack.c.bf16 %v10348_v32, %v10343_v0  ;;  %v6859_v34 = vsel %vm1132_vm8, %v10352_v1, %v10353_v52  ;;  %v15904_v49 = vld [vmem:[#allocation12_spill] sm:$0xff]  ;;  %vm8135_vm6 = vcmask 1040384  }
0x109b   : > { %v10361_v56 = vpop.permute.xlu0 %10360  ;;  %v10356_v15 = vpop.permute.xlu1 %10355  ;;  %v9323_v25 = vpack.c.bf16 %v6852_v51, %v6845_v43  ;;  %v15905_v1 = vld [vmem:[#allocation20_spill] sm:$0xff]  ;;  %vm8149_vm8 = vcmask 1043456  }
0x109c   : > { %v10358_v24 = vunpack.i.h.bf16 %v10356_v15  ;;  %v10357_v41 = vunpack.i.l.bf16 %v10356_v15  ;;  %9322 = vmatprep.subr.bf16.mxu0 %v9321_v3  ;;  %v10363_v48 = vunpack.i.h.bf16 %v10361_v56  ;;  %v10362_v58 = vunpack.i.l.bf16 %v10361_v56  ;;  %v15906_v51 = vld [vmem:[#allocation16_spill] sm:$0xff]  ;;  %v15907_v56 = vld [vmem:[#allocation18_spill] sm:$0xff] }
0x109d   : > { %9324 = vmatpush1.bf16.msra.mxu0 %v9323_v25  ;;  %v15908_v25 = vld [vmem:[#allocation14_spill] sm:$0xff] }
0x109e   : > { %v6866_v23 = vsel %vm1140_vm7, %v10357_v41, %v10358_v24  ;;  %v9325_v14 = vpack.c.bf16 %v10358_v24, %v10353_v52  ;;  %v6873_v2 = vsel %vm1148_vm9, %v10362_v58, %v10363_v48  ;;  %vm8140_vm7 = vcmask 1041408  }
0x109f   : > { %v10371_v31 = vpop.permute.xlu0 %10370  ;;  %v10366_v44 = vpop.permute.xlu1 %10365  ;;  %v9327_v50 = vpack.c.bf16 %v6866_v23, %v6859_v34  ;;  %v15910_v23 = vld [vmem:[#allocation17_spill] sm:$0xff]  ;;  %vm8154_vm9 = vcmask 1044480  }
0x10a0   : > { %v10368_v55 = vunpack.i.h.bf16 %v10366_v44  ;;  %v10367_v59 = vunpack.i.l.bf16 %v10366_v44  ;;  %9326 = vmatprep.subr.bf16.mxu0 %v9325_v14  ;;  %v10373_v12 = vunpack.i.h.bf16 %v10371_v31  ;;  %v10372_v42 = vunpack.i.l.bf16 %v10371_v31  ;;  %v15911_v31 = vld [vmem:[#allocation23_spill] sm:$0xff] }
0x10a1   : > { %9328 = vmatpush1.bf16.msra.mxu0 %v9327_v50  ;;  %v15912_v50 = vld [vmem:[#allocation19_spill] sm:$0xff] }
0x10a2   : > { %v6880_v40 = vsel %vm1156_vm10, %v10367_v59, %v10368_v55  ;;  %v9329_v17 = vpack.c.bf16 %v10368_v55, %v10363_v48  ;;  %v6887_v20 = vsel %vm1164_vm12, %v10372_v42, %v10373_v12  ;;  %v15909_v48 = vld [vmem:[#allocation21_spill] sm:$0xff]  ;;  %v15913_v59 = vld [vmem:[#allocation28_spill] sm:$0xff]  ;;  %vm7643_vm10 = vcmask 130048  }
0x10a3   : > { %v10381_v22 = vpop.permute.xlu0 %10380  ;;  %v10376_v8 = vpop.permute.xlu1 %10375  ;;  %v9331_v57 = vpack.c.bf16 %v6880_v40, %v6873_v2  ;;  %v15914_v42 = vld [vmem:[#allocation24_spill] sm:$0xff]  ;;  %v15915_v40 = vld [vmem:[#allocation26_spill] sm:$0xff]  ;;  %vm7647_vm12 = vcmask 719872  }
0x10a4   : > { %v10378_v29 = vunpack.i.h.bf16 %v10376_v8  ;;  %v10377_v36 = vunpack.i.l.bf16 %v10376_v8  ;;  %9330 = vmatprep.subr.bf16.mxu0 %v9329_v17  ;;  %v10383_v9 = vunpack.i.h.bf16 %v10381_v22  ;;  %v10382_v35 = vunpack.i.l.bf16 %v10381_v22  ;;  %v15916_v22 = vld [vmem:[#allocation22_spill] sm:$0xff] }
0x10a5   : > { %9332 = vmatpush1.bf16.msra.mxu0 %v9331_v57 }
0x10a6   : > { %v6894_v37 = vsel %vm1172_vm11, %v10377_v36, %v10378_v29  ;;  %v9333_v47 = vpack.c.bf16 %v10378_v29, %v10373_v12  ;;  %v6901_v63 = vsel %vm1180_vm13, %v10382_v35, %v10383_v9  ;;  %v15917_v36 = vld [vmem:[#allocation29_spill] sm:$0xff]  ;;  %vm7645_vm11 = vcmask 424960  }
0x10a7   : > { %v10386_v45 = vpop.permute.xlu1 %10385  ;;  %v9335_v4 = vpack.c.bf16 %v6894_v37, %v6887_v20  ;;  %vm7649_vm13 = vcmask 1014784  }
0x10a8   : > { %v10388_v28 = vunpack.i.h.bf16 %v10386_v45  ;;  %v10387_v30 = vunpack.i.l.bf16 %v10386_v45  ;;  %9334 = vmatprep.subr.bf16.mxu0 %v9333_v47  ;;  %v15919_v47 = vld [vmem:[#allocation27_spill] sm:$0xff] }
0x10a9   : > { %9336 = vmatpush1.bf16.msra.mxu0 %v9335_v4 }
0x10aa   : > { %v6908_v39 = vsel %vm1188_vm14, %v10387_v30, %v10388_v28  ;;  %v9337_v53 = vpack.c.bf16 %v10388_v28, %v10383_v9  ;;  %v15918_v9 = vld [vmem:[#allocation25_spill] sm:$0xff]  ;;  %vm8159_vm14 = vcmask 1045504  }
0x10ab   : > { %v9339_v38 = vpack.c.bf16 %v6908_v39, %v6901_v63  ;;  %v7374_v63 = vld [vmem:[%s15799_s5 + $0x10] sm:$0xff]  ;;  %v11005_v39 = vmov 0.0|0.0  }
0x10ac   : > { %9338 = vmatprep.subr.bf16.mxu0 %v9337_v53  ;;  %v7375_v53 = vld [vmem:[%s15799_s5 + $0x18] sm:$0xff] }
0x10ad   : > { %9340 = vmatpush1.bf16.msra.mxu0 %v9339_v38  ;;  %v9345_v38 = vpack.c.bf16 %v7375_v53, %v7374_v63 }
0x10ae   : > { %9341 = vmatprep.subr.bf16.mxu0 %v11005_v39 }
0x10b0   : > { %6976 = vmatmul.mubr.f32.vlgmr.msra.gmra.mrb[44].mxu0 %v14140_v21 }
0x10b1   : > { %6981 = vmatprep.mubr.f32.mxu0 %v15880_v26 }
0x10b4   : > { %v14290_v0 = vpop.permute.xlu0 %1198  ;;  %6982 = vmatmul.mubr.f32.gmra.mrb[46].mxu0 %v14159_v33 }
0x10b5   : > { %v14295_v13 = vadd.f32 %v11851_v5, %v14290_v0  ;;  %v14303_v7 = vadd.f32 %v12263_v61, %v14290_v0  ;;  %v14311_v33 = vadd.f32 %v11849_v6, %v14290_v0  ;;  %v15901_v61 = vld [vmem:[#allocation13_spill] sm:$0xff]  ;;  %v15902_v6 = vld [vmem:[#allocation11_spill] sm:$0xff]  ;;  %v14341_v52 = vadd.f32 %v15904_v49, %v14290_v0 }
0x10b6   : > { %v14357_v15 = vadd.f32 %v15907_v56, %v14290_v0  ;;  %v14361_v24 = vadd.f32 %v15908_v25, %v14290_v0  ;;  %v14383_v44 = vadd.f32 %v15911_v31, %v14290_v0  ;;  %v14387_v55 = vadd.f32 %v15912_v50, %v14290_v0  ;;  %v7382_v25 = vld [vmem:[%s15799_s5 + $0x50] sm:$0xff] }
0x10b7   : > { %7022 = vrot.lane.b32.xlu1 %v14295_v13, %s15871_s25  ;;  %v14403_v17 = vadd.f32 %v15915_v40, %v14290_v0  ;;  %v14407_v8 = vadd.f32 %v15916_v22, %v14290_v0  ;;  %v14429_v37 = vadd.f32 %v14244_v19, %v14290_v0  ;;  %v14433_v45 = vadd.f32 %v15919_v47, %v14290_v0  ;;  %v7386_v50 = vld [vmem:[%s15799_s5 + $0x70] sm:$0xff] }
0x10b8   : > { %v14299_v46 = vpop.permute.xlu1 %1203  ;;  %v14445_v28 = vadd.f32 %v14242_v54, %v14290_v0  ;;  %v7373_v54 = vld [vmem:[%s15799_s5 + $0x8] sm:$0xff] }
0x10b9   : > { %v14307_v21 = vadd.f32 %v12267_v62, %v14299_v46  ;;  %v14315_v5 = vadd.f32 %v11853_v27, %v14299_v46  ;;  %v14325_v62 = vadd.f32 %v15901_v61, %v14299_v46  ;;  %v14329_v16 = vadd.f32 %v15902_v6, %v14299_v46  ;;  %v15903_v27 = vld [vmem:[#allocation15_spill] sm:$0xff] }
0x10ba   : > { %v14337_v32 = vadd.f32 %v15903_v27, %v14290_v0  ;;  %v14345_v43 = vadd.f32 %v15905_v1, %v14299_v46  ;;  %v14349_v3 = vadd.f32 %v15906_v51, %v14299_v46  ;;  %v14371_v58 = vadd.f32 %v15909_v48, %v14299_v46  ;;  %v7378_v6 = vld [vmem:[%s15799_s5 + $0x30] sm:$0xff]  ;;  %v7379_v27 = vld [vmem:[%s15799_s5 + $0x38] sm:$0xff]  ;;  %v7380_v1 = vld [vmem:[%s15799_s5 + $0x40] sm:$0xff] }
0x10bb   : > { %v10395_v11 = vpack.i.bf16 %v14307_v21, %v14303_v7  ;;  %v10390_v60 = vpack.i.bf16 %v14315_v5, %v14311_v33  ;;  %v14375_v14 = vadd.f32 %v15910_v23, %v14299_v46  ;;  %v14391_v12 = vadd.f32 %v15913_v59, %v14299_v46  ;;  %v7381_v51 = vld [vmem:[%s15799_s5 + $0x48] sm:$0xff]  ;;  %v7384_v48 = vld [vmem:[%s15799_s5 + $0x60] sm:$0xff]  ;;  %v7387_v59 = vld [vmem:[%s15799_s5 + $0x78] sm:$0xff] }
0x10bc   : > { %v10405_v41 = vpack.i.bf16 %v14345_v43, %v14357_v15  ;;  %v10400_v34 = vpack.i.bf16 %v14349_v3, %v14361_v24  ;;  %v14395_v2 = vadd.f32 %v15914_v42, %v14299_v46  ;;  %v14417_v20 = vadd.f32 %v15917_v36, %v14299_v46  ;;  %v7385_v23 = vld [vmem:[%s15799_s5 + $0x68] sm:$0xff]  ;;  %v7388_v36 = vld [vmem:[%s15799_s5 + $0x80] sm:$0xff] }
0x10bd   : > { %10396 = vrot.lane.b32.xlu1 %v10395_v11, %s15871_s25  ;;  %10391 = vrot.lane.b32.xlu0 %v10390_v60, %s15871_s25  ;;  %v10415_v57 = vpack.i.bf16 %v14391_v12, %v14403_v17  ;;  %v14421_v35 = vadd.f32 %v15918_v9, %v14299_v46  ;;  %v14437_v4 = vadd.f32 %v14246_v18, %v14299_v46  ;;  %v7372_v18 = vld [vmem:[%s15799_s5] sm:$0xff]  ;;  %v7377_v60 = vld [vmem:[%s15799_s5 + $0x28] sm:$0xff] }
0x10be   : > { %v10410_v29 = vpack.i.bf16 %v14395_v2, %v14407_v8  ;;  %v14452_v30 = vadd.f32 %v14248_v10, %v14299_v46  ;;  %v9342_v10 = vpack.c.bf16 %v7373_v54, %v7372_v18  ;;  %v7376_v11 = vld [vmem:[%s15799_s5 + $0x20] sm:$0xff]  ;;  %v9351_v49 = vpack.c.bf16 %v7379_v27, %v7378_v6  ;;  %v7389_v9 = vld [vmem:[%s15799_s5 + $0x88] sm:$0xff]  ;;  %v7390_v18 = vld [vmem:[%s15799_s5 + $0x90] sm:$0xff] }
0x10bf   : > { %v10420_v19 = vpack.i.bf16 %v14437_v4, %v14445_v28  ;;  %v9348_v61 = vpack.c.bf16 %v7377_v60, %v7376_v11  ;;  %v9354_v56 = vpack.c.bf16 %v7381_v51, %v7380_v1  ;;  %v9360_v31 = vpack.c.bf16 %v7385_v23, %v7384_v48  ;;  %v7391_v54 = vld [vmem:[%s15799_s5 + $0x98] sm:$0xff]  ;;  %v7392_v1 = vld [vmem:[%s15799_s5 + $0xa0] sm:$0xff]  ;;  %v7393_v51 = vld [vmem:[%s15799_s5 + $0xa8] sm:$0x7] }
0x10c0   : > { %9343 = vmatpush1.bf16.msra.mxu0 %v9342_v10  ;;  %v9363_v42 = vpack.c.bf16 %v7387_v59, %v7386_v50  ;;  %v9369_v53 = vpack.c.bf16 %v7391_v54, %v7390_v18 }
0x10c1   : > { %7034 = vrot.lane.b32.xlu1 %v14325_v62, %s15871_s25  ;;  %7026 = vrot.lane.b32.xlu0 %v14329_v16, %s15871_s25 }
0x10c2   : > { %9344 = vmatprep.subr.bf16.mxu0 %v11005_v39 }
0x10c4   : > { %9346 = vmatpush1.bf16.msra.mxu0 %v9345_v38 }
0x10c5   : > { %7038 = vrot.lane.b32.xlu1 %v14337_v32, %s15871_s25  ;;  %7030 = vrot.lane.b32.xlu0 %v14341_v52, %s15871_s25 }
0x10c6   : > { %9347 = vmatprep.subr.bf16.mxu0 %v11005_v39 }
0x10c8   : > { %9349 = vmatpush1.bf16.msra.mxu0 %v9348_v61 }
0x10c9   : > { %10406 = vrot.lane.b32.xlu1 %v10405_v41, %s15871_s25  ;;  %10401 = vrot.lane.b32.xlu0 %v10400_v34, %s15871_s25  ;;  %v7383_v41 = vld [vmem:[%s15799_s5 + $0x58] sm:$0xff] }
0x10ca   : > { %9350 = vmatprep.subr.bf16.mxu0 %v11005_v39  ;;  %v9357_v34 = vpack.c.bf16 %v7383_v41, %v7382_v25 }
0x10cc   : > { %9352 = vmatpush1.bf16.msra.mxu0 %v9351_v49 }
0x10cd   : > { %7050 = vrot.lane.b32.xlu1 %v14371_v58, %s15871_s25  ;;  %7042 = vrot.lane.b32.xlu0 %v14375_v14, %s15871_s25 }
0x10ce   : > { %9353 = vmatprep.subr.bf16.mxu0 %v11005_v39 }
0x10d0   : > { %9355 = vmatpush1.bf16.msra.mxu0 %v9354_v56 }
0x10d1   : > { %7054 = vrot.lane.b32.xlu1 %v14383_v44, %s15871_s25  ;;  %7046 = vrot.lane.b32.xlu0 %v14387_v55, %s15871_s25 }
0x10d2   : > { %9356 = vmatprep.subr.bf16.mxu0 %v11005_v39 }
0x10d4   : > { %9358 = vmatpush1.bf16.msra.mxu0 %v9357_v34  ;;  %v9372_v34 = vpack.c.bf16 %v7393_v51, %v7392_v1 }
0x10d5   : > { %10416 = vrot.lane.b32.xlu1 %v10415_v57, %s15871_s25  ;;  %10411 = vrot.lane.b32.xlu0 %v10410_v29, %s15871_s25 }
0x10d6   : > { %9359 = vmatprep.subr.bf16.mxu0 %v11005_v39 }
0x10d8   : > { %9361 = vmatpush1.bf16.msra.mxu0 %v9360_v31 }
0x10d9   : > { %7066 = vrot.lane.b32.xlu1 %v14417_v20, %s15871_s25  ;;  %7058 = vrot.lane.b32.xlu0 %v14421_v35, %s15871_s25 }
0x10da   : > { %9362 = vmatprep.subr.bf16.mxu0 %v11005_v39 }
0x10dc   : > { %9364 = vmatpush1.bf16.msra.mxu0 %v9363_v42 }
0x10dd   : > { %7070 = vrot.lane.b32.xlu1 %v14429_v37, %s15871_s25  ;;  %7062 = vrot.lane.b32.xlu0 %v14433_v45, %s15871_s25 }
0x10de   : > { %9365 = vmatprep.subr.bf16.mxu0 %v11005_v39 }
0x10e1   : > { %10421 = vrot.lane.b32.xlu0 %v10420_v19, %s15871_s25  ;;  %v9366_v19 = vpack.c.bf16 %v7389_v9, %v7388_v36 }
0x10e3   : > { %9367 = vmatpush1.bf16.msra.mxu0 %v9366_v19 }
0x10e4   : > { %9368 = vmatprep.subr.bf16.mxu0 %v11005_v39 }
0x10e5   : > { %7074 = vrot.lane.b32.xlu0 %v14452_v30, %s15871_s25 }
0x10e7   : > { %9370 = vmatpush1.bf16.msra.mxu0 %v9369_v53 }
0x10e8   : > { %9371 = vmatprep.subr.bf16.mxu0 %v11005_v39 }
0x10eb   : > { %9374 = vmatpush1.bf16.msk.msra.mxu0 %vm9373_vm3, %v9372_v34  ;;  %vm7651_vm3 = vcmask 261120  }
0x10ec   : > { %9483 = vmatprep.subr.bf16.mxu0 %v11005_v39 }
0x1129   : > { %v7023_v57 = vpop.permute.xlu1 %7022 }
0x112f   : > { %v10392_v40 = vpop.permute.xlu0 %10391  ;;  %v10397_v47 = vpop.permute.xlu1 %10396 }
0x1130   : > { %v10394_v63 = vunpack.i.h.bf16 %v10392_v40  ;;  %v10393_v38 = vunpack.i.l.bf16 %v10392_v40  ;;  %v10398_v6 = vunpack.i.l.bf16 %v10397_v47  ;;  %v10399_v23 = vunpack.i.h.bf16 %v10397_v47 }
0x1131   : > { %v14562_v40 = vmax.f32 %v14295_v13, %v7023_v57 }
0x1132   : > { %v7084_v61 = vsel %vm569_vm0, %v10393_v38, %v7023_v57 }
0x1133   : > { %v7027_v22 = vpop.permute.xlu0 %7026  ;;  %v7035_v11 = vpop.permute.xlu1 %7034  ;;  %v14546_v31 = vmax.f32 %v14311_v33, %v7084_v61 }
0x1134   : > { %v7085_v60 = vsel %vm569_vm0, %v10394_v63, %v7027_v22  ;;  %v7087_v42 = vsel %vm569_vm0, %v10399_v23, %v7035_v11  ;;  %v14574_v63 = vmax.f32 %v14329_v16, %v7027_v22  ;;  %v14590_v22 = vmax.f32 %v14325_v62, %v7035_v11 }
0x1135   : > { %v14530_v27 = vmax.f32 %v14315_v5, %v7085_v60  ;;  %v14569_v47 = vmax.f32 %v14307_v21, %v7087_v42 }
0x1137   : > { %v7031_v29 = vpop.permute.xlu0 %7030  ;;  %v7039_v48 = vpop.permute.xlu1 %7038 }
0x1138   : > { %v7086_v50 = vsel %vm569_vm0, %v10398_v6, %v7031_v29  ;;  %v14584_v57 = vmax.f32 %v14341_v52, %v7031_v29  ;;  %v14604_v62 = vmax.f32 %v14337_v32, %v7039_v48 }
0x1139   : > { %v14565_v36 = vmax.f32 %v14303_v7, %v7086_v50 }
0x113b   : > { %v10402_v10 = vpop.permute.xlu0 %10401  ;;  %v10407_v54 = vpop.permute.xlu1 %10406  ;;  %v10430_v13 = vpack.i.bf16 %v14569_v47, %v14565_v36 }
0x113c   : > { %v10404_v19 = vunpack.i.h.bf16 %v10402_v10  ;;  %v10403_v18 = vunpack.i.l.bf16 %v10402_v10  ;;  %v10408_v10 = vunpack.i.l.bf16 %v10407_v54  ;;  %v10409_v60 = vunpack.i.h.bf16 %v10407_v54 }
0x113e   : > { %v7088_v21 = vsel %vm569_vm0, %v10403_v18, %v7039_v48 }
0x113f   : > { %v7043_v56 = vpop.permute.xlu0 %7042  ;;  %v7051_v38 = vpop.permute.xlu1 %7050  ;;  %v14593_v61 = vmax.f32 %v14361_v24, %v7088_v21 }
0x1140   : > { %v7089_v7 = vsel %vm569_vm0, %v10404_v19, %v7043_v56 }
0x1141   : > { %v14587_v53 = vmax.f32 %v14349_v3, %v7089_v7  ;;  %v7091_v3 = vsel %vm569_vm0, %v10409_v60, %v7051_v38 }
0x1142   : > { %v14611_v11 = vmax.f32 %v14345_v43, %v7091_v3 }
0x1143   : > { %v7047_v9 = vpop.permute.xlu0 %7046  ;;  %v10435_v52 = vpack.i.bf16 %v14587_v53, %v14593_v61 }
0x1144   : > { %v7090_v6 = vsel %vm569_vm0, %v10408_v10, %v7047_v9  ;;  %v14626_v34 = vmax.f32 %v14387_v55, %v7047_v9 }
0x1145   : > { %v14607_v29 = vmax.f32 %v14357_v15, %v7090_v6 }
0x1147   : > { %v10412_v16 = vpop.permute.xlu0 %10411  ;;  %v10440_v32 = vpack.i.bf16 %v14611_v11, %v14607_v29 }
0x1148   : > { %v10414_v1 = vunpack.i.h.bf16 %v10412_v16  ;;  %v10413_v51 = vunpack.i.l.bf16 %v10412_v16 }
0x114b   : > { %v7059_v24 = vpop.permute.xlu0 %7058 }
0x114c   : > { %v7093_v15 = vsel %vm569_vm0, %v10414_v1, %v7059_v24 }
0x114d   : > { %v14629_v48 = vmax.f32 %v14395_v2, %v7093_v15 }
0x114f   : > { %v7063_v50 = vpop.permute.xlu0 %7062 }
0x1150   : > { %v14661_v18 = vmax.f32 %v14433_v45, %v7063_v50 }
0x1153   : > { %v10422_v19 = vpop.permute.xlu0 %10421 }
0x1154   : > { %v10424_v16 = vunpack.i.h.bf16 %v10422_v19 }
0x1157   : > { %v7075_v21 = vpop.permute.xlu0 %7074 }
0x1183   : > { %v6977_v49 = vpop.f32.mrb[44].mxu0 }
0x1184   : > { %v14539_v25 = vadd.f32 %v6977_v49, %v14290_v0  ;;  %v6979_v41 = vpop.f32.mrb[45].mxu0  ;;  %v7055_v49 = vpop.permute.xlu1 %7054 }
0x1185   : > { %v14542_v5 = vadd.f32 %v6979_v41, %v14290_v0  ;;  %v10425_v0 = vpack.i.bf16 %v14530_v27, %v14546_v31  ;;  %v14616_v41 = vmax.f32 %v14375_v14, %v7043_v56  ;;  %v7092_v43 = vsel %vm569_vm0, %v10413_v51, %v7055_v49 }
0x1186   : > { %7076 = vrot.lane.b32.xlu1 %v14539_v25, %s15871_s25  ;;  %v14632_v14 = vmax.f32 %v14371_v58, %v7051_v38  ;;  %v14635_v23 = vmax.f32 %v14407_v8, %v7092_v43  ;;  %v14644_v2 = vmax.f32 %v14383_v44, %v7055_v49  ;;  %v14651_v8 = vmax.f32 %v14421_v35, %v7059_v24 }
0x1187   : > { %v14551_v59 = vpop.f32.mrb[46].mxu0  ;;  %7078 = vrot.lane.b32.xlu0 %v14542_v5, %s15871_s25 }
0x1188   : > { %v14559_v33 = vpop.f32.mrb[47].mxu0  ;;  %v10417_v56 = vpop.permute.xlu1 %10416  ;;  %v10445_v55 = vpack.i.bf16 %v14629_v48, %v14635_v23  ;;  %v14665_v54 = vadd.f32 %v14551_v59, %v14299_v46 }
0x1189   : > { %v10419_v44 = vunpack.i.h.bf16 %v10417_v56 }
0x118a   : > { %10426 = vrot.lane.b32.xlu1 %v10425_v0, %s15873_s12  ;;  %v10418_v0 = vunpack.i.l.bf16 %v10417_v56 }
0x118b   : > { %7198 = vrot.lane.b32.xlu0 %v14562_v40, %s15873_s12 }
0x118c   : > { %v7094_v58 = vsel %vm569_vm0, %v10418_v0, %v7063_v50  ;;  %v7067_v9 = vpop.permute.xlu1 %7066 }
0x118d   : > { %v14654_v42 = vmax.f32 %v14403_v17, %v7094_v58  ;;  %v7095_v35 = vsel %vm569_vm0, %v10419_v44, %v7067_v9  ;;  %v10423_v17 = vunpack.i.l.bf16 %v10422_v19  ;;  %v14685_v10 = vmax.f32 %v14417_v20, %v7067_v9 }
0x118e   : > { %7202 = vrot.lane.b32.xlu1 %v14574_v63, %s15873_s12  ;;  %v14677_v45 = vmax.f32 %v14391_v12, %v7095_v35  ;;  %v7097_v12 = vsel %vm569_vm0, %v10424_v16, %v7075_v21  ;;  %v14706_v20 = vmax.f32 %v14452_v30, %v7075_v21 }
0x118f   : > { %10431 = vrot.lane.b32.xlu0 %v10430_v13, %s15873_s12  ;;  %v14674_v13 = vadd.f32 %v14559_v33, %v14299_v46  ;;  %v14699_v38 = vmax.f32 %v14437_v4, %v7097_v12 }
0x1190   : > { %v7071_v7 = vpop.permute.xlu1 %7070 }
0x1191   : > { %v7096_v59 = vsel %vm569_vm0, %v10423_v17, %v7071_v7  ;;  %v14696_v33 = vmax.f32 %v14429_v37, %v7071_v7 }
0x1192   : > { %7206 = vrot.lane.b32.xlu1 %v14584_v57, %s15873_s12  ;;  %v14688_v46 = vmax.f32 %v14445_v28, %v7096_v59 }
0x1193   : > { %7210 = vrot.lane.b32.xlu0 %v14590_v22, %s15873_s12 }
0x1196   : > { %10436 = vrot.lane.b32.xlu1 %v10435_v52, %s15873_s12 }
0x1197   : > { %7214 = vrot.lane.b32.xlu0 %v14604_v62, %s15873_s12 }
0x119a   : > { %7218 = vrot.lane.b32.xlu1 %v14616_v41, %s15873_s12 }
0x119b   : > { %10441 = vrot.lane.b32.xlu0 %v10440_v32, %s15873_s12 }
0x119e   : > { %7222 = vrot.lane.b32.xlu1 %v14626_v34, %s15873_s12 }
0x119f   : > { %7226 = vrot.lane.b32.xlu0 %v14632_v14, %s15873_s12 }
0x11a2   : > { %10446 = vrot.lane.b32.xlu1 %v10445_v55, %s15873_s12 }
0x11a3   : > { %7230 = vrot.lane.b32.xlu0 %v14644_v2, %s15873_s12 }
0x11a6   : > { %7234 = vrot.lane.b32.xlu1 %v14651_v8, %s15873_s12 }
0x11a7   : > { %7236 = vrot.lane.b32.xlu0 %v14654_v42, %s15873_s12 }
0x11aa   : > { %7238 = vrot.lane.b32.xlu1 %v14661_v18, %s15873_s12 }
0x11ab   : > { %7080 = vrot.lane.b32.xlu0 %v14665_v54, %s15871_s25 }
0x11ae   : > { %7082 = vrot.lane.b32.xlu1 %v14674_v13, %s15871_s25  ;;  %s11008_s25 = smov 108  }
0x11af   : > { %7240 = vrot.lane.b32.xlu0 %v14677_v45, %s15873_s12 }
0x11b2   : > { %7242 = vrot.lane.b32.xlu1 %v14685_v10, %s15873_s12 }
0x11b3   : > { %7244 = vrot.lane.b32.xlu0 %v14688_v46, %s15873_s12 }
0x11b6   : > { %7246 = vrot.lane.b32.xlu1 %v14696_v33, %s15873_s12 }
0x11b7   : > { %7248 = vrot.lane.b32.xlu0 %v14699_v38, %s15873_s12 }
0x11ba   : > { %7250 = vrot.lane.b32.xlu1 %v14706_v20, %s15873_s12 }
0x11f8   : > { %v7077_v28 = vpop.permute.xlu1 %7076 }
0x11f9   : > { %v7079_v60 = vpop.permute.xlu0 %7078 }
0x11fa   : > { %v7098_v37 = vsel %vm569_vm0, %v7077_v28, %v7079_v60  ;;  %v14712_v6 = vmax.f32 %v14542_v5, %v7079_v60 }
0x11fb   : > { %v14715_v4 = vmax.f32 %v14539_v25, %v7098_v37 }
0x11fc   : > { %7254 = vrot.lane.b32.xlu1 %v14712_v6, %s15873_s12  ;;  %v10427_v52 = vpop.permute.xlu1 %10426 }
0x11fd   : > { %v10428_v3 = vunpack.i.l.bf16 %v10427_v52  ;;  %v7199_v30 = vpop.permute.xlu0 %7198  ;;  %7252 = vrot.lane.b32.xlu0 %v14715_v4, %s15873_s12  ;;  %v10429_v49 = vunpack.i.h.bf16 %v10427_v52 }
0x11fe   : > { %v7309_v24 = vmax.f32 %v14562_v40, %v7199_v30 }
0x11ff   : > { %v7260_v1 = vsel %vm801_vm1, %v10428_v3, %v7199_v30 }
0x1200   : > { %v7308_v5 = vmax.f32 %v14546_v31, %v7260_v1  ;;  %v7341_v51 = vmax.f32 %v7309_v24, 0.0  ;;  %v7203_v25 = vpop.permute.xlu1 %7202 }
0x1201   : > { %v7261_v32 = vsel %vm801_vm1, %v10429_v49, %v7203_v25  ;;  %v7311_v15 = vmax.f32 %v14574_v63, %v7203_v25  ;;  %v10432_v43 = vpop.permute.xlu0 %10431 }
0x1202   : > { %v7340_v56 = vmax.f32 %v7308_v5, 0.0  ;;  %v7310_v50 = vmax.f32 %v14530_v27, %v7261_v32  ;;  %v10433_v0 = vunpack.i.l.bf16 %v10432_v43  ;;  %9062 = vmatprep.mubr.msk.f32.mxu0 %vm7394_vm4, %v7341_v51  ;;  %v10434_v58 = vunpack.i.h.bf16 %v10432_v43 }
0x1203   : > { %v7343_v40 = vmax.f32 %v7311_v15, 0.0 }
0x1204   : > { %v7207_v55 = vpop.permute.xlu1 %7206  ;;  %7512 = vmatmul.mubr.f32.vlgmr.msra.gmra.mrb[48].mxu0 %v7340_v56  ;;  %v7342_v44 = vmax.f32 %v7310_v50, 0.0 }
0x1205   : > { %v7262_v9 = vsel %vm801_vm1, %v10433_v0, %v7207_v55  ;;  %v7313_v31 = vmax.f32 %v14584_v57, %v7207_v55  ;;  %v7211_v19 = vpop.permute.xlu0 %7210  ;;  %9063 = vmatprep.mubr.msk.f32.mxu0 %vm7394_vm4, %v7343_v40 }
0x1206   : > { %v7312_v63 = vmax.f32 %v14565_v36, %v7262_v9  ;;  %v7263_v27 = vsel %vm801_vm1, %v10434_v58, %v7211_v19  ;;  %v7315_v17 = vmax.f32 %v14590_v22, %v7211_v19 }
0x1207   : > { %v7345_v35 = vmax.f32 %v7313_v31, 0.0  ;;  %v7314_v57 = vmax.f32 %v14569_v47, %v7263_v27 }
0x1208   : > { %v10437_v7 = vpop.permute.xlu1 %10436  ;;  %7517 = vmatmul.mubr.f32.gmra.mrb[50].mxu0 %v7342_v44  ;;  %v7344_v16 = vmax.f32 %v7312_v63, 0.0  ;;  %v7347_v12 = vmax.f32 %v7315_v17, 0.0 }
0x1209   : > { %v10438_v59 = vunpack.i.l.bf16 %v10437_v7  ;;  %v7215_v21 = vpop.permute.xlu0 %7214  ;;  %9064 = vmatprep.mubr.msk.f32.mxu0 %vm7394_vm4, %v7345_v35  ;;  %v10439_v37 = vunpack.i.h.bf16 %v10437_v7  ;;  %v7346_v22 = vmax.f32 %v7314_v57, 0.0 }
0x120a   : > { %v7317_v60 = vmax.f32 %v14604_v62, %v7215_v21 }
0x120b   : > { %v7264_v28 = vsel %vm801_vm1, %v10438_v59, %v7215_v21 }
0x120c   : > { %v7219_v36 = vpop.permute.xlu1 %7218  ;;  %7522 = vmatmul.mubr.f32.gmra.mrb[52].mxu0 %v7344_v16  ;;  %v7316_v3 = vmax.f32 %v14593_v61, %v7264_v28  ;;  %v7349_v30 = vmax.f32 %v7317_v60, 0.0 }
0x120d   : > { %v10442_v52 = vpop.permute.xlu0 %10441  ;;  %9065 = vmatprep.mubr.msk.f32.mxu0 %vm7394_vm4, %v7347_v12  ;;  %v7265_v24 = vsel %vm801_vm1, %v10439_v37, %v7219_v36  ;;  %v7319_v49 = vmax.f32 %v14616_v41, %v7219_v36 }
0x120e   : > { %v10443_v47 = vunpack.i.l.bf16 %v10442_v52  ;;  %v7348_v62 = vmax.f32 %v7316_v3, 0.0  ;;  %v7318_v51 = vmax.f32 %v14587_v53, %v7265_v24  ;;  %v10444_v43 = vunpack.i.h.bf16 %v10442_v52 }
0x120f   : > { %v7351_v25 = vmax.f32 %v7319_v49, 0.0 }
0x1210   : > { %v7223_v1 = vpop.permute.xlu1 %7222  ;;  %7527 = vmatmul.mubr.f32.gmra.mrb[54].mxu0 %v7346_v22  ;;  %v7350_v41 = vmax.f32 %v7318_v51, 0.0 }
0x1211   : > { %v7227_v5 = vpop.permute.xlu0 %7226  ;;  %9066 = vmatprep.mubr.msk.f32.mxu0 %vm7394_vm4, %v7349_v30  ;;  %v7266_v32 = vsel %vm801_vm1, %v10443_v47, %v7223_v1  ;;  %v7321_v15 = vmax.f32 %v14626_v34, %v7223_v1 }
0x1212   : > { %v7320_v50 = vmax.f32 %v14607_v29, %v7266_v32  ;;  %v7267_v40 = vsel %vm801_vm1, %v10444_v43, %v7227_v5  ;;  %v7323_v55 = vmax.f32 %v14632_v14, %v7227_v5 }
0x1213   : > { %v7353_v0 = vmax.f32 %v7321_v15, 0.0  ;;  %v7322_v31 = vmax.f32 %v14611_v11, %v7267_v40 }
0x1214   : > { %v10447_v61 = vpop.permute.xlu1 %10446  ;;  %7532 = vmatmul.mubr.f32.gmra.mrb[56].mxu0 %v7348_v62  ;;  %v7352_v34 = vmax.f32 %v7320_v50, 0.0  ;;  %v7355_v19 = vmax.f32 %v7323_v55, 0.0 }
0x1215   : > { %v7231_v56 = vpop.permute.xlu0 %7230  ;;  %9067 = vmatprep.mubr.msk.f32.mxu0 %vm7394_vm4, %v7351_v25  ;;  %v10448_v53 = vunpack.i.l.bf16 %v10447_v61  ;;  %v10449_v35 = vunpack.i.h.bf16 %v10447_v61  ;;  %v7354_v14 = vmax.f32 %v7322_v31, 0.0 }
0x1216   : > { %v7325_v63 = vmax.f32 %v14644_v2, %v7231_v56 }
0x1217   : > { %v7268_v44 = vsel %vm801_vm1, %v10448_v53, %v7231_v56 }
0x1218   : > { %v7235_v58 = vpop.permute.xlu1 %7234  ;;  %7537 = vmatmul.mubr.f32.gmra.mrb[58].mxu0 %v7350_v41  ;;  %v7324_v17 = vmax.f32 %v14635_v23, %v7268_v44  ;;  %v7357_v7 = vmax.f32 %v7325_v63, 0.0 }
0x1219   : > { %v7237_v9 = vpop.permute.xlu0 %7236  ;;  %9068 = vmatprep.mubr.msk.f32.mxu0 %vm7394_vm4, %v7353_v0  ;;  %v7269_v59 = vsel %vm801_vm1, %v10449_v35, %v7235_v58  ;;  %v7327_v21 = vmax.f32 %v14651_v8, %v7235_v58 }
0x121a   : > { %v7356_v57 = vmax.f32 %v7324_v17, 0.0  ;;  %v7326_v12 = vmax.f32 %v14629_v48, %v7269_v59 }
0x121b   : > { %v7359_v23 = vmax.f32 %v7327_v21, 0.0 }
0x121c   : > { %v7239_v29 = vpop.permute.xlu1 %7238  ;;  %7542 = vmatmul.mubr.f32.gmra.mrb[60].mxu0 %v7352_v34 }
0x121d   : > { %v7081_v27 = vpop.permute.xlu0 %7080  ;;  %9069 = vmatprep.mubr.msk.f32.mxu0 %vm7394_vm4, %v7355_v19  ;;  %v7270_v36 = vsel %vm801_vm1, %v7237_v9, %v7239_v29  ;;  %v7329_v37 = vmax.f32 %v14661_v18, %v7239_v29 }
0x121e   : > { %v7328_v52 = vmax.f32 %v14654_v42, %v7270_v36 }
0x121f   : > { %v7361_v48 = vmax.f32 %v7329_v37, 0.0 }
0x1220   : > { %v7083_v11 = vpop.permute.xlu1 %7082  ;;  %7547 = vmatmul.mubr.f32.gmra.mrb[62].mxu0 %v7354_v14  ;;  %v7360_v18 = vmax.f32 %v7328_v52, 0.0 }
0x1221   : > { %v7099_v16 = vsel %vm569_vm0, %v7081_v27, %v7083_v11  ;;  %v7163_v2 = vmax.f32 %v14674_v13, %v7083_v11  ;;  %9070 = vmatprep.mubr.msk.f32.mxu0 %vm7394_vm4, %v7357_v7  ;;  %v7241_v60 = vpop.permute.xlu0 %7240  ;;  %v7358_v13 = vmax.f32 %v7326_v12, 0.0  ;;  %vm7637_vm0 = vcmask 293888  }
0x1222   : > { %v7162_v28 = vmax.f32 %v14665_v54, %v7099_v16 }
0x1223   : > { %7258 = vrot.lane.b32.xlu1 %v7163_v2, %s15873_s12 }
0x1224   : > { %7256 = vrot.lane.b32.xlu0 %v7162_v28, %s15873_s12  ;;  %v7243_v8 = vpop.permute.xlu1 %7242  ;;  %7552 = vmatmul.mubr.f32.gmra.mrb[64].mxu0 %v7356_v57  ;;  %s11007_s12 = smov 16  }
0x1225   : > { %9071 = vmatprep.mubr.msk.f32.mxu0 %vm7394_vm4, %v7359_v23  ;;  %v7271_v54 = vsel %vm801_vm1, %v7241_v60, %v7243_v8  ;;  %v7331_v22 = vmax.f32 %v14685_v10, %v7243_v8  ;;  %v7245_v3 = vpop.permute.xlu0 %7244 }
0x1226   : > { %v7330_v24 = vmax.f32 %v14677_v45, %v7271_v54 }
0x1227   : > { %v7363_v49 = vmax.f32 %v7331_v22, 0.0 }
0x1228   : > { %v7247_v30 = vpop.permute.xlu1 %7246  ;;  %7557 = vmatmul.mubr.f32.gmra.mrb[66].mxu0 %v7358_v13  ;;  %v7362_v42 = vmax.f32 %v7330_v24, 0.0 }
0x1229   : > { %9072 = vmatprep.mubr.msk.f32.mxu0 %vm7394_vm4, %v7361_v48  ;;  %v7272_v47 = vsel %vm801_vm1, %v7245_v3, %v7247_v30  ;;  %v7333_v1 = vmax.f32 %v14696_v33, %v7247_v30  ;;  %v7249_v62 = vpop.permute.xlu0 %7248 }
0x122a   : > { %v7332_v10 = vmax.f32 %v14688_v46, %v7272_v47 }
0x122b   : > { %v7365_v51 = vmax.f32 %v7333_v1, 0.0 }
0x122c   : > { %v7251_v5 = vpop.permute.xlu1 %7250  ;;  %7562 = vmatmul.mubr.f32.gmra.mrb[68].mxu0 %v7360_v18  ;;  %v7364_v45 = vmax.f32 %v7332_v10, 0.0 }
0x122d   : > { %9073 = vmatprep.mubr.msk.f32.mxu0 %vm7394_vm4, %v7363_v49  ;;  %v7273_v25 = vsel %vm801_vm1, %v7249_v62, %v7251_v5  ;;  %v7335_v32 = vmax.f32 %v14706_v20, %v7251_v5 }
0x122e   : > { %v7334_v15 = vmax.f32 %v14699_v38, %v7273_v25 }
0x122f   : > { %v7367_v33 = vmax.f32 %v7335_v32, 0.0 }
0x1230   : > { %7567 = vmatmul.mubr.f32.gmra.mrb[70].mxu0 %v7362_v42  ;;  %v7366_v61 = vmax.f32 %v7334_v15, 0.0 }
0x1231   : > { %9074 = vmatprep.mubr.msk.f32.mxu0 %vm7394_vm4, %v7365_v51 }
0x1234   : > { %7572 = vmatmul.mubr.f32.gmra.mrb[72].mxu0 %v7364_v45 }
0x1235   : > { %9075 = vmatprep.mubr.msk.f32.mxu0 %vm7394_vm4, %v7367_v33 }
0x1238   : > { %7577 = vmatmul.mubr.f32.gmra.mrb[74].mxu0 %v7366_v61 }
0x126e   : > { %v7255_v43 = vpop.permute.xlu1 %7254 }
0x126f   : > { %v7337_v46 = vmax.f32 %v14712_v6, %v7255_v43  ;;  %v7253_v56 = vpop.permute.xlu0 %7252 }
0x1270   : > { %v7274_v41 = vsel %vm801_vm1, %v7253_v56, %v7255_v43 }
0x1271   : > { %v7369_v50 = vmax.f32 %v7337_v46, 0.0  ;;  %v7336_v20 = vmax.f32 %v14715_v4, %v7274_v41 }
0x1273   : > { %v7368_v0 = vmax.f32 %v7336_v20, 0.0  ;;  %9076 = vmatprep.mubr.msk.f32.mxu0 %vm7394_vm4, %v7369_v50 }
0x1275   : > { %7582 = vmatmul.mubr.f32.gmra.mrb[76].mxu0 %v7368_v0 }
0x1295   : > { %v7259_v38 = vpop.permute.xlu1 %7258 }
0x1296   : > { %v7339_v40 = vmax.f32 %v7163_v2, %v7259_v38  ;;  %v7257_v55 = vpop.permute.xlu0 %7256 }
0x1297   : > { %v7275_v53 = vsel %vm801_vm1, %v7257_v55, %v7259_v38  ;;  %vm7639_vm1 = vcmask 588800  }
0x1298   : > { %v7371_v58 = vmax.f32 %v7339_v40, 0.0  ;;  %v7338_v9 = vmax.f32 %v7162_v28, %v7275_v53 }
0x129a   : > { %v7370_v34 = vmax.f32 %v7338_v9, 0.0  ;;  %9077 = vmatprep.mubr.msk.f32.mxu0 %vm7394_vm4, %v7371_v58  ;;  %vm7653_vm4 = vcmask 556032  }
0x129c   : > { %7587 = vmatmul.mubr.f32.gmra.mrb[78].mxu0 %v7370_v34 }
0x12d7   : > { %v14788_v6 = vpop.f32.mrb[48].mxu0 }
0x12d8   : > { %v7515_v31 = vpop.f32.mrb[49].mxu0  ;;  %v7605_v1 = vrot.slane %v14788_v6, 4  ;;  %v7601_v5 = vrot.slane %v14788_v6, 3  ;;  %v7609_v62 = vrot.slane %v14788_v6, 5  ;;  %v7613_v51 = vrot.slane %v14788_v6, 6 }
0x12d9   : > { %v7593_v25 = vrot.slane %v14788_v6, 1  ;;  %v7597_v32 = vrot.slane %v14788_v6, 2  ;;  %v7617_v41 = vrot.slane %v14788_v6, 7 }
0x12db   : > { %v14790_v19 = vpop.f32.mrb[50].mxu0 }
0x12dc   : > { %v7520_v4 = vpop.f32.mrb[51].mxu0  ;;  %v7625_v34 = vrot.slane %v14790_v19, 1 }
0x12df   : > { %v14792_v44 = vpop.f32.mrb[52].mxu0 }
0x12e0   : > { %v7525_v63 = vpop.f32.mrb[53].mxu0  ;;  %v7672_v27 = vrot.slane %v14792_v44, 4  ;;  %v7668_v14 = vrot.slane %v14792_v44, 3  ;;  %v7676_v7 = vrot.slane %v14792_v44, 5  ;;  %v7680_v59 = vrot.slane %v14792_v44, 6 }
0x12e1   : > { %v7660_v21 = vrot.slane %v14792_v44, 1  ;;  %v7664_v11 = vrot.slane %v14792_v44, 2  ;;  %v7684_v36 = vrot.slane %v14792_v44, 7 }
0x12e3   : > { %v14794_v29 = vpop.f32.mrb[54].mxu0 }
0x12e4   : > { %v7530_v35 = vpop.f32.mrb[55].mxu0  ;;  %v7692_v18 = vrot.slane %v14794_v29, 1 }
0x12e7   : > { %v14798_v17 = vpop.f32.mrb[56].mxu0 }
0x12e8   : > { %v7535_v16 = vpop.f32.mrb[57].mxu0  ;;  %v7728_v2 = vrot.slane %v14798_v17, 4  ;;  %v7724_v57 = vrot.slane %v14798_v17, 3  ;;  %v7732_v12 = vrot.slane %v14798_v17, 5  ;;  %v7736_v28 = vrot.slane %v14798_v17, 6 }
0x12e9   : > { %v7716_v60 = vrot.slane %v14798_v17, 1  ;;  %v7720_v23 = vrot.slane %v14798_v17, 2  ;;  %v7740_v37 = vrot.slane %v14798_v17, 7 }
0x12ea   : > { %v10455_v8 = vpack.i.bf16 %v7728_v2, %v7672_v27  ;;  %v10450_v13 = vpack.i.bf16 %v7724_v57, %v7668_v14  ;;  %v10460_v52 = vpack.i.bf16 %v7732_v12, %v7676_v7  ;;  %v10480_v48 = vpack.i.bf16 %v7736_v28, %v7680_v59 }
0x12eb   : > { %v14812_v54 = vpop.f32.mrb[58].mxu0  ;;  %v10475_v22 = vpack.i.bf16 %v7716_v60, %v7660_v21  ;;  %v10490_v3 = vpack.i.bf16 %v7720_v23, %v7664_v11  ;;  %v10495_v30 = vpack.i.bf16 %v7740_v37, %v7684_v36 }
0x12ec   : > { %v10555_v24 = vpack.i.bf16 %v14812_v54, %v14794_v29  ;;  %v7748_v49 = vrot.slane %v14812_v54, 1  ;;  %10456 = vrot.lane.b32.xlu1 %v10455_v8, %s11007_s12  ;;  %10451 = vrot.lane.b32.xlu0 %v10450_v13, %s11008_s25  ;;  %v7540_v47 = vpop.f32.mrb[59].mxu0 }
0x12ee   : > { %v14822_v42 = vpack.i.bf16 %v7748_v49, %v7692_v18 }
0x12ef   : > { %v14824_v10 = vpop.f32.mrb[60].mxu0 }
0x12f0   : > { %10461 = vrot.lane.b32.xlu0 %v10460_v52, %s11009_s19  ;;  %v7545_v45 = vpop.f32.mrb[61].mxu0  ;;  %v7784_v15 = vrot.slane %v14824_v10, 4  ;;  %v7780_v33 = vrot.slane %v14824_v10, 3  ;;  %v7788_v61 = vrot.slane %v14824_v10, 5  ;;  %v7792_v43 = vrot.slane %v14824_v10, 6 }
0x12f1   : > { %v7772_v46 = vrot.slane %v14824_v10, 1  ;;  %v7776_v56 = vrot.slane %v14824_v10, 2  ;;  %v7796_v50 = vrot.slane %v14824_v10, 7 }
0x12f2   : > { %v10470_v20 = vpack.i.bf16 %v7784_v15, %v7605_v1  ;;  %v10465_v0 = vpack.i.bf16 %v7780_v33, %v7601_v5  ;;  %v10485_v38 = vpack.i.bf16 %v7788_v61, %v7609_v62  ;;  %v10515_v40 = vpack.i.bf16 %v7792_v43, %v7613_v51 }
0x12f3   : > { %v14839_v55 = vpop.f32.mrb[62].mxu0  ;;  %v10510_v53 = vpack.i.bf16 %v7772_v46, %v7593_v25  ;;  %v10525_v58 = vpack.i.bf16 %v7776_v56, %v7597_v32  ;;  %v10530_v9 = vpack.i.bf16 %v7796_v50, %v7617_v41  ;;  %v8170_v56 = vld [vmem:[%s15800_s6 + $0x8] sm:$0xff]  ;;  %v8172_v41 = vld [vmem:[%s15800_s6 + $0x18] sm:$0xff]  ;;  %v8169_v50 = vld [vmem:[%s15800_s6] sm:$0xff] }
0x12f4   : > { %v10600_v31 = vpack.i.bf16 %v14839_v55, %v14790_v19  ;;  %v7804_v4 = vrot.slane %v14839_v55, 1  ;;  %10471 = vrot.lane.b32.xlu0 %v10470_v20, %s11007_s12  ;;  %10466 = vrot.lane.b32.xlu1 %v10465_v0, %s11008_s25  ;;  %v7550_v63 = vpop.f32.mrb[63].mxu0  ;;  %v9375_v20 = vpack.c.bf16 %v8172_v41, %v8170_v56  ;;  %v8171_v0 = vld [vmem:[%s15800_s6 + $0x10] sm:$0xff]  ;;  %v8197_v41 = vld [vmem:[%s15800_s6 + $0xe0] sm:$0xff] }
0x12f5   : > { %v8180_v63 = vld [vmem:[%s15800_s6 + $0x58] sm:$0xff] }
0x12f6   : > { %v14847_v35 = vpack.i.bf16 %v7804_v4, %v7625_v34  ;;  %9376 = vmatprep.subr.bf16.mxu1 %v9375_v20  ;;  %v8178_v4 = vld [vmem:[%s15800_s6 + $0x48] sm:$0xff] }
0x12f7   : > { %v14849_v27 = vpop.f32.mrb[64].mxu0  ;;  %v8202_v20 = vld [vmem:[%s15800_s6 + $0x108] sm:$0xff] }
0x12f8   : > { %10481 = vrot.lane.b32.xlu0 %v10480_v48, %s11010_s22  ;;  %10476 = vrot.lane.b32.xlu1 %v10475_v22, %s11011_s29  ;;  %v7555_v14 = vpop.f32.mrb[65].mxu0  ;;  %v7840_v21 = vrot.slane %v14849_v27, 4  ;;  %v7836_v11 = vrot.slane %v14849_v27, 3  ;;  %v7844_v2 = vrot.slane %v14849_v27, 5  ;;  %v7828_v57 = vrot.slane %v14849_v27, 1 }
0x12f9   : > { %v7848_v12 = vrot.slane %v14849_v27, 6  ;;  %v7832_v28 = vrot.slane %v14849_v27, 2  ;;  %v7852_v48 = vrot.slane %v14849_v27, 7 }
0x12fb   : > { %v14853_v7 = vpop.f32.mrb[66].mxu0 }
0x12fc   : > { %10491 = vrot.lane.b32.xlu0 %v10490_v3, %s11012_s10  ;;  %10486 = vrot.lane.b32.xlu1 %v10485_v38, %s11009_s19  ;;  %v7560_v59 = vpop.f32.mrb[67].mxu0  ;;  %v7860_v51 = vrot.slane %v14853_v7, 1  ;;  %v8174_v38 = vld [vmem:[%s15800_s6 + $0x28] sm:$0xff] }
0x12fd   : > { %v8177_v59 = vld [vmem:[%s15800_s6 + $0x40] sm:$0xff] }
0x12ff   : > { %v14859_v16 = vpop.f32.mrb[68].mxu0 }
0x1300   : > { %10496 = vrot.lane.b32.xlu1 %v10495_v30, %s11013_s13  ;;  %v7565_v60 = vpop.f32.mrb[69].mxu0  ;;  %v7896_v23 = vrot.slane %v14859_v16, 4  ;;  %v7892_v36 = vrot.slane %v14859_v16, 3  ;;  %v7900_v37 = vrot.slane %v14859_v16, 5  ;;  %v7884_v8 = vrot.slane %v14859_v16, 1 }
0x1301   : > { %v7904_v13 = vrot.slane %v14859_v16, 6  ;;  %v7888_v52 = vrot.slane %v14859_v16, 2  ;;  %v7908_v22 = vrot.slane %v14859_v16, 7  ;;  %v8181_v60 = vld [vmem:[%s15800_s6 + $0x60] sm:$0xff] }
0x1302   : > { %v10505_v3 = vpack.i.bf16 %v7896_v23, %v7840_v21  ;;  %v10500_v18 = vpack.i.bf16 %v7892_v36, %v7836_v11  ;;  %v10520_v30 = vpack.i.bf16 %v7900_v37, %v7844_v2  ;;  %v10535_v49 = vpack.i.bf16 %v7884_v8, %v7828_v57  ;;  %v8179_v21 = vld [vmem:[%s15800_s6 + $0x50] sm:$0xff]  ;;  %v8182_v2 = vld [vmem:[%s15800_s6 + $0x68] sm:$0xff]  ;;  %v8184_v57 = vld [vmem:[%s15800_s6 + $0x78] sm:$0xff] }
0x1303   : > { %v14874_v47 = vpop.f32.mrb[70].mxu0  ;;  %v10540_v1 = vpack.i.bf16 %v7904_v13, %v7848_v12  ;;  %v10545_v5 = vpack.i.bf16 %v7888_v52, %v7832_v28  ;;  %v10550_v62 = vpack.i.bf16 %v7908_v22, %v7852_v48  ;;  %v9383_v11 = vpack.c.bf16 %v8180_v63, %v8178_v4  ;;  %v8183_v23 = vld [vmem:[%s15800_s6 + $0x70] sm:$0xff]  ;;  %v8186_v36 = vld [vmem:[%s15800_s6 + $0x88] sm:$0xff]  ;;  %v8188_v37 = vld [vmem:[%s15800_s6 + $0x98] sm:$0xff] }
0x1304   : > { %v10610_v25 = vpack.i.bf16 %v14874_v47, %v14853_v7  ;;  %v7916_v32 = vrot.slane %v14874_v47, 1  ;;  %10506 = vrot.lane.b32.xlu1 %v10505_v3, %s11007_s12  ;;  %10501 = vrot.lane.b32.xlu0 %v10500_v18, %s11008_s25  ;;  %v7570_v45 = vpop.f32.mrb[71].mxu0  ;;  %v9385_v12 = vpack.c.bf16 %v8179_v21, %v8177_v59  ;;  %v9387_v28 = vpack.c.bf16 %v8184_v57, %v8182_v2  ;;  %v8185_v13 = vld [vmem:[%s15800_s6 + $0x80] sm:$0xff]  ;;  %v8187_v52 = vld [vmem:[%s15800_s6 + $0x90] sm:$0xff] }
0x1305   : > { %v9391_v8 = vpack.c.bf16 %v8188_v37, %v8186_v36  ;;  %v8190_v48 = vld [vmem:[%s15800_s6 + $0xa8] sm:$0xff]  ;;  %v8192_v22 = vld [vmem:[%s15800_s6 + $0xb8] sm:$0xff]  ;;  %v8189_v18 = vld [vmem:[%s15800_s6 + $0xa0] sm:$0xff] }
0x1306   : > { %v14882_v15 = vpack.i.bf16 %v7916_v32, %v7860_v51  ;;  %v9395_v3 = vpack.c.bf16 %v8192_v22, %v8190_v48  ;;  %v8193_v51 = vld [vmem:[%s15800_s6 + $0xc0] sm:$0xff]  ;;  %v8195_v32 = vld [vmem:[%s15800_s6 + $0xd0] sm:$0xff]  ;;  %v8198_v45 = vld [vmem:[%s15800_s6 + $0xe8] sm:$0xff] }
0x1307   : > { %v14884_v33 = vpop.f32.mrb[72].mxu0  ;;  %v8207_v59 = vld [vmem:[%s15800_s6 + $0x130] sm:$0xff]  ;;  %v8210_v21 = vld [vmem:[%s15800_s6 + $0x148] sm:$0xff]  ;;  %v8220_v48 = vld [vmem:[%s15800_s6 + $0x198] sm:$0xff] }
0x1308   : > { %10516 = vrot.lane.b32.xlu1 %v10515_v40, %s11010_s22  ;;  %10511 = vrot.lane.b32.xlu0 %v10510_v53, %s11011_s29  ;;  %v7575_v61 = vpop.f32.mrb[73].mxu0  ;;  %v9377_v40 = vpack.c.bf16 %v8171_v0, %v8169_v50  ;;  %v8176_v53 = vld [vmem:[%s15800_s6 + $0x38] sm:$0xff]  ;;  %v8199_v50 = vld [vmem:[%s15800_s6 + $0xf0] sm:$0xff] }
0x1309   : > { %v9379_v34 = vpack.c.bf16 %v8176_v53, %v8174_v38  ;;  %v8200_v61 = vld [vmem:[%s15800_s6 + $0xf8] sm:$0xff]  ;;  %v9405_v38 = vpack.c.bf16 %v8199_v50, %v8197_v41  ;;  %v8201_v53 = vld [vmem:[%s15800_s6 + $0x100] sm:$0xff] }
0x130a   : > { %9378 = vmatpush1.bf16.msra.mxu1 %v9377_v40  ;;  %v9403_v56 = vpack.c.bf16 %v8200_v61, %v8198_v45  ;;  %v8204_v0 = vld [vmem:[%s15800_s6 + $0x118] sm:$0xff]  ;;  %v7960_v45 = vrot.slane %v14884_v33, 6  ;;  %v7944_v61 = vrot.slane %v14884_v33, 2 }
0x130b   : > { %v14888_v43 = vpop.f32.mrb[74].mxu0  ;;  %9380 = vmatprep.subr.bf16.mxu1 %v9379_v34  ;;  %v9407_v40 = vpack.c.bf16 %v8204_v0, %v8202_v20  ;;  %v8208_v34 = vld [vmem:[%s15800_s6 + $0x138] sm:$0xff] }
0x130c   : > { %10526 = vrot.lane.b32.xlu1 %v10525_v58, %s11012_s10  ;;  %10521 = vrot.lane.b32.xlu0 %v10520_v30, %s11009_s19  ;;  %v7580_v46 = vpop.f32.mrb[75].mxu0  ;;  %v8173_v58 = vld [vmem:[%s15800_s6 + $0x20] sm:$0xff]  ;;  %v8191_v30 = vld [vmem:[%s15800_s6 + $0xb0] sm:$0xff] }
0x130d   : > { %v9401_v46 = vpack.c.bf16 %v8195_v32, %v8193_v51  ;;  %v7940_v32 = vrot.slane %v14884_v33, 1 }
0x1310   : > { %10531 = vrot.lane.b32.xlu0 %v10530_v9, %s11013_s13  ;;  %10536 = vrot.lane.b32.xlu1 %v10535_v49, %s11011_s29  ;;  %v8175_v9 = vld [vmem:[%s15800_s6 + $0x30] sm:$0xff]  ;;  %v8194_v49 = vld [vmem:[%s15800_s6 + $0xc8] sm:$0xff] }
0x1311   : > { %v9381_v14 = vpack.c.bf16 %v8175_v9, %v8173_v58  ;;  %v8203_v58 = vld [vmem:[%s15800_s6 + $0x110] sm:$0xff]  ;;  %v8206_v9 = vld [vmem:[%s15800_s6 + $0x128] sm:$0xff] }
0x1312   : > { %v9409_v4 = vpack.c.bf16 %v8203_v58, %v8201_v53  ;;  %v9411_v63 = vpack.c.bf16 %v8208_v34, %v8206_v9  ;;  %v7964_v53 = vrot.slane %v14884_v33, 7  ;;  %v8221_v9 = vld [vmem:[%s15800_s6 + $0x1a0] sm:$0xff]  ;;  %v8223_v34 = vld [vmem:[%s15800_s6 + $0x1b0] sm:$0xff] }
0x1313   : > { %9382 = vmatpush1.bf16.msra.mxu1 %v9381_v14  ;;  %v8205_v14 = vld [vmem:[%s15800_s6 + $0x120] sm:$0xff] }
0x1314   : > { %10541 = vrot.lane.b32.xlu0 %v10540_v1, %s11010_s22  ;;  %10546 = vrot.lane.b32.xlu1 %v10545_v5, %s11012_s10  ;;  %v8196_v1 = vld [vmem:[%s15800_s6 + $0xd8] sm:$0xff]  ;;  %v9397_v5 = vpack.c.bf16 %v8191_v30, %v8189_v18  ;;  %v9413_v2 = vpack.c.bf16 %v8207_v59, %v8205_v14  ;;  %v8222_v18 = vld [vmem:[%s15800_s6 + $0x1a8] sm:$0xff]  ;;  %v7952_v30 = vrot.slane %v14884_v33, 4 }
0x1315   : > { %9384 = vmatprep.subr.bf16.mxu1 %v9383_v11  ;;  %v8212_v11 = vld [vmem:[%s15800_s6 + $0x158] sm:$0xff] }
0x1316   : > { %v9415_v57 = vpack.c.bf16 %v8212_v11, %v8210_v21 }
0x1317   : > { %9386 = vmatpush1.bf16.msra.mxu1 %v9385_v12  ;;  %v8209_v12 = vld [vmem:[%s15800_s6 + $0x140] sm:$0xff] }
0x1318   : > { %10551 = vrot.lane.b32.xlu0 %v10550_v62, %s11013_s13  ;;  %10561 = vrot.lane.b32.xlu1 %v14822_v42, %s11014_s27  ;;  %v9389_v42 = vpack.c.bf16 %v8183_v23, %v8181_v60  ;;  %v9399_v62 = vpack.c.bf16 %v8196_v1, %v8194_v49  ;;  %v8214_v60 = vld [vmem:[%s15800_s6 + $0x168] sm:$0xff]  ;;  %v8216_v23 = vld [vmem:[%s15800_s6 + $0x178] sm:$0xff]  ;;  %v7948_v49 = vrot.slane %v14884_v33, 3  ;;  %v7956_v1 = vrot.slane %v14884_v33, 5 }
0x1319   : > { %9388 = vmatprep.subr.bf16.mxu1 %v9387_v28  ;;  %v8211_v28 = vld [vmem:[%s15800_s6 + $0x150] sm:$0xff]  ;;  %v9419_v37 = vpack.c.bf16 %v8216_v23, %v8214_v60  ;;  %v8225_v23 = vld [vmem:[%s15800_s6 + $0x1c0] sm:$0xff] }
0x131a   : > { %v9417_v36 = vpack.c.bf16 %v8211_v28, %v8209_v12  ;;  %v8226_v12 = vld [vmem:[%s15800_s6 + $0x1c8] sm:$0xff]  ;;  %v8228_v28 = vld [vmem:[%s15800_s6 + $0x1d8] sm:$0xff] }
0x131b   : > { %9390 = vmatpush1.bf16.msra.mxu1 %v9389_v42  ;;  %v8213_v42 = vld [vmem:[%s15800_s6 + $0x160] sm:$0xff]  ;;  %v9431_v60 = vpack.c.bf16 %v8228_v28, %v8226_v12  ;;  %v7980_v28 = vrot.slane %v14888_v43, 3 }
0x131c   : > { %10556 = vrot.lane.b32.xlu0 %v10555_v24, %s11015_s24  ;;  %v9393_v24 = vpack.c.bf16 %v8187_v52, %v8185_v13  ;;  %9392 = vmatprep.subr.bf16.mxu1 %v9391_v8  ;;  %v8215_v8 = vld [vmem:[%s15800_s6 + $0x170] sm:$0xff]  ;;  %v8218_v13 = vld [vmem:[%s15800_s6 + $0x188] sm:$0xff] }
0x131d   : > { %v9421_v52 = vpack.c.bf16 %v8215_v8, %v8213_v42  ;;  %v9423_v22 = vpack.c.bf16 %v8220_v48, %v8218_v13  ;;  %v8230_v42 = vld [vmem:[%s15800_s6 + $0x1e8] sm:$0xff]  ;;  %v8232_v8 = vld [vmem:[%s15800_s6 + $0x1f8] sm:$0xff]  ;;  %v8231_v48 = vld [vmem:[%s15800_s6 + $0x1f0] sm:$0xff] }
0x131e   : > { %v9435_v13 = vpack.c.bf16 %v8232_v8, %v8230_v42 }
0x131f   : > { %9394 = vmatpush1.bf16.msra.mxu1 %v9393_v24  ;;  %v8217_v24 = vld [vmem:[%s15800_s6 + $0x180] sm:$0xff] }
0x1320   : > { %9396 = vmatprep.subr.bf16.mxu1 %v9395_v3  ;;  %v8219_v3 = vld [vmem:[%s15800_s6 + $0x190] sm:$0xff] }
0x1323   : > { %9398 = vmatpush1.bf16.msra.mxu1 %v9397_v5  ;;  %v9425_v5 = vpack.c.bf16 %v8219_v3, %v8217_v24  ;;  %v8234_v24 = vld [vmem:[%s15800_s6 + $0x208] sm:$0xff]  ;;  %v8236_v3 = vld [vmem:[%s15800_s6 + $0x218] sm:$0xff] }
0x1324   : > { %9400 = vmatprep.subr.bf16.mxu1 %v9399_v62  ;;  %v8224_v62 = vld [vmem:[%s15800_s6 + $0x1b8] sm:$0xff] }
0x1327   : > { %9402 = vmatpush1.bf16.msra.mxu1 %v9401_v46  ;;  %v9427_v46 = vpack.c.bf16 %v8224_v62, %v8222_v18  ;;  %v9439_v18 = vpack.c.bf16 %v8236_v3, %v8234_v24  ;;  %v7756_v62 = vrot.slane %v14812_v54, 3 }
0x1328   : > { %9404 = vmatprep.subr.bf16.mxu1 %v9403_v56 }
0x132b   : > { %9406 = vmatpush1.bf16.msra.mxu1 %v9405_v38 }
0x132c   : > { %9408 = vmatprep.subr.bf16.mxu1 %v9407_v40 }
0x132f   : > { %9410 = vmatpush1.bf16.msra.mxu1 %v9409_v4 }
0x1330   : > { %9412 = vmatprep.subr.bf16.mxu1 %v9411_v63 }
0x1333   : > { %9414 = vmatpush1.bf16.msra.mxu1 %v9413_v2 }
0x1334   : > { %9416 = vmatprep.subr.bf16.mxu1 %v9415_v57  ;;  %v9429_v57 = vpack.c.bf16 %v8223_v34, %v8221_v9  ;;  %v7868_v9 = vrot.slane %v14853_v7, 3  ;;  %v7920_v34 = vrot.slane %v14874_v47, 2 }
0x1337   : > { %9418 = vmatpush1.bf16.msra.mxu1 %v9417_v36  ;;  %v8227_v36 = vld [vmem:[%s15800_s6 + $0x1d0] sm:$0xff] }
0x1338   : > { %9420 = vmatprep.subr.bf16.mxu1 %v9419_v37  ;;  %v9433_v37 = vpack.c.bf16 %v8227_v36, %v8225_v23 }
0x133b   : > { %9422 = vmatpush1.bf16.msra.mxu1 %v9421_v52  ;;  %v8229_v52 = vld [vmem:[%s15800_s6 + $0x1e0] sm:$0xff] }
0x133c   : > { %9424 = vmatprep.subr.bf16.mxu1 %v9423_v22  ;;  %v9437_v22 = vpack.c.bf16 %v8231_v48, %v8229_v52 }
0x133f   : > { %9426 = vmatpush1.bf16.msra.mxu1 %v9425_v5  ;;  %v7752_v5 = vrot.slane %v14812_v54, 2  ;;  %v7633_v54 = vrot.slane %v14790_v19, 3 }
0x1340   : > { %9428 = vmatprep.subr.bf16.mxu1 %v9427_v46  ;;  %v7808_v46 = vrot.slane %v14839_v55, 2 }
0x1343   : > { %9430 = vmatpush1.bf16.msra.mxu1 %v9429_v57 }
0x1344   : > { %9432 = vmatprep.subr.bf16.mxu1 %v9431_v60 }
0x1347   : > { %9434 = vmatpush1.bf16.msra.mxu1 %v9433_v37 }
0x1348   : > { %v15068_v51 = vpop.f32.mrb[76].mxu0  ;;  %9436 = vmatprep.subr.bf16.mxu1 %v9435_v13 }
0x1349   : > { %v7585_v56 = vpop.f32.mrb[77].mxu0  ;;  %v8008_v41 = vrot.slane %v15068_v51, 4  ;;  %v8004_v50 = vrot.slane %v15068_v51, 3  ;;  %v8012_v20 = vrot.slane %v15068_v51, 5  ;;  %v7996_v0 = vrot.slane %v15068_v51, 1 }
0x134a   : > { %v8016_v38 = vrot.slane %v15068_v51, 6  ;;  %v8000_v40 = vrot.slane %v15068_v51, 2  ;;  %v8020_v58 = vrot.slane %v15068_v51, 7 }
0x134b   : > { %v10570_v4 = vpack.i.bf16 %v8008_v41, %v7952_v30  ;;  %v10565_v63 = vpack.i.bf16 %v8004_v50, %v7948_v49  ;;  %v10575_v14 = vpack.i.bf16 %v8012_v20, %v7956_v1  ;;  %v10580_v59 = vpack.i.bf16 %v7996_v0, %v7940_v32  ;;  %9438 = vmatpush1.bf16.msra.mxu1 %v9437_v22 }
0x134c   : > { %v10585_v21 = vpack.i.bf16 %v8016_v38, %v7960_v45  ;;  %v10590_v11 = vpack.i.bf16 %v8000_v40, %v7944_v61  ;;  %v10595_v2 = vpack.i.bf16 %v8020_v58, %v7964_v53  ;;  %v7696_v30 = vrot.slane %v14794_v29, 2  ;;  %9440 = vmatprep.subr.bf16.mxu1 %v9439_v18 }
0x134d   : > { %10571 = vrot.lane.b32.xlu0 %v10570_v4, %s11007_s12  ;;  %10566 = vrot.lane.b32.xlu1 %v10565_v63, %s11008_s25  ;;  %v7700_v49 = vrot.slane %v14794_v29, 3  ;;  %v7629_v45 = vrot.slane %v14790_v19, 2  ;;  %v7812_v41 = vrot.slane %v14839_v55, 3  ;;  %v7864_v20 = vrot.slane %v14853_v7, 2  ;;  %s15920_s12 = sld [smem:[#allocation32_spill]] }
0x134e   : > { %v7972_v0 = vrot.slane %v14888_v43, 1 }
0x1351   : > { %10576 = vrot.lane.b32.xlu1 %v10575_v14, %s11009_s19  ;;  %10581 = vrot.lane.b32.xlu0 %v10580_v59, %s11011_s29  ;;  %s11016_s19 = smov 104   ;;  %s11017_s29 = smov 12  }
0x1353   : > { %s15751_s25 = scalar_lea.hbm %s15920_s12, %s9082_s30 }
0x1355   : > { %10586 = vrot.lane.b32.xlu1 %v10585_v21, %s11010_s22  ;;  %10591 = vrot.lane.b32.xlu0 %v10590_v11, %s11012_s10  ;;  %v7976_v11 = vrot.slane %v14888_v43, 2  ;;  %s353_s22 = sand.u32 1, %s10978_s14  }
0x1356   : > { %s8622_s10 = sshll.u32 %s353_s22, 3  ;;  %s8546_s20 = scalar_lea.sflag [#allocation3], %s353_s22 }
0x1357   : > { %s355_s11 = scalar_lea.vmem [#allocation2], %s8622_s10 }
0x1358   : > { %s8559_s28 = sshll.u32 %s355_s11, 4  ;;  %s15753_s28 = int_to_ptr.vmem [resolvable:$true] %s8559_s28 }
0x1359   : > { %10596 = vrot.lane.b32.xlu1 %v10595_v2, %s11013_s13  ;;  %7697 = vrot.lane.b32.xlu0 %v7696_v30, %s11016_s19  ;;  %v8437_v30 = vld [vmem:[%s15802_s8] sm:$0xff]  ;;  %s10924_s15 = scalar_lea.vmem %s15753_s28, 128  ;;  %p10931_p0 = scmp.lt.s32.totalorder %s15753_s28, %s10929_s16 }
0x135a   : > { %p10925_p11 = scmp.ne.s32.totalorder %s15753_s28, %s10924_s15  ;;  %p10932_p1 = scmp.lt.s32.totalorder %s10930_s26, %s10924_s15 }
0x135c   : > { %p10926_p12 = pnand %p10925_p11, %p11112_p5  ;;  %p10933_p2 = por %p10932_p1, %p10931_p0 }
0x135d   : > { %7701 = vrot.lane.b32.xlu1 %v7700_v49, %s11017_s29  ;;  %10601 = vrot.lane.b32.xlu0 %v10600_v31, %s11015_s24  ;;  %v8438_v49 = vld [vmem:[%s15802_s8 + $0x8] sm:$0xff] }
0x135e   : > { %v15132_v1 = vpop.permute.xlu0 %10451  ;;  %v15138_v32 = vpop.permute.xlu1 %10456  ;;  %p10927_p13 = pneg %p10926_p12 }
0x135f   : > { %v10453_v23 = vunpack.i.l.bf16 %v15132_v1 }
0x1360   : > { %p10934_p3 = pnand %p10933_p2, %p10927_p13 }
0x1361   : > { %7753 = vrot.lane.b32.xlu1 %v7752_v5, %s11016_s19  ;;  %7757 = vrot.lane.b32.xlu0 %v7756_v62, %s11017_s29 }
0x1362   : > { %v15140_v29 = vpop.permute.xlu0 %10461 }
0x1365   : > { %10606 = vrot.lane.b32.xlu1 %v14847_v35, %s11014_s27  ;;  %7630 = vrot.lane.b32.xlu0 %v7629_v45, %s11016_s19 }
0x1366   : > { %v15146_v31 = vpop.permute.xlu0 %10471  ;;  %v15148_v61 = vpop.permute.xlu1 %10466 }
0x1367   : > { %v10469_v8 = vunpack.i.h.bf16 %v15148_v61  ;;  %v10468_v22 = vunpack.i.l.bf16 %v15148_v61 }
0x1369   : > { %7634 = vrot.lane.b32.xlu1 %v7633_v54, %s11017_s29  ;;  %7809 = vrot.lane.b32.xlu0 %v7808_v46, %s11016_s19 }
0x136a   : > { %v10477_v56 = vpop.permute.xlu1 %10476  ;;  %v15155_v50 = vpop.permute.xlu0 %10481 }
0x136b   : > { %v10478_v4 = vunpack.i.l.bf16 %v10477_v56  ;;  %v10479_v59 = vunpack.i.h.bf16 %v10477_v56 }
0x136d   : > { %7813 = vrot.lane.b32.xlu1 %v7812_v41, %s11017_s29  ;;  %10611 = vrot.lane.b32.xlu0 %v10610_v25, %s11015_s24  ;;  %v7704_v2 = vsel %vm7637_vm0, %v14792_v44, %v10478_v4  ;;  %v10454_v44 = vunpack.i.h.bf16 %v15132_v1  ;;  %v8441_v4 = vld [vmem:[%s15802_s8 + $0x20] sm:$0xff] }
0x136e   : > { %v15162_v35 = vpop.permute.xlu1 %10486  ;;  %v10492_v53 = vpop.permute.xlu0 %10491 }
0x136f   : > { %v15164_v19 = vpop.f32.mrb[78].mxu0  ;;  %v10493_v21 = vunpack.i.l.bf16 %v10492_v53  ;;  %v10494_v7 = vunpack.i.h.bf16 %v10492_v53 }
0x1370   : > { %v10620_v55 = vpack.i.bf16 %v15164_v19, %v14888_v43  ;;  %v8028_v38 = vrot.slane %v15164_v19, 1  ;;  %v7590_v40 = vpop.f32.mrb[79].mxu0  ;;  %v8032_v24 = vrot.slane %v15164_v19, 2 }
0x1371   : > { %10616 = vrot.lane.b32.xlu1 %v14882_v15, %s11014_s27  ;;  %7865 = vrot.lane.b32.xlu0 %v7864_v20, %s11016_s19  ;;  %v7924_v15 = vrot.slane %v14874_v47, 3  ;;  %v7760_v47 = vsel %vm7637_vm0, %v14798_v17, %v10479_v59  ;;  %v7705_v60 = vsel %vm7639_vm1, %v7704_v2, %v10493_v21  ;;  %v9484_v20 = vpack.c.bf16 %v8438_v49, %v8437_v30  ;;  %v8448_v30 = vld [vmem:[%s15802_s8 + $0x58] sm:$0xff] }
0x1372   : > { %v15174_v25 = vpop.permute.xlu1 %10496  ;;  %v10625_v58 = vpack.i.bf16 %v8028_v38, %v7972_v0  ;;  %v7761_v36 = vsel %vm7639_vm1, %v7760_v47, %v10494_v7  ;;  %v7706_v43 = vsel %vm7641_vm5, %v7705_v60, %v10453_v23  ;;  %v8036_v0 = vrot.slane %v15164_v19, 3  ;;  %v8442_v19 = vld [vmem:[%s15802_s8 + $0x28] sm:$0xff]  ;;  %v8443_v60 = vld [vmem:[%s15802_s8 + $0x30] sm:$0xff] }
0x1373   : > { %v7762_v13 = vsel %vm7641_vm5, %v7761_v36, %v10454_v44  ;;  %v8055_v5 = vrot.slane %v7706_v43, 7  ;;  %9485 = vmatpush1.bf16.msra.mxu0 %v9484_v20  ;;  %v9490_v2 = vpack.c.bf16 %v8442_v19, %v8441_v4  ;;  %v8455_v20 = vld [vmem:[%s15802_s8 + $0x90] sm:$0xff]  ;;  %v8460_v4 = vld [vmem:[%s15802_s8 + $0xb8] sm:$0xff] }
0x1374   : > { %v8067_v54 = vrot.slane %v7762_v13, 6  ;;  %9486 = vmatprep.subr.bf16.mxu0 %v11005_v39  ;;  %v8445_v13 = vld [vmem:[%s15802_s8 + $0x40] sm:$0xff] }
0x1375   : > { %7869 = vrot.lane.b32.xlu1 %v7868_v9, %s11017_s29  ;;  %7921 = vrot.lane.b32.xlu0 %v7920_v34, %s11016_s19 }
0x1376   : > { %v15180_v63 = vpop.permute.xlu1 %10506  ;;  %v15182_v14 = vpop.permute.xlu0 %10501 }
0x1377   : > { %v10504_v21 = vunpack.i.h.bf16 %v15182_v14 }
0x1379   : > { %7925 = vrot.lane.b32.xlu1 %v7924_v15, %s11017_s29  ;;  %7977 = vrot.lane.b32.xlu0 %v7976_v11, %s11016_s19 }
0x137a   : > { %v15190_v57 = vpop.permute.xlu1 %10516  ;;  %v10512_v12 = vpop.permute.xlu0 %10511 }
0x137b   : > { %v10514_v37 = vunpack.i.h.bf16 %v10512_v12  ;;  %v10513_v42 = vunpack.i.l.bf16 %v10512_v12  ;;  %v10503_v12 = vunpack.i.l.bf16 %v15182_v14 }
0x137d   : > { %7981 = vrot.lane.b32.xlu1 %v7980_v28, %s11017_s29  ;;  %10621 = vrot.lane.b32.xlu0 %v10620_v55, %s11015_s24  ;;  %v7816_v3 = vsel %vm7637_vm0, %v14824_v10, %v10514_v37  ;;  %v7638_v18 = vsel %vm7637_vm0, %v14788_v6, %v10513_v42  ;;  %v8439_v6 = vld [vmem:[%s15802_s8 + $0x10] sm:$0xff]  ;;  %v8440_v10 = vld [vmem:[%s15802_s8 + $0x18] sm:$0xff] }
0x137e   : > { %v10527_v17 = vpop.permute.xlu1 %10526 }
0x137f   : > { %v10529_v52 = vunpack.i.h.bf16 %v10527_v17  ;;  %v10528_v48 = vunpack.i.l.bf16 %v10527_v17 }
0x1381   : > { %v7640_v62 = vsel %vm7639_vm1, %v7638_v18, %v10528_v48  ;;  %v7817_v45 = vsel %vm7639_vm1, %v7816_v3, %v10529_v52  ;;  %10626 = vrot.lane.b32.xlu1 %v10625_v58, %s11014_s27  ;;  %8033 = vrot.lane.b32.xlu0 %v8032_v24, %s11016_s19  ;;  %v9487_v58 = vpack.c.bf16 %v8440_v10, %v8439_v6  ;;  %v8446_v52 = vld [vmem:[%s15802_s8 + $0x48] sm:$0xff]  ;;  %v8447_v18 = vld [vmem:[%s15802_s8 + $0x50] sm:$0xff] }
0x1382   : > { %v7642_v46 = vsel %vm7641_vm5, %v7640_v62, %v10468_v22  ;;  %v7818_v56 = vsel %vm7641_vm5, %v7817_v45, %v10469_v8  ;;  %v10537_v41 = vpop.permute.xlu1 %10536  ;;  %v9496_v3 = vpack.c.bf16 %v8446_v52, %v8445_v13  ;;  %v9499_v49 = vpack.c.bf16 %v8448_v30, %v8447_v18  ;;  %v8450_v62 = vld [vmem:[%s15802_s8 + $0x68] sm:$0xff]  ;;  %v8451_v6 = vld [vmem:[%s15802_s8 + $0x70] sm:$0xff]  ;;  %v8452_v10 = vld [vmem:[%s15802_s8 + $0x78] sm:$0xff] }
0x1383   : > { %v8079_v55 = vrot.slane %v7818_v56, 5  ;;  %v8136_v38 = vsel %vm8135_vm6, %v7642_v46, %v8055_v5  ;;  %v10539_v53 = vunpack.i.h.bf16 %v10537_v41  ;;  %v10538_v34 = vunpack.i.l.bf16 %v10537_v41  ;;  %9488 = vmatpush1.bf16.msra.mxu0 %v9487_v58  ;;  %v8449_v5 = vld [vmem:[%s15802_s8 + $0x60] sm:$0xff]  ;;  %v8454_v56 = vld [vmem:[%s15802_s8 + $0x88] sm:$0xff] }
0x1384   : > { %v8141_v40 = vsel %vm8140_vm7, %v8136_v38, %v8067_v54  ;;  %9489 = vmatprep.subr.bf16.mxu0 %v11005_v39  ;;  %v9502_v45 = vpack.c.bf16 %v8450_v62, %v8449_v5  ;;  %v9505_v54 = vpack.c.bf16 %v8452_v10, %v8451_v6  ;;  %v8453_v46 = vld [vmem:[%s15802_s8 + $0x80] sm:$0xff]  ;;  %v10499_v13 = vunpack.i.h.bf16 %v15174_v25 }
0x1385   : > { %v8145_v9 = vsel %vm7443_vm15, %v8141_v40, %v8079_v55  ;;  %8037 = vrot.lane.b32.xlu1 %v8036_v0, %s11017_s29  ;;  %v7928_v11 = vsel %vm7637_vm0, %v14859_v16, %v10539_v53  ;;  %v7872_v28 = vsel %vm7637_vm0, %v14849_v27, %v10538_v34  ;;  %v8444_v16 = vld [vmem:[%s15802_s8 + $0x38] sm:$0xff]  ;;  %v9508_v41 = vpack.c.bf16 %v8454_v56, %v8453_v46  ;;  %v15315_v55 = vpop.permute.xlu0 %10521  ;;  %v8457_v40 = vld [vmem:[%s15802_s8 + $0xa0] sm:$0xff]  ;;  %v8458_v53 = vld [vmem:[%s15802_s8 + $0xa8] sm:$0xff] }
0x1386   : > { %v10547_v15 = vpop.permute.xlu1 %10546  ;;  %v9493_v17 = vpack.c.bf16 %v8444_v16, %v8443_v60  ;;  %v8456_v0 = vld [vmem:[%s15802_s8 + $0x98] sm:$0xff]  ;;  %v9514_v58 = vpack.c.bf16 %v8458_v53, %v8457_v40  ;;  %v8459_v34 = vld [vmem:[%s15802_s8 + $0xb0] sm:$0xff]  ;;  %v10463_v60 = vunpack.i.l.bf16 %v15140_v29  ;;  %v10464_v16 = vunpack.i.h.bf16 %v15140_v29 }
0x1387   : > { %v10549_v59 = vunpack.i.h.bf16 %v10547_v15  ;;  %v10548_v7 = vunpack.i.l.bf16 %v10547_v15  ;;  %9491 = vmatpush1.bf16.msra.mxu0 %v9490_v2  ;;  %v9511_v38 = vpack.c.bf16 %v8456_v0, %v8455_v20  ;;  %v9517_v19 = vpack.c.bf16 %v8460_v4, %v8459_v34  ;;  %v8461_v15 = vld [vmem:[%s15802_s8 + $0xc0] sm:$0xff] }
0x1388   : > { %9492 = vmatprep.subr.bf16.mxu0 %v11005_v39  ;;  %v10458_v2 = vunpack.i.l.bf16 %v15138_v32  ;;  %v10489_v29 = vunpack.i.h.bf16 %v15162_v35  ;;  %v10508_v62 = vunpack.i.l.bf16 %v15180_v63  ;;  %v10523_v46 = vunpack.i.l.bf16 %v15315_v55 }
0x1389   : > { %v7929_v47 = vsel %vm7639_vm1, %v7928_v11, %v10549_v59  ;;  %v7873_v36 = vsel %vm7639_vm1, %v7872_v28, %v10548_v7  ;;  %v8462_v59 = vld [vmem:[%s15802_s8 + $0xc8] sm:$0xff] }
0x138a   : > { %v7930_v37 = vsel %vm7641_vm5, %v7929_v47, %v10504_v21  ;;  %v7874_v27 = vsel %vm7641_vm5, %v7873_v36, %v10503_v12  ;;  %v9520_v7 = vpack.c.bf16 %v8462_v59, %v8461_v15  ;;  %v10459_v47 = vunpack.i.h.bf16 %v15138_v32 }
0x138b   : > { %v8103_v42 = vrot.slane %v7930_v37, 3  ;;  %v8091_v43 = vrot.slane %v7874_v27, 4  ;;  %9494 = vmatpush1.bf16.msra.mxu0 %v9493_v17  ;;  %v10473_v36 = vunpack.i.l.bf16 %v15146_v31  ;;  %v10474_v37 = vunpack.i.h.bf16 %v15146_v31 }
0x138c   : > { %9495 = vmatprep.subr.bf16.mxu0 %v11005_v39  ;;  %v10488_v27 = vunpack.i.l.bf16 %v15162_v35  ;;  %v7707_v32 = vsel %vm7643_vm10, %v10453_v23, %v10458_v2  ;;  %v7763_v17 = vsel %vm7643_vm10, %v10454_v44, %v10459_v47  ;;  %v10519_v23 = vunpack.i.h.bf16 %v15190_v57 }
0x138d   : > { %v8150_v48 = vsel %vm8149_vm8, %v8145_v9, %v8091_v43  ;;  %v15324_v9 = vpop.permute.xlu0 %10531  ;;  %v10518_v43 = vunpack.i.l.bf16 %v15190_v57  ;;  %v7708_v31 = vsel %vm7645_vm11, %v7707_v32, %v10463_v60  ;;  %v7819_v44 = vsel %vm7643_vm10, %v10469_v8, %v10474_v37 }
0x138e   : > { %v15278_v24 = vsel %vm8154_vm9, %v8150_v48, %v8103_v42  ;;  %v10484_v42 = vunpack.i.h.bf16 %v15155_v50  ;;  %v10533_v52 = vunpack.i.l.bf16 %v15324_v9  ;;  %v7764_v48 = vsel %vm7645_vm11, %v7763_v17, %v10464_v16 }
0x138f   : > { %9497 = vmatpush1.bf16.msra.mxu0 %v9496_v3  ;;  %v15373_v3 = vpop.permute.xlu1 %10561  ;;  %v7820_v57 = vsel %vm7645_vm11, %v7819_v44, %v10489_v29  ;;  %v10509_v8 = vunpack.i.h.bf16 %v15180_v63  ;;  %v7875_v34 = vsel %vm7643_vm10, %v10503_v12, %v10508_v62 }
0x1390   : > { %9498 = vmatprep.subr.bf16.mxu0 %v11005_v39  ;;  %v7821_v10 = vsel %vm7647_vm12, %v7820_v57, %v10519_v23  ;;  %v7876_v4 = vsel %vm7645_vm11, %v7875_v34, %v10523_v46 }
0x1391   : > { %v15340_v11 = vpop.permute.xlu0 %10541 }
0x1392   : > { %v10544_v0 = vunpack.i.h.bf16 %v15340_v11  ;;  %v10543_v63 = vunpack.i.l.bf16 %v15340_v11 }
0x1393   : > { %9500 = vmatpush1.bf16.msra.mxu0 %v9499_v49  ;;  %v7765_v49 = vsel %vm7647_vm12, %v7764_v48, %v10484_v42 }
0x1394   : > { %9501 = vmatprep.subr.bf16.mxu0 %v11005_v39  ;;  %v7766_v61 = vsel %vm7649_vm13, %v7765_v49, %v10499_v13  ;;  %v7877_v2 = vsel %vm7647_vm12, %v7876_v4, %v10543_v63 }
0x1395   : > { %v15344_v28 = vpop.permute.xlu0 %10551 }
0x1396   : > { %v10554_v40 = vunpack.i.h.bf16 %v15344_v28  ;;  %v10553_v53 = vunpack.i.l.bf16 %v15344_v28 }
0x1397   : > { %9503 = vmatpush1.bf16.msra.mxu0 %v9502_v45 }
0x1398   : > { %9504 = vmatprep.subr.bf16.mxu0 %v11005_v39  ;;  %v7878_v14 = vsel %vm7649_vm13, %v7877_v2, %v10553_v53 }
0x1399   : > { %v15375_v1 = vpop.permute.xlu0 %10556  ;;  %v8092_v17 = vrot.slane %v7878_v14, 4 }
0x139b   : > { %9506 = vmatpush1.bf16.msra.mxu0 %v9505_v54  ;;  %v10524_v54 = vunpack.i.h.bf16 %v15315_v55  ;;  %v7931_v55 = vsel %vm7643_vm10, %v10504_v21, %v10509_v8 }
0x139c   : > { %9507 = vmatprep.subr.bf16.mxu0 %v11005_v39 }
0x139f   : > { %9509 = vmatpush1.bf16.msra.mxu0 %v9508_v41 }
0x13a0   : > { %9510 = vmatprep.subr.bf16.mxu0 %v11005_v39 }
0x13a3   : > { %9512 = vmatpush1.bf16.msra.mxu0 %v9511_v38 }
0x13a4   : > { %9513 = vmatprep.subr.bf16.mxu0 %v11005_v39 }
0x13a7   : > { %9515 = vmatpush1.bf16.msra.mxu0 %v9514_v58  ;;  %v8068_v58 = vrot.slane %v7766_v61, 6 }
0x13a8   : > { %9516 = vmatprep.subr.bf16.mxu0 %v11005_v39 }
0x13ab   : > { %9518 = vmatpush1.bf16.msra.mxu0 %v9517_v19  ;;  %v7932_v19 = vsel %vm7645_vm11, %v7931_v55, %v10524_v54  ;;  %v8235_v55 = vld [vmem:[%s15800_s6 + $0x210] sm:$0xff] }
0x13ac   : > { %9519 = vmatprep.subr.bf16.mxu0 %v11005_v39  ;;  %v10483_v39 = vunpack.i.l.bf16 %v15155_v50  ;;  %v7644_v50 = vsel %vm7643_vm10, %v10468_v22, %v10473_v36  ;;  %v10534_v22 = vunpack.i.h.bf16 %v15324_v9  ;;  %v7933_v47 = vsel %vm7647_vm12, %v7932_v19, %v10544_v0 }
0x13ad   : > { %v7646_v18 = vsel %vm7645_vm11, %v7644_v50, %v10488_v27  ;;  %v7934_v21 = vsel %vm7649_vm13, %v7933_v47, %v10554_v40 }
0x13ae   : > { %v7709_v35 = vsel %vm7647_vm12, %v7708_v31, %v10483_v39  ;;  %v7648_v5 = vsel %vm7647_vm12, %v7646_v18, %v10518_v43  ;;  %v7822_v20 = vsel %vm7649_vm13, %v7821_v10, %v10534_v22  ;;  %v8104_v31 = vrot.slane %v7934_v21, 3 }
0x13af   : > { %9521 = vmatpush1.bf16.msra.mxu0 %v9520_v7  ;;  %v7650_v45 = vsel %vm7649_vm13, %v7648_v5, %v10533_v52  ;;  %v8080_v15 = vrot.slane %v7822_v20, 5 }
0x13b0   : > { %8526 = vmatprep.subr.mxu0 %v15880_v26  ;;  %v10498_v26 = vunpack.i.l.bf16 %v15174_v25 }
0x13b2   : > { %v7710_v30 = vsel %vm7649_vm13, %v7709_v35, %v10498_v26 }
0x13b3   : > { %v8056_v6 = vrot.slane %v7710_v30, 7 }
0x13b5   : > { %v8137_v38 = vsel %vm8135_vm6, %v7650_v45, %v8056_v6 }
0x13b6   : > { %v8142_v7 = vsel %vm8140_vm7, %v8137_v38, %v8068_v58  ;;  %v8233_v58 = vld [vmem:[%s15800_s6 + $0x200] sm:$0xff] }
0x13b7   : > { %v8146_v43 = vsel %vm7443_vm15, %v8142_v7, %v8080_v15  ;;  %v9441_v47 = vpack.c.bf16 %v8235_v55, %v8233_v58  ;;  %v8258_v55 = vld [vmem:[%s15800_s6 + $0x2c8] sm:$0xff] }
0x13b8   : > { %v8151_v20 = vsel %vm8149_vm8, %v8146_v43, %v8092_v17 }
0x13b9   : > { %v8156_v7 = vsel %vm8154_vm9, %v8151_v20, %v8104_v31  ;;  %v8246_v31 = vld [vmem:[%s15800_s6 + $0x268] sm:$0xff] }
0x13bf   : > { %v10572_v56 = vpop.permute.xlu0 %10571  ;;  %v10567_v41 = vpop.permute.xlu1 %10566 }
0x13c0   : > { %v10574_v16 = vunpack.i.h.bf16 %v10572_v56  ;;  %v10573_v36 = vunpack.i.l.bf16 %v10572_v56  ;;  %v10569_v39 = vunpack.i.h.bf16 %v10567_v41  ;;  %v10568_v37 = vunpack.i.l.bf16 %v10567_v41 }
0x13c2   : > { %v8043_v30 = vsel %vm7643_vm10, %v10569_v39, %v10574_v16  ;;  %v7987_v49 = vsel %vm7643_vm10, %v10568_v37, %v10573_v36 }
0x13c3   : > { %v10577_v59 = vpop.permute.xlu1 %10576  ;;  %v10582_v11 = vpop.permute.xlu0 %10581 }
0x13c4   : > { %v10584_v12 = vunpack.i.h.bf16 %v10582_v11  ;;  %v10583_v60 = vunpack.i.l.bf16 %v10582_v11  ;;  %v10579_v27 = vunpack.i.h.bf16 %v10577_v59  ;;  %v10578_v32 = vunpack.i.l.bf16 %v10577_v59  ;;  %v8240_v11 = vld [vmem:[%s15800_s6 + $0x238] sm:$0xff] }
0x13c6   : > { %v8040_v35 = vsel %vm7637_vm0, %v15068_v51, %v10584_v12  ;;  %v7984_v23 = vsel %vm7637_vm0, %v14884_v33, %v10583_v60  ;;  %v7988_v61 = vsel %vm7645_vm11, %v7987_v49, %v10578_v32  ;;  %v8044_v8 = vsel %vm7645_vm11, %v8043_v30, %v10579_v27  ;;  %v8237_v12 = vld [vmem:[%s15800_s6 + $0x220] sm:$0xff]  ;;  %v8239_v60 = vld [vmem:[%s15800_s6 + $0x230] sm:$0xff]  ;;  %v8250_v49 = vld [vmem:[%s15800_s6 + $0x288] sm:$0xff] }
0x13c7   : > { %v10587_v42 = vpop.permute.xlu1 %10586  ;;  %v10592_v29 = vpop.permute.xlu0 %10591  ;;  %v9445_v27 = vpack.c.bf16 %v8239_v60, %v8237_v12  ;;  %vm7655_vm0 = vcmask 850944   ;;  %v15573_v12 = vld [vmem:[%s15800_s6 + $0x2e0] sm:$0xff]  ;;  %v15578_v60 = vld [vmem:[%s15800_s6 + $0x2f0] sm:$0xff] }
0x13c8   : > { %v10594_v48 = vunpack.i.h.bf16 %v10592_v29  ;;  %v10593_v50 = vunpack.i.l.bf16 %v10592_v29  ;;  %v10589_v44 = vunpack.i.h.bf16 %v10587_v42  ;;  %v10588_v18 = vunpack.i.l.bf16 %v10587_v42  ;;  %v8241_v42 = vld [vmem:[%s15800_s6 + $0x240] sm:$0xff]  ;;  %v8243_v29 = vld [vmem:[%s15800_s6 + $0x250] sm:$0xff] }
0x13c9   : > { %v9469_v25 = vpack.c.bf16 %v15578_v60, %v15573_v12 }
0x13ca   : > { %v7985_v57 = vsel %vm7639_vm1, %v7984_v23, %v10593_v50  ;;  %v8041_v5 = vsel %vm7639_vm1, %v8040_v35, %v10594_v48  ;;  %v7989_v56 = vsel %vm7647_vm12, %v7988_v61, %v10588_v18  ;;  %v8045_v41 = vsel %vm7647_vm12, %v8044_v8, %v10589_v44  ;;  %v8248_v48 = vld [vmem:[%s15800_s6 + $0x278] sm:$0xff]  ;;  %v8245_v23 = vld [vmem:[%s15800_s6 + $0x260] sm:$0xff]  ;;  %v8247_v44 = vld [vmem:[%s15800_s6 + $0x270] sm:$0xff] }
0x13cb   : > { %v7986_v62 = vsel %vm7641_vm5, %v7985_v57, %v10568_v37  ;;  %v8042_v51 = vsel %vm7641_vm5, %v8041_v5, %v10569_v39  ;;  %v15437_v45 = vpop.permute.xlu1 %10596  ;;  %v15439_v33 = vpop.permute.xlu0 %7697  ;;  %v8242_v39 = vld [vmem:[%s15800_s6 + $0x248] sm:$0xff]  ;;  %v8244_v37 = vld [vmem:[%s15800_s6 + $0x258] sm:$0xff]  ;;  %v9449_v50 = vpack.c.bf16 %v8243_v29, %v8241_v42  ;;  %v9451_v35 = vpack.c.bf16 %v8248_v48, %v8246_v31  ;;  %v8249_v8 = vld [vmem:[%s15800_s6 + $0x280] sm:$0xff] }
0x13cc   : > { %v8115_v6 = vrot.slane %v7986_v62, 2  ;;  %v8127_v10 = vrot.slane %v8042_v51, 1  ;;  %v10599_v54 = vunpack.i.h.bf16 %v15437_v45  ;;  %v10598_v46 = vunpack.i.l.bf16 %v15437_v45  ;;  %v8252_v57 = vld [vmem:[%s15800_s6 + $0x298] sm:$0xff]  ;;  %v8251_v62 = vld [vmem:[%s15800_s6 + $0x290] sm:$0xff]  ;;  %v15597_v48 = vld [vmem:[%s15800_s6 + $0x300] sm:$0xff] }
0x13cd   : > { %v9447_v32 = vpack.c.bf16 %v8244_v37, %v8242_v39  ;;  %v9453_v5 = vpack.c.bf16 %v8247_v44, %v8245_v23  ;;  %v9455_v61 = vpack.c.bf16 %v8252_v57, %v8250_v49  ;;  %vm7657_vm1 = vcmask 97280   ;;  %v15583_v39 = vld [vmem:[%s15800_s6 + $0x308] sm:$0xff]  ;;  %v15592_v31 = vld [vmem:[%s15800_s6 + $0x318] sm:$0xff] }
0x13ce   : > { %v7990_v0 = vsel %vm7649_vm13, %v7989_v56, %v10598_v46  ;;  %v8046_v63 = vsel %vm7649_vm13, %v8045_v41, %v10599_v54  ;;  %v8160_v38 = vsel %vm8159_vm14, %v15278_v24, %v8115_v6  ;;  %v8238_v24 = vld [vmem:[%s15800_s6 + $0x228] sm:$0xff]  ;;  %v9457_v41 = vpack.c.bf16 %v8251_v62, %v8249_v8  ;;  %v15633_v8 = vld [vmem:[%s15800_s6 + $0x338] sm:$0xff]  ;;  %v15638_v62 = vld [vmem:[%s15800_s6 + $0x320] sm:$0xff] }
0x13cf   : > { %v8116_v34 = vrot.slane %v7990_v0, 2  ;;  %v15460_v4 = vpop.permute.xlu1 %7701  ;;  %v15462_v19 = vpop.permute.xlu0 %10601  ;;  %v8128_v15 = vrot.slane %v8046_v63, 1  ;;  %v8165_v59 = vsel %vm8164_vm2, %v8160_v38, %v8127_v10  ;;  %v9443_v21 = vpack.c.bf16 %v8240_v11, %v8238_v24  ;;  %v8254_v6 = vld [vmem:[%s15800_s6 + $0x2a8] sm:$0xff]  ;;  %v8256_v10 = vld [vmem:[%s15800_s6 + $0x2b8] sm:$0xff]  ;;  %v8253_v0 = vld [vmem:[%s15800_s6 + $0x2a0] sm:$0xff] }
0x13d0   : > { %v9459_v20 = vpack.c.bf16 %v8256_v10, %v8254_v6  ;;  %v8255_v63 = vld [vmem:[%s15800_s6 + $0x2b0] sm:$0xff]  ;;  %v10558_v38 = vunpack.i.l.bf16 %v15375_v1  ;;  %v10564_v49 = vunpack.i.h.bf16 %v15373_v3  ;;  %v7714_v10 = vsel %vm7657_vm1, %v15439_v33, %v15460_v4 }
0x13d1   : > { %v8161_v2 = vsel %vm8159_vm14, %v8156_v7, %v8116_v34  ;;  %v8260_v34 = vld [vmem:[%s15800_s6 + $0x2d8] sm:$0xff]  ;;  %v8259_v11 = vld [vmem:[%s15800_s6 + $0x2d0] sm:$0xff]  ;;  %v8262_v7 = vld [vmem:[%s15800_s6 + $0x2e8] sm:$0xff] }
0x13d2   : > { %v8166_v14 = vsel %vm8164_vm2, %v8161_v2, %v8128_v15  ;;  %v8257_v15 = vld [vmem:[%s15800_s6 + $0x2c0] sm:$0xff]  ;;  %v8264_v2 = vld [vmem:[%s15800_s6 + $0x2f8] sm:$0xff]  ;;  %v7711_v37 = vsel %vm7651_vm3, %v10498_v26, %v10558_v38  ;;  %v10563_v26 = vunpack.i.l.bf16 %v15373_v3  ;;  %v15657_v38 = vld [vmem:[%s15800_s6 + $0x348] sm:$0xff] }
0x13d3   : > { %v15480_v16 = vpop.permute.xlu1 %7753  ;;  %8357 = vmatprep.mubr.f32.mxu1 %v8166_v14  ;;  %v15482_v36 = vpop.permute.xlu0 %7757  ;;  %v9465_v42 = vpack.c.bf16 %v8259_v11, %v8257_v15  ;;  %v9467_v29 = vpack.c.bf16 %v8264_v2, %v8262_v7 }
0x13d4   : > { %8358 = vmatmul.mubr.f32.vlgmr.msra.gmra.mrb[48].mxu1 %v8165_v59  ;;  %v10559_v59 = vunpack.i.h.bf16 %v15375_v1  ;;  %v9461_v1 = vpack.c.bf16 %v8255_v63, %v8253_v0  ;;  %v15652_v63 = vld [vmem:[%s15800_s6 + $0x330] sm:$0xff] }
0x13d5   : > { %9442 = vmatpush1.bf16.msra.mxu1 %v9441_v47  ;;  %v10603_v47 = vunpack.i.l.bf16 %v15462_v19 }
0x13d6   : > { %9444 = vmatprep.subr.bf16.mxu1 %v9443_v21  ;;  %v9463_v21 = vpack.c.bf16 %v8260_v34, %v8258_v55 }
0x13d7   : > { %v15496_v43 = vpop.permute.xlu1 %10606  ;;  %v15498_v17 = vpop.permute.xlu0 %7630  ;;  %v7652_v57 = vsel %vm7651_vm3, %v10533_v52, %v10603_v47  ;;  %v15628_v52 = vld [vmem:[%s15800_s6 + $0x328] sm:$0xff]  ;;  %v8058_v47 = vrot.slane %v7714_v10, 7 }
0x13d8   : > { %v10608_v14 = vunpack.i.l.bf16 %v15496_v43  ;;  %v9475_v7 = vpack.c.bf16 %v15633_v8, %v15628_v52 }
0x13d9   : > { %9446 = vmatpush1.bf16.msra.mxu1 %v9445_v27  ;;  %v10604_v27 = vunpack.i.h.bf16 %v15462_v19  ;;  %v7767_v19 = vsel %vm7651_vm3, %v10499_v13, %v10559_v59  ;;  %v7712_v13 = vsel %vm7653_vm4, %v7711_v37, %v10563_v26 }
0x13da   : > { %9448 = vmatprep.subr.bf16.mxu1 %v9447_v32  ;;  %v7713_v6 = vsel %vm7655_vm0, %v7712_v13, %v15439_v33  ;;  %v15662_v33 = vld [vmem:[%s15800_s6 + $0x358] sm:$0xff] }
0x13db   : > { %v15512_v18 = vpop.permute.xlu1 %7634  ;;  %v15514_v30 = vpop.permute.xlu0 %7809  ;;  %v8057_v2 = vrot.slane %v7713_v6, 7 }
0x13dd   : > { %9450 = vmatpush1.bf16.msra.mxu1 %v9449_v50  ;;  %v15602_v50 = vld [vmem:[%s15800_s6 + $0x310] sm:$0xff] }
0x13de   : > { %9452 = vmatprep.subr.bf16.mxu1 %v9451_v35  ;;  %v10609_v35 = vunpack.i.h.bf16 %v15496_v43  ;;  %v7654_v43 = vsel %vm7653_vm4, %v7652_v57, %v10608_v14  ;;  %v9473_v3 = vpack.c.bf16 %v15602_v50, %v15597_v48  ;;  %v7658_v14 = vsel %vm7657_vm1, %v15498_v17, %v15512_v18 }
0x13df   : > { %v15528_v51 = vpop.permute.xlu1 %7813  ;;  %v15536_v56 = vpop.permute.xlu0 %10611  ;;  %v7656_v15 = vsel %vm7655_vm0, %v7654_v43, %v15498_v17 }
0x13e0   : > { %v10613_v23 = vunpack.i.l.bf16 %v15536_v56  ;;  %v10614_v4 = vunpack.i.h.bf16 %v15536_v56  ;;  %v9477_v56 = vpack.c.bf16 %v15652_v63, %v15638_v62  ;;  %v8138_v60 = vsel %vm8135_vm6, %v7656_v15, %v8057_v2  ;;  %v8463_v15 = vld [vmem:[%s15802_s8 + $0xd0] sm:$0xff]  ;;  %v8277_v2 = vld [vmem:[%s15801_s7] sm:$0x3] }
0x13e1   : > { %9454 = vmatpush1.bf16.msra.mxu1 %v9453_v5  ;;  %8527 = vmatpush1.msra.mxu0 %v8463_v15 }
0x13e2   : > { %9456 = vmatprep.subr.bf16.mxu1 %v9455_v61  ;;  %v9471_v61 = vpack.c.bf16 %v15592_v31, %v15583_v39  ;;  %v7879_v55 = vsel %vm7651_vm3, %v10553_v53, %v10613_v23  ;;  %v9479_v53 = vpack.c.bf16 %v15662_v33, %v15657_v38  ;;  %v7826_v39 = vsel %vm7657_vm1, %v15514_v30, %v15528_v51 }
0x13e3   : > { %v15545_v58 = vpop.permute.xlu1 %10616  ;;  %v15557_v24 = vpop.permute.xlu0 %7865  ;;  %v8139_v31 = vsel %vm8135_vm6, %v7658_v14, %v8058_v47 }
0x13e4   : > { %v10618_v5 = vunpack.i.l.bf16 %v15545_v58  ;;  %v10619_v59 = vunpack.i.h.bf16 %v15545_v58  ;;  %v7770_v58 = vsel %vm7657_vm1, %v15480_v16, %v15482_v36 }
0x13e5   : > { %9458 = vmatpush1.bf16.msra.mxu1 %v9457_v41  ;;  %v7768_v41 = vsel %vm7653_vm4, %v7767_v19, %v10564_v49 }
0x13e6   : > { %9460 = vmatprep.subr.bf16.mxu1 %v9459_v20  ;;  %v7823_v20 = vsel %vm7651_vm3, %v10534_v22, %v10604_v27  ;;  %v7769_v9 = vsel %vm7655_vm0, %v7768_v41, %v15480_v16  ;;  %v7880_v11 = vsel %vm7653_vm4, %v7879_v55, %v10618_v5  ;;  %v7935_v16 = vsel %vm7651_vm3, %v10554_v40, %v10614_v4 }
0x13e7   : > { %v7870_v32 = vpop.permute.xlu1 %7869  ;;  %v15610_v44 = vpop.permute.xlu0 %7921  ;;  %v7824_v22 = vsel %vm7653_vm4, %v7823_v20, %v10609_v35  ;;  %v7881_v37 = vsel %vm7655_vm0, %v7880_v11, %v15557_v24  ;;  %v7936_v18 = vsel %vm7653_vm4, %v7935_v16, %v10619_v59  ;;  %v8082_v40 = vrot.slane %v7826_v39, 5  ;;  %v9079_v39 = vld [vmem:[%s15803_s9] ss:$0 sm:$0xff] }
0x13e8   : > { %v7882_v17 = vsel %vm7657_vm1, %v15557_v24, %v7870_v32  ;;  %v8093_v48 = vrot.slane %v7881_v37, 4  ;;  %v7937_v26 = vsel %vm7655_vm0, %v7936_v18, %v15610_v44  ;;  %v8279_v59 = vlaneseq }
0x13e9   : > { %9462 = vmatpush1.bf16.msra.mxu1 %v9461_v1  ;;  %v8069_v1 = vrot.slane %v7769_v9, 6  ;;  %v8094_v32 = vrot.slane %v7882_v17, 4 }
0x13ea   : > { %9464 = vmatprep.subr.bf16.mxu1 %v9463_v21  ;;  %v7825_v21 = vsel %vm7655_vm0, %v7824_v22, %v15514_v30  ;;  %v8280_v11 = vshrl.u32 %v8279_v59, 7 }
0x13eb   : > { %v7926_v0 = vpop.permute.xlu1 %7925  ;;  %v7978_v34 = vpop.permute.xlu0 %7977  ;;  %v8081_v30 = vrot.slane %v7825_v21, 5  ;;  %v8143_v28 = vsel %vm8140_vm7, %v8138_v60, %v8069_v1 }
0x13ec   : > { %v7938_v51 = vsel %vm7657_vm1, %v15610_v44, %v7926_v0  ;;  %v8285_v47 = vsub.s32 1, %v8280_v11 }
0x13ed   : > { %9466 = vmatpush1.bf16.msra.mxu1 %v9465_v42  ;;  %v8106_v49 = vrot.slane %v7938_v51, 3 }
0x13ee   : > { %9468 = vmatprep.subr.bf16.mxu1 %v9467_v29  ;;  %v8070_v29 = vrot.slane %v7770_v58, 6 }
0x13ef   : > { %v7982_v12 = vpop.permute.xlu1 %7981  ;;  %v10622_v36 = vpop.permute.xlu0 %10621 }
0x13f0   : > { %v10624_v27 = vunpack.i.h.bf16 %v10622_v36  ;;  %v10623_v42 = vunpack.i.l.bf16 %v10622_v36  ;;  %v7994_v50 = vsel %vm7657_vm1, %v7978_v34, %v7982_v12  ;;  %v8144_v23 = vsel %vm8140_vm7, %v8139_v31, %v8070_v29 }
0x13f1   : > { %9470 = vmatpush1.bf16.msra.mxu1 %v9469_v25  ;;  %v8147_v25 = vsel %vm7443_vm15, %v8143_v28, %v8081_v30  ;;  %v8118_v13 = vrot.slane %v7994_v50, 2  ;;  %v8148_v45 = vsel %vm7443_vm15, %v8144_v23, %v8082_v40  ;;  %vm8289_vm15 = vcmask 392192  }
0x13f2   : > { %9472 = vmatprep.subr.bf16.mxu1 %v9471_v61  ;;  %v8047_v57 = vsel %vm7651_vm3, %v10599_v54, %v10624_v27  ;;  %v7991_v5 = vsel %vm7651_vm3, %v10598_v46, %v10623_v42  ;;  %v8273_v61 = vld [vmem:[%s15800_s6 + $0x340] sm:$0xff]  ;;  %v8275_v54 = vld [vmem:[%s15800_s6 + $0x350] sm:$0xff]  ;;  %v8152_v46 = vsel %vm8149_vm8, %v8147_v25, %v8093_v48  ;;  %v8153_v6 = vsel %vm8149_vm8, %v8148_v45, %v8094_v32 }
0x13f3   : > { %v10627_v24 = vpop.permute.xlu1 %10626  ;;  %v8034_v52 = vpop.permute.xlu0 %8033  ;;  %v8158_v0 = vsel %vm8154_vm9, %v8153_v6, %v8106_v49  ;;  %v9481_v38 = vpack.c.bf16 %v8275_v54, %v8273_v61 }
0x13f4   : > { %v10629_v19 = vunpack.i.h.bf16 %v10627_v24  ;;  %v10628_v35 = vunpack.i.l.bf16 %v10627_v24  ;;  %v8163_v33 = vsel %vm8159_vm14, %v8158_v0, %v8118_v13 }
0x13f5   : > { %9474 = vmatpush1.bf16.msra.mxu1 %v9473_v3  ;;  %v8105_v3 = vrot.slane %v7937_v26, 3 }
0x13f6   : > { %v8048_v43 = vsel %vm7653_vm4, %v8047_v57, %v10629_v19  ;;  %v7992_v44 = vsel %vm7653_vm4, %v7991_v5, %v10628_v35  ;;  %9476 = vmatprep.subr.bf16.mxu1 %v9475_v7  ;;  %v8281_v7 = vsub.s32 0, %v8280_v11 }
0x13f7   : > { %v7993_v8 = vsel %vm7655_vm0, %v7992_v44, %v7978_v34  ;;  %v8038_v62 = vpop.permute.xlu1 %8037  ;;  %v8049_v20 = vsel %vm7655_vm0, %v8048_v43, %v8034_v52  ;;  %v8157_v9 = vsel %vm8154_vm9, %v8152_v46, %v8105_v3 }
0x13f8   : > { %v8117_v10 = vrot.slane %v7993_v8, 2  ;;  %v8050_v41 = vsel %vm7657_vm1, %v8034_v52, %v8038_v62  ;;  %v8129_v4 = vrot.slane %v8049_v20, 1 }
0x13f9   : > { %v8130_v63 = vrot.slane %v8050_v41, 1  ;;  %9478 = vmatpush1.bf16.msra.mxu1 %v9477_v56  ;;  %v8282_v56 = vrot.slane %v8277_v2, %v8281_v7 }
0x13fa   : > { %9480 = vmatprep.subr.bf16.mxu1 %v9479_v53  ;;  %v8162_v55 = vsel %vm8159_vm14, %v8157_v9, %v8117_v10  ;;  %v8286_v53 = vrot.slane %v8277_v2, %v8285_v47 }
0x13fb   : > { %v8168_v22 = vsel %vm8164_vm2, %v8163_v33, %v8130_v63  ;;  %v8167_v34 = vsel %vm8164_vm2, %v8162_v55, %v8129_v4 }
0x13fc   : > { %9078 = vmatprep.mubr.msk.f32.mxu1 %vm8289_vm15, %v8168_v22 }
0x13fd   : > { %9482 = vmatpush1.bf16.msra.mxu1 %v9481_v38 }
0x1400   : > { %8429 = vmatmul.mubr.f32.vlgmr.msra.gmra.mrb[48].mxu1 %v8167_v34 }
0x14d3   : > { %v8430_v1 = vpop.f32.mrb[48].mxu1 }
0x14d4   : > { %v9522_v58 = vadd.f32 %v8430_v1, %v8282_v56  ;;  %v8432_v14 = vpop.f32.mrb[49].mxu1 }
0x14d5   : > { %v9523_v21 = vadd.f32 %v8432_v14, %v8286_v53 }
0x14d6   : > { %v8435_v60 = vmax.f32 %v9522_v58, 0.0 }
0x14d7   : > { %v8436_v12 = vmax.f32 %v9523_v21, 0.0 }
0x14d9   : > { %9080 = vmatprep.mubr.msk.f32.mxu0 %vm7647_vm12, %v8436_v12 }
0x14da   : > { %8539 = vmatmul.mubr.f32.vlgmr.msra.gmra.mrb[80].mxu0 %v8435_v60 }
0x15ad   : > { %v8540_v37 = vpop.f32.mrb[80].mxu0 }
0x15ae   : > { %v8541_v16 = vadd.f32 %v9079_v39, %v8540_v37  ;;  %v8542_v36 = vpop.f32.mrb[81].mxu0 }
0x15b0   : > { %8544 = vst.msk [vmem:[%s355_s11] sm:$0xff] %vm7657_vm1, %v8541_v16 }
0x15b1   : > { %10937 = shalt.err (!%p10934_p3)
}
0x15b2   : > { %s10938_s2 = scalar_lea.hbm %s15751_s25, 128  ;;  %s10942_s19 = scalar_lea.hbm %s15920_s12, 256 }
0x15b3   : > { %p10939_p4 = scmp.ne.s32.totalorder %s15751_s25, %s10938_s2  ;;  %p10943_p9 = scmp.lt.u32.totalorder %s15751_s25, %s15920_s12 }
0x15b4   : > { %p10944_p10 = scmp.lt.u32.totalorder %s10942_s19, %s10938_s2  ;;  %p10946_p12 = scmp.lt.u32.totalorder %s10938_s2, %s15751_s25 }
0x15b5   : > { %p10940_p7 = pnand %p10939_p4, %p11112_p5 }
0x15b6   : > { %p10945_p11 = por %p10944_p10, %p10943_p9 }
0x15b7   : > { %p10941_p8 = pneg %p10940_p7 }
0x15b8   : > { %p10947_p13 = por %p10946_p12, %p10945_p11 }
0x15ba   : > { %p10948_p0 = pnand %p10947_p13, %p10941_p8 }
0x15bc   : > { %10951 = shalt.err (!%p10948_p0)
}
0x15bd   : > { %9719 = dma.vmem_to_hbm [thread:$0]  (%p11112_p5), %s15753_s28, 128, %s15751_s25, %s8546_s20  }
0x15be PF: > { %s15921_s10 = sld [smem:[#allocation7_spill]]  ;;  %s15922_s13 = sld [smem:[#allocation5_spill]] }
0x15c4   : > { %p9725_p1 = scmp.ge.s32.totalorder %s15921_s10, 2  ;;  %s8571_s30 = sand.u32 1, %s15922_s13  }
0x15c5   : > { %s8572_s11 = scalar_lea.sflag [#allocation3], %s8571_s30 }
0x15c6   : > { %p9722_p2 = pnand %p9725_p1, %p11116_p6 }
0x15c8   : > { %10969 = dma.done.wait (!%p9722_p2), %s8572_s11, 128  }
0x15c9   : > { %10971 = vsyncadd (!%p9722_p2), %s8572_s11, 4294967168  ;;  %s15924_s16 = sld [smem:[#allocation8_spill]]  ;;  %s15925_s18 = sld [smem:[#allocation6_spill]] }
0x15ca   : > { %s15926_s15 = sld [smem:[#allocation9_spill]]  ;;  %s15927_s13 = smov %s10978_s14 }
0x15cf   : > { %p20_p3 = scmp.ge.s32.totalorder %s15924_s16, 4   ;;  %s15928_s14 = smov %s15925_s18 }
0x15d1   :  { %22 = sbr.rel (!%p20_p3) target bundleno = 7 (0x7), region = 105 }
0x15d8   :  { %8577 = vsyncpa [#allocation3], 1 }
0x15d9   :  { %8579 = vsyncpa [#allocation3 + $0x1], 1 }

</bundles_post_ra>
